<compile_context>
chip_gen: v6e
topology: v6e:2x2x1
jax: 0.10.0
libtpu: 0.0.40
codegen_flags: <defaults>
</compile_context>

<pallas_src>
import functools
import math

import jax
import jax.numpy as jnp
from jax.experimental import pallas as pl
from jax.experimental.pallas import tpu as pltpu


def _round_up(x, m):
    return ((x + m - 1) // m) * m


# ----------------------------------------------------------------------------
# Pallas kernel: single-step matmul + bias + optional relu
#   (full-K / full-N blocks, grid over M only, bf16 MXU operands, f32 epilogue)
# ----------------------------------------------------------------------------

def _matmul_bias_kernel(x_ref, w_ref, b_ref, o_ref, *, relu):
    x = x_ref[...].astype(jnp.bfloat16)
    w = w_ref[...].astype(jnp.bfloat16)
    y = jnp.dot(x, w, preferred_element_type=jnp.float32) + b_ref[...]
    if relu:
        y = jnp.maximum(y, 0.0)
    o_ref[...] = y.astype(o_ref.dtype)


def pallas_linear(x, w, b, relu=False, out_dtype=jnp.float32, tm=None):
    """y = act(x @ w + b).  K and N are taken as full-extent blocks (no HBM padding);
    only M is tiled.  Operands are cast to bf16 inside the kernel."""
    M, K = x.shape
    Kw, N = w.shape
    assert K == Kw
    if tm is None:
        if M >= 512:
            tm = 256
        elif M >= 128:
            tm = 128
        else:
            tm = _round_up(max(M, 8), 8)
    Mp = _round_up(M, tm)
    xp = x if Mp == M else jnp.pad(x, ((0, Mp - M), (0, 0)))
    b2 = b.reshape(1, N)

    out = pl.pallas_call(
        functools.partial(_matmul_bias_kernel, relu=relu),
        out_shape=jax.ShapeDtypeStruct((Mp, N), out_dtype),
        grid_spec=pltpu.PrefetchScalarGridSpec(
            num_scalar_prefetch=0,
            grid=(Mp // tm,),
            in_specs=[pl.BlockSpec((tm, K), lambda i: (i, 0)),
                      pl.BlockSpec((K, N), lambda i: (0, 0)),
                      pl.BlockSpec((1, N), lambda i: (0, 0))],
            out_specs=pl.BlockSpec((tm, N), lambda i: (i, 0))),
        compiler_params=pltpu.CompilerParams(
            dimension_semantics=("parallel",)),
    )(xp, w, b2)
    return out if Mp == M else out[:M]


# ----------------------------------------------------------------------------
# Pallas kernel: per-image batched matmul (used for RoIAlign-as-matmul)
# ----------------------------------------------------------------------------

def _bmm_kernel(a_ref, b_ref, o_ref):
    a = a_ref[...].astype(jnp.bfloat16)
    b = b_ref[...].astype(jnp.bfloat16)
    o_ref[...] = jnp.dot(a, b, preferred_element_type=jnp.float32).astype(o_ref.dtype)


def pallas_bmm(a, b, out_dtype=jnp.float32):
    """(N, M, K) @ (N, K, C) -> (N, M, C); grid over the batch axis (megacore parallel)."""
    N, M, K = a.shape
    _, Kb, C = b.shape
    assert K == Kb
    return pl.pallas_call(
        _bmm_kernel,
        out_shape=jax.ShapeDtypeStruct((N, M, C), out_dtype),
        grid_spec=pltpu.PrefetchScalarGridSpec(
            num_scalar_prefetch=0,
            grid=(N,),
            in_specs=[pl.BlockSpec((None, M, K), lambda n: (n, 0, 0)),
                      pl.BlockSpec((None, K, C), lambda n: (n, 0, 0))],
            out_specs=pl.BlockSpec((None, M, C), lambda n: (n, 0, 0))),
        compiler_params=pltpu.CompilerParams(
            dimension_semantics=("parallel",)),
    )(a, b)


# ----------------------------------------------------------------------------
# Pallas kernels: box decode (SoA layout) and fused detection epilogue
# ----------------------------------------------------------------------------

def _decode_rows(ax1, ay1, ax2, ay2, dx, dy, dw, dh,
                 wx, wy, ww, wh, im_w, im_h, bbox_clip):
    """torchvision BoxCoder.decode_single on (1, P) row vectors; constants are Python floats."""
    aw = ax2 - ax1
    ah = ay2 - ay1
    acx = ax1 + 0.5 * aw
    acy = ay1 + 0.5 * ah
    pcx = (dx * (1.0 / wx)) * aw + acx
    pcy = (dy * (1.0 / wy)) * ah + acy
    pw = jnp.exp(jnp.minimum(dw * (1.0 / ww), bbox_clip)) * aw
    ph = jnp.exp(jnp.minimum(dh * (1.0 / wh), bbox_clip)) * ah
    x1 = jnp.clip(pcx - 0.5 * pw, 0.0, im_w)
    y1 = jnp.clip(pcy - 0.5 * ph, 0.0, im_h)
    x2 = jnp.clip(pcx + 0.5 * pw, 0.0, im_w)
    y2 = jnp.clip(pcy + 0.5 * ph, 0.0, im_h)
    return x1, y1, x2, y2


def _box_decode_kernel(a_ref, d_ref, boxes_ref, *,
                       wx, wy, ww, wh, im_w, im_h, bbox_clip):
    a = a_ref[...]   # (4, P)
    d = d_ref[...]   # (4, P)
    x1, y1, x2, y2 = _decode_rows(a[0:1], a[1:2], a[2:3], a[3:4],
                                  d[0:1], d[1:2], d[2:3], d[3:4],
                                  wx, wy, ww, wh, im_w, im_h, bbox_clip)
    boxes_ref[...] = jnp.concatenate([x1, y1, x2, y2], axis=0)


def pallas_box_decode(anchors, deltas, weights, im_hw):
    """Batched decode of (M,4) anchors/deltas via lane-dense (4, P) SoA layout."""
    # TODO(synk): at realistic anchor counts this should be gridded over the P axis.
    M = anchors.shape[0]
    P = _round_up(M, 128)
    a_t = jnp.pad(anchors.astype(jnp.float32), ((0, P - M), (0, 0))).T
    d_t = jnp.pad(deltas.astype(jnp.float32), ((0, P - M), (0, 0))).T
    im_h, im_w = im_hw
    boxes_t = pl.pallas_call(
        functools.partial(_box_decode_kernel,
                          wx=float(weights[0]), wy=float(weights[1]),
                          ww=float(weights[2]), wh=float(weights[3]),
                          im_w=float(im_w), im_h=float(im_h),
                          bbox_clip=math.log(1000.0 / 16.0)),
        out_shape=jax.ShapeDtypeStruct((4, P), jnp.float32),
        in_specs=[pl.BlockSpec(memory_space=pltpu.MemorySpace.VMEM)] * 2,
        out_specs=pl.BlockSpec(memory_space=pltpu.MemorySpace.VMEM),
    )(a_t, d_t)
    return boxes_t.T[:M]


def _detect_epilogue_kernel(logits_ref, regs_ref, props_ref,
                            boxes_ref, coords_ref, labels_ref, scores_ref, *,
                            n_classes, wx, wy, ww, wh, im_w, im_h, bbox_clip):
    """Fused: softmax -> fg argmax -> per-class delta select -> box decode -> centers."""
    logits = logits_ref[...]   # (C+1, P)
    regs = regs_ref[...]       # (4*(C+1), P), class-major / delta-minor rows
    p = props_ref[...]         # (4, P)

    # softmax over class rows (statically unrolled over tiny class count)
    # TODO(synk): for large C, pack the class axis into sublanes instead of (1,P) rows.
    m = logits[0:1]
    for c in range(1, n_classes + 1):
        m = jnp.maximum(m, logits[c:c + 1])
    e = jnp.exp(logits - m)
    s = e[0:1]
    for c in range(1, n_classes + 1):
        s = s + e[c:c + 1]
    probs = e / s

    # argmax over foreground classes + gather that class's regression deltas
    best = probs[1:2]
    lbl = jnp.ones_like(best)
    sdx = regs[4:5]
    sdy = regs[5:6]
    sdw = regs[6:7]
    sdh = regs[7:8]
    for c in range(2, n_classes + 1):
        sc = probs[c:c + 1]
        better = sc > best
        best = jnp.where(better, sc, best)
        lbl = jnp.where(better, float(c), lbl)
        sdx = jnp.where(better, regs[4 * c + 0:4 * c + 1], sdx)
        sdy = jnp.where(better, regs[4 * c + 1:4 * c + 2], sdy)
        sdw = jnp.where(better, regs[4 * c + 2:4 * c + 3], sdw)
        sdh = jnp.where(better, regs[4 * c + 3:4 * c + 4], sdh)

    x1, y1, x2, y2 = _decode_rows(p[0:1], p[1:2], p[2:3], p[3:4],
                                  sdx, sdy, sdw, sdh,
                                  wx, wy, ww, wh, im_w, im_h, bbox_clip)
    boxes_ref[...] = jnp.concatenate([x1, y1, x2, y2], axis=0)
    # Module's eval-mode addition: coordinates = box centers (fused here).
    coords_ref[...] = jnp.concatenate([0.5 * (x1 + x2), 0.5 * (y1 + y2)], axis=0)
    labels_ref[...] = lbl.astype(jnp.int32)
    scores_ref[...] = best


def pallas_detect_epilogue(cls_logits, box_regs, proposals, n_classes, weights, im_hw):
    M = cls_logits.shape[0]
    P = _round_up(M, 128)
    lg = jnp.pad(cls_logits.astype(jnp.float32), ((0, P - M), (0, 0))).T   # (C+1, P)
    rg = jnp.pad(box_regs.astype(jnp.float32), ((0, P - M), (0, 0))).T     # (4*(C+1), P)
    pr = jnp.pad(proposals.astype(jnp.float32), ((0, P - M), (0, 0))).T    # (4, P)
    im_h, im_w = im_hw
    boxes_t, coords_t, labels_t, scores_t = pl.pallas_call(
        functools.partial(_detect_epilogue_kernel,
                          n_classes=int(n_classes),
                          wx=float(weights[0]), wy=float(weights[1]),
                          ww=float(weights[2]), wh=float(weights[3]),
                          im_w=float(im_w), im_h=float(im_h),
                          bbox_clip=math.log(1000.0 / 16.0)),
        out_shape=(jax.ShapeDtypeStruct((4, P), jnp.float32),
                   jax.ShapeDtypeStruct((2, P), jnp.float32),
                   jax.ShapeDtypeStruct((1, P), jnp.int32),
                   jax.ShapeDtypeStruct((1, P), jnp.float32)),
        in_specs=[pl.BlockSpec(memory_space=pltpu.MemorySpace.VMEM)] * 3,
        out_specs=(pl.BlockSpec(memory_space=pltpu.MemorySpace.VMEM),) * 4,
    )(lg, rg, pr)
    return (boxes_t.T[:M], coords_t.T[:M], labels_t[0, :M], scores_t[0, :M])


# ----------------------------------------------------------------------------
# Glue: conv-as-matmul, anchors, RoIAlign-as-matmul
# ----------------------------------------------------------------------------

def conv2d(x, w, b, stride, pad, relu=False, out_dtype=jnp.bfloat16):
    """NHWC conv via im2col (glue) + single-step Pallas matmul kernel."""
    # TODO(synk): fuse im2col into the matmul kernel (overlapping row-window index_map)
    # instead of materializing the kh*kw-expanded activation — matters at real sizes.
    N, H, W, Cin = x.shape
    kh, kw, _, Cout = w.shape
    xp = jnp.pad(x, ((0, 0), (pad, pad), (pad, pad), (0, 0)))
    Ho = (H + 2 * pad - kh) // stride + 1
    Wo = (W + 2 * pad - kw) // stride + 1
    cols = []
    for i in range(kh):
        for j in range(kw):
            cols.append(xp[:, i:i + stride * Ho:stride, j:j + stride * Wo:stride, :])
    cols = jnp.concatenate(cols, axis=-1).reshape(N * Ho * Wo, kh * kw * Cin)
    y = pallas_linear(cols, w.reshape(kh * kw * Cin, Cout), b, relu=relu,
                      out_dtype=out_dtype)
    return y.reshape(N, Ho, Wo, Cout)


def linear_nhwc(x, w, b, relu=False, out_dtype=jnp.bfloat16):
    """1x1 conv == per-pixel matmul (Pallas)."""
    N, H, W, C = x.shape
    y = pallas_linear(x.reshape(N * H * W, C), w, b, relu=relu, out_dtype=out_dtype)
    return y.reshape(N, H, W, -1)


def make_anchors(Hf, Wf, stride, size):
    ys = jnp.arange(Hf, dtype=jnp.float32) * stride
    xs = jnp.arange(Wf, dtype=jnp.float32) * stride
    yy, xx = jnp.meshgrid(ys, xs, indexing="ij")
    ctr = jnp.stack([xx.ravel(), yy.ravel()], axis=-1)  # (A, 2), (x, y)
    half = size / 2.0
    return jnp.concatenate([ctr - half, ctr + half], axis=-1)  # (A, 4) x1y1x2y2


def roi_pool_bilinear(feat, proposals, out_size, spatial_scale):
    """RoIAlign expressed as (bilinear sampling-weights @ features) on the MXU.

    Weight construction is pure elementwise broadcasting (no gathers); the actual
    sampling is a per-image (R*S*S, Hf*Wf) x (Hf*Wf, C) Pallas matmul.
    """
    # TODO(synk): torchvision's aligned=-0.5 offset and sampling_ratio grid averaging
    # are not reproduced (single sample per output cell, clipped bilinear).
    N, Hf, Wf, C = feat.shape
    R = proposals.shape[1]
    S = out_size
    b = proposals.astype(jnp.float32) * spatial_scale
    x1, y1, x2, y2 = b[..., 0], b[..., 1], b[..., 2], b[..., 3]
    bw = jnp.maximum(x2 - x1, 1.0)
    bh = jnp.maximum(y2 - y1, 1.0)
    idx = (jnp.arange(S, dtype=jnp.float32) + 0.5) / S
    xs = jnp.clip(x1[..., None] + idx * bw[..., None], 0.0, Wf - 1.0)    # (N,R,S)
    ys = jnp.clip(y1[..., None] + idx * bh[..., None], 0.0, Hf - 1.0)    # (N,R,S)
    # triangular bilinear weights over the full grid (non-zero only at the 2 nearest cells)
    wy = jnp.maximum(0.0, 1.0 - jnp.abs(ys[..., None] - jnp.arange(Hf, dtype=jnp.float32)))  # (N,R,S,Hf)
    wx = jnp.maximum(0.0, 1.0 - jnp.abs(xs[..., None] - jnp.arange(Wf, dtype=jnp.float32)))  # (N,R,S,Wf)
    wmat = (wy[:, :, :, None, :, None] * wx[:, :, None, :, None, :]).reshape(
        N, R * S * S, Hf * Wf)
    feat_flat = feat.reshape(N, Hf * Wf, C)
    pooled = pallas_bmm(wmat, feat_flat, out_dtype=jnp.bfloat16)         # (N, R*S*S, C)
    return pooled.reshape(N, R, S, S, C)


# ----------------------------------------------------------------------------
# Parameters (deterministic synthetic init) + forward pass
# ----------------------------------------------------------------------------

def init_params(key, n_classes, box_size, c_stem=16, c_feat=32, c_fc=128):
    ks = jax.random.split(key, 10)

    def w(k, shape, scale=0.05):
        return jax.random.normal(k, shape, jnp.float32) * scale

    return {
        "conv1_w": w(ks[0], (3, 3, 3, c_stem)), "conv1_b": jnp.zeros((c_stem,), jnp.float32),
        "conv2_w": w(ks[1], (3, 3, c_stem, c_feat)), "conv2_b": jnp.zeros((c_feat,), jnp.float32),
        "fpn_w": w(ks[2], (c_feat, c_feat)), "fpn_b": jnp.zeros((c_feat,), jnp.float32),
        "rpn_conv_w": w(ks[3], (3, 3, c_feat, c_feat)), "rpn_conv_b": jnp.zeros((c_feat,), jnp.float32),
        "rpn_cls_w": w(ks[4], (c_feat, 1)), "rpn_cls_b": jnp.zeros((1,), jnp.float32),
        "rpn_bbox_w": w(ks[5], (c_feat, 4)), "rpn_bbox_b": jnp.zeros((4,), jnp.float32),
        "fc1_w": w(ks[6], (box_size * box_size * c_feat, c_fc)), "fc1_b": jnp.zeros((c_fc,), jnp.float32),
        "fc2_w": w(ks[7], (c_fc, c_fc)), "fc2_b": jnp.zeros((c_fc,), jnp.float32),
        "cls_w": w(ks[8], (c_fc, n_classes + 1)), "cls_b": jnp.zeros((n_classes + 1,), jnp.float32),
        "bbox_w": w(ks[9], (c_fc, 4 * (n_classes + 1))), "bbox_b": jnp.zeros((4 * (n_classes + 1),), jnp.float32),
    }


def forward(params, X_nchw, *, box_size=7, n_classes=2, num_proposals=32):
    """Eval-mode forward (targets=None): returns a list (per image) of dicts with
    'boxes', 'labels', 'scores', 'coordinates' (box centers, as the module adds)."""
    # NCHW (torch) -> NHWC for the kernels.
    x = jnp.transpose(X_nchw, (0, 2, 3, 1)).astype(jnp.float32)
    # GeneralizedRCNNTransform: normalize (resize skipped: "fixed size" usage).
    mean = jnp.asarray([0.485, 0.456, 0.406], jnp.float32)
    std = jnp.asarray([0.229, 0.224, 0.225], jnp.float32)
    x = (x - mean) / std
    N, H, W, _ = x.shape

    # --- backbone (simplified resnet_fpn_backbone stand-in, single FPN level) ---
    # TODO(synk): full ResNet50-FPN (5 levels) replaced by a 2-conv stem + 1x1 lateral.
    c1 = conv2d(x, params["conv1_w"], params["conv1_b"], stride=2, pad=1, relu=True,
                out_dtype=jnp.bfloat16)
    c2 = conv2d(c1, params["conv2_w"], params["conv2_b"], stride=2, pad=1, relu=True,
                out_dtype=jnp.bfloat16)
    feat = linear_nhwc(c2, params["fpn_w"], params["fpn_b"], relu=False,
                       out_dtype=jnp.bfloat16)
    Hf, Wf, Cf = feat.shape[1], feat.shape[2], feat.shape[3]
    stride = H // Hf

    # --- RPN head (objectness + bbox heads fused into one matmul) ---
    t = conv2d(feat, params["rpn_conv_w"], params["rpn_conv_b"], stride=1, pad=1,
               relu=True, out_dtype=jnp.bfloat16)
    rpn_w = jnp.concatenate([params["rpn_cls_w"], params["rpn_bbox_w"]], axis=1)   # (Cf, 5)
    rpn_b = jnp.concatenate([params["rpn_cls_b"], params["rpn_bbox_b"]], axis=0)
    rpn_out = linear_nhwc(t, rpn_w, rpn_b, out_dtype=jnp.float32)                  # (N,Hf,Wf,5)
    A = Hf * Wf
    obj_flat = rpn_out[..., 0].reshape(N, A)
    deltas_flat = rpn_out[..., 1:5].reshape(N * A, 4)

    anchors = make_anchors(Hf, Wf, float(stride), size=16.0)                       # (A,4)
    anchors_all = jnp.broadcast_to(anchors[None], (N, A, 4)).reshape(N * A, 4)

    # Batched RPN decode: one kernel for all N*A anchors.
    boxes_all = pallas_box_decode(anchors_all, deltas_flat,
                                  (1.0, 1.0, 1.0, 1.0), (H, W)).reshape(N, A, 4)
    # Batched top-k objectness proposals.
    _, idx = jax.lax.top_k(obj_flat, num_proposals)                                # (N,R)
    proposals = jnp.take_along_axis(boxes_all, idx[..., None], axis=1)             # (N,R,4)
    # TODO(synk): RPN NMS / pre-nms filtering omitted; top-k objectness only.

    # --- RoI heads ---
    pooled = roi_pool_bilinear(feat, proposals, box_size, 1.0 / stride)            # (N,R,S,S,Cf)
    R = num_proposals
    flat = pooled.reshape(N * R, box_size * box_size * Cf)
    h1 = pallas_linear(flat, params["fc1_w"], params["fc1_b"], relu=True,
                       out_dtype=jnp.bfloat16)
    h2 = pallas_linear(h1, params["fc2_w"], params["fc2_b"], relu=True,
                       out_dtype=jnp.bfloat16)

    # cls + bbox heads fused into one matmul, split in glue.
    head_w = jnp.concatenate([params["cls_w"], params["bbox_w"]], axis=1)          # (c_fc, 5*(C+1))
    head_b = jnp.concatenate([params["cls_b"], params["bbox_b"]], axis=0)
    head_out = pallas_linear(h2, head_w, head_b, out_dtype=jnp.float32)
    ncls1 = n_classes + 1
    cls_logits = head_out[:, :ncls1]                                               # (NR, C+1)
    box_regs = head_out[:, ncls1:]                                                 # (NR, 4*(C+1))

    # Fused detection epilogue kernel: softmax/argmax/select/decode/centers.
    det_boxes, coords, labels, best_scores = pallas_detect_epilogue(
        cls_logits, box_regs, proposals.reshape(N * R, 4),
        n_classes, (10.0, 10.0, 5.0, 5.0), (H, W))
    # TODO(synk): per-class NMS / score threshold of RoIHeads.postprocess omitted.

    outputs = []
    for n in range(N):
        sl = slice(n * R, (n + 1) * R)
        outputs.append({
            "boxes": det_boxes[sl],
            "labels": labels[sl],
            "scores": best_scores[sl],
            "coordinates": coords[sl],
        })
    return outputs


# ----------------------------------------------------------------------------
# Main
# ----------------------------------------------------------------------------

if __name__ == "__main__":
    key = jax.random.PRNGKey(0)
    kp, kx = jax.random.split(key)

    n_classes = 2
    box_size = 7
    params = init_params(kp, n_classes, box_size)

    # Small NCHW input, like the PyTorch module would receive.
    X = jax.random.uniform(kx, (2, 3, 64, 64), jnp.float32)

    fwd = jax.jit(functools.partial(forward, box_size=box_size, n_classes=n_classes))
    out = fwd(params, X)
    jax.block_until_ready(out)

    # light sanity checks
    assert out[0]["boxes"].shape == (32, 4)
    assert out[0]["coordinates"].shape == (32, 2)
    assert out[1]["scores"].shape == (32,)
    print("KERNEL_OK")
</pallas_src>

<mosaic_0001>
module attributes {stable_mosaic.version = 11 : i64} {
  func.func @_matmul_bias_kernel(%arg0: i32, %arg1: memref<256x27xf32, #tpu.memory_space<vmem>>, %arg2: memref<27x16xf32, #tpu.memory_space<vmem>>, %arg3: memref<1x16xf32, #tpu.memory_space<vmem>>, %arg4: memref<256x16xbf16, #tpu.memory_space<vmem>>) attributes {dimension_semantics = [#tpu.dimension_semantics<parallel>], iteration_bounds = array<i64: 8>, scalar_prefetch = 0 : i64, scratch_operands = 0 : i64, tpu.core_type = #tpu.core_type<tc>, window_params = [{transform_indices = @transform_0, window_bounds = array<i64: 256, 27>}, {pipeline_mode = #tpu.pipeline_mode<synchronous>, transform_indices = @transform_1, window_bounds = array<i64: 27, 16>}, {pipeline_mode = #tpu.pipeline_mode<synchronous>, transform_indices = @transform_2, window_bounds = array<i64: 1, 16>}, {transform_indices = @transform_3, window_bounds = array<i64: 256, 16>}]} {
    %c0 = arith.constant 0 : index
    %c0_0 = arith.constant 0 : index
    %0 = vector.load %arg1[%c0, %c0_0] : memref<256x27xf32, #tpu.memory_space<vmem>>, vector<256x27xf32>
    %1 = arith.truncf %0 : vector<256x27xf32> to vector<256x27xbf16>
    %c0_1 = arith.constant 0 : index
    %c0_2 = arith.constant 0 : index
    %2 = vector.load %arg2[%c0_1, %c0_2] : memref<27x16xf32, #tpu.memory_space<vmem>>, vector<27x16xf32>
    %3 = arith.truncf %2 : vector<27x16xf32> to vector<27x16xbf16>
    %cst = arith.constant dense<0.000000e+00> : vector<256x16xf32>
    %4 = tpu.matmul %1, %3, %cst {dimension_numbers = #tpu.dot_dimension_numbers<[1], [0], [0], [1], [0, 0, 1, 1], [], []>} : vector<256x27xbf16>, vector<27x16xbf16>, vector<256x16xf32> -> vector<256x16xf32>
    %c0_3 = arith.constant 0 : index
    %c0_4 = arith.constant 0 : index
    %5 = vector.load %arg3[%c0_3, %c0_4] : memref<1x16xf32, #tpu.memory_space<vmem>>, vector<1x16xf32>
    %6 = vector.broadcast %5 : vector<1x16xf32> to vector<256x16xf32>
    %7 = arith.addf %4, %6 : vector<256x16xf32>
    %cst_5 = arith.constant 0.000000e+00 : f32
    %8 = vector.broadcast %cst_5 : f32 to vector<256x16xf32>
    %9 = arith.maximumf %7, %8 : vector<256x16xf32>
    %10 = arith.truncf %9 : vector<256x16xf32> to vector<256x16xbf16>
    %c0_6 = arith.constant 0 : index
    %c0_7 = arith.constant 0 : index
    %11 = vector.load %arg4[%c0_6, %c0_7] : memref<256x16xbf16, #tpu.memory_space<vmem>>, vector<256x16xbf16>
    tpu.vector_store %arg4[%c0_6, %c0_7], %10 {strides = array<i32>} : memref<256x16xbf16, #tpu.memory_space<vmem>>, vector<256x16xbf16>,
    return
  }
  func.func @transform_0(%arg0: i32) -> (i32, i32) {
    %c0_i32 = arith.constant 0 : i32
    %c0_i32_0 = arith.constant 0 : i32
    return %arg0, %c0_i32 : i32, i32
  }
  func.func @transform_1(%arg0: i32) -> (i32, i32) {
    %c0_i32 = arith.constant 0 : i32
    %c0_i32_0 = arith.constant 0 : i32
    %c0_i32_1 = arith.constant 0 : i32
    return %c0_i32, %c0_i32_0 : i32, i32
  }
  func.func @transform_2(%arg0: i32) -> (i32, i32) {
    %c0_i32 = arith.constant 0 : i32
    %c0_i32_0 = arith.constant 0 : i32
    %c0_i32_1 = arith.constant 0 : i32
    return %c0_i32, %c0_i32_0 : i32, i32
  }
  func.func @transform_3(%arg0: i32) -> (i32, i32) {
    %c0_i32 = arith.constant 0 : i32
    %c0_i32_0 = arith.constant 0 : i32
    return %arg0, %c0_i32 : i32, i32
  }
}

module attributes {stable_mosaic.version = 11 : i64} {
  func.func @_matmul_bias_kernel(%arg0: i32, %arg1: memref<256x144xbf16, #tpu.memory_space<vmem>>, %arg2: memref<144x32xf32, #tpu.memory_space<vmem>>, %arg3: memref<1x32xf32, #tpu.memory_space<vmem>>, %arg4: memref<256x32xbf16, #tpu.memory_space<vmem>>) attributes {dimension_semantics = [#tpu.dimension_semantics<parallel>], iteration_bounds = array<i64: 2>, scalar_prefetch = 0 : i64, scratch_operands = 0 : i64, tpu.core_type = #tpu.core_type<tc>, window_params = [{transform_indices = @transform_0, window_bounds = array<i64: 256, 144>}, {pipeline_mode = #tpu.pipeline_mode<synchronous>, transform_indices = @transform_1, window_bounds = array<i64: 144, 32>}, {pipeline_mode = #tpu.pipeline_mode<synchronous>, transform_indices = @transform_2, window_bounds = array<i64: 1, 32>}, {transform_indices = @transform_3, window_bounds = array<i64: 256, 32>}]} {
    %c0 = arith.constant 0 : index
    %c0_0 = arith.constant 0 : index
    %0 = vector.load %arg1[%c0, %c0_0] : memref<256x144xbf16, #tpu.memory_space<vmem>>, vector<256x144xbf16>
    %c0_1 = arith.constant 0 : index
    %c0_2 = arith.constant 0 : index
    %1 = vector.load %arg2[%c0_1, %c0_2] : memref<144x32xf32, #tpu.memory_space<vmem>>, vector<144x32xf32>
    %2 = arith.truncf %1 : vector<144x32xf32> to vector<144x32xbf16>
    %cst = arith.constant dense<0.000000e+00> : vector<256x32xf32>
    %3 = tpu.matmul %0, %2, %cst {dimension_numbers = #tpu.dot_dimension_numbers<[1], [0], [0], [1], [0, 0, 1, 1], [], []>} : vector<256x144xbf16>, vector<144x32xbf16>, vector<256x32xf32> -> vector<256x32xf32>
    %c0_3 = arith.constant 0 : index
    %c0_4 = arith.constant 0 : index
    %4 = vector.load %arg3[%c0_3, %c0_4] : memref<1x32xf32, #tpu.memory_space<vmem>>, vector<1x32xf32>
    %5 = vector.broadcast %4 : vector<1x32xf32> to vector<256x32xf32>
    %6 = arith.addf %3, %5 : vector<256x32xf32>
    %cst_5 = arith.constant 0.000000e+00 : f32
    %7 = vector.broadcast %cst_5 : f32 to vector<256x32xf32>
    %8 = arith.maximumf %6, %7 : vector<256x32xf32>
    %9 = arith.truncf %8 : vector<256x32xf32> to vector<256x32xbf16>
    %c0_6 = arith.constant 0 : index
    %c0_7 = arith.constant 0 : index
    %10 = vector.load %arg4[%c0_6, %c0_7] : memref<256x32xbf16, #tpu.memory_space<vmem>>, vector<256x32xbf16>
    tpu.vector_store %arg4[%c0_6, %c0_7], %9 {strides = array<i32>} : memref<256x32xbf16, #tpu.memory_space<vmem>>, vector<256x32xbf16>,
    return
  }
  func.func @transform_0(%arg0: i32) -> (i32, i32) {
    %c0_i32 = arith.constant 0 : i32
    %c0_i32_0 = arith.constant 0 : i32
    return %arg0, %c0_i32 : i32, i32
  }
  func.func @transform_1(%arg0: i32) -> (i32, i32) {
    %c0_i32 = arith.constant 0 : i32
    %c0_i32_0 = arith.constant 0 : i32
    %c0_i32_1 = arith.constant 0 : i32
    return %c0_i32, %c0_i32_0 : i32, i32
  }
  func.func @transform_2(%arg0: i32) -> (i32, i32) {
    %c0_i32 = arith.constant 0 : i32
    %c0_i32_0 = arith.constant 0 : i32
    %c0_i32_1 = arith.constant 0 : i32
    return %c0_i32, %c0_i32_0 : i32, i32
  }
  func.func @transform_3(%arg0: i32) -> (i32, i32) {
    %c0_i32 = arith.constant 0 : i32
    %c0_i32_0 = arith.constant 0 : i32
    return %arg0, %c0_i32 : i32, i32
  }
}

module attributes {stable_mosaic.version = 11 : i64} {
  func.func @_matmul_bias_kernel(%arg0: i32, %arg1: memref<256x32xbf16, #tpu.memory_space<vmem>>, %arg2: memref<32x32xf32, #tpu.memory_space<vmem>>, %arg3: memref<1x32xf32, #tpu.memory_space<vmem>>, %arg4: memref<256x32xbf16, #tpu.memory_space<vmem>>) attributes {dimension_semantics = [#tpu.dimension_semantics<parallel>], iteration_bounds = array<i64: 2>, scalar_prefetch = 0 : i64, scratch_operands = 0 : i64, tpu.core_type = #tpu.core_type<tc>, window_params = [{transform_indices = @transform_0, window_bounds = array<i64: 256, 32>}, {pipeline_mode = #tpu.pipeline_mode<synchronous>, transform_indices = @transform_1, window_bounds = array<i64: 32, 32>}, {pipeline_mode = #tpu.pipeline_mode<synchronous>, transform_indices = @transform_2, window_bounds = array<i64: 1, 32>}, {transform_indices = @transform_3, window_bounds = array<i64: 256, 32>}]} {
    %c0 = arith.constant 0 : index
    %c0_0 = arith.constant 0 : index
    %0 = vector.load %arg1[%c0, %c0_0] : memref<256x32xbf16, #tpu.memory_space<vmem>>, vector<256x32xbf16>
    %c0_1 = arith.constant 0 : index
    %c0_2 = arith.constant 0 : index
    %1 = vector.load %arg2[%c0_1, %c0_2] : memref<32x32xf32, #tpu.memory_space<vmem>>, vector<32x32xf32>
    %2 = arith.truncf %1 : vector<32x32xf32> to vector<32x32xbf16>
    %cst = arith.constant dense<0.000000e+00> : vector<256x32xf32>
    %3 = tpu.matmul %0, %2, %cst {dimension_numbers = #tpu.dot_dimension_numbers<[1], [0], [0], [1], [0, 0, 1, 1], [], []>} : vector<256x32xbf16>, vector<32x32xbf16>, vector<256x32xf32> -> vector<256x32xf32>
    %c0_3 = arith.constant 0 : index
    %c0_4 = arith.constant 0 : index
    %4 = vector.load %arg3[%c0_3, %c0_4] : memref<1x32xf32, #tpu.memory_space<vmem>>, vector<1x32xf32>
    %5 = vector.broadcast %4 : vector<1x32xf32> to vector<256x32xf32>
    %6 = arith.addf %3, %5 : vector<256x32xf32>
    %7 = arith.truncf %6 : vector<256x32xf32> to vector<256x32xbf16>
    %c0_5 = arith.constant 0 : index
    %c0_6 = arith.constant 0 : index
    %8 = vector.load %arg4[%c0_5, %c0_6] : memref<256x32xbf16, #tpu.memory_space<vmem>>, vector<256x32xbf16>
    tpu.vector_store %arg4[%c0_5, %c0_6], %7 {strides = array<i32>} : memref<256x32xbf16, #tpu.memory_space<vmem>>, vector<256x32xbf16>,
    return
  }
  func.func @transform_0(%arg0: i32) -> (i32, i32) {
    %c0_i32 = arith.constant 0 : i32
    %c0_i32_0 = arith.constant 0 : i32
    return %arg0, %c0_i32 : i32, i32
  }
  func.func @transform_1(%arg0: i32) -> (i32, i32) {
    %c0_i32 = arith.constant 0 : i32
    %c0_i32_0 = arith.constant 0 : i32
    %c0_i32_1 = arith.constant 0 : i32
    return %c0_i32, %c0_i32_0 : i32, i32
  }
  func.func @transform_2(%arg0: i32) -> (i32, i32) {
    %c0_i32 = arith.constant 0 : i32
    %c0_i32_0 = arith.constant 0 : i32
    %c0_i32_1 = arith.constant 0 : i32
    return %c0_i32, %c0_i32_0 : i32, i32
  }
  func.func @transform_3(%arg0: i32) -> (i32, i32) {
    %c0_i32 = arith.constant 0 : i32
    %c0_i32_0 = arith.constant 0 : i32
    return %arg0, %c0_i32 : i32, i32
  }
}

module attributes {stable_mosaic.version = 11 : i64} {
  func.func @_matmul_bias_kernel(%arg0: i32, %arg1: memref<256x288xbf16, #tpu.memory_space<vmem>>, %arg2: memref<288x32xf32, #tpu.memory_space<vmem>>, %arg3: memref<1x32xf32, #tpu.memory_space<vmem>>, %arg4: memref<256x32xbf16, #tpu.memory_space<vmem>>) attributes {dimension_semantics = [#tpu.dimension_semantics<parallel>], iteration_bounds = array<i64: 2>, scalar_prefetch = 0 : i64, scratch_operands = 0 : i64, tpu.core_type = #tpu.core_type<tc>, window_params = [{transform_indices = @transform_0, window_bounds = array<i64: 256, 288>}, {pipeline_mode = #tpu.pipeline_mode<synchronous>, transform_indices = @transform_1, window_bounds = array<i64: 288, 32>}, {pipeline_mode = #tpu.pipeline_mode<synchronous>, transform_indices = @transform_2, window_bounds = array<i64: 1, 32>}, {transform_indices = @transform_3, window_bounds = array<i64: 256, 32>}]} {
    %c0 = arith.constant 0 : index
    %c0_0 = arith.constant 0 : index
    %0 = vector.load %arg1[%c0, %c0_0] : memref<256x288xbf16, #tpu.memory_space<vmem>>, vector<256x288xbf16>
    %c0_1 = arith.constant 0 : index
    %c0_2 = arith.constant 0 : index
    %1 = vector.load %arg2[%c0_1, %c0_2] : memref<288x32xf32, #tpu.memory_space<vmem>>, vector<288x32xf32>
    %2 = arith.truncf %1 : vector<288x32xf32> to vector<288x32xbf16>
    %cst = arith.constant dense<0.000000e+00> : vector<256x32xf32>
    %3 = tpu.matmul %0, %2, %cst {dimension_numbers = #tpu.dot_dimension_numbers<[1], [0], [0], [1], [0, 0, 1, 1], [], []>} : vector<256x288xbf16>, vector<288x32xbf16>, vector<256x32xf32> -> vector<256x32xf32>
    %c0_3 = arith.constant 0 : index
    %c0_4 = arith.constant 0 : index
    %4 = vector.load %arg3[%c0_3, %c0_4] : memref<1x32xf32, #tpu.memory_space<vmem>>, vector<1x32xf32>
    %5 = vector.broadcast %4 : vector<1x32xf32> to vector<256x32xf32>
    %6 = arith.addf %3, %5 : vector<256x32xf32>
    %cst_5 = arith.constant 0.000000e+00 : f32
    %7 = vector.broadcast %cst_5 : f32 to vector<256x32xf32>
    %8 = arith.maximumf %6, %7 : vector<256x32xf32>
    %9 = arith.truncf %8 : vector<256x32xf32> to vector<256x32xbf16>
    %c0_6 = arith.constant 0 : index
    %c0_7 = arith.constant 0 : index
    %10 = vector.load %arg4[%c0_6, %c0_7] : memref<256x32xbf16, #tpu.memory_space<vmem>>, vector<256x32xbf16>
    tpu.vector_store %arg4[%c0_6, %c0_7], %9 {strides = array<i32>} : memref<256x32xbf16, #tpu.memory_space<vmem>>, vector<256x32xbf16>,
    return
  }
  func.func @transform_0(%arg0: i32) -> (i32, i32) {
    %c0_i32 = arith.constant 0 : i32
    %c0_i32_0 = arith.constant 0 : i32
    return %arg0, %c0_i32 : i32, i32
  }
  func.func @transform_1(%arg0: i32) -> (i32, i32) {
    %c0_i32 = arith.constant 0 : i32
    %c0_i32_0 = arith.constant 0 : i32
    %c0_i32_1 = arith.constant 0 : i32
    return %c0_i32, %c0_i32_0 : i32, i32
  }
  func.func @transform_2(%arg0: i32) -> (i32, i32) {
    %c0_i32 = arith.constant 0 : i32
    %c0_i32_0 = arith.constant 0 : i32
    %c0_i32_1 = arith.constant 0 : i32
    return %c0_i32, %c0_i32_0 : i32, i32
  }
  func.func @transform_3(%arg0: i32) -> (i32, i32) {
    %c0_i32 = arith.constant 0 : i32
    %c0_i32_0 = arith.constant 0 : i32
    return %arg0, %c0_i32 : i32, i32
  }
}

module attributes {stable_mosaic.version = 11 : i64} {
  func.func @_matmul_bias_kernel(%arg0: i32, %arg1: memref<256x32xbf16, #tpu.memory_space<vmem>>, %arg2: memref<32x5xf32, #tpu.memory_space<vmem>>, %arg3: memref<1x5xf32, #tpu.memory_space<vmem>>, %arg4: memref<256x5xf32, #tpu.memory_space<vmem>>) attributes {dimension_semantics = [#tpu.dimension_semantics<parallel>], iteration_bounds = array<i64: 2>, scalar_prefetch = 0 : i64, scratch_operands = 0 : i64, tpu.core_type = #tpu.core_type<tc>, window_params = [{transform_indices = @transform_0, window_bounds = array<i64: 256, 32>}, {pipeline_mode = #tpu.pipeline_mode<synchronous>, transform_indices = @transform_1, window_bounds = array<i64: 32, 5>}, {pipeline_mode = #tpu.pipeline_mode<synchronous>, transform_indices = @transform_2, window_bounds = array<i64: 1, 5>}, {transform_indices = @transform_3, window_bounds = array<i64: 256, 5>}]} {
    %c0 = arith.constant 0 : index
    %c0_0 = arith.constant 0 : index
    %0 = vector.load %arg1[%c0, %c0_0] : memref<256x32xbf16, #tpu.memory_space<vmem>>, vector<256x32xbf16>
    %c0_1 = arith.constant 0 : index
    %c0_2 = arith.constant 0 : index
    %1 = vector.load %arg2[%c0_1, %c0_2] : memref<32x5xf32, #tpu.memory_space<vmem>>, vector<32x5xf32>
    %2 = arith.truncf %1 : vector<32x5xf32> to vector<32x5xbf16>
    %cst = arith.constant dense<0.000000e+00> : vector<256x5xf32>
    %3 = tpu.matmul %0, %2, %cst {dimension_numbers = #tpu.dot_dimension_numbers<[1], [0], [0], [1], [0, 0, 1, 1], [], []>} : vector<256x32xbf16>, vector<32x5xbf16>, vector<256x5xf32> -> vector<256x5xf32>
    %c0_3 = arith.constant 0 : index
    %c0_4 = arith.constant 0 : index
    %4 = vector.load %arg3[%c0_3, %c0_4] : memref<1x5xf32, #tpu.memory_space<vmem>>, vector<1x5xf32>
    %5 = vector.broadcast %4 : vector<1x5xf32> to vector<256x5xf32>
    %6 = arith.addf %3, %5 : vector<256x5xf32>
    %c0_5 = arith.constant 0 : index
    %c0_6 = arith.constant 0 : index
    %7 = vector.load %arg4[%c0_5, %c0_6] : memref<256x5xf32, #tpu.memory_space<vmem>>, vector<256x5xf32>
    tpu.vector_store %arg4[%c0_5, %c0_6], %6 {strides = array<i32>} : memref<256x5xf32, #tpu.memory_space<vmem>>, vector<256x5xf32>,
    return
  }
  func.func @transform_0(%arg0: i32) -> (i32, i32) {
    %c0_i32 = arith.constant 0 : i32
    %c0_i32_0 = arith.constant 0 : i32
    return %arg0, %c0_i32 : i32, i32
  }
  func.func @transform_1(%arg0: i32) -> (i32, i32) {
    %c0_i32 = arith.constant 0 : i32
    %c0_i32_0 = arith.constant 0 : i32
    %c0_i32_1 = arith.constant 0 : i32
    return %c0_i32, %c0_i32_0 : i32, i32
  }
  func.func @transform_2(%arg0: i32) -> (i32, i32) {
    %c0_i32 = arith.constant 0 : i32
    %c0_i32_0 = arith.constant 0 : i32
    %c0_i32_1 = arith.constant 0 : i32
    return %c0_i32, %c0_i32_0 : i32, i32
  }
  func.func @transform_3(%arg0: i32) -> (i32, i32) {
    %c0_i32 = arith.constant 0 : i32
    %c0_i32_0 = arith.constant 0 : i32
    return %arg0, %c0_i32 : i32, i32
  }
}

module attributes {stable_mosaic.version = 11 : i64} {
  func.func @_box_decode_kernel(%arg0: memref<4x512xf32, #tpu.memory_space<vmem>>, %arg1: memref<4x512xf32, #tpu.memory_space<vmem>>, %arg2: memref<4x512xf32, #tpu.memory_space<vmem>>) attributes {dimension_semantics = [], scalar_prefetch = 0 : i64, scratch_operands = 0 : i64, tpu.core_type = #tpu.core_type<tc>} {
    %c0 = arith.constant 0 : index
    %c0_0 = arith.constant 0 : index
    %0 = vector.load %arg0[%c0, %c0_0] : memref<4x512xf32, #tpu.memory_space<vmem>>, vector<4x512xf32>
    %c0_1 = arith.constant 0 : index
    %c0_2 = arith.constant 0 : index
    %1 = vector.load %arg1[%c0_1, %c0_2] : memref<4x512xf32, #tpu.memory_space<vmem>>, vector<4x512xf32>
    %2 = vector.extract_strided_slice %0 {offsets = [0, 0], sizes = [1, 512], strides = [1, 1]} : vector<4x512xf32> to vector<1x512xf32>
    %3 = vector.extract_strided_slice %0 {offsets = [1, 0], sizes = [1, 512], strides = [1, 1]} : vector<4x512xf32> to vector<1x512xf32>
    %4 = vector.extract_strided_slice %0 {offsets = [2, 0], sizes = [1, 512], strides = [1, 1]} : vector<4x512xf32> to vector<1x512xf32>
    %5 = vector.extract_strided_slice %0 {offsets = [3, 0], sizes = [1, 512], strides = [1, 1]} : vector<4x512xf32> to vector<1x512xf32>
    %6 = vector.extract_strided_slice %1 {offsets = [0, 0], sizes = [1, 512], strides = [1, 1]} : vector<4x512xf32> to vector<1x512xf32>
    %7 = vector.extract_strided_slice %1 {offsets = [1, 0], sizes = [1, 512], strides = [1, 1]} : vector<4x512xf32> to vector<1x512xf32>
    %8 = vector.extract_strided_slice %1 {offsets = [2, 0], sizes = [1, 512], strides = [1, 1]} : vector<4x512xf32> to vector<1x512xf32>
    %9 = vector.extract_strided_slice %1 {offsets = [3, 0], sizes = [1, 512], strides = [1, 1]} : vector<4x512xf32> to vector<1x512xf32>
    %10 = arith.subf %4, %2 : vector<1x512xf32>
    %11 = arith.subf %5, %3 : vector<1x512xf32>
    %cst = arith.constant 5.000000e-01 : f32
    %12 = vector.broadcast %cst : f32 to vector<1x512xf32>
    %13 = arith.mulf %12, %10 : vector<1x512xf32>
    %14 = arith.addf %2, %13 : vector<1x512xf32>
    %cst_3 = arith.constant 5.000000e-01 : f32
    %15 = vector.broadcast %cst_3 : f32 to vector<1x512xf32>
    %16 = arith.mulf %15, %11 : vector<1x512xf32>
    %17 = arith.addf %3, %16 : vector<1x512xf32>
    %cst_4 = arith.constant 1.000000e+00 : f32
    %18 = vector.broadcast %cst_4 : f32 to vector<1x512xf32>
    %19 = arith.mulf %6, %18 : vector<1x512xf32>
    %20 = arith.mulf %19, %10 : vector<1x512xf32>
    %21 = arith.addf %20, %14 : vector<1x512xf32>
    %cst_5 = arith.constant 1.000000e+00 : f32
    %22 = vector.broadcast %cst_5 : f32 to vector<1x512xf32>
    %23 = arith.mulf %7, %22 : vector<1x512xf32>
    %24 = arith.mulf %23, %11 : vector<1x512xf32>
    %25 = arith.addf %24, %17 : vector<1x512xf32>
    %cst_6 = arith.constant 1.000000e+00 : f32
    %26 = vector.broadcast %cst_6 : f32 to vector<1x512xf32>
    %27 = arith.mulf %8, %26 : vector<1x512xf32>
    %cst_7 = arith.constant 4.13516665 : f32
    %28 = vector.broadcast %cst_7 : f32 to vector<1x512xf32>
    %29 = arith.minimumf %27, %28 : vector<1x512xf32>
    %30 = math.exp %29 : vector<1x512xf32>
    %31 = arith.mulf %30, %10 : vector<1x512xf32>
    %cst_8 = arith.constant 1.000000e+00 : f32
    %32 = vector.broadcast %cst_8 : f32 to vector<1x512xf32>
    %33 = arith.mulf %9, %32 : vector<1x512xf32>
    %cst_9 = arith.constant 4.13516665 : f32
    %34 = vector.broadcast %cst_9 : f32 to vector<1x512xf32>
    %35 = arith.minimumf %33, %34 : vector<1x512xf32>
    %36 = math.exp %35 : vector<1x512xf32>
    %37 = arith.mulf %36, %11 : vector<1x512xf32>
    %cst_10 = arith.constant 5.000000e-01 : f32
    %38 = vector.broadcast %cst_10 : f32 to vector<1x512xf32>
    %39 = arith.mulf %38, %31 : vector<1x512xf32>
    %40 = arith.subf %21, %39 : vector<1x512xf32>
    %cst_11 = arith.constant 0.000000e+00 : f32
    %cst_12 = arith.constant 6.400000e+01 : f32
    %41 = vector.broadcast %cst_11 : f32 to vector<1x512xf32>
    %42 = arith.maximumf %41, %40 : vector<1x512xf32>
    %43 = vector.broadcast %cst_12 : f32 to vector<1x512xf32>
    %44 = arith.minimumf %43, %42 : vector<1x512xf32>
    %cst_13 = arith.constant 5.000000e-01 : f32
    %45 = vector.broadcast %cst_13 : f32 to vector<1x512xf32>
    %46 = arith.mulf %45, %37 : vector<1x512xf32>
    %47 = arith.subf %25, %46 : vector<1x512xf32>
    %cst_14 = arith.constant 0.000000e+00 : f32
    %cst_15 = arith.constant 6.400000e+01 : f32
    %48 = vector.broadcast %cst_14 : f32 to vector<1x512xf32>
    %49 = arith.maximumf %48, %47 : vector<1x512xf32>
    %50 = vector.broadcast %cst_15 : f32 to vector<1x512xf32>
    %51 = arith.minimumf %50, %49 : vector<1x512xf32>
    %cst_16 = arith.constant 5.000000e-01 : f32
    %52 = vector.broadcast %cst_16 : f32 to vector<1x512xf32>
    %53 = arith.mulf %52, %31 : vector<1x512xf32>
    %54 = arith.addf %21, %53 : vector<1x512xf32>
    %cst_17 = arith.constant 0.000000e+00 : f32
    %cst_18 = arith.constant 6.400000e+01 : f32
    %55 = vector.broadcast %cst_17 : f32 to vector<1x512xf32>
    %56 = arith.maximumf %55, %54 : vector<1x512xf32>
    %57 = vector.broadcast %cst_18 : f32 to vector<1x512xf32>
    %58 = arith.minimumf %57, %56 : vector<1x512xf32>
    %cst_19 = arith.constant 5.000000e-01 : f32
    %59 = vector.broadcast %cst_19 : f32 to vector<1x512xf32>
    %60 = arith.mulf %59, %37 : vector<1x512xf32>
    %61 = arith.addf %25, %60 : vector<1x512xf32>
    %cst_20 = arith.constant 0.000000e+00 : f32
    %cst_21 = arith.constant 6.400000e+01 : f32
    %62 = vector.broadcast %cst_20 : f32 to vector<1x512xf32>
    %63 = arith.maximumf %62, %61 : vector<1x512xf32>
    %64 = vector.broadcast %cst_21 : f32 to vector<1x512xf32>
    %65 = arith.minimumf %64, %63 : vector<1x512xf32>
    %66 = tpu.concatenate %44, %51, %58, %65 in 0 : vector<1x512xf32>, vector<1x512xf32>, vector<1x512xf32>, vector<1x512xf32> -> vector<4x512xf32>
    %c0_22 = arith.constant 0 : index
    %c0_23 = arith.constant 0 : index
    %67 = vector.load %arg2[%c0_22, %c0_23] : memref<4x512xf32, #tpu.memory_space<vmem>>, vector<4x512xf32>
    tpu.vector_store %arg2[%c0_22, %c0_23], %66 {strides = array<i32>} : memref<4x512xf32, #tpu.memory_space<vmem>>, vector<4x512xf32>,
    return
  }
}

module attributes {stable_mosaic.version = 11 : i64} {
  func.func @_bmm_kernel(%arg0: i32, %arg1: memref<1x1568x256xf32, #tpu.memory_space<vmem>>, %arg2: memref<1x256x32xbf16, #tpu.memory_space<vmem>>, %arg3: memref<1x1568x32xbf16, #tpu.memory_space<vmem>>) attributes {dimension_semantics = [#tpu.dimension_semantics<parallel>], iteration_bounds = array<i64: 2>, scalar_prefetch = 0 : i64, scratch_operands = 0 : i64, tpu.core_type = #tpu.core_type<tc>, window_params = [{transform_indices = @transform_0, window_bounds = array<i64: 1, 1568, 256>}, {transform_indices = @transform_1, window_bounds = array<i64: 1, 256, 32>}, {transform_indices = @transform_2, window_bounds = array<i64: 1, 1568, 32>}]} {
    %c0 = arith.constant 0 : index
    %c0_0 = arith.constant 0 : index
    %c0_1 = arith.constant 0 : index
    %0 = vector.load %arg1[%c0, %c0_0, %c0_1] : memref<1x1568x256xf32, #tpu.memory_space<vmem>>, vector<1x1568x256xf32>
    %1 = vector.shape_cast %0 : vector<1x1568x256xf32> to vector<1568x256xf32>
    %2 = arith.truncf %1 : vector<1568x256xf32> to vector<1568x256xbf16>
    %c0_2 = arith.constant 0 : index
    %c0_3 = arith.constant 0 : index
    %c0_4 = arith.constant 0 : index
    %3 = vector.load %arg2[%c0_2, %c0_3, %c0_4] : memref<1x256x32xbf16, #tpu.memory_space<vmem>>, vector<1x256x32xbf16>
    %4 = vector.shape_cast %3 : vector<1x256x32xbf16> to vector<256x32xbf16>
    %cst = arith.constant dense<0.000000e+00> : vector<1568x32xf32>
    %5 = tpu.matmul %2, %4, %cst {dimension_numbers = #tpu.dot_dimension_numbers<[1], [0], [0], [1], [0, 0, 1, 1], [], []>} : vector<1568x256xbf16>, vector<256x32xbf16>, vector<1568x32xf32> -> vector<1568x32xf32>
    %6 = arith.truncf %5 : vector<1568x32xf32> to vector<1568x32xbf16>
    %c0_5 = arith.constant 0 : index
    %c0_6 = arith.constant 0 : index
    %c0_7 = arith.constant 0 : index
    %7 = vector.load %arg3[%c0_5, %c0_6, %c0_7] : memref<1x1568x32xbf16, #tpu.memory_space<vmem>>, vector<1x1568x32xbf16>
    %8 = vector.shape_cast %7 : vector<1x1568x32xbf16> to vector<1568x32xbf16>
    %9 = vector.shape_cast %6 : vector<1568x32xbf16> to vector<1x1568x32xbf16>
    tpu.vector_store %arg3[%c0_5, %c0_6, %c0_7], %9 {strides = array<i32>} : memref<1x1568x32xbf16, #tpu.memory_space<vmem>>, vector<1x1568x32xbf16>,
    return
  }
  func.func @transform_0(%arg0: i32) -> (i32, i32, i32) {
    %c0_i32 = arith.constant 0 : i32
    %c0_i32_0 = arith.constant 0 : i32
    %c0_i32_1 = arith.constant 0 : i32
    return %arg0, %c0_i32, %c0_i32_0 : i32, i32, i32
  }
  func.func @transform_1(%arg0: i32) -> (i32, i32, i32) {
    %c0_i32 = arith.constant 0 : i32
    %c0_i32_0 = arith.constant 0 : i32
    %c0_i32_1 = arith.constant 0 : i32
    return %arg0, %c0_i32, %c0_i32_0 : i32, i32, i32
  }
  func.func @transform_2(%arg0: i32) -> (i32, i32, i32) {
    %c0_i32 = arith.constant 0 : i32
    %c0_i32_0 = arith.constant 0 : i32
    %c0_i32_1 = arith.constant 0 : i32
    return %arg0, %c0_i32, %c0_i32_0 : i32, i32, i32
  }
}

module attributes {stable_mosaic.version = 11 : i64} {
  func.func @_matmul_bias_kernel(%arg0: i32, %arg1: memref<64x1568xbf16, #tpu.memory_space<vmem>>, %arg2: memref<1568x128xf32, #tpu.memory_space<vmem>>, %arg3: memref<1x128xf32, #tpu.memory_space<vmem>>, %arg4: memref<64x128xbf16, #tpu.memory_space<vmem>>) attributes {dimension_semantics = [#tpu.dimension_semantics<parallel>], iteration_bounds = array<i64: 1>, scalar_prefetch = 0 : i64, scratch_operands = 0 : i64, tpu.core_type = #tpu.core_type<tc>, window_params = [{transform_indices = @transform_0, window_bounds = array<i64: 64, 1568>}, {pipeline_mode = #tpu.pipeline_mode<synchronous>, transform_indices = @transform_1, window_bounds = array<i64: 1568, 128>}, {pipeline_mode = #tpu.pipeline_mode<synchronous>, transform_indices = @transform_2, window_bounds = array<i64: 1, 128>}, {transform_indices = @transform_3, window_bounds = array<i64: 64, 128>}]} {
    %c0 = arith.constant 0 : index
    %c0_0 = arith.constant 0 : index
    %0 = vector.load %arg1[%c0, %c0_0] : memref<64x1568xbf16, #tpu.memory_space<vmem>>, vector<64x1568xbf16>
    %c0_1 = arith.constant 0 : index
    %c0_2 = arith.constant 0 : index
    %1 = vector.load %arg2[%c0_1, %c0_2] : memref<1568x128xf32, #tpu.memory_space<vmem>>, vector<1568x128xf32>
    %2 = arith.truncf %1 : vector<1568x128xf32> to vector<1568x128xbf16>
    %cst = arith.constant dense<0.000000e+00> : vector<64x128xf32>
    %3 = tpu.matmul %0, %2, %cst {dimension_numbers = #tpu.dot_dimension_numbers<[1], [0], [0], [1], [0, 0, 1, 1], [], []>} : vector<64x1568xbf16>, vector<1568x128xbf16>, vector<64x128xf32> -> vector<64x128xf32>
    %c0_3 = arith.constant 0 : index
    %c0_4 = arith.constant 0 : index
    %4 = vector.load %arg3[%c0_3, %c0_4] : memref<1x128xf32, #tpu.memory_space<vmem>>, vector<1x128xf32>
    %5 = vector.broadcast %4 : vector<1x128xf32> to vector<64x128xf32>
    %6 = arith.addf %3, %5 : vector<64x128xf32>
    %cst_5 = arith.constant 0.000000e+00 : f32
    %7 = vector.broadcast %cst_5 : f32 to vector<64x128xf32>
    %8 = arith.maximumf %6, %7 : vector<64x128xf32>
    %9 = arith.truncf %8 : vector<64x128xf32> to vector<64x128xbf16>
    %c0_6 = arith.constant 0 : index
    %c0_7 = arith.constant 0 : index
    %10 = vector.load %arg4[%c0_6, %c0_7] : memref<64x128xbf16, #tpu.memory_space<vmem>>, vector<64x128xbf16>
    tpu.vector_store %arg4[%c0_6, %c0_7], %9 {strides = array<i32>} : memref<64x128xbf16, #tpu.memory_space<vmem>>, vector<64x128xbf16>,
    return
  }
  func.func @transform_0(%arg0: i32) -> (i32, i32) {
    %c0_i32 = arith.constant 0 : i32
    %c0_i32_0 = arith.constant 0 : i32
    return %arg0, %c0_i32 : i32, i32
  }
  func.func @transform_1(%arg0: i32) -> (i32, i32) {
    %c0_i32 = arith.constant 0 : i32
    %c0_i32_0 = arith.constant 0 : i32
    %c0_i32_1 = arith.constant 0 : i32
    return %c0_i32, %c0_i32_0 : i32, i32
  }
  func.func @transform_2(%arg0: i32) -> (i32, i32) {
    %c0_i32 = arith.constant 0 : i32
    %c0_i32_0 = arith.constant 0 : i32
    %c0_i32_1 = arith.constant 0 : i32
    return %c0_i32, %c0_i32_0 : i32, i32
  }
  func.func @transform_3(%arg0: i32) -> (i32, i32) {
    %c0_i32 = arith.constant 0 : i32
    %c0_i32_0 = arith.constant 0 : i32
    return %arg0, %c0_i32 : i32, i32
  }
}

module attributes {stable_mosaic.version = 11 : i64} {
  func.func @_matmul_bias_kernel(%arg0: i32, %arg1: memref<64x128xbf16, #tpu.memory_space<vmem>>, %arg2: memref<128x128xf32, #tpu.memory_space<vmem>>, %arg3: memref<1x128xf32, #tpu.memory_space<vmem>>, %arg4: memref<64x128xbf16, #tpu.memory_space<vmem>>) attributes {dimension_semantics = [#tpu.dimension_semantics<parallel>], iteration_bounds = array<i64: 1>, scalar_prefetch = 0 : i64, scratch_operands = 0 : i64, tpu.core_type = #tpu.core_type<tc>, window_params = [{transform_indices = @transform_0, window_bounds = array<i64: 64, 128>}, {pipeline_mode = #tpu.pipeline_mode<synchronous>, transform_indices = @transform_1, window_bounds = array<i64: 128, 128>}, {pipeline_mode = #tpu.pipeline_mode<synchronous>, transform_indices = @transform_2, window_bounds = array<i64: 1, 128>}, {transform_indices = @transform_3, window_bounds = array<i64: 64, 128>}]} {
    %c0 = arith.constant 0 : index
    %c0_0 = arith.constant 0 : index
    %0 = vector.load %arg1[%c0, %c0_0] : memref<64x128xbf16, #tpu.memory_space<vmem>>, vector<64x128xbf16>
    %c0_1 = arith.constant 0 : index
    %c0_2 = arith.constant 0 : index
    %1 = vector.load %arg2[%c0_1, %c0_2] : memref<128x128xf32, #tpu.memory_space<vmem>>, vector<128x128xf32>
    %2 = arith.truncf %1 : vector<128x128xf32> to vector<128x128xbf16>
    %cst = arith.constant dense<0.000000e+00> : vector<64x128xf32>
    %3 = tpu.matmul %0, %2, %cst {dimension_numbers = #tpu.dot_dimension_numbers<[1], [0], [0], [1], [0, 0, 1, 1], [], []>} : vector<64x128xbf16>, vector<128x128xbf16>, vector<64x128xf32> -> vector<64x128xf32>
    %c0_3 = arith.constant 0 : index
    %c0_4 = arith.constant 0 : index
    %4 = vector.load %arg3[%c0_3, %c0_4] : memref<1x128xf32, #tpu.memory_space<vmem>>, vector<1x128xf32>
    %5 = vector.broadcast %4 : vector<1x128xf32> to vector<64x128xf32>
    %6 = arith.addf %3, %5 : vector<64x128xf32>
    %cst_5 = arith.constant 0.000000e+00 : f32
    %7 = vector.broadcast %cst_5 : f32 to vector<64x128xf32>
    %8 = arith.maximumf %6, %7 : vector<64x128xf32>
    %9 = arith.truncf %8 : vector<64x128xf32> to vector<64x128xbf16>
    %c0_6 = arith.constant 0 : index
    %c0_7 = arith.constant 0 : index
    %10 = vector.load %arg4[%c0_6, %c0_7] : memref<64x128xbf16, #tpu.memory_space<vmem>>, vector<64x128xbf16>
    tpu.vector_store %arg4[%c0_6, %c0_7], %9 {strides = array<i32>} : memref<64x128xbf16, #tpu.memory_space<vmem>>, vector<64x128xbf16>,
    return
  }
  func.func @transform_0(%arg0: i32) -> (i32, i32) {
    %c0_i32 = arith.constant 0 : i32
    %c0_i32_0 = arith.constant 0 : i32
    return %arg0, %c0_i32 : i32, i32
  }
  func.func @transform_1(%arg0: i32) -> (i32, i32) {
    %c0_i32 = arith.constant 0 : i32
    %c0_i32_0 = arith.constant 0 : i32
    %c0_i32_1 = arith.constant 0 : i32
    return %c0_i32, %c0_i32_0 : i32, i32
  }
  func.func @transform_2(%arg0: i32) -> (i32, i32) {
    %c0_i32 = arith.constant 0 : i32
    %c0_i32_0 = arith.constant 0 : i32
    %c0_i32_1 = arith.constant 0 : i32
    return %c0_i32, %c0_i32_0 : i32, i32
  }
  func.func @transform_3(%arg0: i32) -> (i32, i32) {
    %c0_i32 = arith.constant 0 : i32
    %c0_i32_0 = arith.constant 0 : i32
    return %arg0, %c0_i32 : i32, i32
  }
}

module attributes {stable_mosaic.version = 11 : i64} {
  func.func @_matmul_bias_kernel(%arg0: i32, %arg1: memref<64x128xbf16, #tpu.memory_space<vmem>>, %arg2: memref<128x15xf32, #tpu.memory_space<vmem>>, %arg3: memref<1x15xf32, #tpu.memory_space<vmem>>, %arg4: memref<64x15xf32, #tpu.memory_space<vmem>>) attributes {dimension_semantics = [#tpu.dimension_semantics<parallel>], iteration_bounds = array<i64: 1>, scalar_prefetch = 0 : i64, scratch_operands = 0 : i64, tpu.core_type = #tpu.core_type<tc>, window_params = [{transform_indices = @transform_0, window_bounds = array<i64: 64, 128>}, {pipeline_mode = #tpu.pipeline_mode<synchronous>, transform_indices = @transform_1, window_bounds = array<i64: 128, 15>}, {pipeline_mode = #tpu.pipeline_mode<synchronous>, transform_indices = @transform_2, window_bounds = array<i64: 1, 15>}, {transform_indices = @transform_3, window_bounds = array<i64: 64, 15>}]} {
    %c0 = arith.constant 0 : index
    %c0_0 = arith.constant 0 : index
    %0 = vector.load %arg1[%c0, %c0_0] : memref<64x128xbf16, #tpu.memory_space<vmem>>, vector<64x128xbf16>
    %c0_1 = arith.constant 0 : index
    %c0_2 = arith.constant 0 : index
    %1 = vector.load %arg2[%c0_1, %c0_2] : memref<128x15xf32, #tpu.memory_space<vmem>>, vector<128x15xf32>
    %2 = arith.truncf %1 : vector<128x15xf32> to vector<128x15xbf16>
    %cst = arith.constant dense<0.000000e+00> : vector<64x15xf32>
    %3 = tpu.matmul %0, %2, %cst {dimension_numbers = #tpu.dot_dimension_numbers<[1], [0], [0], [1], [0, 0, 1, 1], [], []>} : vector<64x128xbf16>, vector<128x15xbf16>, vector<64x15xf32> -> vector<64x15xf32>
    %c0_3 = arith.constant 0 : index
    %c0_4 = arith.constant 0 : index
    %4 = vector.load %arg3[%c0_3, %c0_4] : memref<1x15xf32, #tpu.memory_space<vmem>>, vector<1x15xf32>
    %5 = vector.broadcast %4 : vector<1x15xf32> to vector<64x15xf32>
    %6 = arith.addf %3, %5 : vector<64x15xf32>
    %c0_5 = arith.constant 0 : index
    %c0_6 = arith.constant 0 : index
    %7 = vector.load %arg4[%c0_5, %c0_6] : memref<64x15xf32, #tpu.memory_space<vmem>>, vector<64x15xf32>
    tpu.vector_store %arg4[%c0_5, %c0_6], %6 {strides = array<i32>} : memref<64x15xf32, #tpu.memory_space<vmem>>, vector<64x15xf32>,
    return
  }
  func.func @transform_0(%arg0: i32) -> (i32, i32) {
    %c0_i32 = arith.constant 0 : i32
    %c0_i32_0 = arith.constant 0 : i32
    return %arg0, %c0_i32 : i32, i32
  }
  func.func @transform_1(%arg0: i32) -> (i32, i32) {
    %c0_i32 = arith.constant 0 : i32
    %c0_i32_0 = arith.constant 0 : i32
    %c0_i32_1 = arith.constant 0 : i32
    return %c0_i32, %c0_i32_0 : i32, i32
  }
  func.func @transform_2(%arg0: i32) -> (i32, i32) {
    %c0_i32 = arith.constant 0 : i32
    %c0_i32_0 = arith.constant 0 : i32
    %c0_i32_1 = arith.constant 0 : i32
    return %c0_i32, %c0_i32_0 : i32, i32
  }
  func.func @transform_3(%arg0: i32) -> (i32, i32) {
    %c0_i32 = arith.constant 0 : i32
    %c0_i32_0 = arith.constant 0 : i32
    return %arg0, %c0_i32 : i32, i32
  }
}

module attributes {stable_mosaic.version = 11 : i64} {
  func.func @_detect_epilogue_kernel(%arg0: memref<3x128xf32, #tpu.memory_space<vmem>>, %arg1: memref<12x128xf32, #tpu.memory_space<vmem>>, %arg2: memref<4x128xf32, #tpu.memory_space<vmem>>, %arg3: memref<4x128xf32, #tpu.memory_space<vmem>>, %arg4: memref<2x128xf32, #tpu.memory_space<vmem>>, %arg5: memref<1x128xi32, #tpu.memory_space<vmem>>, %arg6: memref<1x128xf32, #tpu.memory_space<vmem>>) attributes {dimension_semantics = [], scalar_prefetch = 0 : i64, scratch_operands = 0 : i64, tpu.core_type = #tpu.core_type<tc>} {
    %c0 = arith.constant 0 : index
    %c0_0 = arith.constant 0 : index
    %0 = vector.load %arg0[%c0, %c0_0] : memref<3x128xf32, #tpu.memory_space<vmem>>, vector<3x128xf32>
    %c0_1 = arith.constant 0 : index
    %c0_2 = arith.constant 0 : index
    %1 = vector.load %arg1[%c0_1, %c0_2] : memref<12x128xf32, #tpu.memory_space<vmem>>, vector<12x128xf32>
    %c0_3 = arith.constant 0 : index
    %c0_4 = arith.constant 0 : index
    %2 = vector.load %arg2[%c0_3, %c0_4] : memref<4x128xf32, #tpu.memory_space<vmem>>, vector<4x128xf32>
    %3 = vector.extract_strided_slice %0 {offsets = [0, 0], sizes = [1, 128], strides = [1, 1]} : vector<3x128xf32> to vector<1x128xf32>
    %4 = vector.extract_strided_slice %0 {offsets = [1, 0], sizes = [1, 128], strides = [1, 1]} : vector<3x128xf32> to vector<1x128xf32>
    %5 = arith.maximumf %3, %4 : vector<1x128xf32>
    %6 = vector.extract_strided_slice %0 {offsets = [2, 0], sizes = [1, 128], strides = [1, 1]} : vector<3x128xf32> to vector<1x128xf32>
    %7 = arith.maximumf %5, %6 : vector<1x128xf32>
    %8 = vector.broadcast %7 : vector<1x128xf32> to vector<3x128xf32>
    %9 = arith.subf %0, %8 : vector<3x128xf32>
    %10 = math.exp %9 : vector<3x128xf32>
    %11 = vector.extract_strided_slice %10 {offsets = [0, 0], sizes = [1, 128], strides = [1, 1]} : vector<3x128xf32> to vector<1x128xf32>
    %12 = vector.extract_strided_slice %10 {offsets = [1, 0], sizes = [1, 128], strides = [1, 1]} : vector<3x128xf32> to vector<1x128xf32>
    %13 = arith.addf %11, %12 : vector<1x128xf32>
    %14 = vector.extract_strided_slice %10 {offsets = [2, 0], sizes = [1, 128], strides = [1, 1]} : vector<3x128xf32> to vector<1x128xf32>
    %15 = arith.addf %13, %14 : vector<1x128xf32>
    %16 = vector.broadcast %15 : vector<1x128xf32> to vector<3x128xf32>
    %17 = arith.divf %10, %16 : vector<3x128xf32>
    %18 = vector.extract_strided_slice %17 {offsets = [1, 0], sizes = [1, 128], strides = [1, 1]} : vector<3x128xf32> to vector<1x128xf32>
    %cst = arith.constant 1.000000e+00 : f32
    %19 = vector.broadcast %cst : f32 to vector<1x128xf32>
    %20 = vector.extract_strided_slice %1 {offsets = [4, 0], sizes = [1, 128], strides = [1, 1]} : vector<12x128xf32> to vector<1x128xf32>
    %21 = vector.extract_strided_slice %1 {offsets = [5, 0], sizes = [1, 128], strides = [1, 1]} : vector<12x128xf32> to vector<1x128xf32>
    %22 = vector.extract_strided_slice %1 {offsets = [6, 0], sizes = [1, 128], strides = [1, 1]} : vector<12x128xf32> to vector<1x128xf32>
    %23 = vector.extract_strided_slice %1 {offsets = [7, 0], sizes = [1, 128], strides = [1, 1]} : vector<12x128xf32> to vector<1x128xf32>
    %24 = vector.extract_strided_slice %17 {offsets = [2, 0], sizes = [1, 128], strides = [1, 1]} : vector<3x128xf32> to vector<1x128xf32>
    %25 = arith.cmpf ogt, %24, %18 : vector<1x128xf32>
    %26 = arith.select %25, %24, %18 : vector<1x128xi1>, vector<1x128xf32>
    %cst_5 = arith.constant 2.000000e+00 : f32
    %27 = vector.broadcast %cst_5 : f32 to vector<1x128xf32>
    %28 = arith.select %25, %27, %19 : vector<1x128xi1>, vector<1x128xf32>
    %29 = vector.extract_strided_slice %1 {offsets = [8, 0], sizes = [1, 128], strides = [1, 1]} : vector<12x128xf32> to vector<1x128xf32>
    %30 = arith.select %25, %29, %20 : vector<1x128xi1>, vector<1x128xf32>
    %31 = vector.extract_strided_slice %1 {offsets = [9, 0], sizes = [1, 128], strides = [1, 1]} : vector<12x128xf32> to vector<1x128xf32>
    %32 = arith.select %25, %31, %21 : vector<1x128xi1>, vector<1x128xf32>
    %33 = vector.extract_strided_slice %1 {offsets = [10, 0], sizes = [1, 128], strides = [1, 1]} : vector<12x128xf32> to vector<1x128xf32>
    %34 = arith.select %25, %33, %22 : vector<1x128xi1>, vector<1x128xf32>
    %35 = vector.extract_strided_slice %1 {offsets = [11, 0], sizes = [1, 128], strides = [1, 1]} : vector<12x128xf32> to vector<1x128xf32>
    %36 = arith.select %25, %35, %23 : vector<1x128xi1>, vector<1x128xf32>
    %37 = vector.extract_strided_slice %2 {offsets = [0, 0], sizes = [1, 128], strides = [1, 1]} : vector<4x128xf32> to vector<1x128xf32>
    %38 = vector.extract_strided_slice %2 {offsets = [1, 0], sizes = [1, 128], strides = [1, 1]} : vector<4x128xf32> to vector<1x128xf32>
    %39 = vector.extract_strided_slice %2 {offsets = [2, 0], sizes = [1, 128], strides = [1, 1]} : vector<4x128xf32> to vector<1x128xf32>
    %40 = vector.extract_strided_slice %2 {offsets = [3, 0], sizes = [1, 128], strides = [1, 1]} : vector<4x128xf32> to vector<1x128xf32>
    %41 = arith.subf %39, %37 : vector<1x128xf32>
    %42 = arith.subf %40, %38 : vector<1x128xf32>
    %cst_6 = arith.constant 5.000000e-01 : f32
    %43 = vector.broadcast %cst_6 : f32 to vector<1x128xf32>
    %44 = arith.mulf %43, %41 : vector<1x128xf32>
    %45 = arith.addf %37, %44 : vector<1x128xf32>
    %cst_7 = arith.constant 5.000000e-01 : f32
    %46 = vector.broadcast %cst_7 : f32 to vector<1x128xf32>
    %47 = arith.mulf %46, %42 : vector<1x128xf32>
    %48 = arith.addf %38, %47 : vector<1x128xf32>
    %cst_8 = arith.constant 1.000000e-01 : f32
    %49 = vector.broadcast %cst_8 : f32 to vector<1x128xf32>
    %50 = arith.mulf %30, %49 : vector<1x128xf32>
    %51 = arith.mulf %50, %41 : vector<1x128xf32>
    %52 = arith.addf %51, %45 : vector<1x128xf32>
    %cst_9 = arith.constant 1.000000e-01 : f32
    %53 = vector.broadcast %cst_9 : f32 to vector<1x128xf32>
    %54 = arith.mulf %32, %53 : vector<1x128xf32>
    %55 = arith.mulf %54, %42 : vector<1x128xf32>
    %56 = arith.addf %55, %48 : vector<1x128xf32>
    %cst_10 = arith.constant 2.000000e-01 : f32
    %57 = vector.broadcast %cst_10 : f32 to vector<1x128xf32>
    %58 = arith.mulf %34, %57 : vector<1x128xf32>
    %cst_11 = arith.constant 4.13516665 : f32
    %59 = vector.broadcast %cst_11 : f32 to vector<1x128xf32>
    %60 = arith.minimumf %58, %59 : vector<1x128xf32>
    %61 = math.exp %60 : vector<1x128xf32>
    %62 = arith.mulf %61, %41 : vector<1x128xf32>
    %cst_12 = arith.constant 2.000000e-01 : f32
    %63 = vector.broadcast %cst_12 : f32 to vector<1x128xf32>
    %64 = arith.mulf %36, %63 : vector<1x128xf32>
    %cst_13 = arith.constant 4.13516665 : f32
    %65 = vector.broadcast %cst_13 : f32 to vector<1x128xf32>
    %66 = arith.minimumf %64, %65 : vector<1x128xf32>
    %67 = math.exp %66 : vector<1x128xf32>
    %68 = arith.mulf %67, %42 : vector<1x128xf32>
    %cst_14 = arith.constant 5.000000e-01 : f32
    %69 = vector.broadcast %cst_14 : f32 to vector<1x128xf32>
    %70 = arith.mulf %69, %62 : vector<1x128xf32>
    %71 = arith.subf %52, %70 : vector<1x128xf32>
    %cst_15 = arith.constant 0.000000e+00 : f32
    %cst_16 = arith.constant 6.400000e+01 : f32
    %72 = vector.broadcast %cst_15 : f32 to vector<1x128xf32>
    %73 = arith.maximumf %72, %71 : vector<1x128xf32>
    %74 = vector.broadcast %cst_16 : f32 to vector<1x128xf32>
    %75 = arith.minimumf %74, %73 : vector<1x128xf32>
    %cst_17 = arith.constant 5.000000e-01 : f32
    %76 = vector.broadcast %cst_17 : f32 to vector<1x128xf32>
    %77 = arith.mulf %76, %68 : vector<1x128xf32>
    %78 = arith.subf %56, %77 : vector<1x128xf32>
    %cst_18 = arith.constant 0.000000e+00 : f32
    %cst_19 = arith.constant 6.400000e+01 : f32
    %79 = vector.broadcast %cst_18 : f32 to vector<1x128xf32>
    %80 = arith.maximumf %79, %78 : vector<1x128xf32>
    %81 = vector.broadcast %cst_19 : f32 to vector<1x128xf32>
    %82 = arith.minimumf %81, %80 : vector<1x128xf32>
    %cst_20 = arith.constant 5.000000e-01 : f32
    %83 = vector.broadcast %cst_20 : f32 to vector<1x128xf32>
    %84 = arith.mulf %83, %62 : vector<1x128xf32>
    %85 = arith.addf %52, %84 : vector<1x128xf32>
    %cst_21 = arith.constant 0.000000e+00 : f32
    %cst_22 = arith.constant 6.400000e+01 : f32
    %86 = vector.broadcast %cst_21 : f32 to vector<1x128xf32>
    %87 = arith.maximumf %86, %85 : vector<1x128xf32>
    %88 = vector.broadcast %cst_22 : f32 to vector<1x128xf32>
    %89 = arith.minimumf %88, %87 : vector<1x128xf32>
    %cst_23 = arith.constant 5.000000e-01 : f32
    %90 = vector.broadcast %cst_23 : f32 to vector<1x128xf32>
    %91 = arith.mulf %90, %68 : vector<1x128xf32>
    %92 = arith.addf %56, %91 : vector<1x128xf32>
    %cst_24 = arith.constant 0.000000e+00 : f32
    %cst_25 = arith.constant 6.400000e+01 : f32
    %93 = vector.broadcast %cst_24 : f32 to vector<1x128xf32>
    %94 = arith.maximumf %93, %92 : vector<1x128xf32>
    %95 = vector.broadcast %cst_25 : f32 to vector<1x128xf32>
    %96 = arith.minimumf %95, %94 : vector<1x128xf32>
    %97 = tpu.concatenate %75, %82, %89, %96 in 0 : vector<1x128xf32>, vector<1x128xf32>, vector<1x128xf32>, vector<1x128xf32> -> vector<4x128xf32>
    %c0_26 = arith.constant 0 : index
    %c0_27 = arith.constant 0 : index
    %98 = vector.load %arg3[%c0_26, %c0_27] : memref<4x128xf32, #tpu.memory_space<vmem>>, vector<4x128xf32>
    tpu.vector_store %arg3[%c0_26, %c0_27], %97 {strides = array<i32>} : memref<4x128xf32, #tpu.memory_space<vmem>>, vector<4x128xf32>,
    %99 = arith.addf %75, %89 : vector<1x128xf32>
    %cst_28 = arith.constant 5.000000e-01 : f32
    %100 = vector.broadcast %cst_28 : f32 to vector<1x128xf32>
    %101 = arith.mulf %100, %99 : vector<1x128xf32>
    %102 = arith.addf %82, %96 : vector<1x128xf32>
    %cst_29 = arith.constant 5.000000e-01 : f32
    %103 = vector.broadcast %cst_29 : f32 to vector<1x128xf32>
    %104 = arith.mulf %103, %102 : vector<1x128xf32>
    %105 = tpu.concatenate %101, %104 in 0 : vector<1x128xf32>, vector<1x128xf32> -> vector<2x128xf32>
    %c0_30 = arith.constant 0 : index
    %c0_31 = arith.constant 0 : index
    %106 = vector.load %arg4[%c0_30, %c0_31] : memref<2x128xf32, #tpu.memory_space<vmem>>, vector<2x128xf32>
    tpu.vector_store %arg4[%c0_30, %c0_31], %105 {strides = array<i32>} : memref<2x128xf32, #tpu.memory_space<vmem>>, vector<2x128xf32>,
    %107 = arith.fptosi %28 : vector<1x128xf32> to vector<1x128xi32>
    %c0_32 = arith.constant 0 : index
    %c0_33 = arith.constant 0 : index
    %108 = vector.load %arg5[%c0_32, %c0_33] : memref<1x128xi32, #tpu.memory_space<vmem>>, vector<1x128xi32>
    tpu.vector_store %arg5[%c0_32, %c0_33], %107 {strides = array<i32>} : memref<1x128xi32, #tpu.memory_space<vmem>>, vector<1x128xi32>,
    %c0_34 = arith.constant 0 : index
    %c0_35 = arith.constant 0 : index
    %109 = vector.load %arg6[%c0_34, %c0_35] : memref<1x128xf32, #tpu.memory_space<vmem>>, vector<1x128xf32>
    tpu.vector_store %arg6[%c0_34, %c0_35], %26 {strides = array<i32>} : memref<1x128xf32, #tpu.memory_space<vmem>>, vector<1x128xf32>,
    return
  }
}

</mosaic_0001>

<bundles_post_ra>
// kernel: forward.11
= control target key start
LH: loop header
LB: loop body
LE: loop exit
PB: predicated region body
PF: predicated region fallthrough
CT: control target
= control target key end

     0   :  { %8 = vsyncpa [#allocation3], 0  ;;  %s959_s12 = smov 0   ;;  %s1163_s0 = inlined_call_operand.vmem [shape: f32[2048,27], index: 0, kind: input, shape index: {}]   ;;  %s1164_s1 = inlined_call_operand.vmem [shape: f32[27,16], index: 1, kind: input, shape index: {}]   ;;  %s1165_s2 = inlined_call_operand.hbm [shape: f32[1,16], index: 2, kind: input, shape index: {}]   ;;  %s1166_s3 = inlined_call_operand.vmem [shape: bf16[2048,16], index: 3, kind: output, shape index: {}]  }
   0x1 LB: > { %s727_s13 = sadd.s32 4294967295, %s935_s12   ;;  %p729_p0 = scmp.ge.s32.totalorder %s935_s12, 1  ;;  %s935_s12 = sphi %s959_s12, %s14_s12  }
   0x2   : > { %p113_p1 = scmp.lt.s32.totalorder %s935_s12, 9  ;;  %p971_p3 = scmp.eq.s32.totalorder %s727_s13, 0 }
   0x3   : > { %s937_s16 = smov [#allocation2]  }
   0x4   : > { %p967_p2 = pnand %p729_p0, %p113_p1  ;;  %s129_s17 = sshll.u32 %s937_s16, 4  ;;  %s130_s17 = int_to_ptr.vmem [resolvable:$true] %s129_s17 }
   0x5   : > { %s910_s18 = scalar_lea.vmem %s130_s17, 16  ;;  %s917_s19 = scalar_lea.vmem %s130_s17, 32 }
   0x6   : > { %p883_p4 = pneg %p967_p2  ;;  %p911_p7 = scmp.ne.s32.totalorder %s130_s17, %s910_s18 }
   0x7   : > { %p918_p10 = scmp.lt.s32.totalorder %s130_s17, %s130_s17  ;;  %p919_p11 = scmp.lt.s32.totalorder %s917_s19, %s910_s18 }
   0x8   : > { %p884_p5 = pnand %p971_p3, %p883_p4 }
   0x9   : > { %p920_p12 = por %p919_p11, %p918_p10 }
   0xa   : > { %p901_p6 = pneg %p884_p5 }
   0xc   : > { %p913_p8 = pnand %p911_p7, %p901_p6 }
   0xe   : > { %p914_p9 = pneg %p913_p8 }
  0x10   : > { %p921_p13 = pnand %p920_p12, %p914_p9 }
  0x12   : > { %924 = shalt.err (!%p921_p13)
}
  0x13   : > { %886 = dma.hbm_to_vmem [thread:$0]  (!%p884_p5), %s1165_s2, 16, %s130_s17, [#allocation3]  }
  0x14   : > { %151 = sbr.rel (%p967_p2) target bundleno = 271 (0x10f), region = 32 }
  0x19   : > { %930 = dma.done.wait (%p971_p3), [#allocation3], 16  }
  0x1a   : > { %932 = vsyncadd (%p971_p3), [#allocation3], 4294967280  ;;  %s734_s22 = sshll.u32 %s727_s13, 5  ;;  %vm298_vm0 = vcmask 1044480   ;;  %vm299_vm1 = vcmask 1045504   ;;  %v938_v0 = vmov 65535  }
  0x1b   : > { %p176_p0 = scmp.lt.s32.totalorder %s734_s22, 255  ;;  %v300_v1 = vsel %vm298_vm0, 4294967295, %v938_v0  ;;  %v238_v2 = vld [vmem:[%s1164_s1 + $0x10] sm:$0xff]  ;;  %v239_v3 = vld [vmem:[%s1164_s1 + $0x18] sm:$0x7]  ;;  %v236_v5 = vld [vmem:[%s1164_s1] sm:$0xff] }
  0x1c   : > { %v301_v4 = vsel %vm299_vm1, %v300_v1, 0  ;;  %v241_v6 = vpack.c.bf16 %v239_v3, %v238_v2  ;;  %v237_v7 = vld [vmem:[%s1164_s1 + $0x8] sm:$0xff]  ;;  %vm249_vm2 = vcmask 220160   ;;  %v1056_v58 = vld [vmem:[#allocation2] ss:$0 sm:$0xff]  ;;  %vm626_vm3 = vcmask 125952  }
  0x1d   : > { %s1170_s22 = smov (!%p176_p0, %s734_s22), 255  ;;  %v240_v14 = vpack.c.bf16 %v237_v7, %v236_v5 }
  0x1e   : > { %s735_s23 = sshll.u32 %s1170_s22, 3  ;;  %v303_v13 = vand.u32 %v301_v4, %v241_v6  ;;  %s737_s8 = sshll.u32 %s1170_s22, 2 }
  0x1f   : > { %s994_s26 = scalar_lea.vmem %s1163_s0, %s735_s23  ;;  %s1066_s11 = scalar_lea.vmem %s1166_s3, %s737_s8 }
  0x20   : > { %v188_v8 = vld [vmem:[%s994_s26] sm:$0xff]  ;;  %v189_v9 = vld [vmem:[%s994_s26 + $0x8] sm:$0xff]  ;;  %839 = vmatprep.subr.bf16.mxu0 %v303_v13  ;;  %875 = vmatprep.subr.bf16.mxu1 %v303_v13  ;;  %v190_v16 = vld [vmem:[%s994_s26 + $0x10] sm:$0xff] }
  0x21   : > { %v220_v10 = vpack.c.bf16 %v189_v9, %v188_v8  ;;  %v204_v11 = vld [vmem:[%s994_s26 + $0x80] sm:$0xff]  ;;  %v205_v12 = vld [vmem:[%s994_s26 + $0x88] sm:$0xff]  ;;  %v191_v17 = vld [vmem:[%s994_s26 + $0x18] sm:$0xff]  ;;  %840 = vmatpush3.bf16.msra.mxu0 %v303_v13  ;;  %877 = vmatpush3.bf16.msra.mxu1 %v303_v13 }
  0x22   : > { %v228_v15 = vpack.c.bf16 %v205_v12, %v204_v11  ;;  %v206_v18 = vld [vmem:[%s994_s26 + $0x90] sm:$0xff]  ;;  %v207_v19 = vld [vmem:[%s994_s26 + $0x98] sm:$0xff]  ;;  %v192_v20 = vld [vmem:[%s994_s26 + $0x20] sm:$0xff]  ;;  %841 = vmatprep.subr.bf16.mxu0 %v240_v14  ;;  %876 = vmatprep.subr.bf16.mxu1 %v240_v14  ;;  %v221_v24 = vpack.c.bf16 %v191_v17, %v190_v16 }
  0x23   : > { %843 = vmatprep.mubr.msk.bf16.mxu0 %vm249_vm2, %v220_v10  ;;  %v193_v21 = vld [vmem:[%s994_s26 + $0x28] sm:$0xff]  ;;  %v208_v22 = vld [vmem:[%s994_s26 + $0xa0] sm:$0xff]  ;;  %v229_v25 = vpack.c.bf16 %v207_v19, %v206_v18  ;;  %v194_v28 = vld [vmem:[%s994_s26 + $0x30] sm:$0xff] }
  0x24   : > { %v209_v23 = vld [vmem:[%s994_s26 + $0xa8] sm:$0xff]  ;;  %859 = vmatprep.mubr.msk.bf16.mxu1 %vm249_vm2, %v228_v15  ;;  %v222_v26 = vpack.c.bf16 %v193_v21, %v192_v20  ;;  %v195_v29 = vld [vmem:[%s994_s26 + $0x38] sm:$0xff]  ;;  %v210_v30 = vld [vmem:[%s994_s26 + $0xb0] sm:$0xff] }
  0x25   : > { %842 = vmatpush3.bf16.msra.mxu0 %v240_v14  ;;  %878 = vmatpush3.bf16.msra.mxu1 %v240_v14  ;;  %v230_v27 = vpack.c.bf16 %v209_v23, %v208_v22  ;;  %v211_v31 = vld [vmem:[%s994_s26 + $0xb8] sm:$0xff]  ;;  %v196_v32 = vld [vmem:[%s994_s26 + $0x40] sm:$0xff]  ;;  %v197_v33 = vld [vmem:[%s994_s26 + $0x48] sm:$0xff]  ;;  %v223_v36 = vpack.c.bf16 %v195_v29, %v194_v28 }
  0x26   : > { %v212_v34 = vld [vmem:[%s994_s26 + $0xc0] sm:$0xff]  ;;  %v213_v35 = vld [vmem:[%s994_s26 + $0xc8] sm:$0xff]  ;;  %v231_v37 = vpack.c.bf16 %v211_v31, %v210_v30  ;;  %v224_v38 = vpack.c.bf16 %v197_v33, %v196_v32  ;;  %v198_v40 = vld [vmem:[%s994_s26 + $0x50] sm:$0xff] }
  0x27   : > { %v232_v39 = vpack.c.bf16 %v213_v35, %v212_v34  ;;  %v199_v41 = vld [vmem:[%s994_s26 + $0x58] sm:$0xff]  ;;  %v214_v42 = vld [vmem:[%s994_s26 + $0xd0] sm:$0xff]  ;;  %v200_v44 = vld [vmem:[%s994_s26 + $0x60] sm:$0xff] }
  0x28   : > { %844 = vmatmul.mubr.msk.bf16.vlgmr.msra.gmra.mxu0 %vm249_vm2, %v221_v24  ;;  %860 = vmatmul.mubr.msk.bf16.vlgmr.msra.gmra.mxu1 %vm249_vm2, %v229_v25  ;;  %v215_v43 = vld [vmem:[%s994_s26 + $0xd8] sm:$0xff]  ;;  %v201_v45 = vld [vmem:[%s994_s26 + $0x68] sm:$0xff]  ;;  %v216_v46 = vld [vmem:[%s994_s26 + $0xe0] sm:$0xff]  ;;  %v225_v48 = vpack.c.bf16 %v199_v41, %v198_v40 }
  0x29   : > { %847 = vmatprep.mubr.msk.bf16.mxu0 %vm249_vm2, %v222_v26  ;;  %863 = vmatprep.mubr.msk.bf16.mxu1 %vm249_vm2, %v230_v27  ;;  %v217_v47 = vld [vmem:[%s994_s26 + $0xe8] sm:$0xff]  ;;  %v233_v49 = vpack.c.bf16 %v215_v43, %v214_v42  ;;  %v226_v50 = vpack.c.bf16 %v201_v45, %v200_v44  ;;  %v202_v52 = vld [vmem:[%s994_s26 + $0x70] sm:$0xff]  ;;  %v203_v53 = vld [vmem:[%s994_s26 + $0x78] sm:$0xff] }
  0x2a   : > { %v234_v51 = vpack.c.bf16 %v217_v47, %v216_v46  ;;  %v218_v54 = vld [vmem:[%s994_s26 + $0xf0] sm:$0xff]  ;;  %v219_v55 = vld [vmem:[%s994_s26 + $0xf8] sm:$0xff]  ;;  %v227_v56 = vpack.c.bf16 %v203_v53, %v202_v52 }
  0x2b   : > { %v235_v57 = vpack.c.bf16 %v219_v55, %v218_v54 }
  0x30   : > { %848 = vmatmul.mubr.msk.bf16.gmra.mxu0 %vm249_vm2, %v223_v36  ;;  %864 = vmatmul.mubr.msk.bf16.gmra.mxu1 %vm249_vm2, %v231_v37 }
  0x31   : > { %851 = vmatprep.mubr.msk.bf16.mxu0 %vm249_vm2, %v224_v38  ;;  %867 = vmatprep.mubr.msk.bf16.mxu1 %vm249_vm2, %v232_v39 }
  0x38   : > { %852 = vmatmul.mubr.msk.bf16.gmra.mxu0 %vm249_vm2, %v225_v48  ;;  %868 = vmatmul.mubr.msk.bf16.gmra.mxu1 %vm249_vm2, %v233_v49 }
  0x39   : > { %855 = vmatprep.mubr.msk.bf16.mxu0 %vm249_vm2, %v226_v50  ;;  %871 = vmatprep.mubr.msk.bf16.mxu1 %vm249_vm2, %v234_v51 }
  0x40   : > { %856 = vmatmul.mubr.msk.bf16.gmra.mxu0 %vm249_vm2, %v227_v56  ;;  %872 = vmatmul.mubr.msk.bf16.gmra.mxu1 %vm249_vm2, %v235_v57 }
  0xe8   : > { %v845_v59 = vpop.f32.mrf.mxu0  ;;  %v861_v60 = vpop.f32.mrf.mxu1 }
  0xe9   : > { %v348_v61 = vadd.f32 %v845_v59, %v1056_v58  ;;  %v412_v62 = vadd.f32 %v861_v60, %v1056_v58 }
  0xea   : > { %v339_v63 = vpop.f32.mrf.mxu0  ;;  %v403_v0 = vpop.f32.mrf.mxu1 }
  0xeb   : > { %v468_v1 = vmax.f32 %v348_v61, 0.0  ;;  %v484_v2 = vmax.f32 %v412_v62, 0.0  ;;  %v340_v3 = vadd.f32 %v1056_v58, %v339_v63  ;;  %v404_v4 = vadd.f32 %v1056_v58, %v403_v0 }
  0xec   : > { %v846_v5 = vpop.f32.mrf.mxu0  ;;  %v862_v6 = vpop.f32.mrf.mxu1 }
  0xed   : > { %v791_v7 = vpack.c.bf16 %v468_v1, %v468_v1  ;;  %v807_v8 = vpack.c.bf16 %v484_v2, %v484_v2  ;;  %v466_v9 = vmax.f32 %v340_v3, 0.0  ;;  %v482_v10 = vmax.f32 %v404_v4, 0.0 }
  0xee   : > { %v351_v11 = vadd.f32 %v846_v5, %v1056_v58  ;;  %v415_v12 = vadd.f32 %v862_v6, %v1056_v58  ;;  %v342_v13 = vpop.f32.mrf.mxu0  ;;  %v406_v14 = vpop.f32.mrf.mxu1 }
  0xef   : > { %629 = vst.msk [vmem:[%s1066_s11 + $0x8] sm:$0xf] %vm626_vm3, %v791_v7  ;;  %645 = vst.msk [vmem:[%s1066_s11 + $0x48] sm:$0xf] %vm626_vm3, %v807_v8  ;;  %v789_v15 = vpack.c.bf16 %v466_v9, %v466_v9  ;;  %v805_v16 = vpack.c.bf16 %v482_v10, %v482_v10  ;;  %v343_v17 = vadd.f32 %v1056_v58, %v342_v13 }
  0xf0   : > { %v407_v18 = vadd.f32 %v1056_v58, %v406_v14  ;;  %v469_v19 = vmax.f32 %v351_v11, 0.0  ;;  %v485_v20 = vmax.f32 %v415_v12, 0.0  ;;  %v849_v21 = vpop.f32.mrf.mxu0  ;;  %v865_v22 = vpop.f32.mrf.mxu1 }
  0xf1   : > { %627 = vst.msk [vmem:[%s1066_s11] sm:$0xf] %vm626_vm3, %v789_v15  ;;  %643 = vst.msk [vmem:[%s1066_s11 + $0x40] sm:$0xf] %vm626_vm3, %v805_v16  ;;  %v467_v23 = vmax.f32 %v343_v17, 0.0  ;;  %v364_v25 = vadd.f32 %v849_v21, %v1056_v58  ;;  %v428_v26 = vadd.f32 %v865_v22, %v1056_v58 }
  0xf2   : > { %v483_v24 = vmax.f32 %v407_v18, 0.0  ;;  %v792_v27 = vpack.c.bf16 %v469_v19, %v469_v19  ;;  %v808_v28 = vpack.c.bf16 %v485_v20, %v485_v20  ;;  %v355_v29 = vpop.f32.mrf.mxu0  ;;  %v419_v30 = vpop.f32.mrf.mxu1 }
  0xf3   : > { %v790_v31 = vpack.c.bf16 %v467_v23, %v467_v23  ;;  %v472_v33 = vmax.f32 %v364_v25, 0.0  ;;  %v488_v34 = vmax.f32 %v428_v26, 0.0  ;;  %v356_v35 = vadd.f32 %v1056_v58, %v355_v29 }
  0xf4   : > { %v806_v32 = vpack.c.bf16 %v483_v24, %v483_v24  ;;  %630 = vst.msk [vmem:[%s1066_s11 + $0xc] sm:$0xf] %vm626_vm3, %v792_v27  ;;  %646 = vst.msk [vmem:[%s1066_s11 + $0x4c] sm:$0xf] %vm626_vm3, %v808_v28  ;;  %v420_v36 = vadd.f32 %v1056_v58, %v419_v30  ;;  %v850_v37 = vpop.f32.mrf.mxu0  ;;  %v866_v38 = vpop.f32.mrf.mxu1 }
  0xf5   : > { %628 = vst.msk [vmem:[%s1066_s11 + $0x4] sm:$0xf] %vm626_vm3, %v790_v31  ;;  %v795_v39 = vpack.c.bf16 %v472_v33, %v472_v33  ;;  %v811_v40 = vpack.c.bf16 %v488_v34, %v488_v34  ;;  %v367_v41 = vadd.f32 %v850_v37, %v1056_v58  ;;  %v431_v42 = vadd.f32 %v866_v38, %v1056_v58 }
  0xf6   : > { %644 = vst.msk [vmem:[%s1066_s11 + $0x44] sm:$0xf] %vm626_vm3, %v806_v32  ;;  %v470_v43 = vmax.f32 %v356_v35, 0.0  ;;  %v486_v44 = vmax.f32 %v420_v36, 0.0  ;;  %v358_v45 = vpop.f32.mrf.mxu0  ;;  %v422_v46 = vpop.f32.mrf.mxu1 }
  0xf7   : > { %633 = vst.msk [vmem:[%s1066_s11 + $0x18] sm:$0xf] %vm626_vm3, %v795_v39  ;;  %649 = vst.msk [vmem:[%s1066_s11 + $0x58] sm:$0xf] %vm626_vm3, %v811_v40  ;;  %v473_v47 = vmax.f32 %v367_v41, 0.0  ;;  %v489_v48 = vmax.f32 %v431_v42, 0.0  ;;  %v359_v49 = vadd.f32 %v1056_v58, %v358_v45  ;;  %v423_v50 = vadd.f32 %v1056_v58, %v422_v46 }
  0xf8   : > { %v793_v51 = vpack.c.bf16 %v470_v43, %v470_v43  ;;  %v809_v52 = vpack.c.bf16 %v486_v44, %v486_v44  ;;  %v853_v53 = vpop.f32.mrf.mxu0  ;;  %v869_v54 = vpop.f32.mrf.mxu1 }
  0xf9   : > { %v796_v55 = vpack.c.bf16 %v473_v47, %v473_v47  ;;  %v812_v56 = vpack.c.bf16 %v489_v48, %v489_v48  ;;  %v471_v57 = vmax.f32 %v359_v49, 0.0  ;;  %v487_v59 = vmax.f32 %v423_v50, 0.0 }
  0xfa   : > { %631 = vst.msk [vmem:[%s1066_s11 + $0x10] sm:$0xf] %vm626_vm3, %v793_v51  ;;  %647 = vst.msk [vmem:[%s1066_s11 + $0x50] sm:$0xf] %vm626_vm3, %v809_v52  ;;  %v380_v60 = vadd.f32 %v853_v53, %v1056_v58  ;;  %v444_v61 = vadd.f32 %v869_v54, %v1056_v58  ;;  %v371_v62 = vpop.f32.mrf.mxu0  ;;  %v435_v63 = vpop.f32.mrf.mxu1 }
  0xfb   : > { %634 = vst.msk [vmem:[%s1066_s11 + $0x1c] sm:$0xf] %vm626_vm3, %v796_v55  ;;  %650 = vst.msk [vmem:[%s1066_s11 + $0x5c] sm:$0xf] %vm626_vm3, %v812_v56  ;;  %v794_v0 = vpack.c.bf16 %v471_v57, %v471_v57  ;;  %v810_v1 = vpack.c.bf16 %v487_v59, %v487_v59  ;;  %v372_v2 = vadd.f32 %v1056_v58, %v371_v62 }
  0xfc   : > { %v436_v3 = vadd.f32 %v1056_v58, %v435_v63  ;;  %v476_v4 = vmax.f32 %v380_v60, 0.0  ;;  %v492_v5 = vmax.f32 %v444_v61, 0.0  ;;  %v854_v6 = vpop.f32.mrf.mxu0  ;;  %v870_v7 = vpop.f32.mrf.mxu1 }
  0xfd   : > { %632 = vst.msk [vmem:[%s1066_s11 + $0x14] sm:$0xf] %vm626_vm3, %v794_v0  ;;  %648 = vst.msk [vmem:[%s1066_s11 + $0x54] sm:$0xf] %vm626_vm3, %v810_v1  ;;  %v474_v8 = vmax.f32 %v372_v2, 0.0  ;;  %v383_v10 = vadd.f32 %v854_v6, %v1056_v58  ;;  %v447_v11 = vadd.f32 %v870_v7, %v1056_v58 }
  0xfe   : > { %v490_v9 = vmax.f32 %v436_v3, 0.0  ;;  %v799_v12 = vpack.c.bf16 %v476_v4, %v476_v4  ;;  %v815_v13 = vpack.c.bf16 %v492_v5, %v492_v5  ;;  %v374_v14 = vpop.f32.mrf.mxu0  ;;  %v438_v15 = vpop.f32.mrf.mxu1 }
  0xff   : > { %v797_v16 = vpack.c.bf16 %v474_v8, %v474_v8  ;;  %v477_v18 = vmax.f32 %v383_v10, 0.0  ;;  %v493_v19 = vmax.f32 %v447_v11, 0.0  ;;  %v375_v20 = vadd.f32 %v1056_v58, %v374_v14 }
 0x100   : > { %v813_v17 = vpack.c.bf16 %v490_v9, %v490_v9  ;;  %637 = vst.msk [vmem:[%s1066_s11 + $0x28] sm:$0xf] %vm626_vm3, %v799_v12  ;;  %653 = vst.msk [vmem:[%s1066_s11 + $0x68] sm:$0xf] %vm626_vm3, %v815_v13  ;;  %v439_v21 = vadd.f32 %v1056_v58, %v438_v15  ;;  %v857_v22 = vpop.f32.mrf.mxu0  ;;  %v873_v23 = vpop.f32.mrf.mxu1 }
 0x101   : > { %635 = vst.msk [vmem:[%s1066_s11 + $0x20] sm:$0xf] %vm626_vm3, %v797_v16  ;;  %v800_v24 = vpack.c.bf16 %v477_v18, %v477_v18  ;;  %v816_v25 = vpack.c.bf16 %v493_v19, %v493_v19  ;;  %v396_v26 = vadd.f32 %v857_v22, %v1056_v58  ;;  %v460_v27 = vadd.f32 %v873_v23, %v1056_v58 }
 0x102   : > { %651 = vst.msk [vmem:[%s1066_s11 + $0x60] sm:$0xf] %vm626_vm3, %v813_v17  ;;  %v475_v28 = vmax.f32 %v375_v20, 0.0  ;;  %v491_v29 = vmax.f32 %v439_v21, 0.0  ;;  %v387_v30 = vpop.f32.mrf.mxu0  ;;  %v451_v31 = vpop.f32.mrf.mxu1 }
 0x103   : > { %638 = vst.msk [vmem:[%s1066_s11 + $0x2c] sm:$0xf] %vm626_vm3, %v800_v24  ;;  %654 = vst.msk [vmem:[%s1066_s11 + $0x6c] sm:$0xf] %vm626_vm3, %v816_v25  ;;  %v480_v32 = vmax.f32 %v396_v26, 0.0  ;;  %v496_v33 = vmax.f32 %v460_v27, 0.0  ;;  %v388_v34 = vadd.f32 %v1056_v58, %v387_v30  ;;  %v452_v35 = vadd.f32 %v1056_v58, %v451_v31 }
 0x104   : > { %v798_v36 = vpack.c.bf16 %v475_v28, %v475_v28  ;;  %v814_v37 = vpack.c.bf16 %v491_v29, %v491_v29  ;;  %v858_v38 = vpop.f32.mrf.mxu0  ;;  %v874_v39 = vpop.f32.mrf.mxu1 }
 0x105   : > { %v803_v40 = vpack.c.bf16 %v480_v32, %v480_v32  ;;  %v819_v41 = vpack.c.bf16 %v496_v33, %v496_v33  ;;  %v478_v42 = vmax.f32 %v388_v34, 0.0  ;;  %v494_v43 = vmax.f32 %v452_v35, 0.0 }
 0x106   : > { %636 = vst.msk [vmem:[%s1066_s11 + $0x24] sm:$0xf] %vm626_vm3, %v798_v36  ;;  %652 = vst.msk [vmem:[%s1066_s11 + $0x64] sm:$0xf] %vm626_vm3, %v814_v37  ;;  %v399_v44 = vadd.f32 %v858_v38, %v1056_v58  ;;  %v463_v45 = vadd.f32 %v874_v39, %v1056_v58  ;;  %v390_v46 = vpop.f32.mrf.mxu0  ;;  %v454_v47 = vpop.f32.mrf.mxu1 }
 0x107   : > { %641 = vst.msk [vmem:[%s1066_s11 + $0x38] sm:$0xf] %vm626_vm3, %v803_v40  ;;  %657 = vst.msk [vmem:[%s1066_s11 + $0x78] sm:$0xf] %vm626_vm3, %v819_v41  ;;  %v801_v48 = vpack.c.bf16 %v478_v42, %v478_v42  ;;  %v817_v49 = vpack.c.bf16 %v494_v43, %v494_v43  ;;  %v391_v50 = vadd.f32 %v1056_v58, %v390_v46 }
 0x108   : > { %v455_v51 = vadd.f32 %v1056_v58, %v454_v47  ;;  %v481_v52 = vmax.f32 %v399_v44, 0.0  ;;  %v497_v53 = vmax.f32 %v463_v45, 0.0 }
 0x109   : > { %639 = vst.msk [vmem:[%s1066_s11 + $0x30] sm:$0xf] %vm626_vm3, %v801_v48  ;;  %655 = vst.msk [vmem:[%s1066_s11 + $0x70] sm:$0xf] %vm626_vm3, %v817_v49  ;;  %v479_v54 = vmax.f32 %v391_v50, 0.0 }
 0x10a   : > { %v495_v55 = vmax.f32 %v455_v51, 0.0  ;;  %v804_v56 = vpack.c.bf16 %v481_v52, %v481_v52  ;;  %v820_v57 = vpack.c.bf16 %v497_v53, %v497_v53 }
 0x10b   : > { %v802_v59 = vpack.c.bf16 %v479_v54, %v479_v54 }
 0x10c   : > { %v818_v60 = vpack.c.bf16 %v495_v55, %v495_v55  ;;  %642 = vst.msk [vmem:[%s1066_s11 + $0x3c] sm:$0xf] %vm626_vm3, %v804_v56  ;;  %658 = vst.msk [vmem:[%s1066_s11 + $0x7c] sm:$0xf] %vm626_vm3, %v820_v57 }
 0x10d   : > { %640 = vst.msk [vmem:[%s1066_s11 + $0x34] sm:$0xf] %vm626_vm3, %v802_v59 }
 0x10e   : > { %656 = vst.msk [vmem:[%s1066_s11 + $0x74] sm:$0xf] %vm626_vm3, %v818_v60 }
 0x10f PF: > { %s14_s12 = sadd.s32 1, %s935_s12  }
 0x110   : > { %p11_p1 = scmp.ge.s32.totalorder %s14_s12, 10  }
 0x112   :  { %13 = sbr.rel (!%p11_p1) target bundleno = 1 (0x1), region = 67 }
 0x117   :  { %681 = vsyncpa [#allocation3], 1 }
 0x118   :  { %683 = vsyncpa [#allocation3 + $0x1], 1 }

// kernel: forward.13
= control target key start
LH: loop header
LB: loop body
LE: loop exit
PB: predicated region body
PF: predicated region fallthrough
CT: control target
= control target key end

     0   :  { %8 = vsyncpa [#allocation3], 0  ;;  %s1292_s0 = inlined_call_operand.vmem [shape: bf16[512,32], index: 0, kind: input, shape index: {}]   ;;  %s1293_s1 = inlined_call_operand.hbm [shape: f32[32,32], index: 1, kind: input, shape index: {}]   ;;  %s1294_s2 = inlined_call_operand.hbm [shape: f32[1,32], index: 2, kind: input, shape index: {}]   ;;  %s1295_s3 = inlined_call_operand.vmem [shape: bf16[512,32], index: 3, kind: output, shape index: {}]  }
   0x1   :  { %9 = vsyncpa [#allocation5], 0  ;;  %s1086_s12 = smov 0  }
   0x2 LB: > { %s777_s13 = sadd.s32 4294967295, %s1060_s12   ;;  %p779_p0 = scmp.ge.s32.totalorder %s1060_s12, 1  ;;  %s1060_s12 = sphi %s1086_s12, %s15_s12  }
   0x3   : > { %p114_p1 = scmp.lt.s32.totalorder %s1060_s12, 3  ;;  %s1062_s14 = smov [#allocation2]  }
   0x4   : > { %s126_s15 = sshll.u32 %s1062_s14, 4  ;;  %p1100_p3 = scmp.eq.s32.totalorder %s777_s13, 0  ;;  %s127_s15 = int_to_ptr.vmem [resolvable:$true] %s126_s15 }
   0x5   : > { %p1094_p2 = pnand %p779_p0, %p114_p1  ;;  %s1063_s18 = smov [#allocation4]  }
   0x6   : > { %s140_s19 = sshll.u32 %s1063_s18, 4  ;;  %s1005_s21 = scalar_lea.vmem %s127_s15, 512  ;;  %s141_s19 = int_to_ptr.vmem [resolvable:$true] %s140_s19 }
   0x7   : > { %p955_p4 = pneg %p1094_p2  ;;  %p1006_p7 = scmp.ne.s32.totalorder %s127_s15, %s1005_s21 }
   0x8   : > { %p1013_p10 = scmp.lt.s32.totalorder %s127_s15, %s127_s15  ;;  %p1014_p11 = scmp.lt.s32.totalorder %s1005_s21, %s1005_s21 }
   0x9   : > { %p1108_p5 = pnand %p1100_p3, %p955_p4 }
   0xa   : > { %p1015_p12 = por %p1014_p11, %p1013_p10 }
   0xb   : > { %p996_p6 = pneg %p1108_p5 }
   0xd   : > { %p1008_p8 = pnand %p1006_p7, %p996_p6 }
   0xf   : > { %p1009_p9 = pneg %p1008_p8 }
  0x11   : > { %p1016_p13 = pnand %p1015_p12, %p1009_p9 }
  0x13   : > { %1019 = shalt.err (!%p1016_p13)
}
  0x14   : > { %s1064_s22 = smov 128   ;;  %s1065_s23 = smov 8  }
  0x15   : > { %958 = dma.hbm_to_vmem [thread:$0]  (!%p1108_p5), %s1293_s1, 512, %s127_s15, [#allocation3], %s1064_s22, %s1064_s22, %s1065_s23  }
  0x16   : > { %s1031_s26 = scalar_lea.vmem %s141_s19, 16  ;;  %s1038_s27 = scalar_lea.vmem %s141_s19, 32 }
  0x17   : > { %p1032_p0 = scmp.ne.s32.totalorder %s141_s19, %s1031_s26  ;;  %p1039_p7 = scmp.lt.s32.totalorder %s141_s19, %s141_s19 }
  0x18   : > { %p1040_p8 = scmp.lt.s32.totalorder %s1038_s27, %s1031_s26 }
  0x19   : > { %p1034_p1 = pnand %p1032_p0, %p996_p6 }
  0x1a   : > { %p1041_p9 = por %p1040_p8, %p1039_p7 }
  0x1b   : > { %p1035_p4 = pneg %p1034_p1 }
  0x1d   : > { %p1042_p10 = pnand %p1041_p9, %p1035_p4 }
  0x1f   : > { %1045 = shalt.err (!%p1042_p10)
}
  0x20   : > { %961 = dma.hbm_to_vmem [thread:$0]  (!%p1108_p5), %s1294_s2, 16, %s141_s19, [#allocation5]  }
  0x21   : > { %162 = sbr.rel (%p1094_p2) target bundleno = 281 (0x119), region = 32 }
  0x26   : > { %1051 = dma.done.wait (%p1100_p3), [#allocation3], 512  }
  0x27   : > { %1053 = vsyncadd (%p1100_p3), [#allocation3], 4294966784 }
  0x28   : > { %1055 = dma.done.wait (%p1100_p3), [#allocation5], 16  }
  0x29   : > { %1057 = vsyncadd (%p1100_p3), [#allocation5], 4294967280  ;;  %s786_s30 = sshll.u32 %s777_s13, 5  ;;  %v237_v0 = vld [vmem:[#allocation2 + $0x10] sm:$0xff]  ;;  %v238_v1 = vld [vmem:[#allocation2 + $0x18] sm:$0xff]  ;;  %vm328_vm0 = vcmask 261120  }
  0x2a   : > { %p191_p6 = scmp.lt.s32.totalorder %s786_s30, 63  ;;  %v235_v2 = vld [vmem:[#allocation2] sm:$0xff]  ;;  %v240_v3 = vpack.c.bf16 %v238_v1, %v237_v0  ;;  %v236_v4 = vld [vmem:[#allocation2 + $0x8] sm:$0xff]  ;;  %vm666_vm1 = vcmask 257024  }
  0x2b   : > { %v239_v5 = vpack.c.bf16 %v236_v4, %v235_v2  ;;  %v1184_v22 = vld [vmem:[#allocation4] ss:$0 sm:$0xff] }
  0x2c   : > { %s1300_s30 = smov (!%p191_p6, %s786_s30), 63  ;;  %907 = vmatprep.subr.bf16.mxu0 %v240_v3  ;;  %943 = vmatprep.subr.bf16.mxu1 %v240_v3 }
  0x2d   : > { %s787_s4 = sshll.u32 %s1300_s30, 2  ;;  %908 = vmatpush3.bf16.msra.mxu0 %v240_v3  ;;  %945 = vmatpush3.bf16.msra.mxu1 %v240_v3 }
  0x2e   : > { %s1150_s7 = scalar_lea.vmem %s1292_s0, %s787_s4  ;;  %909 = vmatprep.subr.bf16.mxu0 %v239_v5  ;;  %944 = vmatprep.subr.bf16.mxu1 %v239_v5  ;;  %s1193_s10 = scalar_lea.vmem %s1295_s3, %s787_s4 }
  0x2f   : > { %v978_v6 = vld [vmem:[%s1150_s7] sm:$0xff]   ;;  %v980_v8 = vld [vmem:[%s1150_s7 + $0x8] sm:$0xff]   ;;  %v982_v10 = vld [vmem:[%s1150_s7 + $0x10] sm:$0xff]  }
  0x30   : > { %v979_v7 = vld [vmem:[%s1150_s7 + $0x40] sm:$0xff]   ;;  %911 = vmatprep.mubr.msk.bf16.mxu0 %vm328_vm0, %v978_v6  ;;  %v981_v9 = vld [vmem:[%s1150_s7 + $0x48] sm:$0xff]   ;;  %v983_v11 = vld [vmem:[%s1150_s7 + $0x50] sm:$0xff]  }
  0x31   : > { %927 = vmatprep.mubr.msk.bf16.mxu1 %vm328_vm0, %v979_v7  ;;  %910 = vmatpush3.bf16.msra.mxu0 %v239_v5  ;;  %v984_v12 = vld [vmem:[%s1150_s7 + $0x18] sm:$0xff]   ;;  %v986_v14 = vld [vmem:[%s1150_s7 + $0x20] sm:$0xff]   ;;  %v988_v16 = vld [vmem:[%s1150_s7 + $0x28] sm:$0xff]  }
  0x32   : > { %946 = vmatpush3.bf16.msra.mxu1 %v239_v5  ;;  %v985_v13 = vld [vmem:[%s1150_s7 + $0x58] sm:$0xff]   ;;  %v987_v15 = vld [vmem:[%s1150_s7 + $0x60] sm:$0xff]   ;;  %v989_v17 = vld [vmem:[%s1150_s7 + $0x68] sm:$0xff]  }
  0x33   : > { %v990_v18 = vld [vmem:[%s1150_s7 + $0x30] sm:$0xff]   ;;  %v992_v20 = vld [vmem:[%s1150_s7 + $0x38] sm:$0xff]  }
  0x34   : > { %912 = vmatmul.mubr.msk.bf16.vlgmr.msra.gmra.mxu0 %vm328_vm0, %v980_v8  ;;  %v991_v19 = vld [vmem:[%s1150_s7 + $0x70] sm:$0xff]   ;;  %v993_v21 = vld [vmem:[%s1150_s7 + $0x78] sm:$0xff]  }
  0x35   : > { %928 = vmatmul.mubr.msk.bf16.vlgmr.msra.gmra.mxu1 %vm328_vm0, %v981_v9  ;;  %915 = vmatprep.mubr.msk.bf16.mxu0 %vm328_vm0, %v982_v10 }
  0x36   : > { %931 = vmatprep.mubr.msk.bf16.mxu1 %vm328_vm0, %v983_v11 }
  0x3c   : > { %916 = vmatmul.mubr.msk.bf16.gmra.mxu0 %vm328_vm0, %v984_v12 }
  0x3d   : > { %932 = vmatmul.mubr.msk.bf16.gmra.mxu1 %vm328_vm0, %v985_v13  ;;  %919 = vmatprep.mubr.msk.bf16.mxu0 %vm328_vm0, %v986_v14 }
  0x3e   : > { %935 = vmatprep.mubr.msk.bf16.mxu1 %vm328_vm0, %v987_v15 }
  0x44   : > { %920 = vmatmul.mubr.msk.bf16.gmra.mxu0 %vm328_vm0, %v988_v16 }
  0x45   : > { %936 = vmatmul.mubr.msk.bf16.gmra.mxu1 %vm328_vm0, %v989_v17  ;;  %923 = vmatprep.mubr.msk.bf16.mxu0 %vm328_vm0, %v990_v18 }
  0x46   : > { %939 = vmatprep.mubr.msk.bf16.mxu1 %vm328_vm0, %v991_v19 }
  0x4c   : > { %924 = vmatmul.mubr.msk.bf16.gmra.mxu0 %vm328_vm0, %v992_v20 }
  0x4d   : > { %940 = vmatmul.mubr.msk.bf16.gmra.mxu1 %vm328_vm0, %v993_v21 }
  0xf4   : > { %v913_v23 = vpop.f32.mrf.mxu0 }
  0xf5   : > { %v929_v24 = vpop.f32.mrf.mxu1  ;;  %v420_v25 = vadd.f32 %v913_v23, %v1184_v22 }
  0xf6   : > { %v484_v26 = vadd.f32 %v929_v24, %v1184_v22  ;;  %v411_v27 = vpop.f32.mrf.mxu0 }
  0xf7   : > { %v475_v28 = vpop.f32.mrf.mxu1  ;;  %v859_v29 = vpack.c.bf16 %v420_v25, %v420_v25  ;;  %v412_v31 = vadd.f32 %v1184_v22, %v411_v27 }
  0xf8   : > { %v875_v30 = vpack.c.bf16 %v484_v26, %v484_v26  ;;  %v476_v32 = vadd.f32 %v1184_v22, %v475_v28  ;;  %v914_v33 = vpop.f32.mrf.mxu0 }
  0xf9   : > { %v930_v34 = vpop.f32.mrf.mxu1  ;;  %669 = vst.msk [vmem:[%s1193_s10 + $0x8] sm:$0xf] %vm666_vm1, %v859_v29  ;;  %v857_v35 = vpack.c.bf16 %v412_v31, %v412_v31  ;;  %v423_v37 = vadd.f32 %v914_v33, %v1184_v22 }
  0xfa   : > { %685 = vst.msk [vmem:[%s1193_s10 + $0x48] sm:$0xf] %vm666_vm1, %v875_v30  ;;  %v873_v36 = vpack.c.bf16 %v476_v32, %v476_v32  ;;  %v487_v38 = vadd.f32 %v930_v34, %v1184_v22  ;;  %v414_v39 = vpop.f32.mrf.mxu0 }
  0xfb   : > { %v478_v40 = vpop.f32.mrf.mxu1  ;;  %667 = vst.msk [vmem:[%s1193_s10] sm:$0xf] %vm666_vm1, %v857_v35  ;;  %v860_v41 = vpack.c.bf16 %v423_v37, %v423_v37  ;;  %v415_v43 = vadd.f32 %v1184_v22, %v414_v39 }
  0xfc   : > { %683 = vst.msk [vmem:[%s1193_s10 + $0x40] sm:$0xf] %vm666_vm1, %v873_v36  ;;  %v876_v42 = vpack.c.bf16 %v487_v38, %v487_v38  ;;  %v479_v44 = vadd.f32 %v1184_v22, %v478_v40  ;;  %v917_v45 = vpop.f32.mrf.mxu0 }
  0xfd   : > { %v933_v46 = vpop.f32.mrf.mxu1  ;;  %670 = vst.msk [vmem:[%s1193_s10 + $0xc] sm:$0xf] %vm666_vm1, %v860_v41  ;;  %v858_v47 = vpack.c.bf16 %v415_v43, %v415_v43  ;;  %v436_v49 = vadd.f32 %v917_v45, %v1184_v22 }
  0xfe   : > { %686 = vst.msk [vmem:[%s1193_s10 + $0x4c] sm:$0xf] %vm666_vm1, %v876_v42  ;;  %v874_v48 = vpack.c.bf16 %v479_v44, %v479_v44  ;;  %v500_v50 = vadd.f32 %v933_v46, %v1184_v22  ;;  %v427_v51 = vpop.f32.mrf.mxu0 }
  0xff   : > { %v491_v52 = vpop.f32.mrf.mxu1  ;;  %668 = vst.msk [vmem:[%s1193_s10 + $0x4] sm:$0xf] %vm666_vm1, %v858_v47  ;;  %v863_v53 = vpack.c.bf16 %v436_v49, %v436_v49  ;;  %v428_v55 = vadd.f32 %v1184_v22, %v427_v51 }
 0x100   : > { %684 = vst.msk [vmem:[%s1193_s10 + $0x44] sm:$0xf] %vm666_vm1, %v874_v48  ;;  %v879_v54 = vpack.c.bf16 %v500_v50, %v500_v50  ;;  %v492_v56 = vadd.f32 %v1184_v22, %v491_v52  ;;  %v918_v57 = vpop.f32.mrf.mxu0 }
 0x101   : > { %v934_v58 = vpop.f32.mrf.mxu1  ;;  %673 = vst.msk [vmem:[%s1193_s10 + $0x18] sm:$0xf] %vm666_vm1, %v863_v53  ;;  %v861_v59 = vpack.c.bf16 %v428_v55, %v428_v55  ;;  %v439_v61 = vadd.f32 %v918_v57, %v1184_v22 }
 0x102   : > { %689 = vst.msk [vmem:[%s1193_s10 + $0x58] sm:$0xf] %vm666_vm1, %v879_v54  ;;  %v877_v60 = vpack.c.bf16 %v492_v56, %v492_v56  ;;  %v503_v62 = vadd.f32 %v934_v58, %v1184_v22  ;;  %v430_v63 = vpop.f32.mrf.mxu0 }
 0x103   : > { %v494_v0 = vpop.f32.mrf.mxu1  ;;  %671 = vst.msk [vmem:[%s1193_s10 + $0x10] sm:$0xf] %vm666_vm1, %v861_v59  ;;  %v864_v1 = vpack.c.bf16 %v439_v61, %v439_v61  ;;  %v431_v3 = vadd.f32 %v1184_v22, %v430_v63 }
 0x104   : > { %687 = vst.msk [vmem:[%s1193_s10 + $0x50] sm:$0xf] %vm666_vm1, %v877_v60  ;;  %v880_v2 = vpack.c.bf16 %v503_v62, %v503_v62  ;;  %v495_v4 = vadd.f32 %v1184_v22, %v494_v0  ;;  %v921_v5 = vpop.f32.mrf.mxu0 }
 0x105   : > { %v937_v6 = vpop.f32.mrf.mxu1  ;;  %674 = vst.msk [vmem:[%s1193_s10 + $0x1c] sm:$0xf] %vm666_vm1, %v864_v1  ;;  %v862_v7 = vpack.c.bf16 %v431_v3, %v431_v3  ;;  %v452_v9 = vadd.f32 %v921_v5, %v1184_v22 }
 0x106   : > { %690 = vst.msk [vmem:[%s1193_s10 + $0x5c] sm:$0xf] %vm666_vm1, %v880_v2  ;;  %v878_v8 = vpack.c.bf16 %v495_v4, %v495_v4  ;;  %v516_v10 = vadd.f32 %v937_v6, %v1184_v22  ;;  %v443_v11 = vpop.f32.mrf.mxu0 }
 0x107   : > { %v507_v12 = vpop.f32.mrf.mxu1  ;;  %672 = vst.msk [vmem:[%s1193_s10 + $0x14] sm:$0xf] %vm666_vm1, %v862_v7  ;;  %v867_v13 = vpack.c.bf16 %v452_v9, %v452_v9  ;;  %v444_v15 = vadd.f32 %v1184_v22, %v443_v11 }
 0x108   : > { %688 = vst.msk [vmem:[%s1193_s10 + $0x54] sm:$0xf] %vm666_vm1, %v878_v8  ;;  %v883_v14 = vpack.c.bf16 %v516_v10, %v516_v10  ;;  %v508_v16 = vadd.f32 %v1184_v22, %v507_v12  ;;  %v922_v17 = vpop.f32.mrf.mxu0 }
 0x109   : > { %v938_v18 = vpop.f32.mrf.mxu1  ;;  %677 = vst.msk [vmem:[%s1193_s10 + $0x28] sm:$0xf] %vm666_vm1, %v867_v13  ;;  %v865_v19 = vpack.c.bf16 %v444_v15, %v444_v15  ;;  %v455_v21 = vadd.f32 %v922_v17, %v1184_v22 }
 0x10a   : > { %693 = vst.msk [vmem:[%s1193_s10 + $0x68] sm:$0xf] %vm666_vm1, %v883_v14  ;;  %v881_v20 = vpack.c.bf16 %v508_v16, %v508_v16  ;;  %v519_v23 = vadd.f32 %v938_v18, %v1184_v22  ;;  %v446_v24 = vpop.f32.mrf.mxu0 }
 0x10b   : > { %v510_v25 = vpop.f32.mrf.mxu1  ;;  %675 = vst.msk [vmem:[%s1193_s10 + $0x20] sm:$0xf] %vm666_vm1, %v865_v19  ;;  %v868_v26 = vpack.c.bf16 %v455_v21, %v455_v21  ;;  %v447_v28 = vadd.f32 %v1184_v22, %v446_v24 }
 0x10c   : > { %691 = vst.msk [vmem:[%s1193_s10 + $0x60] sm:$0xf] %vm666_vm1, %v881_v20  ;;  %v884_v27 = vpack.c.bf16 %v519_v23, %v519_v23  ;;  %v511_v29 = vadd.f32 %v1184_v22, %v510_v25  ;;  %v925_v30 = vpop.f32.mrf.mxu0 }
 0x10d   : > { %v941_v31 = vpop.f32.mrf.mxu1  ;;  %678 = vst.msk [vmem:[%s1193_s10 + $0x2c] sm:$0xf] %vm666_vm1, %v868_v26  ;;  %v866_v32 = vpack.c.bf16 %v447_v28, %v447_v28  ;;  %v468_v34 = vadd.f32 %v925_v30, %v1184_v22 }
 0x10e   : > { %694 = vst.msk [vmem:[%s1193_s10 + $0x6c] sm:$0xf] %vm666_vm1, %v884_v27  ;;  %v882_v33 = vpack.c.bf16 %v511_v29, %v511_v29  ;;  %v532_v35 = vadd.f32 %v941_v31, %v1184_v22  ;;  %v459_v36 = vpop.f32.mrf.mxu0 }
 0x10f   : > { %v523_v37 = vpop.f32.mrf.mxu1  ;;  %676 = vst.msk [vmem:[%s1193_s10 + $0x24] sm:$0xf] %vm666_vm1, %v866_v32  ;;  %v871_v38 = vpack.c.bf16 %v468_v34, %v468_v34  ;;  %v460_v40 = vadd.f32 %v1184_v22, %v459_v36 }
 0x110   : > { %692 = vst.msk [vmem:[%s1193_s10 + $0x64] sm:$0xf] %vm666_vm1, %v882_v33  ;;  %v887_v39 = vpack.c.bf16 %v532_v35, %v532_v35  ;;  %v524_v41 = vadd.f32 %v1184_v22, %v523_v37  ;;  %v926_v42 = vpop.f32.mrf.mxu0 }
 0x111   : > { %v942_v43 = vpop.f32.mrf.mxu1  ;;  %681 = vst.msk [vmem:[%s1193_s10 + $0x38] sm:$0xf] %vm666_vm1, %v871_v38  ;;  %v869_v44 = vpack.c.bf16 %v460_v40, %v460_v40  ;;  %v471_v46 = vadd.f32 %v926_v42, %v1184_v22 }
 0x112   : > { %697 = vst.msk [vmem:[%s1193_s10 + $0x78] sm:$0xf] %vm666_vm1, %v887_v39  ;;  %v885_v45 = vpack.c.bf16 %v524_v41, %v524_v41  ;;  %v535_v47 = vadd.f32 %v942_v43, %v1184_v22  ;;  %v462_v48 = vpop.f32.mrf.mxu0 }
 0x113   : > { %v526_v49 = vpop.f32.mrf.mxu1  ;;  %679 = vst.msk [vmem:[%s1193_s10 + $0x30] sm:$0xf] %vm666_vm1, %v869_v44  ;;  %v872_v50 = vpack.c.bf16 %v471_v46, %v471_v46  ;;  %v463_v52 = vadd.f32 %v1184_v22, %v462_v48 }
 0x114   : > { %695 = vst.msk [vmem:[%s1193_s10 + $0x70] sm:$0xf] %vm666_vm1, %v885_v45  ;;  %v888_v51 = vpack.c.bf16 %v535_v47, %v535_v47  ;;  %v527_v53 = vadd.f32 %v1184_v22, %v526_v49 }
 0x115   : > { %682 = vst.msk [vmem:[%s1193_s10 + $0x3c] sm:$0xf] %vm666_vm1, %v872_v50  ;;  %v870_v54 = vpack.c.bf16 %v463_v52, %v463_v52 }
 0x116   : > { %698 = vst.msk [vmem:[%s1193_s10 + $0x7c] sm:$0xf] %vm666_vm1, %v888_v51  ;;  %v886_v55 = vpack.c.bf16 %v527_v53, %v527_v53 }
 0x117   : > { %680 = vst.msk [vmem:[%s1193_s10 + $0x34] sm:$0xf] %vm666_vm1, %v870_v54 }
 0x118   : > { %696 = vst.msk [vmem:[%s1193_s10 + $0x74] sm:$0xf] %vm666_vm1, %v886_v55 }
 0x119 PF: > { %s15_s12 = sadd.s32 1, %s1060_s12  }
 0x11a   : > { %p12_p2 = scmp.ge.s32.totalorder %s15_s12, 4  }
 0x11c   :  { %14 = sbr.rel (!%p12_p2) target bundleno = 2 (0x2), region = 71 }
 0x121   :  { %721 = vsyncpa [#allocation3], 1 }
 0x122   :  { %723 = vsyncpa [#allocation3 + $0x1], 1 }
 0x123   :  { %724 = vsyncpa [#allocation5], 1 }

// kernel: forward.12
= control target key start
LH: loop header
LB: loop body
LE: loop exit
PB: predicated region body
PF: predicated region fallthrough
CT: control target
= control target key end

     0   :  { %8 = vsyncpa [#allocation3], 0  ;;  %s1455_s0 = inlined_call_operand.vmem [shape: bf16[512,144], index: 0, kind: input, shape index: {}]   ;;  %s1456_s1 = inlined_call_operand.hbm [shape: f32[144,32], index: 1, kind: input, shape index: {}]   ;;  %s1457_s2 = inlined_call_operand.hbm [shape: f32[1,32], index: 2, kind: input, shape index: {}]   ;;  %s1458_s3 = inlined_call_operand.vmem [shape: bf16[512,32], index: 3, kind: output, shape index: {}]  }
   0x1   :  { %9 = vsyncpa [#allocation5], 0  ;;  %s1218_s12 = smov 0  }
   0x2 LB: > { %s897_s13 = sadd.s32 4294967295, %s1191_s12   ;;  %p899_p0 = scmp.ge.s32.totalorder %s1191_s12, 1  ;;  %s1191_s12 = sphi %s1218_s12, %s15_s12  }
   0x3   : > { %p114_p1 = scmp.lt.s32.totalorder %s1191_s12, 3  ;;  %s1193_s14 = smov [#allocation2]  }
   0x4   : > { %s126_s15 = sshll.u32 %s1193_s14, 4  ;;  %p1232_p3 = scmp.eq.s32.totalorder %s897_s13, 0  ;;  %s127_s15 = int_to_ptr.vmem [resolvable:$true] %s126_s15 }
   0x5   : > { %p1226_p2 = pnand %p899_p0, %p114_p1  ;;  %s1194_s18 = smov [#allocation4]  }
   0x6   : > { %s140_s19 = sshll.u32 %s1194_s18, 4  ;;  %s1136_s21 = scalar_lea.vmem %s127_s15, 2304  ;;  %s141_s19 = int_to_ptr.vmem [resolvable:$true] %s140_s19 }
   0x7   : > { %p1053_p4 = pneg %p1226_p2  ;;  %p1137_p7 = scmp.ne.s32.totalorder %s127_s15, %s1136_s21 }
   0x8   : > { %p1144_p10 = scmp.lt.s32.totalorder %s127_s15, %s127_s15  ;;  %p1145_p11 = scmp.lt.s32.totalorder %s1136_s21, %s1136_s21 }
   0x9   : > { %p1240_p5 = pnand %p1232_p3, %p1053_p4 }
   0xa   : > { %p1146_p12 = por %p1145_p11, %p1144_p10 }
   0xb   : > { %p1127_p6 = pneg %p1240_p5 }
   0xd   : > { %p1139_p8 = pnand %p1137_p7, %p1127_p6 }
   0xf   : > { %p1140_p9 = pneg %p1139_p8 }
  0x11   : > { %p1147_p13 = pnand %p1146_p12, %p1140_p9 }
  0x13   : > { %1150 = shalt.err (!%p1147_p13)
}
  0x14   : > { %s1195_s22 = smov 128   ;;  %s1196_s23 = smov 8  }
  0x15   : > { %1056 = dma.hbm_to_vmem [thread:$0]  (!%p1240_p5), %s1456_s1, 2304, %s127_s15, [#allocation3], %s1195_s22, %s1195_s22, %s1196_s23  }
  0x16   : > { %s1162_s26 = scalar_lea.vmem %s141_s19, 16  ;;  %s1169_s27 = scalar_lea.vmem %s141_s19, 32 }
  0x17   : > { %p1163_p0 = scmp.ne.s32.totalorder %s141_s19, %s1162_s26  ;;  %p1170_p7 = scmp.lt.s32.totalorder %s141_s19, %s141_s19 }
  0x18   : > { %p1171_p8 = scmp.lt.s32.totalorder %s1169_s27, %s1162_s26 }
  0x19   : > { %p1165_p1 = pnand %p1163_p0, %p1127_p6 }
  0x1a   : > { %p1172_p9 = por %p1171_p8, %p1170_p7 }
  0x1b   : > { %p1166_p4 = pneg %p1165_p1 }
  0x1d   : > { %p1173_p10 = pnand %p1172_p9, %p1166_p4 }
  0x1f   : > { %1176 = shalt.err (!%p1173_p10)
}
  0x20   : > { %1059 = dma.hbm_to_vmem [thread:$0]  (!%p1240_p5), %s1457_s2, 16, %s141_s19, [#allocation5]  }
  0x21   : > { %163 = sbr.rel (%p1226_p2) target bundleno = 339 (0x153), region = 32 }
  0x26   : > { %1182 = dma.done.wait (%p1232_p3), [#allocation3], 2304  }
  0x27   : > { %1184 = vsyncadd (%p1232_p3), [#allocation3], 4294964992 }
  0x28   : > { %1186 = dma.done.wait (%p1232_p3), [#allocation5], 16  }
  0x29   : > { %1188 = vsyncadd (%p1232_p3), [#allocation5], 4294967280  ;;  %s906_s30 = sshll.u32 %s897_s13, 5  ;;  %v1197_v0 = vmov 0   ;;  %v252_v1 = vld [vmem:[#allocation2 + $0x70] sm:$0xff]  ;;  %v253_v2 = vld [vmem:[#allocation2 + $0x78] sm:$0xff] }
  0x2a   : > { %465 = vmatprep.subr.bf16.mxu0 %v1197_v0  ;;  %1027 = vmatprep.subr.bf16.mxu1 %v1197_v0  ;;  %p193_p2 = scmp.lt.s32.totalorder %s906_s30, 63  ;;  %v250_v3 = vld [vmem:[#allocation2 + $0x60] sm:$0xff]  ;;  %v263_v4 = vpack.c.bf16 %v253_v2, %v252_v1  ;;  %v251_v5 = vld [vmem:[#allocation2 + $0x68] sm:$0xff]  ;;  %v248_v7 = vld [vmem:[#allocation2 + $0x50] sm:$0xff]  ;;  %vm416_vm0 = vcmask 130048   ;;  %vm786_vm1 = vcmask 257024  }
  0x2b   : > { %v262_v6 = vpack.c.bf16 %v251_v5, %v250_v3  ;;  %v249_v8 = vld [vmem:[#allocation2 + $0x58] sm:$0xff]  ;;  %v246_v9 = vld [vmem:[#allocation2 + $0x40] sm:$0xff]  ;;  %v247_v12 = vld [vmem:[#allocation2 + $0x48] sm:$0xff] }
  0x2c   : > { %s1463_s30 = smov (!%p193_p2, %s906_s30), 63  ;;  %466 = vmatpush1.bf16.msra.mxu0 %v263_v4  ;;  %1036 = vmatpush1.bf16.msra.mxu1 %v263_v4  ;;  %v261_v10 = vpack.c.bf16 %v249_v8, %v248_v7  ;;  %v260_v14 = vpack.c.bf16 %v247_v12, %v246_v9  ;;  %v244_v15 = vld [vmem:[#allocation2 + $0x30] sm:$0xff]  ;;  %v245_v16 = vld [vmem:[#allocation2 + $0x38] sm:$0xff]  ;;  %v242_v18 = vld [vmem:[#allocation2 + $0x20] sm:$0xff] }
  0x2d   : > { %s994_s4 = sshll.u32 %s1463_s30, 3  ;;  %467 = vmatprep.subr.bf16.mxu0 %v1197_v0  ;;  %1028 = vmatprep.subr.bf16.mxu1 %v1197_v0  ;;  %v259_v17 = vpack.c.bf16 %v245_v16, %v244_v15  ;;  %v243_v19 = vld [vmem:[#allocation2 + $0x28] sm:$0xff]  ;;  %v240_v21 = vld [vmem:[#allocation2 + $0x10] sm:$0xff]  ;;  %v241_v22 = vld [vmem:[#allocation2 + $0x18] sm:$0xff]  ;;  %s910_s8 = sshll.u32 %s1463_s30, 2 }
  0x2e   : > { %s1284_s7 = scalar_lea.vmem %s1455_s0, %s994_s4  ;;  %v258_v20 = vpack.c.bf16 %v243_v19, %v242_v18  ;;  %v257_v23 = vpack.c.bf16 %v241_v22, %v240_v21  ;;  %v238_v24 = vld [vmem:[#allocation2] sm:$0xff]  ;;  %v239_v25 = vld [vmem:[#allocation2 + $0x8] sm:$0xff]  ;;  %v1348_v60 = vld [vmem:[#allocation4] ss:$0 sm:$0xff]  ;;  %s1356_s11 = scalar_lea.vmem %s1458_s3, %s910_s8 }
  0x2f   : > { %v1079_v11 = vld [vmem:[%s1284_s7 + $0x4] ss:$8 sps:$4 sm:$0xff]   ;;  %v256_v26 = vpack.c.bf16 %v239_v25, %v238_v24  ;;  %v1077_v30 = vld [vmem:[%s1284_s7] ss:$8 sps:$4 sm:$0xff]   ;;  %v1083_v32 = vld [vmem:[%s1284_s7 + $0x14] ss:$8 sps:$4 sm:$0xff]  }
  0x30   : > { %468 = vmatpush1.bf16.msra.mxu0 %v262_v6  ;;  %1037 = vmatpush1.bf16.msra.mxu1 %v262_v6  ;;  %v1082_v13 = vld [vmem:[%s1284_s7 + $0x84] ss:$8 sps:$4 sm:$0xff]   ;;  %v1080_v31 = vld [vmem:[%s1284_s7 + $0x80] ss:$8 sps:$4 sm:$0xff]   ;;  %v1085_v33 = vld [vmem:[%s1284_s7 + $0x94] ss:$8 sps:$4 sm:$0xff]  }
  0x31   : > { %469 = vmatprep.subr.bf16.mxu0 %v1197_v0  ;;  %1029 = vmatprep.subr.bf16.mxu1 %v1197_v0  ;;  %v254_v27 = vld [vmem:[#allocation2 + $0x80] sm:$0xff]  ;;  %v255_v28 = vld [vmem:[#allocation2 + $0x88] sm:$0xff]  ;;  %v1087_v34 = vld [vmem:[%s1284_s7 + $0x10] ss:$8 sps:$4 sm:$0xff]  }
  0x32   : > { %944 = vmatprep.mubr.msk.bf16.mxu0 %vm416_vm0, %v1079_v11  ;;  %952 = vmatprep.mubr.msk.bf16.mxu1 %vm416_vm0, %v1082_v13  ;;  %v264_v29 = vpack.c.bf16 %v255_v28, %v254_v27  ;;  %v1088_v35 = vld [vmem:[%s1284_s7 + $0x90] ss:$8 sps:$4 sm:$0xff]   ;;  %v1089_v36 = vld [vmem:[%s1284_s7 + $0x24] ss:$8 sps:$4 sm:$0xff]   ;;  %v1093_v38 = vld [vmem:[%s1284_s7 + $0x20] ss:$8 sps:$4 sm:$0xff]  }
  0x33   : > { %v1091_v37 = vld [vmem:[%s1284_s7 + $0xa4] ss:$8 sps:$4 sm:$0xff]   ;;  %v1094_v39 = vld [vmem:[%s1284_s7 + $0xa0] ss:$8 sps:$4 sm:$0xff]   ;;  %v1095_v40 = vld [vmem:[%s1284_s7 + $0x34] ss:$8 sps:$4 sm:$0xff]  }
  0x34   : > { %470 = vmatpush1.bf16.msra.mxu0 %v261_v10  ;;  %1038 = vmatpush1.bf16.msra.mxu1 %v261_v10  ;;  %v1097_v41 = vld [vmem:[%s1284_s7 + $0xb4] ss:$8 sps:$4 sm:$0xff]   ;;  %v1099_v42 = vld [vmem:[%s1284_s7 + $0x30] ss:$8 sps:$4 sm:$0xff]   ;;  %v1101_v44 = vld [vmem:[%s1284_s7 + $0x44] ss:$8 sps:$4 sm:$0xff]  }
  0x35   : > { %471 = vmatprep.subr.bf16.mxu0 %v1197_v0  ;;  %1030 = vmatprep.subr.bf16.mxu1 %v1197_v0  ;;  %v1100_v43 = vld [vmem:[%s1284_s7 + $0xb0] ss:$8 sps:$4 sm:$0xff]   ;;  %v1103_v45 = vld [vmem:[%s1284_s7 + $0xc4] ss:$8 sps:$4 sm:$0xff]   ;;  %v1105_v46 = vld [vmem:[%s1284_s7 + $0x40] ss:$8 sps:$4 sm:$0xff]  }
  0x36   : > { %v1106_v47 = vld [vmem:[%s1284_s7 + $0xc0] ss:$8 sps:$4 sm:$0xff]   ;;  %v1107_v48 = vld [vmem:[%s1284_s7 + $0x54] ss:$8 sps:$4 sm:$0xff]   ;;  %v1111_v50 = vld [vmem:[%s1284_s7 + $0x50] ss:$8 sps:$4 sm:$0xff]  }
  0x37   : > { %v1109_v49 = vld [vmem:[%s1284_s7 + $0xd4] ss:$8 sps:$4 sm:$0xff]   ;;  %v1112_v51 = vld [vmem:[%s1284_s7 + $0xd0] ss:$8 sps:$4 sm:$0xff]   ;;  %v1113_v52 = vld [vmem:[%s1284_s7 + $0x64] ss:$8 sps:$4 sm:$0xff]  }
  0x38   : > { %472 = vmatpush1.bf16.msra.mxu0 %v260_v14  ;;  %1039 = vmatpush1.bf16.msra.mxu1 %v260_v14  ;;  %v1115_v53 = vld [vmem:[%s1284_s7 + $0xe4] ss:$8 sps:$4 sm:$0xff]   ;;  %v1117_v54 = vld [vmem:[%s1284_s7 + $0x60] ss:$8 sps:$4 sm:$0xff]   ;;  %v1119_v56 = vld [vmem:[%s1284_s7 + $0x74] ss:$8 sps:$4 sm:$0xff]  }
  0x39   : > { %473 = vmatprep.subr.bf16.mxu0 %v1197_v0  ;;  %1031 = vmatprep.subr.bf16.mxu1 %v1197_v0  ;;  %v1118_v55 = vld [vmem:[%s1284_s7 + $0xe0] ss:$8 sps:$4 sm:$0xff]   ;;  %v1121_v57 = vld [vmem:[%s1284_s7 + $0xf4] ss:$8 sps:$4 sm:$0xff]   ;;  %v1123_v58 = vld [vmem:[%s1284_s7 + $0x70] ss:$8 sps:$4 sm:$0xff]  }
  0x3a   : > { %v1124_v59 = vld [vmem:[%s1284_s7 + $0xf0] ss:$8 sps:$4 sm:$0xff]  }
  0x3c   : > { %474 = vmatpush1.bf16.msra.mxu0 %v259_v17  ;;  %1040 = vmatpush1.bf16.msra.mxu1 %v259_v17 }
  0x3d   : > { %475 = vmatprep.subr.bf16.mxu0 %v1197_v0  ;;  %1032 = vmatprep.subr.bf16.mxu1 %v1197_v0 }
  0x40   : > { %476 = vmatpush1.bf16.msra.mxu0 %v258_v20  ;;  %1041 = vmatpush1.bf16.msra.mxu1 %v258_v20 }
  0x41   : > { %477 = vmatprep.subr.bf16.mxu0 %v1197_v0  ;;  %1033 = vmatprep.subr.bf16.mxu1 %v1197_v0 }
  0x44   : > { %478 = vmatpush1.bf16.msra.mxu0 %v257_v23  ;;  %1042 = vmatpush1.bf16.msra.mxu1 %v257_v23 }
  0x45   : > { %479 = vmatprep.subr.bf16.mxu0 %v1197_v0  ;;  %1034 = vmatprep.subr.bf16.mxu1 %v1197_v0 }
  0x48   : > { %480 = vmatpush1.bf16.msra.mxu0 %v256_v26  ;;  %1043 = vmatpush1.bf16.msra.mxu1 %v256_v26 }
  0x49   : > { %495 = vmatprep.subr.bf16.mxu0 %v1197_v0  ;;  %1035 = vmatprep.subr.bf16.mxu1 %v1197_v0 }
  0x4c   : > { %496 = vmatpush2.bf16.msra.mxu0 %v264_v29  ;;  %1044 = vmatpush2.bf16.msra.mxu1 %v264_v29 }
  0x4f   : > { %498 = vmatmul.mubr.bf16.vlgmr.msra.gmra.mxu0 %v1077_v30  ;;  %562 = vmatmul.mubr.bf16.vlgmr.msra.gmra.mxu1 %v1080_v31 }
  0x50   : > { %945 = vmatprep.mubr.msk.bf16.mxu0 %vm416_vm0, %v1083_v32  ;;  %953 = vmatprep.mubr.msk.bf16.mxu1 %vm416_vm0, %v1085_v33 }
  0x57   : > { %506 = vmatmul.mubr.bf16.gmra.mxu0 %v1087_v34  ;;  %570 = vmatmul.mubr.bf16.gmra.mxu1 %v1088_v35 }
  0x58   : > { %946 = vmatprep.mubr.msk.bf16.mxu0 %vm416_vm0, %v1089_v36  ;;  %954 = vmatprep.mubr.msk.bf16.mxu1 %vm416_vm0, %v1091_v37 }
  0x5f   : > { %514 = vmatmul.mubr.bf16.gmra.mxu0 %v1093_v38  ;;  %578 = vmatmul.mubr.bf16.gmra.mxu1 %v1094_v39 }
  0x60   : > { %947 = vmatprep.mubr.msk.bf16.mxu0 %vm416_vm0, %v1095_v40  ;;  %955 = vmatprep.mubr.msk.bf16.mxu1 %vm416_vm0, %v1097_v41 }
  0x67   : > { %522 = vmatmul.mubr.bf16.gmra.mxu0 %v1099_v42  ;;  %586 = vmatmul.mubr.bf16.gmra.mxu1 %v1100_v43 }
  0x68   : > { %948 = vmatprep.mubr.msk.bf16.mxu0 %vm416_vm0, %v1101_v44  ;;  %956 = vmatprep.mubr.msk.bf16.mxu1 %vm416_vm0, %v1103_v45 }
  0x6f   : > { %530 = vmatmul.mubr.bf16.gmra.mxu0 %v1105_v46  ;;  %594 = vmatmul.mubr.bf16.gmra.mxu1 %v1106_v47 }
  0x70   : > { %949 = vmatprep.mubr.msk.bf16.mxu0 %vm416_vm0, %v1107_v48  ;;  %957 = vmatprep.mubr.msk.bf16.mxu1 %vm416_vm0, %v1109_v49 }
  0x77   : > { %538 = vmatmul.mubr.bf16.gmra.mxu0 %v1111_v50  ;;  %602 = vmatmul.mubr.bf16.gmra.mxu1 %v1112_v51 }
  0x78   : > { %950 = vmatprep.mubr.msk.bf16.mxu0 %vm416_vm0, %v1113_v52  ;;  %958 = vmatprep.mubr.msk.bf16.mxu1 %vm416_vm0, %v1115_v53 }
  0x7f   : > { %546 = vmatmul.mubr.bf16.gmra.mxu0 %v1117_v54  ;;  %610 = vmatmul.mubr.bf16.gmra.mxu1 %v1118_v55 }
  0x80   : > { %951 = vmatprep.mubr.msk.bf16.mxu0 %vm416_vm0, %v1119_v56  ;;  %959 = vmatprep.mubr.msk.bf16.mxu1 %vm416_vm0, %v1121_v57 }
  0x87   : > { %554 = vmatmul.mubr.bf16.gmra.mxu0 %v1123_v58  ;;  %618 = vmatmul.mubr.bf16.gmra.mxu1 %v1124_v59 }
 0x10f   : > { %v499_v61 = vpop.f32.mrf.mxu0  ;;  %v563_v62 = vpop.f32.mrf.mxu1 }
 0x110   : > { %v500_v63 = vadd.f32 %v1348_v60, %v499_v61  ;;  %v564_v0 = vadd.f32 %v1348_v60, %v563_v62 }
 0x111   : > { %v501_v1 = vpop.f32.mrf.mxu0  ;;  %v565_v2 = vpop.f32.mrf.mxu1 }
 0x112   : > { %v626_v3 = vmax.f32 %v500_v63, 0.0  ;;  %v642_v4 = vmax.f32 %v564_v0, 0.0 }
 0x113   : > { %v502_v5 = vpop.f32.mrf.mxu0  ;;  %v566_v6 = vpop.f32.mrf.mxu1 }
 0x114   : > { %v995_v7 = vpack.c.bf16 %v626_v3, %v626_v3  ;;  %v1011_v8 = vpack.c.bf16 %v642_v4, %v642_v4  ;;  %v503_v9 = vadd.f32 %v1348_v60, %v502_v5  ;;  %v567_v10 = vadd.f32 %v1348_v60, %v566_v6 }
 0x115   : > { %v504_v11 = vpop.f32.mrf.mxu0  ;;  %v568_v12 = vpop.f32.mrf.mxu1 }
 0x116   : > { %787 = vst.msk [vmem:[%s1356_s11] sm:$0xf] %vm786_vm1, %v995_v7  ;;  %803 = vst.msk [vmem:[%s1356_s11 + $0x40] sm:$0xf] %vm786_vm1, %v1011_v8  ;;  %v627_v13 = vmax.f32 %v503_v9, 0.0  ;;  %v643_v14 = vmax.f32 %v567_v10, 0.0 }
 0x117   : > { %v507_v15 = vpop.f32.mrf.mxu0  ;;  %v571_v16 = vpop.f32.mrf.mxu1 }
 0x118   : > { %v996_v17 = vpack.c.bf16 %v627_v13, %v627_v13  ;;  %v1012_v18 = vpack.c.bf16 %v643_v14, %v643_v14  ;;  %v508_v19 = vadd.f32 %v1348_v60, %v507_v15  ;;  %v572_v20 = vadd.f32 %v1348_v60, %v571_v16 }
 0x119   : > { %v509_v21 = vpop.f32.mrf.mxu0  ;;  %v573_v22 = vpop.f32.mrf.mxu1 }
 0x11a   : > { %788 = vst.msk [vmem:[%s1356_s11 + $0x4] sm:$0xf] %vm786_vm1, %v996_v17  ;;  %804 = vst.msk [vmem:[%s1356_s11 + $0x44] sm:$0xf] %vm786_vm1, %v1012_v18  ;;  %v628_v23 = vmax.f32 %v508_v19, 0.0  ;;  %v644_v24 = vmax.f32 %v572_v20, 0.0 }
 0x11b   : > { %v510_v25 = vpop.f32.mrf.mxu0  ;;  %v574_v26 = vpop.f32.mrf.mxu1 }
 0x11c   : > { %v997_v27 = vpack.c.bf16 %v628_v23, %v628_v23  ;;  %v1013_v28 = vpack.c.bf16 %v644_v24, %v644_v24  ;;  %v511_v29 = vadd.f32 %v1348_v60, %v510_v25  ;;  %v575_v30 = vadd.f32 %v1348_v60, %v574_v26 }
 0x11d   : > { %v512_v31 = vpop.f32.mrf.mxu0  ;;  %v576_v32 = vpop.f32.mrf.mxu1 }
 0x11e   : > { %789 = vst.msk [vmem:[%s1356_s11 + $0x8] sm:$0xf] %vm786_vm1, %v997_v27  ;;  %805 = vst.msk [vmem:[%s1356_s11 + $0x48] sm:$0xf] %vm786_vm1, %v1013_v28  ;;  %v629_v33 = vmax.f32 %v511_v29, 0.0  ;;  %v645_v34 = vmax.f32 %v575_v30, 0.0 }
 0x11f   : > { %v515_v35 = vpop.f32.mrf.mxu0  ;;  %v579_v36 = vpop.f32.mrf.mxu1 }
 0x120   : > { %v998_v37 = vpack.c.bf16 %v629_v33, %v629_v33  ;;  %v1014_v38 = vpack.c.bf16 %v645_v34, %v645_v34  ;;  %v516_v39 = vadd.f32 %v1348_v60, %v515_v35  ;;  %v580_v40 = vadd.f32 %v1348_v60, %v579_v36 }
 0x121   : > { %v517_v41 = vpop.f32.mrf.mxu0  ;;  %v581_v42 = vpop.f32.mrf.mxu1 }
 0x122   : > { %790 = vst.msk [vmem:[%s1356_s11 + $0xc] sm:$0xf] %vm786_vm1, %v998_v37  ;;  %806 = vst.msk [vmem:[%s1356_s11 + $0x4c] sm:$0xf] %vm786_vm1, %v1014_v38  ;;  %v630_v43 = vmax.f32 %v516_v39, 0.0  ;;  %v646_v44 = vmax.f32 %v580_v40, 0.0 }
 0x123   : > { %v518_v45 = vpop.f32.mrf.mxu0  ;;  %v582_v46 = vpop.f32.mrf.mxu1 }
 0x124   : > { %v999_v47 = vpack.c.bf16 %v630_v43, %v630_v43  ;;  %v1015_v48 = vpack.c.bf16 %v646_v44, %v646_v44  ;;  %v519_v49 = vadd.f32 %v1348_v60, %v518_v45  ;;  %v583_v50 = vadd.f32 %v1348_v60, %v582_v46 }
 0x125   : > { %v520_v51 = vpop.f32.mrf.mxu0  ;;  %v584_v52 = vpop.f32.mrf.mxu1 }
 0x126   : > { %791 = vst.msk [vmem:[%s1356_s11 + $0x10] sm:$0xf] %vm786_vm1, %v999_v47  ;;  %807 = vst.msk [vmem:[%s1356_s11 + $0x50] sm:$0xf] %vm786_vm1, %v1015_v48  ;;  %v631_v53 = vmax.f32 %v519_v49, 0.0  ;;  %v647_v54 = vmax.f32 %v583_v50, 0.0 }
 0x127   : > { %v523_v55 = vpop.f32.mrf.mxu0  ;;  %v587_v56 = vpop.f32.mrf.mxu1 }
 0x128   : > { %v1000_v57 = vpack.c.bf16 %v631_v53, %v631_v53  ;;  %v1016_v58 = vpack.c.bf16 %v647_v54, %v647_v54  ;;  %v524_v59 = vadd.f32 %v1348_v60, %v523_v55  ;;  %v588_v61 = vadd.f32 %v1348_v60, %v587_v56 }
 0x129   : > { %v525_v62 = vpop.f32.mrf.mxu0  ;;  %v589_v63 = vpop.f32.mrf.mxu1 }
 0x12a   : > { %792 = vst.msk [vmem:[%s1356_s11 + $0x14] sm:$0xf] %vm786_vm1, %v1000_v57  ;;  %808 = vst.msk [vmem:[%s1356_s11 + $0x54] sm:$0xf] %vm786_vm1, %v1016_v58  ;;  %v632_v0 = vmax.f32 %v524_v59, 0.0  ;;  %v648_v1 = vmax.f32 %v588_v61, 0.0 }
 0x12b   : > { %v526_v2 = vpop.f32.mrf.mxu0  ;;  %v590_v3 = vpop.f32.mrf.mxu1 }
 0x12c   : > { %v1001_v4 = vpack.c.bf16 %v632_v0, %v632_v0  ;;  %v1017_v5 = vpack.c.bf16 %v648_v1, %v648_v1  ;;  %v527_v6 = vadd.f32 %v1348_v60, %v526_v2  ;;  %v591_v7 = vadd.f32 %v1348_v60, %v590_v3 }
 0x12d   : > { %v528_v8 = vpop.f32.mrf.mxu0  ;;  %v592_v9 = vpop.f32.mrf.mxu1 }
 0x12e   : > { %793 = vst.msk [vmem:[%s1356_s11 + $0x18] sm:$0xf] %vm786_vm1, %v1001_v4  ;;  %809 = vst.msk [vmem:[%s1356_s11 + $0x58] sm:$0xf] %vm786_vm1, %v1017_v5  ;;  %v633_v10 = vmax.f32 %v527_v6, 0.0  ;;  %v649_v11 = vmax.f32 %v591_v7, 0.0 }
 0x12f   : > { %v531_v12 = vpop.f32.mrf.mxu0  ;;  %v595_v13 = vpop.f32.mrf.mxu1 }
 0x130   : > { %v1002_v14 = vpack.c.bf16 %v633_v10, %v633_v10  ;;  %v1018_v15 = vpack.c.bf16 %v649_v11, %v649_v11  ;;  %v532_v16 = vadd.f32 %v1348_v60, %v531_v12  ;;  %v596_v17 = vadd.f32 %v1348_v60, %v595_v13 }
 0x131   : > { %v533_v18 = vpop.f32.mrf.mxu0  ;;  %v597_v19 = vpop.f32.mrf.mxu1 }
 0x132   : > { %794 = vst.msk [vmem:[%s1356_s11 + $0x1c] sm:$0xf] %vm786_vm1, %v1002_v14  ;;  %810 = vst.msk [vmem:[%s1356_s11 + $0x5c] sm:$0xf] %vm786_vm1, %v1018_v15  ;;  %v634_v20 = vmax.f32 %v532_v16, 0.0  ;;  %v650_v21 = vmax.f32 %v596_v17, 0.0 }
 0x133   : > { %v534_v22 = vpop.f32.mrf.mxu0  ;;  %v598_v23 = vpop.f32.mrf.mxu1 }
 0x134   : > { %v1003_v24 = vpack.c.bf16 %v634_v20, %v634_v20  ;;  %v1019_v25 = vpack.c.bf16 %v650_v21, %v650_v21  ;;  %v535_v26 = vadd.f32 %v1348_v60, %v534_v22  ;;  %v599_v27 = vadd.f32 %v1348_v60, %v598_v23 }
 0x135   : > { %v536_v28 = vpop.f32.mrf.mxu0  ;;  %v600_v29 = vpop.f32.mrf.mxu1 }
 0x136   : > { %795 = vst.msk [vmem:[%s1356_s11 + $0x20] sm:$0xf] %vm786_vm1, %v1003_v24  ;;  %811 = vst.msk [vmem:[%s1356_s11 + $0x60] sm:$0xf] %vm786_vm1, %v1019_v25  ;;  %v635_v30 = vmax.f32 %v535_v26, 0.0  ;;  %v651_v31 = vmax.f32 %v599_v27, 0.0 }
 0x137   : > { %v539_v32 = vpop.f32.mrf.mxu0  ;;  %v603_v33 = vpop.f32.mrf.mxu1 }
 0x138   : > { %v1004_v34 = vpack.c.bf16 %v635_v30, %v635_v30  ;;  %v1020_v35 = vpack.c.bf16 %v651_v31, %v651_v31  ;;  %v540_v36 = vadd.f32 %v1348_v60, %v539_v32  ;;  %v604_v37 = vadd.f32 %v1348_v60, %v603_v33 }
 0x139   : > { %v541_v38 = vpop.f32.mrf.mxu0  ;;  %v605_v39 = vpop.f32.mrf.mxu1 }
 0x13a   : > { %796 = vst.msk [vmem:[%s1356_s11 + $0x24] sm:$0xf] %vm786_vm1, %v1004_v34  ;;  %812 = vst.msk [vmem:[%s1356_s11 + $0x64] sm:$0xf] %vm786_vm1, %v1020_v35  ;;  %v636_v40 = vmax.f32 %v540_v36, 0.0  ;;  %v652_v41 = vmax.f32 %v604_v37, 0.0 }
 0x13b   : > { %v542_v42 = vpop.f32.mrf.mxu0  ;;  %v606_v43 = vpop.f32.mrf.mxu1 }
 0x13c   : > { %v1005_v44 = vpack.c.bf16 %v636_v40, %v636_v40  ;;  %v1021_v45 = vpack.c.bf16 %v652_v41, %v652_v41  ;;  %v543_v46 = vadd.f32 %v1348_v60, %v542_v42  ;;  %v607_v47 = vadd.f32 %v1348_v60, %v606_v43 }
 0x13d   : > { %v544_v48 = vpop.f32.mrf.mxu0  ;;  %v608_v49 = vpop.f32.mrf.mxu1 }
 0x13e   : > { %797 = vst.msk [vmem:[%s1356_s11 + $0x28] sm:$0xf] %vm786_vm1, %v1005_v44  ;;  %813 = vst.msk [vmem:[%s1356_s11 + $0x68] sm:$0xf] %vm786_vm1, %v1021_v45  ;;  %v637_v50 = vmax.f32 %v543_v46, 0.0  ;;  %v653_v51 = vmax.f32 %v607_v47, 0.0 }
 0x13f   : > { %v547_v52 = vpop.f32.mrf.mxu0  ;;  %v611_v53 = vpop.f32.mrf.mxu1 }
 0x140   : > { %v1006_v54 = vpack.c.bf16 %v637_v50, %v637_v50  ;;  %v1022_v55 = vpack.c.bf16 %v653_v51, %v653_v51  ;;  %v548_v56 = vadd.f32 %v1348_v60, %v547_v52  ;;  %v612_v57 = vadd.f32 %v1348_v60, %v611_v53 }
 0x141   : > { %v549_v58 = vpop.f32.mrf.mxu0  ;;  %v613_v59 = vpop.f32.mrf.mxu1 }
 0x142   : > { %798 = vst.msk [vmem:[%s1356_s11 + $0x2c] sm:$0xf] %vm786_vm1, %v1006_v54  ;;  %814 = vst.msk [vmem:[%s1356_s11 + $0x6c] sm:$0xf] %vm786_vm1, %v1022_v55  ;;  %v638_v61 = vmax.f32 %v548_v56, 0.0  ;;  %v654_v62 = vmax.f32 %v612_v57, 0.0 }
 0x143   : > { %v550_v63 = vpop.f32.mrf.mxu0  ;;  %v614_v0 = vpop.f32.mrf.mxu1 }
 0x144   : > { %v1007_v1 = vpack.c.bf16 %v638_v61, %v638_v61  ;;  %v1023_v2 = vpack.c.bf16 %v654_v62, %v654_v62  ;;  %v551_v3 = vadd.f32 %v1348_v60, %v550_v63  ;;  %v615_v4 = vadd.f32 %v1348_v60, %v614_v0 }
 0x145   : > { %v552_v5 = vpop.f32.mrf.mxu0  ;;  %v616_v6 = vpop.f32.mrf.mxu1 }
 0x146   : > { %799 = vst.msk [vmem:[%s1356_s11 + $0x30] sm:$0xf] %vm786_vm1, %v1007_v1  ;;  %815 = vst.msk [vmem:[%s1356_s11 + $0x70] sm:$0xf] %vm786_vm1, %v1023_v2  ;;  %v639_v7 = vmax.f32 %v551_v3, 0.0  ;;  %v655_v8 = vmax.f32 %v615_v4, 0.0 }
 0x147   : > { %v555_v9 = vpop.f32.mrf.mxu0  ;;  %v619_v10 = vpop.f32.mrf.mxu1 }
 0x148   : > { %v1008_v11 = vpack.c.bf16 %v639_v7, %v639_v7  ;;  %v1024_v12 = vpack.c.bf16 %v655_v8, %v655_v8  ;;  %v556_v13 = vadd.f32 %v1348_v60, %v555_v9  ;;  %v620_v14 = vadd.f32 %v1348_v60, %v619_v10 }
 0x149   : > { %v557_v15 = vpop.f32.mrf.mxu0  ;;  %v621_v16 = vpop.f32.mrf.mxu1 }
 0x14a   : > { %800 = vst.msk [vmem:[%s1356_s11 + $0x34] sm:$0xf] %vm786_vm1, %v1008_v11  ;;  %816 = vst.msk [vmem:[%s1356_s11 + $0x74] sm:$0xf] %vm786_vm1, %v1024_v12  ;;  %v640_v17 = vmax.f32 %v556_v13, 0.0  ;;  %v656_v18 = vmax.f32 %v620_v14, 0.0 }
 0x14b   : > { %v558_v19 = vpop.f32.mrf.mxu0  ;;  %v622_v20 = vpop.f32.mrf.mxu1 }
 0x14c   : > { %v1009_v21 = vpack.c.bf16 %v640_v17, %v640_v17  ;;  %v1025_v22 = vpack.c.bf16 %v656_v18, %v656_v18  ;;  %v559_v23 = vadd.f32 %v1348_v60, %v558_v19  ;;  %v623_v24 = vadd.f32 %v1348_v60, %v622_v20 }
 0x14d   : > { %v560_v25 = vpop.f32.mrf.mxu0  ;;  %v624_v26 = vpop.f32.mrf.mxu1 }
 0x14e   : > { %801 = vst.msk [vmem:[%s1356_s11 + $0x38] sm:$0xf] %vm786_vm1, %v1009_v21  ;;  %817 = vst.msk [vmem:[%s1356_s11 + $0x78] sm:$0xf] %vm786_vm1, %v1025_v22  ;;  %v641_v27 = vmax.f32 %v559_v23, 0.0  ;;  %v657_v28 = vmax.f32 %v623_v24, 0.0 }
 0x150   : > { %v1010_v29 = vpack.c.bf16 %v641_v27, %v641_v27  ;;  %v1026_v30 = vpack.c.bf16 %v657_v28, %v657_v28 }
 0x152   : > { %802 = vst.msk [vmem:[%s1356_s11 + $0x3c] sm:$0xf] %vm786_vm1, %v1010_v29  ;;  %818 = vst.msk [vmem:[%s1356_s11 + $0x7c] sm:$0xf] %vm786_vm1, %v1026_v30 }
 0x153 PF: > { %s15_s12 = sadd.s32 1, %s1191_s12  }
 0x154   : > { %p12_p3 = scmp.ge.s32.totalorder %s15_s12, 4  }
 0x156   :  { %14 = sbr.rel (!%p12_p3) target bundleno = 2 (0x2), region = 71 }
 0x15b   :  { %841 = vsyncpa [#allocation3], 1 }
 0x15c   :  { %843 = vsyncpa [#allocation3 + $0x1], 1 }
 0x15d   :  { %844 = vsyncpa [#allocation5], 1 }

// kernel: forward.14
= control target key start
LH: loop header
LB: loop body
LE: loop exit
PB: predicated region body
PF: predicated region fallthrough
CT: control target
= control target key end

     0   :  { %8 = vsyncpa [#allocation3], 0  ;;  %s1998_s0 = inlined_call_operand.vmem [shape: bf16[512,288], index: 0, kind: input, shape index: {}]   ;;  %s1999_s1 = inlined_call_operand.hbm [shape: f32[288,32], index: 1, kind: input, shape index: {}]   ;;  %s2000_s2 = inlined_call_operand.hbm [shape: f32[1,32], index: 2, kind: input, shape index: {}]   ;;  %s2001_s3 = inlined_call_operand.vmem [shape: bf16[512,32], index: 3, kind: output, shape index: {}]  }
   0x1   :  { %9 = vsyncpa [#allocation5], 0  ;;  %s1727_s12 = smov 0  }
   0x2 LB: > { %s1213_s13 = sadd.s32 4294967295, %s1701_s12   ;;  %p1215_p0 = scmp.ge.s32.totalorder %s1701_s12, 1  ;;  %s1701_s12 = sphi %s1727_s12, %s15_s12  }
   0x3   : > { %p114_p1 = scmp.lt.s32.totalorder %s1701_s12, 3  ;;  %s1703_s14 = smov [#allocation2]  }
   0x4   : > { %s126_s15 = sshll.u32 %s1703_s14, 4  ;;  %p1741_p3 = scmp.eq.s32.totalorder %s1213_s13, 0  ;;  %s127_s15 = int_to_ptr.vmem [resolvable:$true] %s126_s15 }
   0x5   : > { %p1735_p2 = pnand %p1215_p0, %p114_p1  ;;  %s1704_s18 = smov [#allocation4]  }
   0x6   : > { %s140_s19 = sshll.u32 %s1704_s18, 4  ;;  %s1646_s21 = scalar_lea.vmem %s127_s15, 4608  ;;  %s141_s19 = int_to_ptr.vmem [resolvable:$true] %s140_s19 }
   0x7   : > { %p1548_p4 = pneg %p1735_p2  ;;  %p1647_p7 = scmp.ne.s32.totalorder %s127_s15, %s1646_s21 }
   0x8   : > { %p1654_p10 = scmp.lt.s32.totalorder %s127_s15, %s127_s15  ;;  %p1655_p11 = scmp.lt.s32.totalorder %s1646_s21, %s1646_s21 }
   0x9   : > { %p1749_p5 = pnand %p1741_p3, %p1548_p4 }
   0xa   : > { %p1656_p12 = por %p1655_p11, %p1654_p10 }
   0xb   : > { %p1637_p6 = pneg %p1749_p5 }
   0xd   : > { %p1649_p8 = pnand %p1647_p7, %p1637_p6 }
   0xf   : > { %p1650_p9 = pneg %p1649_p8 }
  0x11   : > { %p1657_p13 = pnand %p1656_p12, %p1650_p9 }
  0x13   : > { %1660 = shalt.err (!%p1657_p13)
}
  0x14   : > { %s1705_s22 = smov 128   ;;  %s1706_s23 = smov 8  }
  0x15   : > { %1551 = dma.hbm_to_vmem [thread:$0]  (!%p1749_p5), %s1999_s1, 4608, %s127_s15, [#allocation3], %s1705_s22, %s1705_s22, %s1706_s23  }
  0x16   : > { %s1672_s26 = scalar_lea.vmem %s141_s19, 16  ;;  %s1679_s27 = scalar_lea.vmem %s141_s19, 32 }
  0x17   : > { %p1673_p0 = scmp.ne.s32.totalorder %s141_s19, %s1672_s26  ;;  %p1680_p7 = scmp.lt.s32.totalorder %s141_s19, %s141_s19 }
  0x18   : > { %p1681_p8 = scmp.lt.s32.totalorder %s1679_s27, %s1672_s26 }
  0x19   : > { %p1675_p1 = pnand %p1673_p0, %p1637_p6 }
  0x1a   : > { %p1682_p9 = por %p1681_p8, %p1680_p7 }
  0x1b   : > { %p1676_p4 = pneg %p1675_p1 }
  0x1d   : > { %p1683_p10 = pnand %p1682_p9, %p1676_p4 }
  0x1f   : > { %1686 = shalt.err (!%p1683_p10)
}
  0x20   : > { %1554 = dma.hbm_to_vmem [thread:$0]  (!%p1749_p5), %s2000_s2, 16, %s141_s19, [#allocation5]  }
  0x21   : > { %163 = sbr.rel (%p1735_p2) target bundleno = 374 (0x176), region = 32 }
  0x26   : > { %1692 = dma.done.wait (%p1741_p3), [#allocation3], 4608  }
  0x27   : > { %1694 = vsyncadd (%p1741_p3), [#allocation3], 4294962688 }
  0x28   : > { %1696 = dma.done.wait (%p1741_p3), [#allocation5], 16  }
  0x29   : > { %1698 = vsyncadd (%p1741_p3), [#allocation5], 4294967280  ;;  %s1222_s30 = sshll.u32 %s1213_s13, 5  ;;  %v300_v0 = vld [vmem:[#allocation2 + $0xf0] sm:$0xff]  ;;  %v301_v1 = vld [vmem:[#allocation2 + $0xf8] sm:$0xff]  ;;  %vm571_vm0 = vcmask 261120  }
  0x2a   : > { %p193_p6 = scmp.lt.s32.totalorder %s1222_s30, 63  ;;  %v284_v2 = vld [vmem:[#allocation2 + $0x70] sm:$0xff]  ;;  %v321_v3 = vpack.c.bf16 %v301_v1, %v300_v0  ;;  %v285_v4 = vld [vmem:[#allocation2 + $0x78] sm:$0xff]  ;;  %v298_v5 = vld [vmem:[#allocation2 + $0xe0] sm:$0xff]  ;;  %vm1102_vm1 = vcmask 257024  }
  0x2b   : > { %v299_v6 = vld [vmem:[#allocation2 + $0xe8] sm:$0xff]  ;;  %v313_v7 = vpack.c.bf16 %v285_v4, %v284_v2  ;;  %v282_v9 = vld [vmem:[#allocation2 + $0x60] sm:$0xff]  ;;  %v296_v11 = vld [vmem:[#allocation2 + $0xd0] sm:$0xff] }
  0x2c   : > { %s2006_s30 = smov (!%p193_p6, %s1222_s30), 63  ;;  %v320_v8 = vpack.c.bf16 %v299_v6, %v298_v5  ;;  %v283_v10 = vld [vmem:[#allocation2 + $0x68] sm:$0xff]  ;;  %1357 = vmatprep.subr.bf16.mxu0 %v321_v3  ;;  %1523 = vmatprep.subr.bf16.mxu1 %v321_v3  ;;  %v297_v12 = vld [vmem:[#allocation2 + $0xd8] sm:$0xff]  ;;  %v280_v15 = vld [vmem:[#allocation2 + $0x50] sm:$0xff] }
  0x2d   : > { %1358 = vmatpush3.bf16.msra.mxu0 %v313_v7  ;;  %1531 = vmatpush3.bf16.msra.mxu1 %v313_v7  ;;  %v312_v13 = vpack.c.bf16 %v283_v10, %v282_v9  ;;  %s1539_s4 = smul.u32 12, %s2006_s30  ;;  %v319_v14 = vpack.c.bf16 %v297_v12, %v296_v11  ;;  %v281_v16 = vld [vmem:[#allocation2 + $0x58] sm:$0xff]  ;;  %v294_v17 = vld [vmem:[#allocation2 + $0xc0] sm:$0xff]  ;;  %v295_v18 = vld [vmem:[#allocation2 + $0xc8] sm:$0xff]  ;;  %s1225_s8 = sshll.u32 %s2006_s30, 2 }
  0x2e   : > { %1359 = vmatprep.subr.bf16.mxu0 %v320_v8  ;;  %1524 = vmatprep.subr.bf16.mxu1 %v320_v8  ;;  %v311_v19 = vpack.c.bf16 %v281_v16, %v280_v15  ;;  %v318_v20 = vpack.c.bf16 %v295_v18, %v294_v17  ;;  %v278_v21 = vld [vmem:[#allocation2 + $0x40] sm:$0xff]  ;;  %v279_v22 = vld [vmem:[#allocation2 + $0x48] sm:$0xff]  ;;  %v292_v23 = vld [vmem:[#allocation2 + $0xb0] sm:$0xff]  ;;  %s1884_s11 = scalar_lea.vmem %s2001_s3, %s1225_s8 }
  0x2f   : > { %s1789_s7 = scalar_lea.vmem %s1998_s0, %s1539_s4  ;;  %v293_v24 = vld [vmem:[#allocation2 + $0xb8] sm:$0xff]  ;;  %v310_v26 = vpack.c.bf16 %v279_v22, %v278_v21  ;;  %v276_v27 = vld [vmem:[#allocation2 + $0x30] sm:$0xff]  ;;  %v290_v30 = vld [vmem:[#allocation2 + $0xa0] sm:$0xff] }
  0x30   : > { %v1573_v25 = vld [vmem:[%s1789_s7 + $0x4] ss:$12 sps:$4 sm:$0xff]   ;;  %v317_v28 = vpack.c.bf16 %v293_v24, %v292_v23  ;;  %v277_v29 = vld [vmem:[#allocation2 + $0x38] sm:$0xff]  ;;  %v291_v32 = vld [vmem:[#allocation2 + $0xa8] sm:$0xff] }
  0x31   : > { %1360 = vmatpush3.bf16.msra.mxu0 %v312_v13  ;;  %1532 = vmatpush3.bf16.msra.mxu1 %v312_v13  ;;  %v1576_v31 = vld [vmem:[%s1789_s7 + $0x124] ss:$12 sps:$4 sm:$0xff]   ;;  %v309_v33 = vpack.c.bf16 %v277_v29, %v276_v27  ;;  %v316_v35 = vpack.c.bf16 %v291_v32, %v290_v30  ;;  %v275_v36 = vld [vmem:[#allocation2 + $0x28] sm:$0xff]  ;;  %v289_v38 = vld [vmem:[#allocation2 + $0x98] sm:$0xff] }
  0x32   : > { %1361 = vmatprep.subr.bf16.mxu0 %v319_v14  ;;  %1525 = vmatprep.subr.bf16.mxu1 %v319_v14  ;;  %v274_v34 = vld [vmem:[#allocation2 + $0x20] sm:$0xff]  ;;  %v288_v37 = vld [vmem:[#allocation2 + $0x90] sm:$0xff]  ;;  %v273_v42 = vld [vmem:[#allocation2 + $0x18] sm:$0xff] }
  0x33   : > { %652 = vmatprep.mubr.bf16.mxu0 %v1573_v25  ;;  %748 = vmatprep.mubr.bf16.mxu1 %v1576_v31  ;;  %v308_v39 = vpack.c.bf16 %v275_v36, %v274_v34  ;;  %v272_v40 = vld [vmem:[#allocation2 + $0x10] sm:$0xff]  ;;  %v315_v41 = vpack.c.bf16 %v289_v38, %v288_v37  ;;  %v286_v43 = vld [vmem:[#allocation2 + $0x80] sm:$0xff]  ;;  %v287_v44 = vld [vmem:[#allocation2 + $0x88] sm:$0xff] }
  0x34   : > { %v307_v45 = vpack.c.bf16 %v273_v42, %v272_v40  ;;  %v270_v46 = vld [vmem:[#allocation2] sm:$0xff]  ;;  %v271_v47 = vld [vmem:[#allocation2 + $0x8] sm:$0xff]  ;;  %v314_v48 = vpack.c.bf16 %v287_v44, %v286_v43  ;;  %v304_v49 = vld [vmem:[#allocation2 + $0x110] sm:$0xff] }
  0x35   : > { %1362 = vmatpush3.bf16.msra.mxu0 %v311_v19  ;;  %1533 = vmatpush3.bf16.msra.mxu1 %v311_v19  ;;  %v305_v50 = vld [vmem:[#allocation2 + $0x118] sm:$0xff]  ;;  %v306_v51 = vpack.c.bf16 %v271_v47, %v270_v46  ;;  %v302_v53 = vld [vmem:[#allocation2 + $0x100] sm:$0xff]  ;;  %v303_v54 = vld [vmem:[#allocation2 + $0x108] sm:$0xff] }
  0x36   : > { %1363 = vmatprep.subr.bf16.mxu0 %v318_v20  ;;  %1526 = vmatprep.subr.bf16.mxu1 %v318_v20  ;;  %v323_v52 = vpack.c.bf16 %v305_v50, %v304_v49  ;;  %v1571_v55 = vld [vmem:[%s1789_s7] ss:$12 sps:$4 sm:$0xff]   ;;  %v1577_v57 = vld [vmem:[%s1789_s7 + $0x1c] ss:$12 sps:$4 sm:$0xff]   ;;  %v322_v59 = vpack.c.bf16 %v303_v54, %v302_v53  ;;  %v1581_v60 = vld [vmem:[%s1789_s7 + $0x18] ss:$12 sps:$4 sm:$0xff]  }
  0x37   : > { %v1574_v56 = vld [vmem:[%s1789_s7 + $0x120] ss:$12 sps:$4 sm:$0xff]   ;;  %v1579_v58 = vld [vmem:[%s1789_s7 + $0x13c] ss:$12 sps:$4 sm:$0xff]   ;;  %v1582_v61 = vld [vmem:[%s1789_s7 + $0x138] ss:$12 sps:$4 sm:$0xff]  }
  0x38   : > { %v1583_v62 = vld [vmem:[%s1789_s7 + $0x34] ss:$12 sps:$4 sm:$0xff]   ;;  %v1587_v0 = vld [vmem:[%s1789_s7 + $0x30] ss:$12 sps:$4 sm:$0xff]   ;;  %v1589_v2 = vld [vmem:[%s1789_s7 + $0x4c] ss:$12 sps:$4 sm:$0xff]  }
  0x39   : > { %1364 = vmatpush3.bf16.msra.mxu0 %v310_v26  ;;  %1534 = vmatpush3.bf16.msra.mxu1 %v310_v26  ;;  %v1585_v63 = vld [vmem:[%s1789_s7 + $0x154] ss:$12 sps:$4 sm:$0xff]   ;;  %v1588_v1 = vld [vmem:[%s1789_s7 + $0x150] ss:$12 sps:$4 sm:$0xff]   ;;  %v1591_v3 = vld [vmem:[%s1789_s7 + $0x16c] ss:$12 sps:$4 sm:$0xff]  }
  0x3a   : > { %1365 = vmatprep.subr.bf16.mxu0 %v317_v28  ;;  %1527 = vmatprep.subr.bf16.mxu1 %v317_v28  ;;  %v1593_v4 = vld [vmem:[%s1789_s7 + $0x48] ss:$12 sps:$4 sm:$0xff]   ;;  %v1595_v6 = vld [vmem:[%s1789_s7 + $0x64] ss:$12 sps:$4 sm:$0xff]   ;;  %v1598_v8 = vld [vmem:[%s1789_s7 + $0x60] ss:$12 sps:$4 sm:$0xff]  }
  0x3b   : > { %v1594_v5 = vld [vmem:[%s1789_s7 + $0x168] ss:$12 sps:$4 sm:$0xff]   ;;  %v1599_v9 = vld [vmem:[%s1789_s7 + $0x20] ss:$12 sps:$4 sm:$0xff]   ;;  %v1602_v11 = vld [vmem:[%s1789_s7 + $0x38] ss:$12 sps:$4 sm:$0xff]  }
  0x3c   : > { %v1597_v7 = vld [vmem:[%s1789_s7 + $0x8] ss:$12 sps:$4 sm:$0xff]   ;;  %v1603_v12 = vld [vmem:[%s1789_s7 + $0x78] ss:$12 sps:$4 sm:$0xff]   ;;  %v1604_v13 = vld [vmem:[%s1789_s7 + $0x50] ss:$12 sps:$4 sm:$0xff]  }
  0x3d   : > { %1366 = vmatpush3.bf16.msra.mxu0 %v309_v33  ;;  %1535 = vmatpush3.bf16.msra.mxu1 %v309_v33  ;;  %v1600_v10 = vld [vmem:[%s1789_s7 + $0x7c] ss:$12 sps:$4 sm:$0xff]   ;;  %v1605_v14 = vld [vmem:[%s1789_s7 + $0x94] ss:$12 sps:$4 sm:$0xff]   ;;  %v1610_v18 = vld [vmem:[%s1789_s7 + $0xac] ss:$12 sps:$4 sm:$0xff]  }
  0x3e   : > { %1367 = vmatprep.subr.bf16.mxu0 %v316_v35  ;;  %1528 = vmatprep.subr.bf16.mxu1 %v316_v35  ;;  %v1607_v15 = vld [vmem:[%s1789_s7 + $0x68] ss:$12 sps:$4 sm:$0xff]   ;;  %v1608_v16 = vld [vmem:[%s1789_s7 + $0x90] ss:$12 sps:$4 sm:$0xff]   ;;  %v1609_v17 = vld [vmem:[%s1789_s7 + $0x80] ss:$12 sps:$4 sm:$0xff]  }
  0x3f   : > { %v1612_v19 = vld [vmem:[%s1789_s7 + $0x98] ss:$12 sps:$4 sm:$0xff]   ;;  %v1613_v20 = vld [vmem:[%s1789_s7 + $0xa8] ss:$12 sps:$4 sm:$0xff]   ;;  %v1614_v21 = vld [vmem:[%s1789_s7 + $0xb0] ss:$12 sps:$4 sm:$0xff]  }
  0x40   : > { %v1615_v22 = vld [vmem:[%s1789_s7 + $0xc4] ss:$12 sps:$4 sm:$0xff]   ;;  %v1617_v23 = vld [vmem:[%s1789_s7 + $0xc8] ss:$12 sps:$4 sm:$0xff]   ;;  %v1618_v24 = vld [vmem:[%s1789_s7 + $0xc0] ss:$12 sps:$4 sm:$0xff]  }
  0x41   : > { %1368 = vmatpush3.bf16.msra.mxu0 %v308_v39  ;;  %1536 = vmatpush3.bf16.msra.mxu1 %v308_v39  ;;  %v1619_v25 = vld [vmem:[%s1789_s7 + $0xe0] ss:$12 sps:$4 sm:$0xff]   ;;  %v1620_v26 = vld [vmem:[%s1789_s7 + $0xdc] ss:$12 sps:$4 sm:$0xff]   ;;  %v1622_v27 = vld [vmem:[%s1789_s7 + $0xf8] ss:$12 sps:$4 sm:$0xff]  }
  0x42   : > { %1369 = vmatprep.subr.bf16.mxu0 %v315_v41  ;;  %1529 = vmatprep.subr.bf16.mxu1 %v315_v41  ;;  %v1623_v28 = vld [vmem:[%s1789_s7 + $0xd8] ss:$12 sps:$4 sm:$0xff]   ;;  %v1624_v29 = vld [vmem:[%s1789_s7 + $0x110] ss:$12 sps:$4 sm:$0xff]   ;;  %v1625_v30 = vld [vmem:[%s1789_s7 + $0xf4] ss:$12 sps:$4 sm:$0xff]  }
  0x43   : > { %v1627_v31 = vld [vmem:[%s1789_s7 + $0x128] ss:$12 sps:$4 sm:$0xff]   ;;  %v1628_v32 = vld [vmem:[%s1789_s7 + $0xf0] ss:$12 sps:$4 sm:$0xff]   ;;  %v1629_v33 = vld [vmem:[%s1789_s7 + $0x140] ss:$12 sps:$4 sm:$0xff]  }
  0x44   : > { %v1630_v34 = vld [vmem:[%s1789_s7 + $0x10c] ss:$12 sps:$4 sm:$0xff]   ;;  %v1633_v36 = vld [vmem:[%s1789_s7 + $0x108] ss:$12 sps:$4 sm:$0xff]   ;;  %v1634_v37 = vld [vmem:[%s1789_s7 + $0x170] ss:$12 sps:$4 sm:$0xff]  }
  0x45   : > { %1370 = vmatpush3.bf16.msra.mxu0 %v307_v45  ;;  %1537 = vmatpush3.bf16.msra.mxu1 %v307_v45  ;;  %v1632_v35 = vld [vmem:[%s1789_s7 + $0x158] ss:$12 sps:$4 sm:$0xff]  }
  0x46   : > { %1371 = vmatprep.subr.bf16.mxu0 %v314_v48  ;;  %1530 = vmatprep.subr.bf16.mxu1 %v314_v48 }
  0x49   : > { %1372 = vmatpush3.bf16.msra.mxu0 %v306_v51  ;;  %1538 = vmatpush3.bf16.msra.mxu1 %v306_v51 }
  0x4a   : > { %1487 = vmatprep.subr.bf16.mxu1 %v323_v52 }
  0x4c   : > { %653 = vmatmul.mubr.bf16.vlgmr.msra.gmra.mxu0 %v1571_v55  ;;  %749 = vmatmul.mubr.bf16.vlgmr.msra.gmra.mxu1 %v1574_v56 }
  0x4d   : > { %1488 = vmatpush3.bf16.msra.mxu1 %v323_v52  ;;  %660 = vmatprep.mubr.bf16.mxu0 %v1577_v57 }
  0x4e   : > { %756 = vmatprep.mubr.bf16.mxu1 %v1579_v58  ;;  %1489 = vmatprep.subr.bf16.mxu1 %v322_v59 }
  0x51   : > { %1490 = vmatpush3.bf16.msra.mxu1 %v322_v59 }
  0x54   : > { %661 = vmatmul.mubr.bf16.gmra.mxu0 %v1581_v60  ;;  %757 = vmatmul.mubr.bf16.gmra.mxu1 %v1582_v61 }
  0x55   : > { %668 = vmatprep.mubr.bf16.mxu0 %v1583_v62  ;;  %764 = vmatprep.mubr.bf16.mxu1 %v1585_v63 }
  0x5c   : > { %669 = vmatmul.mubr.bf16.gmra.mxu0 %v1587_v0  ;;  %765 = vmatmul.mubr.bf16.gmra.mxu1 %v1588_v1 }
  0x5d   : > { %676 = vmatprep.mubr.bf16.mxu0 %v1589_v2  ;;  %772 = vmatprep.mubr.bf16.mxu1 %v1591_v3 }
  0x64   : > { %677 = vmatmul.mubr.bf16.gmra.mxu0 %v1593_v4  ;;  %773 = vmatmul.mubr.bf16.gmra.mxu1 %v1594_v5 }
  0x65   : > { %684 = vmatprep.mubr.bf16.mxu0 %v1595_v6  ;;  %1491 = vmatprep.mubr.msk.bf16.mxu1 %vm571_vm0, %v1597_v7 }
  0x6c   : > { %685 = vmatmul.mubr.bf16.gmra.mxu0 %v1598_v8  ;;  %1492 = vmatmul.mubr.msk.bf16.vlgmr.msra.gmra.mxu1 %vm571_vm0, %v1599_v9 }
  0x6d   : > { %692 = vmatprep.mubr.bf16.mxu0 %v1600_v10  ;;  %1495 = vmatprep.mubr.msk.bf16.mxu1 %vm571_vm0, %v1602_v11 }
  0x74   : > { %693 = vmatmul.mubr.bf16.gmra.mxu0 %v1603_v12  ;;  %1496 = vmatmul.mubr.msk.bf16.gmra.mxu1 %vm571_vm0, %v1604_v13 }
  0x75   : > { %700 = vmatprep.mubr.bf16.mxu0 %v1605_v14  ;;  %1499 = vmatprep.mubr.msk.bf16.mxu1 %vm571_vm0, %v1607_v15  ;;  %v1875_v14 = vld [vmem:[#allocation4] ss:$0 sm:$0xff] }
  0x7c   : > { %701 = vmatmul.mubr.bf16.gmra.mxu0 %v1608_v16  ;;  %1500 = vmatmul.mubr.msk.bf16.gmra.mxu1 %vm571_vm0, %v1609_v17 }
  0x7d   : > { %708 = vmatprep.mubr.bf16.mxu0 %v1610_v18  ;;  %1503 = vmatprep.mubr.msk.bf16.mxu1 %vm571_vm0, %v1612_v19 }
  0x84   : > { %709 = vmatmul.mubr.bf16.gmra.mxu0 %v1613_v20  ;;  %1504 = vmatmul.mubr.msk.bf16.gmra.mxu1 %vm571_vm0, %v1614_v21 }
  0x85   : > { %716 = vmatprep.mubr.bf16.mxu0 %v1615_v22  ;;  %1507 = vmatprep.mubr.msk.bf16.mxu1 %vm571_vm0, %v1617_v23 }
  0x8c   : > { %717 = vmatmul.mubr.bf16.gmra.mxu0 %v1618_v24  ;;  %1508 = vmatmul.mubr.msk.bf16.gmra.mxu1 %vm571_vm0, %v1619_v25 }
  0x8d   : > { %724 = vmatprep.mubr.bf16.mxu0 %v1620_v26  ;;  %1511 = vmatprep.mubr.msk.bf16.mxu1 %vm571_vm0, %v1622_v27 }
  0x94   : > { %725 = vmatmul.mubr.bf16.gmra.mxu0 %v1623_v28  ;;  %1512 = vmatmul.mubr.msk.bf16.gmra.mxu1 %vm571_vm0, %v1624_v29 }
  0x95   : > { %732 = vmatprep.mubr.bf16.mxu0 %v1625_v30  ;;  %1515 = vmatprep.mubr.msk.bf16.mxu1 %vm571_vm0, %v1627_v31 }
  0x9c   : > { %733 = vmatmul.mubr.bf16.gmra.mxu0 %v1628_v32  ;;  %1516 = vmatmul.mubr.msk.bf16.gmra.mxu1 %vm571_vm0, %v1629_v33 }
  0x9d   : > { %740 = vmatprep.mubr.bf16.mxu0 %v1630_v34  ;;  %1519 = vmatprep.mubr.msk.bf16.mxu1 %vm571_vm0, %v1632_v35 }
  0xa4   : > { %741 = vmatmul.mubr.bf16.gmra.mxu0 %v1633_v36  ;;  %1520 = vmatmul.mubr.msk.bf16.gmra.mxu1 %vm571_vm0, %v1634_v37 }
 0x10c   : > { %v1373_v38 = vpop.f32.mrf.mxu0  ;;  %v1445_v39 = vpop.f32.mrf.mxu1 }
 0x10e   : > { %v1374_v40 = vpop.f32.mrf.mxu0  ;;  %v1446_v41 = vpop.f32.mrf.mxu1 }
 0x10f   : > { %v1855_v42 = vadd.f32 %v1446_v41, %v1445_v39  ;;  %v1375_v11 = vadd.f32 %v1374_v40, %v1373_v38 }
 0x110   : > { %v1376_v43 = vpop.f32.mrf.mxu0  ;;  %v1448_v44 = vpop.f32.mrf.mxu1 }
 0x111   : > { %v655_v21 = vadd.f32 %v1375_v11, %v1875_v14 }
 0x112   : > { %v1377_v45 = vpop.f32.mrf.mxu0  ;;  %v1449_v46 = vpop.f32.mrf.mxu1 }
 0x113   : > { %v1857_v47 = vadd.f32 %v1449_v46, %v1448_v44  ;;  %v1378_v17 = vadd.f32 %v1377_v45, %v1376_v43 }
 0x114   : > { %v1379_v48 = vpop.f32.mrf.mxu0  ;;  %v1451_v49 = vpop.f32.mrf.mxu1 }
 0x115   : > { %v658_v30 = vadd.f32 %v1378_v17, %v1875_v14 }
 0x116   : > { %v1380_v50 = vpop.f32.mrf.mxu0  ;;  %v1452_v51 = vpop.f32.mrf.mxu1 }
 0x117   : > { %v1859_v52 = vadd.f32 %v1452_v51, %v1451_v49  ;;  %v1381_v8 = vadd.f32 %v1380_v50, %v1379_v48 }
 0x118   : > { %v1382_v53 = vpop.f32.mrf.mxu0  ;;  %v1454_v54 = vpop.f32.mrf.mxu1 }
 0x119   : > { %v663_v16 = vadd.f32 %v1381_v8, %v1875_v14 }
 0x11a   : > { %v1383_v55 = vpop.f32.mrf.mxu0  ;;  %v1455_v56 = vpop.f32.mrf.mxu1 }
 0x11b   : > { %v1861_v57 = vadd.f32 %v1455_v56, %v1454_v54  ;;  %v1384_v15 = vadd.f32 %v1383_v55, %v1382_v53 }
 0x11c   : > { %v1385_v58 = vpop.f32.mrf.mxu0  ;;  %v1457_v59 = vpop.f32.mrf.mxu1 }
 0x11d   : > { %v666_v27 = vadd.f32 %v1384_v15, %v1875_v14 }
 0x11e   : > { %v1386_v60 = vpop.f32.mrf.mxu0  ;;  %v1458_v61 = vpop.f32.mrf.mxu1 }
 0x11f   : > { %v1863_v62 = vadd.f32 %v1458_v61, %v1457_v59  ;;  %v1387_v31 = vadd.f32 %v1386_v60, %v1385_v58 }
 0x120   : > { %v1388_v63 = vpop.f32.mrf.mxu0  ;;  %v1460_v0 = vpop.f32.mrf.mxu1 }
 0x121   : > { %v671_v50 = vadd.f32 %v1387_v31, %v1875_v14 }
 0x122   : > { %v1389_v1 = vpop.f32.mrf.mxu0  ;;  %v1461_v2 = vpop.f32.mrf.mxu1 }
 0x123   : > { %v1865_v3 = vadd.f32 %v1461_v2, %v1460_v0  ;;  %v1390_v43 = vadd.f32 %v1389_v1, %v1388_v63 }
 0x124   : > { %v1391_v4 = vpop.f32.mrf.mxu0  ;;  %v1867_v5 = vpop.f32.mrf.mxu1 }
 0x125   : > { %v674_v63 = vadd.f32 %v1390_v43, %v1875_v14 }
 0x126   : > { %v1392_v6 = vpop.f32.mrf.mxu0  ;;  %v1869_v7 = vpop.f32.mrf.mxu1 }
 0x127   : > { %v1393_v24 = vadd.f32 %v1392_v6, %v1391_v4 }
 0x128   : > { %v1394_v9 = vpop.f32.mrf.mxu0  ;;  %v1871_v10 = vpop.f32.mrf.mxu1 }
 0x129   : > { %v679_v41 = vadd.f32 %v1393_v24, %v1875_v14 }
 0x12a   : > { %v1395_v12 = vpop.f32.mrf.mxu0  ;;  %v1873_v13 = vpop.f32.mrf.mxu1 }
 0x12b   : > { %v1396_v35 = vadd.f32 %v1395_v12, %v1394_v9 }
 0x12c   : > { %v1397_v18 = vpop.f32.mrf.mxu0  ;;  %v1493_v19 = vpop.f32.mrf.mxu1 }
 0x12d   : > { %v824_v20 = vadd.f32 %v1493_v19, %v663_v16  ;;  %v682_v54 = vadd.f32 %v1396_v35, %v1875_v14 }
 0x12e   : > { %v1398_v22 = vpop.f32.mrf.mxu0  ;;  %v815_v23 = vpop.f32.mrf.mxu1 }
 0x12f   : > { %v944_v25 = vmax.f32 %v824_v20, 0.0  ;;  %v816_v26 = vadd.f32 %v815_v23, %v655_v21  ;;  %v1399_v0 = vadd.f32 %v1398_v22, %v1397_v18 }
 0x130   : > { %v1400_v28 = vpop.f32.mrf.mxu0  ;;  %v1494_v29 = vpop.f32.mrf.mxu1 }
 0x131   : > { %v1327_v32 = vpack.c.bf16 %v944_v25, %v944_v25  ;;  %v942_v33 = vmax.f32 %v816_v26, 0.0  ;;  %v827_v34 = vadd.f32 %v1494_v29, %v666_v27  ;;  %v687_v23 = vadd.f32 %v1399_v0, %v1875_v14 }
 0x132   : > { %v1401_v36 = vpop.f32.mrf.mxu0  ;;  %v818_v37 = vpop.f32.mrf.mxu1 }
 0x133   : > { %1105 = vst.msk [vmem:[%s1884_s11 + $0x8] sm:$0xf] %vm1102_vm1, %v1327_v32  ;;  %v1325_v38 = vpack.c.bf16 %v942_v33, %v942_v33  ;;  %v945_v39 = vmax.f32 %v827_v34, 0.0  ;;  %v819_v40 = vadd.f32 %v818_v37, %v658_v30  ;;  %v1402_v17 = vadd.f32 %v1401_v36, %v1400_v28 }
 0x134   : > { %v1403_v44 = vpop.f32.mrf.mxu0  ;;  %v1497_v45 = vpop.f32.mrf.mxu1 }
 0x135   : > { %1103 = vst.msk [vmem:[%s1884_s11] sm:$0xf] %vm1102_vm1, %v1325_v38  ;;  %v1328_v46 = vpack.c.bf16 %v945_v39, %v945_v39  ;;  %v943_v48 = vmax.f32 %v819_v40, 0.0  ;;  %v840_v49 = vadd.f32 %v1497_v45, %v679_v41  ;;  %v690_v32 = vadd.f32 %v1402_v17, %v1875_v14 }
 0x136   : > { %v1404_v51 = vpop.f32.mrf.mxu0  ;;  %v831_v53 = vpop.f32.mrf.mxu1 }
 0x137   : > { %1106 = vst.msk [vmem:[%s1884_s11 + $0xc] sm:$0xf] %vm1102_vm1, %v1328_v46  ;;  %v1326_v55 = vpack.c.bf16 %v943_v48, %v943_v48  ;;  %v948_v56 = vmax.f32 %v840_v49, 0.0  ;;  %v1405_v58 = vadd.f32 %v1404_v51, %v1403_v44  ;;  %v832_v59 = vadd.f32 %v831_v53, %v671_v50 }
 0x138   : > { %v1406_v60 = vpop.f32.mrf.mxu0  ;;  %v1498_v61 = vpop.f32.mrf.mxu1 }
 0x139   : > { %1104 = vst.msk [vmem:[%s1884_s11 + $0x4] sm:$0xf] %vm1102_vm1, %v1326_v55  ;;  %v1331_v1 = vpack.c.bf16 %v948_v56, %v948_v56  ;;  %v946_v2 = vmax.f32 %v832_v59, 0.0  ;;  %v843_v4 = vadd.f32 %v1498_v61, %v682_v54  ;;  %v695_v9 = vadd.f32 %v1405_v58, %v1875_v14 }
 0x13a   : > { %v1407_v6 = vpop.f32.mrf.mxu0  ;;  %v834_v8 = vpop.f32.mrf.mxu1 }
 0x13b   : > { %1109 = vst.msk [vmem:[%s1884_s11 + $0x18] sm:$0xf] %vm1102_vm1, %v1331_v1  ;;  %v1329_v11 = vpack.c.bf16 %v946_v2, %v946_v2  ;;  %v949_v12 = vmax.f32 %v843_v4, 0.0  ;;  %v1408_v15 = vadd.f32 %v1407_v6, %v1406_v60  ;;  %v835_v16 = vadd.f32 %v834_v8, %v674_v63 }
 0x13c   : > { %v1409_v19 = vpop.f32.mrf.mxu0  ;;  %v1501_v18 = vpop.f32.mrf.mxu1 }
 0x13d   : > { %1107 = vst.msk [vmem:[%s1884_s11 + $0x10] sm:$0xf] %vm1102_vm1, %v1329_v11  ;;  %v1332_v20 = vpack.c.bf16 %v949_v12, %v949_v12  ;;  %v947_v21 = vmax.f32 %v835_v16, 0.0  ;;  %v856_v22 = vadd.f32 %v1501_v18, %v695_v9  ;;  %v698_v28 = vadd.f32 %v1408_v15, %v1875_v14 }
 0x13e   : > { %v1410_v24 = vpop.f32.mrf.mxu0  ;;  %v847_v25 = vpop.f32.mrf.mxu1 }
 0x13f   : > { %1110 = vst.msk [vmem:[%s1884_s11 + $0x1c] sm:$0xf] %vm1102_vm1, %v1332_v20  ;;  %v1330_v26 = vpack.c.bf16 %v947_v21, %v947_v21  ;;  %v952_v27 = vmax.f32 %v856_v22, 0.0  ;;  %v848_v29 = vadd.f32 %v847_v25, %v687_v23  ;;  %v1411_v34 = vadd.f32 %v1410_v24, %v1409_v19 }
 0x140   : > { %v1412_v30 = vpop.f32.mrf.mxu0  ;;  %v1502_v31 = vpop.f32.mrf.mxu1 }
 0x141   : > { %1108 = vst.msk [vmem:[%s1884_s11 + $0x14] sm:$0xf] %vm1102_vm1, %v1330_v26  ;;  %v1335_v33 = vpack.c.bf16 %v952_v27, %v952_v27  ;;  %v950_v35 = vmax.f32 %v848_v29, 0.0  ;;  %v859_v36 = vadd.f32 %v1502_v31, %v698_v28  ;;  %v703_v49 = vadd.f32 %v1411_v34, %v1875_v14 }
 0x142   : > { %v1413_v37 = vpop.f32.mrf.mxu0  ;;  %v850_v38 = vpop.f32.mrf.mxu1 }
 0x143   : > { %1113 = vst.msk [vmem:[%s1884_s11 + $0x28] sm:$0xf] %vm1102_vm1, %v1335_v33  ;;  %v1333_v39 = vpack.c.bf16 %v950_v35, %v950_v35  ;;  %v953_v40 = vmax.f32 %v859_v36, 0.0  ;;  %v851_v41 = vadd.f32 %v850_v38, %v690_v32  ;;  %v1414_v46 = vadd.f32 %v1413_v37, %v1412_v30 }
 0x144   : > { %v1415_v43 = vpop.f32.mrf.mxu0  ;;  %v1505_v44 = vpop.f32.mrf.mxu1 }
 0x145   : > { %1111 = vst.msk [vmem:[%s1884_s11 + $0x20] sm:$0xf] %vm1102_vm1, %v1333_v39  ;;  %v1336_v45 = vpack.c.bf16 %v953_v40, %v953_v40  ;;  %v951_v48 = vmax.f32 %v851_v41, 0.0  ;;  %v706_v61 = vadd.f32 %v1414_v46, %v1875_v14 }
 0x146   : > { %v1416_v50 = vpop.f32.mrf.mxu0  ;;  %v863_v51 = vpop.f32.mrf.mxu1 }
 0x147   : > { %1114 = vst.msk [vmem:[%s1884_s11 + $0x2c] sm:$0xf] %vm1102_vm1, %v1336_v45  ;;  %v1334_v53 = vpack.c.bf16 %v951_v48, %v951_v48  ;;  %v1417_v54 = vadd.f32 %v1416_v50, %v1415_v43  ;;  %v864_v55 = vadd.f32 %v863_v51, %v703_v49  ;;  %v759_v51 = vadd.f32 %v1859_v52, %v1875_v14 }
 0x148   : > { %v1418_v56 = vpop.f32.mrf.mxu0  ;;  %v1506_v58 = vpop.f32.mrf.mxu1  ;;  %v762_v52 = vadd.f32 %v1861_v57, %v1875_v14 }
 0x149   : > { %1112 = vst.msk [vmem:[%s1884_s11 + $0x24] sm:$0xf] %vm1102_vm1, %v1334_v53  ;;  %v711_v59 = vadd.f32 %v1417_v54, %v1875_v14  ;;  %v954_v60 = vmax.f32 %v864_v55, 0.0 }
 0x14a   : > { %v1419_v63 = vpop.f32.mrf.mxu0  ;;  %v866_v0 = vpop.f32.mrf.mxu1 }
 0x14b   : > { %v872_v1 = vadd.f32 %v1505_v44, %v711_v59  ;;  %v1337_v2 = vpack.c.bf16 %v954_v60, %v954_v60  ;;  %v1420_v4 = vadd.f32 %v1419_v63, %v1418_v56  ;;  %v867_v6 = vadd.f32 %v866_v0, %v706_v61 }
 0x14c   : > { %v1421_v8 = vpop.f32.mrf.mxu0  ;;  %v1509_v9 = vpop.f32.mrf.mxu1  ;;  %v1465_v59 = vadd.f32 %v1869_v7, %v1867_v5  ;;  %v751_v61 = vadd.f32 %v1855_v42, %v1875_v14  ;;  %v1468_v42 = vadd.f32 %v1873_v13, %v1871_v10 }
 0x14d   : > { %v956_v11 = vmax.f32 %v872_v1, 0.0  ;;  %1115 = vst.msk [vmem:[%s1884_s11 + $0x30] sm:$0xf] %vm1102_vm1, %v1337_v2  ;;  %v714_v12 = vadd.f32 %v1420_v4, %v1875_v14  ;;  %v955_v15 = vmax.f32 %v867_v6, 0.0 }
 0x14e   : > { %v1422_v16 = vpop.f32.mrf.mxu0  ;;  %v879_v17 = vpop.f32.mrf.mxu1 }
 0x14f   : > { %v1339_v19 = vpack.c.bf16 %v956_v11, %v956_v11  ;;  %v875_v18 = vadd.f32 %v1506_v58, %v714_v12  ;;  %v1338_v20 = vpack.c.bf16 %v955_v15, %v955_v15  ;;  %v1423_v21 = vadd.f32 %v1422_v16, %v1421_v8 }
 0x150   : > { %v1424_v22 = vpop.f32.mrf.mxu0  ;;  %v1510_v23 = vpop.f32.mrf.mxu1  ;;  %v754_v16 = vadd.f32 %v1857_v47, %v1875_v14 }
 0x151   : > { %1117 = vst.msk [vmem:[%s1884_s11 + $0x38] sm:$0xf] %vm1102_vm1, %v1339_v19  ;;  %v957_v24 = vmax.f32 %v875_v18, 0.0  ;;  %1116 = vst.msk [vmem:[%s1884_s11 + $0x34] sm:$0xf] %vm1102_vm1, %v1338_v20  ;;  %v719_v25 = vadd.f32 %v1423_v21, %v1875_v14  ;;  %v775_v19 = vadd.f32 %v1465_v59, %v1875_v14 }
 0x152   : > { %v1425_v26 = vpop.f32.mrf.mxu0  ;;  %v882_v27 = vpop.f32.mrf.mxu1 }
 0x153   : > { %v1340_v29 = vpack.c.bf16 %v957_v24, %v957_v24  ;;  %v880_v28 = vadd.f32 %v879_v17, %v719_v25  ;;  %v1426_v30 = vadd.f32 %v1425_v26, %v1424_v22 }
 0x154   : > { %v1427_v31 = vpop.f32.mrf.mxu0  ;;  %v1930_v32 = vpop.f32.mrf.mxu1 }
 0x155   : > { %1118 = vst.msk [vmem:[%s1884_s11 + $0x3c] sm:$0xf] %vm1102_vm1, %v1340_v29  ;;  %v958_v33 = vmax.f32 %v880_v28, 0.0  ;;  %v722_v34 = vadd.f32 %v1426_v30, %v1875_v14  ;;  %v767_v30 = vadd.f32 %v1863_v62, %v1875_v14 }
 0x156   : > { %v1428_v35 = vpop.f32.mrf.mxu0  ;;  %v895_v36 = vpop.f32.mrf.mxu1 }
 0x157   : > { %v1341_v37 = vpack.c.bf16 %v958_v33, %v958_v33  ;;  %v883_v38 = vadd.f32 %v882_v27, %v722_v34  ;;  %v1429_v39 = vadd.f32 %v1428_v35, %v1427_v31  ;;  %v778_v33 = vadd.f32 %v1468_v42, %v1875_v14 }
 0x158   : > { %v1430_v40 = vpop.f32.mrf.mxu0  ;;  %v1935_v41 = vpop.f32.mrf.mxu1 }
 0x159   : > { %1119 = vst.msk [vmem:[%s1884_s11 + $0x40] sm:$0xf] %vm1102_vm1, %v1341_v37  ;;  %v959_v43 = vmax.f32 %v883_v38, 0.0  ;;  %v727_v44 = vadd.f32 %v1429_v39, %v1875_v14 }
 0x15a   : > { %v1431_v45 = vpop.f32.mrf.mxu0  ;;  %v898_v46 = vpop.f32.mrf.mxu1 }
 0x15b   : > { %v1342_v48 = vpack.c.bf16 %v959_v43, %v959_v43  ;;  %v888_v49 = vadd.f32 %v1509_v9, %v727_v44  ;;  %v1432_v50 = vadd.f32 %v1431_v45, %v1430_v40 }
 0x15c   : > { %v1433_v53 = vpop.f32.mrf.mxu0  ;;  %v1517_v54 = vpop.f32.mrf.mxu1 }
 0x15d   : > { %1120 = vst.msk [vmem:[%s1884_s11 + $0x44] sm:$0xf] %vm1102_vm1, %v1342_v48  ;;  %v960_v55 = vmax.f32 %v888_v49, 0.0  ;;  %v730_v56 = vadd.f32 %v1432_v50, %v1875_v14  ;;  %v920_v58 = vadd.f32 %v1517_v54, %v759_v51  ;;  %v770_v50 = vadd.f32 %v1865_v3, %v1875_v14 }
 0x15e   : > { %v1434_v60 = vpop.f32.mrf.mxu0  ;;  %v911_v63 = vpop.f32.mrf.mxu1 }
 0x15f   : > { %v1343_v0 = vpack.c.bf16 %v960_v55, %v960_v55  ;;  %v891_v1 = vadd.f32 %v1510_v23, %v730_v56  ;;  %v968_v2 = vmax.f32 %v920_v58, 0.0  ;;  %v1435_v4 = vadd.f32 %v1434_v60, %v1433_v53 }
 0x160   : > { %v912_v6 = vadd.f32 %v911_v63, %v751_v61  ;;  %v1436_v8 = vpop.f32.mrf.mxu0  ;;  %v1518_v9 = vpop.f32.mrf.mxu1 }
 0x161   : > { %1121 = vst.msk [vmem:[%s1884_s11 + $0x48] sm:$0xf] %vm1102_vm1, %v1343_v0  ;;  %v961_v11 = vmax.f32 %v891_v1, 0.0  ;;  %v1351_v5 = vpack.c.bf16 %v968_v2, %v968_v2  ;;  %v735_v7 = vadd.f32 %v1435_v4, %v1875_v14  ;;  %v923_v12 = vadd.f32 %v1518_v9, %v762_v52 }
 0x162   : > { %v966_v57 = vmax.f32 %v912_v6, 0.0  ;;  %v1437_v15 = vpop.f32.mrf.mxu0  ;;  %v914_v17 = vpop.f32.mrf.mxu1 }
 0x163   : > { %v1344_v18 = vpack.c.bf16 %v961_v11, %v961_v11  ;;  %1129 = vst.msk [vmem:[%s1884_s11 + $0x68] sm:$0xf] %vm1102_vm1, %v1351_v5  ;;  %v896_v20 = vadd.f32 %v895_v36, %v735_v7  ;;  %v969_v21 = vmax.f32 %v923_v12, 0.0  ;;  %v1438_v22 = vadd.f32 %v1437_v15, %v1436_v8 }
 0x164   : > { %v1349_v23 = vpack.c.bf16 %v966_v57, %v966_v57  ;;  %v915_v24 = vadd.f32 %v914_v17, %v754_v16  ;;  %v1439_v25 = vpop.f32.mrf.mxu0  ;;  %v1521_v10 = vpop.f32.mrf.mxu1 }
 0x165   : > { %1122 = vst.msk [vmem:[%s1884_s11 + $0x4c] sm:$0xf] %vm1102_vm1, %v1344_v18  ;;  %v962_v13 = vmax.f32 %v896_v20, 0.0  ;;  %v1352_v26 = vpack.c.bf16 %v969_v21, %v969_v21  ;;  %v738_v47 = vadd.f32 %v1438_v22, %v1875_v14  ;;  %v936_v27 = vadd.f32 %v1521_v10, %v775_v19 }
 0x166   : > { %1127 = vst.msk [vmem:[%s1884_s11 + $0x60] sm:$0xf] %vm1102_vm1, %v1349_v23  ;;  %v967_v29 = vmax.f32 %v915_v24, 0.0  ;;  %v1440_v28 = vpop.f32.mrf.mxu0  ;;  %v927_v31 = vpop.f32.mrf.mxu1 }
 0x167   : > { %v1345_v34 = vpack.c.bf16 %v962_v13, %v962_v13  ;;  %1130 = vst.msk [vmem:[%s1884_s11 + $0x6c] sm:$0xf] %vm1102_vm1, %v1352_v26  ;;  %v899_v35 = vadd.f32 %v898_v46, %v738_v47  ;;  %v972_v36 = vmax.f32 %v936_v27, 0.0  ;;  %v1441_v37 = vadd.f32 %v1440_v28, %v1439_v25 }
 0x168   : > { %v1350_v38 = vpack.c.bf16 %v967_v29, %v967_v29  ;;  %v928_v39 = vadd.f32 %v927_v31, %v767_v30  ;;  %v1442_v40 = vpop.f32.mrf.mxu0  ;;  %v1522_v43 = vpop.f32.mrf.mxu1 }
 0x169   : > { %1123 = vst.msk [vmem:[%s1884_s11 + $0x50] sm:$0xf] %vm1102_vm1, %v1345_v34  ;;  %v963_v44 = vmax.f32 %v899_v35, 0.0  ;;  %v1355_v62 = vpack.c.bf16 %v972_v36, %v972_v36  ;;  %v743_v45 = vadd.f32 %v1441_v37, %v1875_v14  ;;  %v939_v48 = vadd.f32 %v1522_v43, %v778_v33 }
 0x16a   : > { %1128 = vst.msk [vmem:[%s1884_s11 + $0x64] sm:$0xf] %vm1102_vm1, %v1350_v38  ;;  %v970_v49 = vmax.f32 %v928_v39, 0.0  ;;  %v1443_v46 = vpop.f32.mrf.mxu0  ;;  %v930_v51 = vpop.f32.mrf.mxu1 }
 0x16b   : > { %v1346_v53 = vpack.c.bf16 %v963_v44, %v963_v44  ;;  %1133 = vst.msk [vmem:[%s1884_s11 + $0x78] sm:$0xf] %vm1102_vm1, %v1355_v62  ;;  %v904_v54 = vadd.f32 %v1930_v32, %v743_v45  ;;  %v973_v55 = vmax.f32 %v939_v48, 0.0  ;;  %v1444_v56 = vadd.f32 %v1443_v46, %v1442_v40 }
 0x16c   : > { %v1353_v58 = vpack.c.bf16 %v970_v49, %v970_v49  ;;  %v931_v59 = vadd.f32 %v930_v51, %v770_v50 }
 0x16d   : > { %1124 = vst.msk [vmem:[%s1884_s11 + $0x54] sm:$0xf] %vm1102_vm1, %v1346_v53  ;;  %v964_v60 = vmax.f32 %v904_v54, 0.0  ;;  %v1356_v61 = vpack.c.bf16 %v973_v55, %v973_v55  ;;  %v746_v3 = vadd.f32 %v1444_v56, %v1875_v14 }
 0x16e   : > { %1131 = vst.msk [vmem:[%s1884_s11 + $0x70] sm:$0xf] %vm1102_vm1, %v1353_v58  ;;  %v971_v63 = vmax.f32 %v931_v59, 0.0 }
 0x16f   : > { %v1347_v52 = vpack.c.bf16 %v964_v60, %v964_v60  ;;  %1134 = vst.msk [vmem:[%s1884_s11 + $0x7c] sm:$0xf] %vm1102_vm1, %v1356_v61  ;;  %v907_v32 = vadd.f32 %v1935_v41, %v746_v3 }
 0x170   : > { %v1354_v0 = vpack.c.bf16 %v971_v63, %v971_v63 }
 0x171   : > { %1125 = vst.msk [vmem:[%s1884_s11 + $0x58] sm:$0xf] %vm1102_vm1, %v1347_v52  ;;  %v965_v1 = vmax.f32 %v907_v32, 0.0 }
 0x172   : > { %1132 = vst.msk [vmem:[%s1884_s11 + $0x74] sm:$0xf] %vm1102_vm1, %v1354_v0 }
 0x173   : > { %v1348_v2 = vpack.c.bf16 %v965_v1, %v965_v1 }
 0x175   : > { %1126 = vst.msk [vmem:[%s1884_s11 + $0x5c] sm:$0xf] %vm1102_vm1, %v1348_v2 }
 0x176 PF: > { %s15_s12 = sadd.s32 1, %s1701_s12  }
 0x177   : > { %p12_p2 = scmp.ge.s32.totalorder %s15_s12, 4  }
 0x179   :  { %14 = sbr.rel (!%p12_p2) target bundleno = 2 (0x2), region = 71 }
 0x17e   :  { %1157 = vsyncpa [#allocation3], 1 }
 0x17f   :  { %1159 = vsyncpa [#allocation3 + $0x1], 1 }
 0x180   :  { %1160 = vsyncpa [#allocation5], 1 }

// kernel: forward.15
= control target key start
LH: loop header
LB: loop body
LE: loop exit
PB: predicated region body
PF: predicated region fallthrough
CT: control target
= control target key end

     0   :  { %s753_s12 = smov 0   ;;  %s923_s0 = inlined_call_operand.vmem [shape: bf16[512,32], index: 0, kind: input, shape index: {}]   ;;  %s924_s1 = inlined_call_operand.vmem [shape: f32[32,5], index: 1, kind: input, shape index: {}]   ;;  %s925_s2 = inlined_call_operand.vmem [shape: f32[1,5], index: 2, kind: input, shape index: {}]   ;;  %s926_s3 = inlined_call_operand.vmem [shape: f32[512,5], index: 3, kind: output, shape index: {}]  }
   0x1 LB: > { %s599_s13 = sadd.s32 4294967295, %s731_s12   ;;  %p603_p0 = scmp.ge.s32.totalorder %s731_s12, 1  ;;  %s731_s12 = sphi %s753_s12, %s13_s12  }
   0x2   : > { %p138_p1 = scmp.lt.s32.totalorder %s731_s12, 3 }
   0x4   : > { %p139_p2 = pnand %p603_p0, %p138_p1 }
   0x5   : > { %s604_s20 = sshll.u32 (!%p139_p2), %s599_s13, 5 }
   0x6   : > { %142 = sbr.rel (%p139_p2) target bundleno = 248 (0xf8), region = 32  ;;  %p163_p3 = scmp.lt.s32.totalorder (!%p139_p2), %s604_s20, 63 }
   0xb   : > { %v209_v0 = vld [vmem:[%s924_s1 + $0x10] sm:$0xff]  ;;  %v210_v1 = vld [vmem:[%s924_s1 + $0x18] sm:$0xff]  ;;  %v207_v2 = vld [vmem:[%s924_s1] sm:$0xff]  ;;  %s928_s20 = smov (!%p163_p3, %s604_s20), 63  ;;  %vm300_vm0 = vcmask 261120   ;;  %vm510_vm1 = vcmask 39936  }
   0xc   : > { %v212_v3 = vpack.c.bf16 %v210_v1, %v209_v0  ;;  %v208_v4 = vld [vmem:[%s924_s1 + $0x8] sm:$0xff]  ;;  %s605_s23 = sshll.u32 %s928_s20, 2  ;;  %s607_s27 = sshll.u32 %s928_s20, 3  ;;  %v817_v22 = vld [vmem:[%s925_s2] ss:$0 sm:$0xff] }
   0xd   : > { %v211_v5 = vpack.c.bf16 %v208_v4, %v207_v2  ;;  %s779_s26 = scalar_lea.vmem %s923_s0, %s605_s23  ;;  %s822_s5 = scalar_lea.vmem %s926_s3, %s607_s27 }
   0xe   : > { %661 = vmatprep.subr.bf16.mxu0 %v212_v3  ;;  %697 = vmatprep.subr.bf16.mxu1 %v212_v3  ;;  %v709_v6 = vld [vmem:[%s779_s26] sm:$0xff]   ;;  %v711_v8 = vld [vmem:[%s779_s26 + $0x8] sm:$0xff]   ;;  %v713_v10 = vld [vmem:[%s779_s26 + $0x10] sm:$0xff]  }
   0xf   : > { %662 = vmatpush3.bf16.msra.mxu0 %v212_v3  ;;  %699 = vmatpush3.bf16.msra.mxu1 %v212_v3  ;;  %v710_v7 = vld [vmem:[%s779_s26 + $0x40] sm:$0xff]   ;;  %v712_v9 = vld [vmem:[%s779_s26 + $0x48] sm:$0xff]   ;;  %v714_v11 = vld [vmem:[%s779_s26 + $0x50] sm:$0xff]  }
  0x10   : > { %663 = vmatprep.subr.bf16.mxu0 %v211_v5  ;;  %698 = vmatprep.subr.bf16.mxu1 %v211_v5  ;;  %v715_v12 = vld [vmem:[%s779_s26 + $0x18] sm:$0xff]   ;;  %v717_v14 = vld [vmem:[%s779_s26 + $0x20] sm:$0xff]   ;;  %v719_v16 = vld [vmem:[%s779_s26 + $0x28] sm:$0xff]  }
  0x11   : > { %665 = vmatprep.mubr.msk.bf16.mxu0 %vm300_vm0, %v709_v6  ;;  %681 = vmatprep.mubr.msk.bf16.mxu1 %vm300_vm0, %v710_v7  ;;  %v716_v13 = vld [vmem:[%s779_s26 + $0x58] sm:$0xff]   ;;  %v718_v15 = vld [vmem:[%s779_s26 + $0x60] sm:$0xff]   ;;  %v720_v17 = vld [vmem:[%s779_s26 + $0x68] sm:$0xff]  }
  0x12   : > { %v721_v18 = vld [vmem:[%s779_s26 + $0x30] sm:$0xff]   ;;  %v723_v20 = vld [vmem:[%s779_s26 + $0x38] sm:$0xff]  }
  0x13   : > { %664 = vmatpush3.bf16.msra.mxu0 %v211_v5  ;;  %700 = vmatpush3.bf16.msra.mxu1 %v211_v5  ;;  %v722_v19 = vld [vmem:[%s779_s26 + $0x70] sm:$0xff]   ;;  %v724_v21 = vld [vmem:[%s779_s26 + $0x78] sm:$0xff]  }
  0x16   : > { %666 = vmatmul.mubr.msk.bf16.vlgmr.msra.gmra.mxu0 %vm300_vm0, %v711_v8  ;;  %682 = vmatmul.mubr.msk.bf16.vlgmr.msra.gmra.mxu1 %vm300_vm0, %v712_v9 }
  0x17   : > { %669 = vmatprep.mubr.msk.bf16.mxu0 %vm300_vm0, %v713_v10  ;;  %685 = vmatprep.mubr.msk.bf16.mxu1 %vm300_vm0, %v714_v11 }
  0x1e   : > { %670 = vmatmul.mubr.msk.bf16.gmra.mxu0 %vm300_vm0, %v715_v12  ;;  %686 = vmatmul.mubr.msk.bf16.gmra.mxu1 %vm300_vm0, %v716_v13 }
  0x1f   : > { %673 = vmatprep.mubr.msk.bf16.mxu0 %vm300_vm0, %v717_v14  ;;  %689 = vmatprep.mubr.msk.bf16.mxu1 %vm300_vm0, %v718_v15 }
  0x26   : > { %674 = vmatmul.mubr.msk.bf16.gmra.mxu0 %vm300_vm0, %v719_v16  ;;  %690 = vmatmul.mubr.msk.bf16.gmra.mxu1 %vm300_vm0, %v720_v17 }
  0x27   : > { %677 = vmatprep.mubr.msk.bf16.mxu0 %vm300_vm0, %v721_v18  ;;  %693 = vmatprep.mubr.msk.bf16.mxu1 %vm300_vm0, %v722_v19 }
  0x2e   : > { %678 = vmatmul.mubr.msk.bf16.gmra.mxu0 %vm300_vm0, %v723_v20  ;;  %694 = vmatmul.mubr.msk.bf16.gmra.mxu1 %vm300_vm0, %v724_v21 }
  0xd6   : > { %v667_v23 = vpop.f32.mrf.mxu0  ;;  %v683_v25 = vpop.f32.mrf.mxu1 }
  0xd7   : > { %v392_v24 = vadd.f32 %v667_v23, %v817_v22  ;;  %v456_v26 = vadd.f32 %v683_v25, %v817_v22 }
  0xd8   : > { %v383_v27 = vpop.f32.mrf.mxu0  ;;  %v447_v29 = vpop.f32.mrf.mxu1 }
  0xd9   : > { %513 = vst.msk [vmem:[%s822_s5 + $0x10] sm:$0xff] %vm510_vm1, %v392_v24  ;;  %v384_v28 = vadd.f32 %v817_v22, %v383_v27  ;;  %529 = vst.msk [vmem:[%s822_s5 + $0x90] sm:$0xff] %vm510_vm1, %v456_v26  ;;  %v448_v30 = vadd.f32 %v817_v22, %v447_v29 }
  0xda   : > { %v668_v31 = vpop.f32.mrf.mxu0  ;;  %v684_v33 = vpop.f32.mrf.mxu1 }
  0xdb   : > { %511 = vst.msk [vmem:[%s822_s5] sm:$0xff] %vm510_vm1, %v384_v28  ;;  %v395_v32 = vadd.f32 %v668_v31, %v817_v22  ;;  %527 = vst.msk [vmem:[%s822_s5 + $0x80] sm:$0xff] %vm510_vm1, %v448_v30  ;;  %v459_v34 = vadd.f32 %v684_v33, %v817_v22 }
  0xdc   : > { %v386_v35 = vpop.f32.mrf.mxu0  ;;  %v450_v37 = vpop.f32.mrf.mxu1 }
  0xdd   : > { %514 = vst.msk [vmem:[%s822_s5 + $0x18] sm:$0xff] %vm510_vm1, %v395_v32  ;;  %v387_v36 = vadd.f32 %v817_v22, %v386_v35  ;;  %530 = vst.msk [vmem:[%s822_s5 + $0x98] sm:$0xff] %vm510_vm1, %v459_v34  ;;  %v451_v38 = vadd.f32 %v817_v22, %v450_v37 }
  0xde   : > { %v671_v39 = vpop.f32.mrf.mxu0  ;;  %v687_v41 = vpop.f32.mrf.mxu1 }
  0xdf   : > { %512 = vst.msk [vmem:[%s822_s5 + $0x8] sm:$0xff] %vm510_vm1, %v387_v36  ;;  %v408_v40 = vadd.f32 %v671_v39, %v817_v22  ;;  %528 = vst.msk [vmem:[%s822_s5 + $0x88] sm:$0xff] %vm510_vm1, %v451_v38  ;;  %v472_v42 = vadd.f32 %v687_v41, %v817_v22 }
  0xe0   : > { %v399_v43 = vpop.f32.mrf.mxu0  ;;  %v463_v45 = vpop.f32.mrf.mxu1 }
  0xe1   : > { %517 = vst.msk [vmem:[%s822_s5 + $0x30] sm:$0xff] %vm510_vm1, %v408_v40  ;;  %v400_v44 = vadd.f32 %v817_v22, %v399_v43  ;;  %533 = vst.msk [vmem:[%s822_s5 + $0xb0] sm:$0xff] %vm510_vm1, %v472_v42  ;;  %v464_v46 = vadd.f32 %v817_v22, %v463_v45 }
  0xe2   : > { %v672_v47 = vpop.f32.mrf.mxu0  ;;  %v688_v49 = vpop.f32.mrf.mxu1 }
  0xe3   : > { %515 = vst.msk [vmem:[%s822_s5 + $0x20] sm:$0xff] %vm510_vm1, %v400_v44  ;;  %v411_v48 = vadd.f32 %v672_v47, %v817_v22  ;;  %531 = vst.msk [vmem:[%s822_s5 + $0xa0] sm:$0xff] %vm510_vm1, %v464_v46  ;;  %v475_v50 = vadd.f32 %v688_v49, %v817_v22 }
  0xe4   : > { %v402_v51 = vpop.f32.mrf.mxu0  ;;  %v466_v53 = vpop.f32.mrf.mxu1 }
  0xe5   : > { %518 = vst.msk [vmem:[%s822_s5 + $0x38] sm:$0xff] %vm510_vm1, %v411_v48  ;;  %v403_v52 = vadd.f32 %v817_v22, %v402_v51  ;;  %534 = vst.msk [vmem:[%s822_s5 + $0xb8] sm:$0xff] %vm510_vm1, %v475_v50  ;;  %v467_v54 = vadd.f32 %v817_v22, %v466_v53 }
  0xe6   : > { %v675_v55 = vpop.f32.mrf.mxu0  ;;  %v691_v57 = vpop.f32.mrf.mxu1 }
  0xe7   : > { %516 = vst.msk [vmem:[%s822_s5 + $0x28] sm:$0xff] %vm510_vm1, %v403_v52  ;;  %v424_v56 = vadd.f32 %v675_v55, %v817_v22  ;;  %532 = vst.msk [vmem:[%s822_s5 + $0xa8] sm:$0xff] %vm510_vm1, %v467_v54  ;;  %v488_v58 = vadd.f32 %v691_v57, %v817_v22 }
  0xe8   : > { %v415_v59 = vpop.f32.mrf.mxu0  ;;  %v479_v61 = vpop.f32.mrf.mxu1 }
  0xe9   : > { %521 = vst.msk [vmem:[%s822_s5 + $0x50] sm:$0xff] %vm510_vm1, %v424_v56  ;;  %v416_v60 = vadd.f32 %v817_v22, %v415_v59  ;;  %537 = vst.msk [vmem:[%s822_s5 + $0xd0] sm:$0xff] %vm510_vm1, %v488_v58  ;;  %v480_v62 = vadd.f32 %v817_v22, %v479_v61 }
  0xea   : > { %v676_v63 = vpop.f32.mrf.mxu0  ;;  %v692_v1 = vpop.f32.mrf.mxu1 }
  0xeb   : > { %519 = vst.msk [vmem:[%s822_s5 + $0x40] sm:$0xff] %vm510_vm1, %v416_v60  ;;  %v427_v0 = vadd.f32 %v676_v63, %v817_v22  ;;  %535 = vst.msk [vmem:[%s822_s5 + $0xc0] sm:$0xff] %vm510_vm1, %v480_v62  ;;  %v491_v2 = vadd.f32 %v692_v1, %v817_v22 }
  0xec   : > { %v418_v3 = vpop.f32.mrf.mxu0  ;;  %v482_v5 = vpop.f32.mrf.mxu1 }
  0xed   : > { %522 = vst.msk [vmem:[%s822_s5 + $0x58] sm:$0xff] %vm510_vm1, %v427_v0  ;;  %v419_v4 = vadd.f32 %v817_v22, %v418_v3  ;;  %538 = vst.msk [vmem:[%s822_s5 + $0xd8] sm:$0xff] %vm510_vm1, %v491_v2  ;;  %v483_v6 = vadd.f32 %v817_v22, %v482_v5 }
  0xee   : > { %v679_v7 = vpop.f32.mrf.mxu0  ;;  %v695_v9 = vpop.f32.mrf.mxu1 }
  0xef   : > { %520 = vst.msk [vmem:[%s822_s5 + $0x48] sm:$0xff] %vm510_vm1, %v419_v4  ;;  %v440_v8 = vadd.f32 %v679_v7, %v817_v22  ;;  %536 = vst.msk [vmem:[%s822_s5 + $0xc8] sm:$0xff] %vm510_vm1, %v483_v6  ;;  %v504_v10 = vadd.f32 %v695_v9, %v817_v22 }
  0xf0   : > { %v431_v11 = vpop.f32.mrf.mxu0  ;;  %v495_v13 = vpop.f32.mrf.mxu1 }
  0xf1   : > { %525 = vst.msk [vmem:[%s822_s5 + $0x70] sm:$0xff] %vm510_vm1, %v440_v8  ;;  %v432_v12 = vadd.f32 %v817_v22, %v431_v11  ;;  %541 = vst.msk [vmem:[%s822_s5 + $0xf0] sm:$0xff] %vm510_vm1, %v504_v10  ;;  %v496_v14 = vadd.f32 %v817_v22, %v495_v13 }
  0xf2   : > { %v680_v15 = vpop.f32.mrf.mxu0  ;;  %v696_v17 = vpop.f32.mrf.mxu1 }
  0xf3   : > { %523 = vst.msk [vmem:[%s822_s5 + $0x60] sm:$0xff] %vm510_vm1, %v432_v12  ;;  %v443_v16 = vadd.f32 %v680_v15, %v817_v22  ;;  %539 = vst.msk [vmem:[%s822_s5 + $0xe0] sm:$0xff] %vm510_vm1, %v496_v14  ;;  %v507_v18 = vadd.f32 %v696_v17, %v817_v22 }
  0xf4   : > { %v434_v19 = vpop.f32.mrf.mxu0  ;;  %v498_v21 = vpop.f32.mrf.mxu1 }
  0xf5   : > { %526 = vst.msk [vmem:[%s822_s5 + $0x78] sm:$0xff] %vm510_vm1, %v443_v16  ;;  %v435_v20 = vadd.f32 %v817_v22, %v434_v19  ;;  %542 = vst.msk [vmem:[%s822_s5 + $0xf8] sm:$0xff] %vm510_vm1, %v507_v18  ;;  %v499_v23 = vadd.f32 %v817_v22, %v498_v21 }
  0xf7   : > { %524 = vst.msk [vmem:[%s822_s5 + $0x68] sm:$0xff] %vm510_vm1, %v435_v20  ;;  %540 = vst.msk [vmem:[%s822_s5 + $0xe8] sm:$0xff] %vm510_vm1, %v499_v23 }
  0xf8 PF: > { %s13_s12 = sadd.s32 1, %s731_s12  }
  0xf9   : > { %p10_p4 = scmp.ge.s32.totalorder %s13_s12, 4  }
  0xfb   :  { %12 = sbr.rel (!%p10_p4) target bundleno = 1 (0x1), region = 62 }

// kernel: squeeze.7
= control target key start
LH: loop header
LB: loop body
LE: loop exit
PB: predicated region body
PF: predicated region fallthrough
CT: control target
= control target key end

     0   :  { %s8_s6 = smov 3  ;;  %s11_s7 = smov 12  ;;  %vm13_vm0 = vcmask 1043458   ;;  %vm3_vm1 = vcmask 130048   ;;  %vm17_vm2 = vcmask 1048448   ;;  %vm31_vm3 = vcmask 917248   ;;  %s216_s0 = inlined_call_operand.vmem [shape: f32[2,16,16], index: 0, kind: input, shape index: {}]   ;;  %s217_s1 = inlined_call_operand.vmem [shape: f32[2,256], index: 1, kind: output, shape index: {}]  }
   0x1   :  { %v119_v0 = vld [vmem:[%s216_s0 + $0x7] ss:$16 sm:%s8_s6]   ;;  %v120_v1 = vld [vmem:[%s216_s0 - $0x11] ss:$16 sm:%s11_s7]   ;;  %s36_s12 = smov 3  ;;  %s39_s15 = smov 12 }
   0x2   :  { %v14_v2 = vsel %vm13_vm0, %v120_v1, %v119_v0  ;;  %v123_v3 = vld [vmem:[%s216_s0 + $0x5] ss:$16 sm:%s36_s12]   ;;  %s141_s16 = smov 112   ;;  %v124_v4 = vld [vmem:[%s216_s0 - $0x13] ss:$16 sm:%s39_s15]   ;;  %s22_s19 = smov 3 }
   0x3   :  { %15 = vrot.lane.b32.xlu0 %v14_v2, %s141_s16  ;;  %s25_s20 = smov 12  ;;  %v42_v5 = vsel %vm13_vm0, %v124_v4, %v123_v3  ;;  %v121_v6 = vld [vmem:[%s216_s0 + $0x6] ss:$16 sm:%s22_s19]   ;;  %s50_s25 = smov 3  ;;  %vm45_vm4 = vcmask 786048   ;;  %vm59_vm5 = vcmask 654848  }
   0x4   :  { %v122_v7 = vld [vmem:[%s216_s0 - $0x12] ss:$16 sm:%s25_s20]   ;;  %s142_s26 = smov 80   ;;  %v125_v9 = vld [vmem:[%s216_s0 + $0x4] ss:$16 sm:%s50_s25]   ;;  %s53_s29 = smov 12 }
   0x5   :  { %43 = vrot.lane.b32.xlu1 %v42_v5, %s142_s26  ;;  %v28_v8 = vsel %vm13_vm0, %v122_v7, %v121_v6  ;;  %v126_v10 = vld [vmem:[%s216_s0 - $0x14] ss:$16 sm:%s53_s29]   ;;  %s64_s3 = smov 3  ;;  %s67_s4 = smov 12  ;;  %vm73_vm6 = vcmask 523648   ;;  %vm87_vm7 = vcmask 392448  }
   0x6   :  { %s143_s5 = smov 96   ;;  %v56_v11 = vsel %vm13_vm0, %v126_v10, %v125_v9  ;;  %v127_v12 = vld [vmem:[%s216_s0 + $0x3] ss:$16 sm:%s64_s3]   ;;  %s78_s8 = smov 3  ;;  %v128_v13 = vld [vmem:[%s216_s0 - $0x15] ss:$16 sm:%s67_s4]  }
   0x7   :  { %29 = vrot.lane.b32.xlu0 %v28_v8, %s143_s5  ;;  %v129_v14 = vld [vmem:[%s216_s0 + $0x2] ss:$16 sm:%s78_s8]   ;;  %s81_s13 = smov 12  ;;  %s144_s14 = smov 64   ;;  %v70_v15 = vsel %vm13_vm0, %v128_v13, %v127_v12  ;;  %vm101_vm8 = vcmask 261248  }
   0x8   :  { %v130_v16 = vld [vmem:[%s216_s0 - $0x16] ss:$16 sm:%s81_s13]   ;;  %s92_s17 = smov 3  ;;  %s95_s18 = smov 12 }
   0x9   :  { %57 = vrot.lane.b32.xlu1 %v56_v11, %s144_s14  ;;  %v84_v17 = vsel %vm13_vm0, %v130_v16, %v129_v14  ;;  %v131_v18 = vld [vmem:[%s216_s0 + $0x1] ss:$16 sm:%s92_s17]   ;;  %s145_s23 = smov 48   ;;  %v2_v20 = vld [vmem:[%s216_s0] ss:$8 sm:$0xf]  }
   0xa   :  { %v132_v19 = vld [vmem:[%s216_s0 - $0x17] ss:$16 sm:%s95_s18]   ;;  %4 = vst.msk [vmem:[#allocation0] ss:$8 sm:$0x3] %vm3_vm1, %v2_v20   ;;  %s146_s0 = smov 32  }
   0xb   :  { %71 = vrot.lane.b32.xlu0 %v70_v15, %s145_s23  ;;  %v98_v21 = vsel %vm13_vm0, %v132_v19, %v131_v18  ;;  %6 = vst.msk [vmem:[#allocation0 - $0xf] ss:$8 sm:$0xc] %vm3_vm1, %v2_v20   ;;  %s147_s26 = smov 16  }
   0xd   :  { %85 = vrot.lane.b32.xlu1 %v84_v17, %s146_s0 }
   0xf   :  { %99 = vrot.lane.b32.xlu0 %v98_v21, %s147_s26 }
  0x75   :  { %v16_v22 = vpop.permute.xlu0 %15  }
  0x76   :  { %18 = vst.msk [vmem:[#allocation0] sm:$0x3] %vm17_vm2, %v16_v22   ;;  %20 = vst.msk [vmem:[#allocation0 + $0x6] sm:$0xc] %vm17_vm2, %v16_v22  }
  0x77   :  { %v44_v23 = vpop.permute.xlu1 %43  }
  0x79   :  { %v30_v24 = vpop.permute.xlu0 %29  }
  0x7a   :  { %32 = vst.msk [vmem:[#allocation0] sm:$0x3] %vm31_vm3, %v30_v24   ;;  %34 = vst.msk [vmem:[#allocation0 + $0x6] sm:$0xc] %vm31_vm3, %v30_v24  }
  0x7b   :  { %46 = vst.msk [vmem:[#allocation0] sm:$0x3] %vm45_vm4, %v44_v23   ;;  %48 = vst.msk [vmem:[#allocation0 + $0x6] sm:$0xc] %vm45_vm4, %v44_v23   ;;  %v58_v25 = vpop.permute.xlu1 %57  }
  0x7c   :  { %60 = vst.msk [vmem:[#allocation0] sm:$0x3] %vm59_vm5, %v58_v25   ;;  %62 = vst.msk [vmem:[#allocation0 + $0x6] sm:$0xc] %vm59_vm5, %v58_v25  }
  0x7d   :  { %v72_v26 = vpop.permute.xlu0 %71  }
  0x7e   :  { %74 = vst.msk [vmem:[#allocation0] sm:$0x3] %vm73_vm6, %v72_v26   ;;  %76 = vst.msk [vmem:[#allocation0 + $0x6] sm:$0xc] %vm73_vm6, %v72_v26  }
  0x7f   :  { %v86_v27 = vpop.permute.xlu1 %85  }
  0x80   :  { %88 = vst.msk [vmem:[#allocation0] sm:$0x3] %vm87_vm7, %v86_v27   ;;  %90 = vst.msk [vmem:[#allocation0 + $0x6] sm:$0xc] %vm87_vm7, %v86_v27  }
  0x81   :  { %v100_v28 = vpop.permute.xlu0 %99  }
  0x82   :  { %102 = vst.msk [vmem:[#allocation0] sm:$0x3] %vm101_vm8, %v100_v28   ;;  %104 = vst.msk [vmem:[#allocation0 + $0x6] sm:$0xc] %vm101_vm8, %v100_v28  }
  0x89   :  { %v109_v29 = vld [vmem:[#allocation0] sm:$0x3]  ;;  %v114_v30 = vld [vmem:[#allocation0 + $0x8] sm:$0x3] }
  0x8a   :  { %112 = vst [vmem:[%s217_s1] sm:$0x3] %v109_v29  ;;  %133 = vst [vmem:[%s217_s1 + $0x2] sm:$0x3] %v114_v30 }

// kernel: forward.16
= control target key start
LH: loop header
LB: loop body
LE: loop exit
PB: predicated region body
PF: predicated region fallthrough
CT: control target
= control target key end

     0   :  { %v79_v23 = vlaneseq  ;;  %vm161_vm0 = vcmask 1040384   ;;  %vm166_vm1 = vcmask 1041408   ;;  %vm171_vm2 = vcmask 1042432   ;;  %s243_s0 = inlined_call_operand.vmem [shape: f32[4,512], index: 0, kind: input, shape index: {}]   ;;  %s244_s1 = inlined_call_operand.vmem [shape: f32[4,512], index: 1, kind: input, shape index: {}]   ;;  %s245_s2 = inlined_call_operand.vmem [shape: f32[4,512], index: 2, kind: output, shape index: {}]  }
   0x1   :  { %v11_v0 = vld [vmem:[%s243_s0] sm:$0xff]  ;;  %v12_v3 = vld [vmem:[%s243_s0 + $0x8] sm:$0xff] }
   0x2   :  { %v13_v1 = vld [vmem:[%s244_s1] sm:$0xff]  ;;  %v14_v4 = vld [vmem:[%s244_s1 + $0x8] sm:$0xff]  ;;  %v17_v6 = vrot.slane %v11_v0, 6  ;;  %v18_v8 = vrot.slane %v12_v3, 6  ;;  %v80_v31 = vshrl.u32 %v79_v23, 7 }
   0x3   :  { %v47_v2 = vmin.f32 %v13_v1, 4.1351666  ;;  %v48_v5 = vmin.f32 %v14_v4, 4.1351666 }
   0x4   :  { %v21_v10 = vsub.f32 %v11_v0, %v17_v6  ;;  %v22_v11 = vsub.f32 %v12_v3, %v18_v8  ;;  %v81_v38 = vsub.s32 0, %v80_v31  ;;  %v85_v39 = vsub.s32 4, %v80_v31 }
   0x5   :  { %v49_v7 = vmul.f32 1.442695, %v47_v2  ;;  %v51_v9 = vmul.f32 1.442695, %v48_v5  ;;  %v101_v44 = vsub.s32 1, %v80_v31  ;;  %v105_v45 = vsub.s32 5, %v80_v31 }
   0x6   :  { %v23_v12 = vmul.f32 0.5, %v21_v10  ;;  %v24_v13 = vmul.f32 0.5, %v22_v11  ;;  %v192_v15 = vrot.slane %v21_v10, 10  ;;  %v193_v17 = vrot.slane %v22_v11, 10 }
   0x7   :  { %194 = vpow2.f32 %v49_v7 }
   0x8   :  { %196 = vpow2.f32 %v51_v9  ;;  %v190_v14 = vrot.slane %v23_v12, 10  ;;  %v191_v16 = vrot.slane %v24_v13, 10  ;;  %v43_v21 = vmul.f32 %v192_v15, %v13_v1 }
   0x9   :  { %v44_v25 = vmul.f32 %v193_v17, %v14_v4 }
   0xa   :  { %v33_v20 = vadd.f32 %v190_v14, %v11_v0  ;;  %v34_v24 = vadd.f32 %v191_v16, %v12_v3 }
   0xc   :  { %v45_v29 = vadd.f32 %v43_v21, %v33_v20  ;;  %v46_v32 = vadd.f32 %v44_v25, %v34_v24 }
  0x14   :  { %v195_v18 = vpop.eup %194 }
  0x15   :  { %v197_v19 = vpop.eup %196  ;;  %v53_v22 = vmul.f32 %v195_v18, %v21_v10 }
  0x16   :  { %v54_v26 = vmul.f32 %v197_v19, %v22_v11 }
  0x17   :  { %v55_v27 = vmul.f32 0.5, %v53_v22 }
  0x18   :  { %v56_v28 = vmul.f32 0.5, %v54_v26 }
  0x19   :  { %v59_v30 = vrot.slane %v55_v27, 6 }
  0x1a   :  { %v61_v33 = vrot.slane %v56_v28, 6 }
  0x1b   :  { %v60_v34 = vrot.slane %v59_v30, 4 }
  0x1c   :  { %v62_v35 = vrot.slane %v61_v33, 4 }
  0x1d   :  { %v65_v36 = vsub.f32 %v45_v29, %v60_v34  ;;  %v71_v37 = vadd.f32 %v60_v34, %v45_v29 }
  0x1e   :  { %v66_v40 = vsub.f32 %v46_v32, %v62_v35  ;;  %v72_v41 = vadd.f32 %v62_v35, %v46_v32 }
  0x1f   :  { %v67_v42 = vmax.f32 %v65_v36, 0.0  ;;  %v73_v43 = vmax.f32 %v71_v37, 0.0 }
  0x20   :  { %v68_v46 = vmax.f32 %v66_v40, 0.0  ;;  %v74_v47 = vmax.f32 %v72_v41, 0.0 }
  0x21   :  { %v69_v48 = vmin.f32 %v67_v42, 64.0  ;;  %v75_v49 = vmin.f32 %v73_v43, 64.0 }
  0x22   :  { %v70_v50 = vmin.f32 %v68_v46, 64.0  ;;  %v76_v51 = vmin.f32 %v74_v47, 64.0 }
  0x23   :  { %v82_v52 = vrot.slane %v69_v48, %v81_v38  ;;  %v86_v53 = vrot.slane %v69_v48, %v85_v39  ;;  %v102_v54 = vrot.slane %v69_v48, %v101_v44  ;;  %v106_v55 = vrot.slane %v69_v48, %v105_v45 }
  0x24   :  { %v124_v56 = vrot.slane %v75_v49, %v81_v38  ;;  %v128_v57 = vrot.slane %v75_v49, %v85_v39  ;;  %v144_v58 = vrot.slane %v75_v49, %v101_v44  ;;  %v148_v59 = vrot.slane %v75_v49, %v105_v45 }
  0x25   :  { %v162_v60 = vsel %vm161_vm0, %v82_v52, %v102_v54  ;;  %v163_v61 = vsel %vm161_vm0, %v86_v53, %v106_v55  ;;  %v90_v62 = vrot.slane %v70_v50, %v81_v38  ;;  %v94_v63 = vrot.slane %v70_v50, %v85_v39 }
  0x26   :  { %v167_v0 = vsel %vm166_vm1, %v162_v60, %v124_v56  ;;  %v168_v1 = vsel %vm166_vm1, %v163_v61, %v128_v57  ;;  %v110_v2 = vrot.slane %v70_v50, %v101_v44  ;;  %v114_v3 = vrot.slane %v70_v50, %v105_v45 }
  0x27   :  { %v172_v4 = vsel %vm171_vm2, %v167_v0, %v144_v58  ;;  %v173_v5 = vsel %vm171_vm2, %v168_v1, %v148_v59  ;;  %v132_v6 = vrot.slane %v76_v51, %v81_v38  ;;  %v136_v7 = vrot.slane %v76_v51, %v85_v39 }
  0x28   :  { %v180_v8 = vcombine.low %v172_v4, %v173_v5  ;;  %v152_v9 = vrot.slane %v76_v51, %v101_v44  ;;  %v156_v10 = vrot.slane %v76_v51, %v105_v45  ;;  %v164_v11 = vsel %vm161_vm0, %v90_v62, %v110_v2 }
  0x29   :  { %v165_v12 = vsel %vm161_vm0, %v94_v63, %v114_v3  ;;  %v169_v13 = vsel %vm166_vm1, %v164_v11, %v132_v6 }
  0x2a   :  { %184 = vst [vmem:[%s245_s2] sm:$0xff] %v180_v8  ;;  %v170_v14 = vsel %vm166_vm1, %v165_v12, %v136_v7  ;;  %v174_v15 = vsel %vm171_vm2, %v169_v13, %v152_v9 }
  0x2b   :  { %v175_v16 = vsel %vm171_vm2, %v170_v14, %v156_v10 }
  0x2c   :  { %v181_v17 = vcombine.low %v174_v15, %v175_v16 }
  0x2e   :  { %185 = vst [vmem:[%s245_s2 + $0x8] sm:$0xff] %v181_v17 }

// kernel: forward.17
= control target key start
LH: loop header
LB: loop body
LE: loop exit
PB: predicated region body
PF: predicated region fallthrough
CT: control target
= control target key end

     0   :  { %s3249_s9 = smov 0   ;;  %s4112_s0 = inlined_call_operand.vmem [shape: f32[2,1568,256], index: 0, kind: input, shape index: {}]   ;;  %s4113_s1 = inlined_call_operand.vmem [shape: bf16[2,256,32], index: 1, kind: input, shape index: {}]   ;;  %s4114_s2 = inlined_call_operand.vmem [shape: bf16[2,1568,32], index: 2, kind: output, shape index: {}]  }
   0x1 LB: > { %s2746_s10 = sadd.s32 4294967295, %s3231_s9   ;;  %p2750_p0 = scmp.ge.s32.totalorder %s3231_s9, 1  ;;  %s3231_s9 = sphi %s3249_s9, %s12_s9  }
   0x2   : > { %p122_p1 = scmp.lt.s32.totalorder %s3231_s9, 3 }
   0x4   : > { %p123_p2 = pnand %p2750_p0, %p122_p1 }
   0x5   : > { %p149_p3 = scmp.lt.s32.totalorder (!%p123_p2), %s2746_s10, 1 }
   0x6   : > { %126 = sbr.rel (%p123_p2) target bundleno = 662 (0x296), region = 28 }
   0xb   : > { %v3233_v0 = vmov 0   ;;  %s4116_s10 = smov (!%p149_p3, %s2746_s10), 1  ;;  %vm2482_vm0 = vcmask 257024  }
   0xc   : > { %881 = vmatprep.subr.bf16.mxu0 %v3233_v0  ;;  %3166 = vmatprep.subr.bf16.mxu1 %v3233_v0  ;;  %s2969_s11 = sshll.u32 %s4116_s10, 7  ;;  %s3198_s15 = smul.u32 3136, %s4116_s10 }
   0xd   : > { %s3265_s14 = scalar_lea.vmem %s4113_s1, %s2969_s11  ;;  %s3199_s19 = smul.u32 784, %s4116_s10 }
   0xe   : > { %v3209_v1 = vld [vmem:[%s3265_s14 + $0x38] sm:$0xff]   ;;  %v3210_v2 = vld [vmem:[%s3265_s14 + $0x30] sm:$0xff]   ;;  %v3211_v3 = vld [vmem:[%s3265_s14 + $0x28] sm:$0xff]   ;;  %s3281_s18 = scalar_lea.vmem %s4112_s0, %s3198_s15 }
   0xf   : > { %882 = vmatpush1.bf16.msra.mxu0 %v3209_v1  ;;  %3182 = vmatpush1.bf16.msra.mxu1 %v3209_v1  ;;  %v3212_v4 = vld [vmem:[%s3265_s14 + $0x20] sm:$0xff]   ;;  %v3213_v5 = vld [vmem:[%s3265_s14 + $0x18] sm:$0xff]   ;;  %v166_v6 = vld [vmem:[%s3281_s18 + $0x8] sm:$0xff]  ;;  %s3527_s22 = scalar_lea.vmem %s4114_s2, %s3199_s19 }
  0x10   : > { %883 = vmatprep.subr.bf16.mxu0 %v3233_v0  ;;  %3167 = vmatprep.subr.bf16.mxu1 %v3233_v0  ;;  %v168_v7 = vld [vmem:[%s3281_s18 + $0x18] sm:$0xff]  ;;  %v362_v8 = vld [vmem:[%s3281_s18 + $0x628] sm:$0xff]  ;;  %v3214_v11 = vld [vmem:[%s3265_s14 + $0x10] sm:$0xff]  }
  0x11   : > { %v558_v9 = vpack.c.bf16 %v168_v7, %v166_v6  ;;  %v364_v10 = vld [vmem:[%s3281_s18 + $0x638] sm:$0xff]  ;;  %v3215_v13 = vld [vmem:[%s3265_s14 + $0x8] sm:$0xff]   ;;  %v3216_v14 = vld [vmem:[%s3265_s14] sm:$0xff]  }
  0x12   : > { %v656_v12 = vpack.c.bf16 %v364_v10, %v362_v8  ;;  %v3217_v15 = vld [vmem:[%s3265_s14 + $0x78] sm:$0xff]   ;;  %v3218_v16 = vld [vmem:[%s3265_s14 + $0x70] sm:$0xff]   ;;  %v3219_v17 = vld [vmem:[%s3265_s14 + $0x68] sm:$0xff]  }
  0x13   : > { %884 = vmatpush1.bf16.msra.mxu0 %v3210_v2  ;;  %3183 = vmatpush1.bf16.msra.mxu1 %v3210_v2  ;;  %v3220_v18 = vld [vmem:[%s3265_s14 + $0x60] sm:$0xff]   ;;  %v3221_v19 = vld [vmem:[%s3265_s14 + $0x58] sm:$0xff]   ;;  %v3222_v20 = vld [vmem:[%s3265_s14 + $0x50] sm:$0xff]  }
  0x14   : > { %885 = vmatprep.subr.bf16.mxu0 %v3233_v0  ;;  %3168 = vmatprep.subr.bf16.mxu1 %v3233_v0  ;;  %v3223_v21 = vld [vmem:[%s3265_s14 + $0x48] sm:$0xff]   ;;  %v3224_v22 = vld [vmem:[%s3265_s14 + $0x40] sm:$0xff]   ;;  %v167_v24 = vld [vmem:[%s3281_s18 + $0x10] sm:$0xff] }
  0x15   : > { %913 = vmatprep.mubr.bf16.mxu0 %v558_v9  ;;  %1305 = vmatprep.mubr.bf16.mxu1 %v656_v12  ;;  %v165_v23 = vld [vmem:[%s3281_s18] sm:$0xff]  ;;  %v363_v26 = vld [vmem:[%s3281_s18 + $0x630] sm:$0xff]  ;;  %v170_v27 = vld [vmem:[%s3281_s18 + $0x28] sm:$0xff] }
  0x16   : > { %v361_v25 = vld [vmem:[%s3281_s18 + $0x620] sm:$0xff]  ;;  %v172_v28 = vld [vmem:[%s3281_s18 + $0x38] sm:$0xff]  ;;  %v366_v29 = vld [vmem:[%s3281_s18 + $0x648] sm:$0xff]  ;;  %v557_v31 = vpack.c.bf16 %v167_v24, %v165_v23 }
  0x17   : > { %886 = vmatpush1.bf16.msra.mxu0 %v3211_v3  ;;  %3184 = vmatpush1.bf16.msra.mxu1 %v3211_v3  ;;  %v368_v30 = vld [vmem:[%s3281_s18 + $0x658] sm:$0xff]  ;;  %v655_v32 = vpack.c.bf16 %v363_v26, %v361_v25  ;;  %v560_v33 = vpack.c.bf16 %v172_v28, %v170_v27  ;;  %v169_v35 = vld [vmem:[%s3281_s18 + $0x20] sm:$0xff]  ;;  %v171_v36 = vld [vmem:[%s3281_s18 + $0x30] sm:$0xff] }
  0x18   : > { %887 = vmatprep.subr.bf16.mxu0 %v3233_v0  ;;  %3169 = vmatprep.subr.bf16.mxu1 %v3233_v0  ;;  %v658_v34 = vpack.c.bf16 %v368_v30, %v366_v29  ;;  %v365_v37 = vld [vmem:[%s3281_s18 + $0x640] sm:$0xff]  ;;  %v367_v38 = vld [vmem:[%s3281_s18 + $0x650] sm:$0xff]  ;;  %v174_v39 = vld [vmem:[%s3281_s18 + $0x48] sm:$0xff]  ;;  %v559_v43 = vpack.c.bf16 %v171_v36, %v169_v35 }
  0x19   : > { %v176_v40 = vld [vmem:[%s3281_s18 + $0x58] sm:$0xff]  ;;  %v370_v41 = vld [vmem:[%s3281_s18 + $0x668] sm:$0xff]  ;;  %v657_v44 = vpack.c.bf16 %v367_v38, %v365_v37  ;;  %v173_v47 = vld [vmem:[%s3281_s18 + $0x40] sm:$0xff] }
  0x1a   : > { %v372_v42 = vld [vmem:[%s3281_s18 + $0x678] sm:$0xff]  ;;  %v562_v45 = vpack.c.bf16 %v176_v40, %v174_v39  ;;  %v175_v48 = vld [vmem:[%s3281_s18 + $0x50] sm:$0xff]  ;;  %v369_v49 = vld [vmem:[%s3281_s18 + $0x660] sm:$0xff] }
  0x1b   : > { %888 = vmatpush1.bf16.msra.mxu0 %v3212_v4  ;;  %3185 = vmatpush1.bf16.msra.mxu1 %v3212_v4  ;;  %v660_v46 = vpack.c.bf16 %v372_v42, %v370_v41  ;;  %v371_v50 = vld [vmem:[%s3281_s18 + $0x670] sm:$0xff]  ;;  %v178_v51 = vld [vmem:[%s3281_s18 + $0x68] sm:$0xff]  ;;  %v180_v52 = vld [vmem:[%s3281_s18 + $0x78] sm:$0xff]  ;;  %v561_v55 = vpack.c.bf16 %v175_v48, %v173_v47 }
  0x1c   : > { %889 = vmatprep.subr.bf16.mxu0 %v3233_v0  ;;  %3170 = vmatprep.subr.bf16.mxu1 %v3233_v0  ;;  %v374_v53 = vld [vmem:[%s3281_s18 + $0x688] sm:$0xff]  ;;  %v376_v54 = vld [vmem:[%s3281_s18 + $0x698] sm:$0xff]  ;;  %v659_v56 = vpack.c.bf16 %v371_v50, %v369_v49  ;;  %v564_v57 = vpack.c.bf16 %v180_v52, %v178_v51  ;;  %v177_v59 = vld [vmem:[%s3281_s18 + $0x60] sm:$0xff] }
  0x1d   : > { %v662_v58 = vpack.c.bf16 %v376_v54, %v374_v53  ;;  %v179_v60 = vld [vmem:[%s3281_s18 + $0x70] sm:$0xff]  ;;  %v373_v61 = vld [vmem:[%s3281_s18 + $0x680] sm:$0xff]  ;;  %v182_v63 = vld [vmem:[%s3281_s18 + $0x88] sm:$0xff] }
  0x1e   : > { %v375_v62 = vld [vmem:[%s3281_s18 + $0x690] sm:$0xff]  ;;  %v378_v1 = vld [vmem:[%s3281_s18 + $0x6a8] sm:$0xff]  ;;  %v380_v2 = vld [vmem:[%s3281_s18 + $0x6b8] sm:$0xff]  ;;  %v563_v3 = vpack.c.bf16 %v179_v60, %v177_v59 }
  0x1f   : > { %890 = vmatpush1.bf16.msra.mxu0 %v3213_v5  ;;  %3186 = vmatpush1.bf16.msra.mxu1 %v3213_v5  ;;  %v661_v4 = vpack.c.bf16 %v375_v62, %v373_v61  ;;  %v664_v6 = vpack.c.bf16 %v380_v2, %v378_v1  ;;  %v181_v7 = vld [vmem:[%s3281_s18 + $0x80] sm:$0xff]  ;;  %v183_v8 = vld [vmem:[%s3281_s18 + $0x90] sm:$0xff]  ;;  %v188_v12 = vld [vmem:[%s3281_s18 + $0xb8] sm:$0xff] }
  0x20   : > { %891 = vmatprep.subr.bf16.mxu0 %v3233_v0  ;;  %3171 = vmatprep.subr.bf16.mxu1 %v3233_v0  ;;  %v377_v9 = vld [vmem:[%s3281_s18 + $0x6a0] sm:$0xff]  ;;  %v379_v10 = vld [vmem:[%s3281_s18 + $0x6b0] sm:$0xff]  ;;  %v190_v23 = vld [vmem:[%s3281_s18 + $0xc8] sm:$0xff] }
  0x21   : > { %v192_v24 = vld [vmem:[%s3281_s18 + $0xd8] sm:$0xff]  ;;  %v386_v25 = vld [vmem:[%s3281_s18 + $0x6e8] sm:$0xff] }
  0x22   : > { %v388_v26 = vld [vmem:[%s3281_s18 + $0x6f8] sm:$0xff]  ;;  %v570_v29 = vpack.c.bf16 %v192_v24, %v190_v23  ;;  %v194_v35 = vld [vmem:[%s3281_s18 + $0xe8] sm:$0xff] }
  0x23   : > { %892 = vmatpush1.bf16.msra.mxu0 %v3214_v11  ;;  %3187 = vmatpush1.bf16.msra.mxu1 %v3214_v11  ;;  %v186_v11 = vld [vmem:[%s3281_s18 + $0xa8] sm:$0xff]  ;;  %v668_v30 = vpack.c.bf16 %v388_v26, %v386_v25  ;;  %v196_v36 = vld [vmem:[%s3281_s18 + $0xf8] sm:$0xff] }
  0x24   : > { %893 = vmatprep.subr.bf16.mxu0 %v3233_v0  ;;  %3172 = vmatprep.subr.bf16.mxu1 %v3233_v0  ;;  %v390_v37 = vld [vmem:[%s3281_s18 + $0x708] sm:$0xff]  ;;  %v392_v38 = vld [vmem:[%s3281_s18 + $0x718] sm:$0xff]  ;;  %v572_v41 = vpack.c.bf16 %v196_v36, %v194_v35 }
  0x25   : > { %v670_v42 = vpack.c.bf16 %v392_v38, %v390_v37  ;;  %v198_v47 = vld [vmem:[%s3281_s18 + $0x108] sm:$0xff]  ;;  %v200_v48 = vld [vmem:[%s3281_s18 + $0x118] sm:$0xff] }
  0x26   : > { %v394_v49 = vld [vmem:[%s3281_s18 + $0x728] sm:$0xff]  ;;  %v396_v50 = vld [vmem:[%s3281_s18 + $0x738] sm:$0xff]  ;;  %v574_v53 = vpack.c.bf16 %v200_v48, %v198_v47 }
  0x27   : > { %894 = vmatpush1.bf16.msra.mxu0 %v3215_v13  ;;  %3188 = vmatpush1.bf16.msra.mxu1 %v3215_v13  ;;  %v382_v13 = vld [vmem:[%s3281_s18 + $0x6c8] sm:$0xff]  ;;  %v672_v54 = vpack.c.bf16 %v396_v50, %v394_v49  ;;  %v204_v60 = vld [vmem:[%s3281_s18 + $0x138] sm:$0xff] }
  0x28   : > { %895 = vmatprep.subr.bf16.mxu0 %v3233_v0  ;;  %3173 = vmatprep.subr.bf16.mxu1 %v3233_v0  ;;  %v202_v59 = vld [vmem:[%s3281_s18 + $0x128] sm:$0xff]  ;;  %v400_v62 = vld [vmem:[%s3281_s18 + $0x758] sm:$0xff] }
  0x29   : > { %v398_v61 = vld [vmem:[%s3281_s18 + $0x748] sm:$0xff]  ;;  %v576_v1 = vpack.c.bf16 %v204_v60, %v202_v59 }
  0x2a   : > { %v674_v2 = vpack.c.bf16 %v400_v62, %v398_v61 }
  0x2b   : > { %896 = vmatpush1.bf16.msra.mxu0 %v3216_v14  ;;  %3189 = vmatpush1.bf16.msra.mxu1 %v3216_v14  ;;  %v384_v14 = vld [vmem:[%s3281_s18 + $0x6d8] sm:$0xff] }
  0x2c   : > { %897 = vmatprep.subr.bf16.mxu0 %v3233_v0  ;;  %3174 = vmatprep.subr.bf16.mxu1 %v3233_v0 }
  0x2f   : > { %898 = vmatpush2.bf16.msra.mxu0 %v3217_v15  ;;  %3190 = vmatpush2.bf16.msra.mxu1 %v3217_v15  ;;  %v565_v15 = vpack.c.bf16 %v183_v8, %v181_v7  ;;  %v206_v7 = vld [vmem:[%s3281_s18 + $0x148] sm:$0xff]  ;;  %v208_v8 = vld [vmem:[%s3281_s18 + $0x158] sm:$0xff] }
  0x30   : > { %899 = vmatprep.subr.bf16.mxu0 %v3233_v0  ;;  %3175 = vmatprep.subr.bf16.mxu1 %v3233_v0 }
  0x33   : > { %900 = vmatpush2.bf16.msra.mxu0 %v3218_v16  ;;  %3191 = vmatpush2.bf16.msra.mxu1 %v3218_v16  ;;  %v663_v16 = vpack.c.bf16 %v379_v10, %v377_v9  ;;  %v402_v9 = vld [vmem:[%s3281_s18 + $0x768] sm:$0xff]  ;;  %v404_v10 = vld [vmem:[%s3281_s18 + $0x778] sm:$0xff] }
  0x34   : > { %901 = vmatprep.subr.bf16.mxu0 %v3233_v0  ;;  %3176 = vmatprep.subr.bf16.mxu1 %v3233_v0 }
  0x37   : > { %902 = vmatpush2.bf16.msra.mxu0 %v3219_v17  ;;  %3192 = vmatpush2.bf16.msra.mxu1 %v3219_v17  ;;  %v568_v17 = vpack.c.bf16 %v188_v12, %v186_v11 }
  0x38   : > { %903 = vmatprep.subr.bf16.mxu0 %v3233_v0  ;;  %3177 = vmatprep.subr.bf16.mxu1 %v3233_v0 }
  0x3b   : > { %904 = vmatpush2.bf16.msra.mxu0 %v3220_v18  ;;  %3193 = vmatpush2.bf16.msra.mxu1 %v3220_v18  ;;  %v666_v18 = vpack.c.bf16 %v384_v14, %v382_v13  ;;  %v578_v13 = vpack.c.bf16 %v208_v8, %v206_v7  ;;  %v676_v14 = vpack.c.bf16 %v404_v10, %v402_v9 }
  0x3c   : > { %905 = vmatprep.subr.bf16.mxu0 %v3233_v0  ;;  %3178 = vmatprep.subr.bf16.mxu1 %v3233_v0 }
  0x3f   : > { %906 = vmatpush2.bf16.msra.mxu0 %v3221_v19  ;;  %3194 = vmatpush2.bf16.msra.mxu1 %v3221_v19  ;;  %v185_v19 = vld [vmem:[%s3281_s18 + $0xa0] sm:$0xff] }
  0x40   : > { %907 = vmatprep.subr.bf16.mxu0 %v3233_v0  ;;  %3179 = vmatprep.subr.bf16.mxu1 %v3233_v0 }
  0x43   : > { %908 = vmatpush2.bf16.msra.mxu0 %v3222_v20  ;;  %3195 = vmatpush2.bf16.msra.mxu1 %v3222_v20  ;;  %v187_v20 = vld [vmem:[%s3281_s18 + $0xb0] sm:$0xff] }
  0x44   : > { %909 = vmatprep.subr.bf16.mxu0 %v3233_v0  ;;  %3180 = vmatprep.subr.bf16.mxu1 %v3233_v0  ;;  %v567_v27 = vpack.c.bf16 %v187_v20, %v185_v19  ;;  %v210_v19 = vld [vmem:[%s3281_s18 + $0x168] sm:$0xff]  ;;  %v212_v20 = vld [vmem:[%s3281_s18 + $0x178] sm:$0xff] }
  0x45   : > { %v580_v25 = vpack.c.bf16 %v212_v20, %v210_v19 }
  0x47   : > { %910 = vmatpush2.bf16.msra.mxu0 %v3223_v21  ;;  %3196 = vmatpush2.bf16.msra.mxu1 %v3223_v21  ;;  %v381_v21 = vld [vmem:[%s3281_s18 + $0x6c0] sm:$0xff] }
  0x48   : > { %911 = vmatprep.subr.bf16.mxu0 %v3233_v0  ;;  %3181 = vmatprep.subr.bf16.mxu1 %v3233_v0  ;;  %v184_v0 = vld [vmem:[%s3281_s18 + $0x98] sm:$0xff] }
  0x49   : > { %v566_v5 = vpack.c.bf16 %v184_v0, %v182_v63 }
  0x4b   : > { %912 = vmatpush2.bf16.msra.mxu0 %v3224_v22  ;;  %3197 = vmatpush2.bf16.msra.mxu1 %v3224_v22  ;;  %v383_v22 = vld [vmem:[%s3281_s18 + $0x6d0] sm:$0xff] }
  0x4c   : > { %v665_v28 = vpack.c.bf16 %v383_v22, %v381_v21  ;;  %v406_v21 = vld [vmem:[%s3281_s18 + $0x788] sm:$0xff]  ;;  %v408_v22 = vld [vmem:[%s3281_s18 + $0x798] sm:$0xff] }
  0x4d   : > { %v678_v26 = vpack.c.bf16 %v408_v22, %v406_v21 }
  0x4e   : > { %914 = vmatmul.mubr.bf16.vlgmr.msra.gmra.mxu0 %v557_v31  ;;  %1306 = vmatmul.mubr.bf16.vlgmr.msra.gmra.mxu1 %v655_v32  ;;  %v189_v31 = vld [vmem:[%s3281_s18 + $0xc0] sm:$0xff]  ;;  %v191_v32 = vld [vmem:[%s3281_s18 + $0xd0] sm:$0xff] }
  0x4f   : > { %921 = vmatprep.mubr.bf16.mxu0 %v560_v33  ;;  %1313 = vmatprep.mubr.bf16.mxu1 %v658_v34  ;;  %v385_v33 = vld [vmem:[%s3281_s18 + $0x6e0] sm:$0xff]  ;;  %v387_v34 = vld [vmem:[%s3281_s18 + $0x6f0] sm:$0xff]  ;;  %v569_v39 = vpack.c.bf16 %v191_v32, %v189_v31  ;;  %v214_v31 = vld [vmem:[%s3281_s18 + $0x188] sm:$0xff] }
  0x50   : > { %v667_v40 = vpack.c.bf16 %v387_v34, %v385_v33  ;;  %v216_v32 = vld [vmem:[%s3281_s18 + $0x198] sm:$0xff]  ;;  %v410_v33 = vld [vmem:[%s3281_s18 + $0x7a8] sm:$0xff] }
  0x51   : > { %v412_v34 = vld [vmem:[%s3281_s18 + $0x7b8] sm:$0xff]  ;;  %v582_v37 = vpack.c.bf16 %v216_v32, %v214_v31 }
  0x52   : > { %v680_v38 = vpack.c.bf16 %v412_v34, %v410_v33 }
  0x56   : > { %922 = vmatmul.mubr.bf16.gmra.mxu0 %v559_v43  ;;  %1314 = vmatmul.mubr.bf16.gmra.mxu1 %v657_v44  ;;  %v193_v43 = vld [vmem:[%s3281_s18 + $0xe0] sm:$0xff]  ;;  %v195_v44 = vld [vmem:[%s3281_s18 + $0xf0] sm:$0xff] }
  0x57   : > { %929 = vmatprep.mubr.bf16.mxu0 %v562_v45  ;;  %1321 = vmatprep.mubr.bf16.mxu1 %v660_v46  ;;  %v389_v45 = vld [vmem:[%s3281_s18 + $0x700] sm:$0xff]  ;;  %v391_v46 = vld [vmem:[%s3281_s18 + $0x710] sm:$0xff]  ;;  %v571_v51 = vpack.c.bf16 %v195_v44, %v193_v43  ;;  %v218_v43 = vld [vmem:[%s3281_s18 + $0x1a8] sm:$0xff] }
  0x58   : > { %v669_v52 = vpack.c.bf16 %v391_v46, %v389_v45  ;;  %v220_v44 = vld [vmem:[%s3281_s18 + $0x1b8] sm:$0xff]  ;;  %v414_v45 = vld [vmem:[%s3281_s18 + $0x7c8] sm:$0xff] }
  0x59   : > { %v416_v46 = vld [vmem:[%s3281_s18 + $0x7d8] sm:$0xff]  ;;  %v584_v49 = vpack.c.bf16 %v220_v44, %v218_v43 }
  0x5a   : > { %v682_v50 = vpack.c.bf16 %v416_v46, %v414_v45 }
  0x5e   : > { %930 = vmatmul.mubr.bf16.gmra.mxu0 %v561_v55  ;;  %1322 = vmatmul.mubr.bf16.gmra.mxu1 %v659_v56  ;;  %v197_v55 = vld [vmem:[%s3281_s18 + $0x100] sm:$0xff]  ;;  %v199_v56 = vld [vmem:[%s3281_s18 + $0x110] sm:$0xff] }
  0x5f   : > { %937 = vmatprep.mubr.bf16.mxu0 %v564_v57  ;;  %1329 = vmatprep.mubr.bf16.mxu1 %v662_v58  ;;  %v393_v57 = vld [vmem:[%s3281_s18 + $0x720] sm:$0xff]  ;;  %v395_v58 = vld [vmem:[%s3281_s18 + $0x730] sm:$0xff]  ;;  %v573_v63 = vpack.c.bf16 %v199_v56, %v197_v55  ;;  %v222_v55 = vld [vmem:[%s3281_s18 + $0x1c8] sm:$0xff] }
  0x60   : > { %v671_v0 = vpack.c.bf16 %v395_v58, %v393_v57  ;;  %v224_v56 = vld [vmem:[%s3281_s18 + $0x1d8] sm:$0xff]  ;;  %v418_v57 = vld [vmem:[%s3281_s18 + $0x7e8] sm:$0xff] }
  0x61   : > { %v420_v58 = vld [vmem:[%s3281_s18 + $0x7f8] sm:$0xff]  ;;  %v586_v61 = vpack.c.bf16 %v224_v56, %v222_v55 }
  0x62   : > { %v684_v62 = vpack.c.bf16 %v420_v58, %v418_v57 }
  0x66   : > { %938 = vmatmul.mubr.bf16.gmra.mxu0 %v563_v3  ;;  %1330 = vmatmul.mubr.bf16.gmra.mxu1 %v661_v4  ;;  %v201_v3 = vld [vmem:[%s3281_s18 + $0x120] sm:$0xff]  ;;  %v203_v4 = vld [vmem:[%s3281_s18 + $0x130] sm:$0xff] }
  0x67   : > { %945 = vmatprep.mubr.bf16.mxu0 %v566_v5  ;;  %1337 = vmatprep.mubr.bf16.mxu1 %v664_v6  ;;  %v397_v5 = vld [vmem:[%s3281_s18 + $0x740] sm:$0xff]  ;;  %v399_v6 = vld [vmem:[%s3281_s18 + $0x750] sm:$0xff]  ;;  %v575_v11 = vpack.c.bf16 %v203_v4, %v201_v3  ;;  %v226_v3 = vld [vmem:[%s3281_s18 + $0x1e8] sm:$0xff] }
  0x68   : > { %v673_v12 = vpack.c.bf16 %v399_v6, %v397_v5  ;;  %v228_v4 = vld [vmem:[%s3281_s18 + $0x1f8] sm:$0xff]  ;;  %v422_v5 = vld [vmem:[%s3281_s18 + $0x808] sm:$0xff] }
  0x69   : > { %v424_v6 = vld [vmem:[%s3281_s18 + $0x818] sm:$0xff]  ;;  %v588_v9 = vpack.c.bf16 %v228_v4, %v226_v3 }
  0x6a   : > { %v686_v10 = vpack.c.bf16 %v424_v6, %v422_v5 }
  0x6e   : > { %946 = vmatmul.mubr.bf16.gmra.mxu0 %v565_v15  ;;  %1338 = vmatmul.mubr.bf16.gmra.mxu1 %v663_v16  ;;  %v205_v15 = vld [vmem:[%s3281_s18 + $0x140] sm:$0xff]  ;;  %v207_v16 = vld [vmem:[%s3281_s18 + $0x150] sm:$0xff] }
  0x6f   : > { %953 = vmatprep.mubr.bf16.mxu0 %v568_v17  ;;  %1345 = vmatprep.mubr.bf16.mxu1 %v666_v18  ;;  %v401_v17 = vld [vmem:[%s3281_s18 + $0x760] sm:$0xff]  ;;  %v403_v18 = vld [vmem:[%s3281_s18 + $0x770] sm:$0xff]  ;;  %v577_v23 = vpack.c.bf16 %v207_v16, %v205_v15  ;;  %v230_v15 = vld [vmem:[%s3281_s18 + $0x208] sm:$0xff] }
  0x70   : > { %v675_v24 = vpack.c.bf16 %v403_v18, %v401_v17  ;;  %v232_v16 = vld [vmem:[%s3281_s18 + $0x218] sm:$0xff]  ;;  %v426_v17 = vld [vmem:[%s3281_s18 + $0x828] sm:$0xff] }
  0x71   : > { %v428_v18 = vld [vmem:[%s3281_s18 + $0x838] sm:$0xff]  ;;  %v590_v21 = vpack.c.bf16 %v232_v16, %v230_v15 }
  0x72   : > { %v688_v22 = vpack.c.bf16 %v428_v18, %v426_v17 }
  0x76   : > { %954 = vmatmul.mubr.bf16.gmra.mxu0 %v567_v27  ;;  %1346 = vmatmul.mubr.bf16.gmra.mxu1 %v665_v28  ;;  %v209_v27 = vld [vmem:[%s3281_s18 + $0x160] sm:$0xff]  ;;  %v211_v28 = vld [vmem:[%s3281_s18 + $0x170] sm:$0xff] }
  0x77   : > { %961 = vmatprep.mubr.bf16.mxu0 %v570_v29  ;;  %1353 = vmatprep.mubr.bf16.mxu1 %v668_v30  ;;  %v405_v29 = vld [vmem:[%s3281_s18 + $0x780] sm:$0xff]  ;;  %v407_v30 = vld [vmem:[%s3281_s18 + $0x790] sm:$0xff]  ;;  %v579_v35 = vpack.c.bf16 %v211_v28, %v209_v27  ;;  %v234_v27 = vld [vmem:[%s3281_s18 + $0x228] sm:$0xff] }
  0x78   : > { %v677_v36 = vpack.c.bf16 %v407_v30, %v405_v29  ;;  %v236_v28 = vld [vmem:[%s3281_s18 + $0x238] sm:$0xff]  ;;  %v430_v29 = vld [vmem:[%s3281_s18 + $0x848] sm:$0xff] }
  0x79   : > { %v432_v30 = vld [vmem:[%s3281_s18 + $0x858] sm:$0xff]  ;;  %v592_v33 = vpack.c.bf16 %v236_v28, %v234_v27 }
  0x7a   : > { %v690_v34 = vpack.c.bf16 %v432_v30, %v430_v29 }
  0x7e   : > { %962 = vmatmul.mubr.bf16.gmra.mxu0 %v569_v39  ;;  %1354 = vmatmul.mubr.bf16.gmra.mxu1 %v667_v40  ;;  %v213_v39 = vld [vmem:[%s3281_s18 + $0x180] sm:$0xff]  ;;  %v215_v40 = vld [vmem:[%s3281_s18 + $0x190] sm:$0xff] }
  0x7f   : > { %969 = vmatprep.mubr.bf16.mxu0 %v572_v41  ;;  %1361 = vmatprep.mubr.bf16.mxu1 %v670_v42  ;;  %v409_v41 = vld [vmem:[%s3281_s18 + $0x7a0] sm:$0xff]  ;;  %v411_v42 = vld [vmem:[%s3281_s18 + $0x7b0] sm:$0xff]  ;;  %v581_v47 = vpack.c.bf16 %v215_v40, %v213_v39  ;;  %v238_v39 = vld [vmem:[%s3281_s18 + $0x248] sm:$0xff] }
  0x80   : > { %v679_v48 = vpack.c.bf16 %v411_v42, %v409_v41  ;;  %v240_v40 = vld [vmem:[%s3281_s18 + $0x258] sm:$0xff]  ;;  %v434_v41 = vld [vmem:[%s3281_s18 + $0x868] sm:$0xff] }
  0x81   : > { %v436_v42 = vld [vmem:[%s3281_s18 + $0x878] sm:$0xff]  ;;  %v594_v45 = vpack.c.bf16 %v240_v40, %v238_v39 }
  0x82   : > { %v692_v46 = vpack.c.bf16 %v436_v42, %v434_v41 }
  0x86   : > { %970 = vmatmul.mubr.bf16.gmra.mxu0 %v571_v51  ;;  %1362 = vmatmul.mubr.bf16.gmra.mxu1 %v669_v52  ;;  %v217_v51 = vld [vmem:[%s3281_s18 + $0x1a0] sm:$0xff]  ;;  %v219_v52 = vld [vmem:[%s3281_s18 + $0x1b0] sm:$0xff] }
  0x87   : > { %977 = vmatprep.mubr.bf16.mxu0 %v574_v53  ;;  %1369 = vmatprep.mubr.bf16.mxu1 %v672_v54  ;;  %v413_v53 = vld [vmem:[%s3281_s18 + $0x7c0] sm:$0xff]  ;;  %v415_v54 = vld [vmem:[%s3281_s18 + $0x7d0] sm:$0xff]  ;;  %v583_v59 = vpack.c.bf16 %v219_v52, %v217_v51  ;;  %v242_v51 = vld [vmem:[%s3281_s18 + $0x268] sm:$0xff] }
  0x88   : > { %v681_v60 = vpack.c.bf16 %v415_v54, %v413_v53  ;;  %v244_v52 = vld [vmem:[%s3281_s18 + $0x278] sm:$0xff]  ;;  %v438_v53 = vld [vmem:[%s3281_s18 + $0x888] sm:$0xff] }
  0x89   : > { %v440_v54 = vld [vmem:[%s3281_s18 + $0x898] sm:$0xff]  ;;  %v596_v57 = vpack.c.bf16 %v244_v52, %v242_v51 }
  0x8a   : > { %v694_v58 = vpack.c.bf16 %v440_v54, %v438_v53 }
  0x8e   : > { %978 = vmatmul.mubr.bf16.gmra.mxu0 %v573_v63  ;;  %1370 = vmatmul.mubr.bf16.gmra.mxu1 %v671_v0  ;;  %v221_v63 = vld [vmem:[%s3281_s18 + $0x1c0] sm:$0xff]  ;;  %v223_v0 = vld [vmem:[%s3281_s18 + $0x1d0] sm:$0xff] }
  0x8f   : > { %985 = vmatprep.mubr.bf16.mxu0 %v576_v1  ;;  %1377 = vmatprep.mubr.bf16.mxu1 %v674_v2  ;;  %v417_v1 = vld [vmem:[%s3281_s18 + $0x7e0] sm:$0xff]  ;;  %v419_v2 = vld [vmem:[%s3281_s18 + $0x7f0] sm:$0xff]  ;;  %v585_v7 = vpack.c.bf16 %v223_v0, %v221_v63  ;;  %v246_v63 = vld [vmem:[%s3281_s18 + $0x288] sm:$0xff] }
  0x90   : > { %v683_v8 = vpack.c.bf16 %v419_v2, %v417_v1  ;;  %v248_v0 = vld [vmem:[%s3281_s18 + $0x298] sm:$0xff]  ;;  %v442_v1 = vld [vmem:[%s3281_s18 + $0x8a8] sm:$0xff] }
  0x91   : > { %v444_v2 = vld [vmem:[%s3281_s18 + $0x8b8] sm:$0xff]  ;;  %v598_v5 = vpack.c.bf16 %v248_v0, %v246_v63 }
  0x92   : > { %v696_v6 = vpack.c.bf16 %v444_v2, %v442_v1 }
  0x96   : > { %986 = vmatmul.mubr.bf16.gmra.mxu0 %v575_v11  ;;  %1378 = vmatmul.mubr.bf16.gmra.mxu1 %v673_v12  ;;  %v225_v11 = vld [vmem:[%s3281_s18 + $0x1e0] sm:$0xff]  ;;  %v227_v12 = vld [vmem:[%s3281_s18 + $0x1f0] sm:$0xff] }
  0x97   : > { %993 = vmatprep.mubr.bf16.mxu0 %v578_v13  ;;  %1385 = vmatprep.mubr.bf16.mxu1 %v676_v14  ;;  %v421_v13 = vld [vmem:[%s3281_s18 + $0x800] sm:$0xff]  ;;  %v423_v14 = vld [vmem:[%s3281_s18 + $0x810] sm:$0xff]  ;;  %v587_v19 = vpack.c.bf16 %v227_v12, %v225_v11  ;;  %v250_v11 = vld [vmem:[%s3281_s18 + $0x2a8] sm:$0xff] }
  0x98   : > { %v685_v20 = vpack.c.bf16 %v423_v14, %v421_v13  ;;  %v252_v12 = vld [vmem:[%s3281_s18 + $0x2b8] sm:$0xff]  ;;  %v446_v13 = vld [vmem:[%s3281_s18 + $0x8c8] sm:$0xff] }
  0x99   : > { %v448_v14 = vld [vmem:[%s3281_s18 + $0x8d8] sm:$0xff]  ;;  %v600_v17 = vpack.c.bf16 %v252_v12, %v250_v11  ;;  %v270_v11 = vld [vmem:[%s3281_s18 + $0x348] sm:$0xff] }
  0x9a   : > { %v698_v18 = vpack.c.bf16 %v448_v14, %v446_v13  ;;  %v272_v14 = vld [vmem:[%s3281_s18 + $0x358] sm:$0xff] }
  0x9e   : > { %994 = vmatmul.mubr.bf16.gmra.mxu0 %v577_v23  ;;  %1386 = vmatmul.mubr.bf16.gmra.mxu1 %v675_v24  ;;  %v229_v23 = vld [vmem:[%s3281_s18 + $0x200] sm:$0xff]  ;;  %v231_v24 = vld [vmem:[%s3281_s18 + $0x210] sm:$0xff] }
  0x9f   : > { %1001 = vmatprep.mubr.bf16.mxu0 %v580_v25  ;;  %1393 = vmatprep.mubr.bf16.mxu1 %v678_v26  ;;  %v425_v25 = vld [vmem:[%s3281_s18 + $0x820] sm:$0xff]  ;;  %v427_v26 = vld [vmem:[%s3281_s18 + $0x830] sm:$0xff]  ;;  %v589_v31 = vpack.c.bf16 %v231_v24, %v229_v23  ;;  %v254_v23 = vld [vmem:[%s3281_s18 + $0x2c8] sm:$0xff] }
  0xa0   : > { %v687_v32 = vpack.c.bf16 %v427_v26, %v425_v25  ;;  %v256_v24 = vld [vmem:[%s3281_s18 + $0x2d8] sm:$0xff]  ;;  %v450_v25 = vld [vmem:[%s3281_s18 + $0x8e8] sm:$0xff] }
  0xa1   : > { %v452_v26 = vld [vmem:[%s3281_s18 + $0x8f8] sm:$0xff]  ;;  %v602_v29 = vpack.c.bf16 %v256_v24, %v254_v23  ;;  %v610_v23 = vpack.c.bf16 %v272_v14, %v270_v11  ;;  %v279_v14 = vld [vmem:[%s3281_s18 + $0x390] sm:$0xff] }
  0xa2   : > { %v700_v30 = vpack.c.bf16 %v452_v26, %v450_v25 }
  0xa6   : > { %1002 = vmatmul.mubr.bf16.gmra.mxu0 %v579_v35  ;;  %1394 = vmatmul.mubr.bf16.gmra.mxu1 %v677_v36  ;;  %v233_v35 = vld [vmem:[%s3281_s18 + $0x220] sm:$0xff]  ;;  %v235_v36 = vld [vmem:[%s3281_s18 + $0x230] sm:$0xff] }
  0xa7   : > { %1009 = vmatprep.mubr.bf16.mxu0 %v582_v37  ;;  %1401 = vmatprep.mubr.bf16.mxu1 %v680_v38  ;;  %v429_v37 = vld [vmem:[%s3281_s18 + $0x840] sm:$0xff]  ;;  %v431_v38 = vld [vmem:[%s3281_s18 + $0x850] sm:$0xff]  ;;  %v591_v43 = vpack.c.bf16 %v235_v36, %v233_v35  ;;  %v258_v35 = vld [vmem:[%s3281_s18 + $0x2e8] sm:$0xff] }
  0xa8   : > { %v689_v44 = vpack.c.bf16 %v431_v38, %v429_v37  ;;  %v260_v36 = vld [vmem:[%s3281_s18 + $0x2f8] sm:$0xff]  ;;  %v454_v37 = vld [vmem:[%s3281_s18 + $0x908] sm:$0xff] }
  0xa9   : > { %v456_v38 = vld [vmem:[%s3281_s18 + $0x918] sm:$0xff]  ;;  %v604_v41 = vpack.c.bf16 %v260_v36, %v258_v35  ;;  %v274_v35 = vld [vmem:[%s3281_s18 + $0x368] sm:$0xff] }
  0xaa   : > { %v702_v42 = vpack.c.bf16 %v456_v38, %v454_v37  ;;  %v276_v38 = vld [vmem:[%s3281_s18 + $0x378] sm:$0xff] }
  0xae   : > { %1010 = vmatmul.mubr.bf16.gmra.mxu0 %v581_v47  ;;  %1402 = vmatmul.mubr.bf16.gmra.mxu1 %v679_v48  ;;  %v237_v47 = vld [vmem:[%s3281_s18 + $0x240] sm:$0xff]  ;;  %v239_v48 = vld [vmem:[%s3281_s18 + $0x250] sm:$0xff] }
  0xaf   : > { %1017 = vmatprep.mubr.bf16.mxu0 %v584_v49  ;;  %1409 = vmatprep.mubr.bf16.mxu1 %v682_v50  ;;  %v433_v49 = vld [vmem:[%s3281_s18 + $0x860] sm:$0xff]  ;;  %v435_v50 = vld [vmem:[%s3281_s18 + $0x870] sm:$0xff]  ;;  %v593_v55 = vpack.c.bf16 %v239_v48, %v237_v47  ;;  %v262_v47 = vld [vmem:[%s3281_s18 + $0x308] sm:$0xff] }
  0xb0   : > { %v691_v56 = vpack.c.bf16 %v435_v50, %v433_v49  ;;  %v264_v48 = vld [vmem:[%s3281_s18 + $0x318] sm:$0xff]  ;;  %v458_v49 = vld [vmem:[%s3281_s18 + $0x928] sm:$0xff] }
  0xb1   : > { %v460_v50 = vld [vmem:[%s3281_s18 + $0x938] sm:$0xff]  ;;  %v606_v53 = vpack.c.bf16 %v264_v48, %v262_v47  ;;  %v612_v47 = vpack.c.bf16 %v276_v38, %v274_v35  ;;  %v283_v38 = vld [vmem:[%s3281_s18 + $0x3b0] sm:$0xff] }
  0xb2   : > { %v704_v54 = vpack.c.bf16 %v460_v50, %v458_v49 }
  0xb6   : > { %1018 = vmatmul.mubr.bf16.gmra.mxu0 %v583_v59  ;;  %1410 = vmatmul.mubr.bf16.gmra.mxu1 %v681_v60  ;;  %v241_v59 = vld [vmem:[%s3281_s18 + $0x260] sm:$0xff]  ;;  %v243_v60 = vld [vmem:[%s3281_s18 + $0x270] sm:$0xff] }
  0xb7   : > { %1025 = vmatprep.mubr.bf16.mxu0 %v586_v61  ;;  %1417 = vmatprep.mubr.bf16.mxu1 %v684_v62  ;;  %v437_v61 = vld [vmem:[%s3281_s18 + $0x880] sm:$0xff]  ;;  %v439_v62 = vld [vmem:[%s3281_s18 + $0x890] sm:$0xff]  ;;  %v595_v3 = vpack.c.bf16 %v243_v60, %v241_v59  ;;  %v266_v59 = vld [vmem:[%s3281_s18 + $0x328] sm:$0xff] }
  0xb8   : > { %v693_v4 = vpack.c.bf16 %v439_v62, %v437_v61  ;;  %v268_v60 = vld [vmem:[%s3281_s18 + $0x338] sm:$0xff]  ;;  %v462_v61 = vld [vmem:[%s3281_s18 + $0x948] sm:$0xff] }
  0xb9   : > { %v464_v62 = vld [vmem:[%s3281_s18 + $0x958] sm:$0xff]  ;;  %v608_v1 = vpack.c.bf16 %v268_v60, %v266_v59  ;;  %v278_v59 = vld [vmem:[%s3281_s18 + $0x388] sm:$0xff] }
  0xba   : > { %v706_v2 = vpack.c.bf16 %v464_v62, %v462_v61  ;;  %v280_v62 = vld [vmem:[%s3281_s18 + $0x398] sm:$0xff] }
  0xbe   : > { %1026 = vmatmul.mubr.bf16.gmra.mxu0 %v585_v7  ;;  %1418 = vmatmul.mubr.bf16.gmra.mxu1 %v683_v8  ;;  %v245_v7 = vld [vmem:[%s3281_s18 + $0x280] sm:$0xff]  ;;  %v247_v8 = vld [vmem:[%s3281_s18 + $0x290] sm:$0xff] }
  0xbf   : > { %1033 = vmatprep.mubr.bf16.mxu0 %v588_v9  ;;  %1425 = vmatprep.mubr.bf16.mxu1 %v686_v10  ;;  %v441_v9 = vld [vmem:[%s3281_s18 + $0x8a0] sm:$0xff]  ;;  %v443_v10 = vld [vmem:[%s3281_s18 + $0x8b0] sm:$0xff]  ;;  %v597_v15 = vpack.c.bf16 %v247_v8, %v245_v7 }
  0xc0   : > { %v695_v16 = vpack.c.bf16 %v443_v10, %v441_v9  ;;  %v461_v9 = vld [vmem:[%s3281_s18 + $0x940] sm:$0xff]  ;;  %v463_v10 = vld [vmem:[%s3281_s18 + $0x950] sm:$0xff] }
  0xc6   : > { %1034 = vmatmul.mubr.bf16.gmra.mxu0 %v587_v19  ;;  %1426 = vmatmul.mubr.bf16.gmra.mxu1 %v685_v20  ;;  %v249_v19 = vld [vmem:[%s3281_s18 + $0x2a0] sm:$0xff]  ;;  %v251_v20 = vld [vmem:[%s3281_s18 + $0x2b0] sm:$0xff] }
  0xc7   : > { %1041 = vmatprep.mubr.bf16.mxu0 %v590_v21  ;;  %1433 = vmatprep.mubr.bf16.mxu1 %v688_v22  ;;  %v445_v21 = vld [vmem:[%s3281_s18 + $0x8c0] sm:$0xff]  ;;  %v447_v22 = vld [vmem:[%s3281_s18 + $0x8d0] sm:$0xff]  ;;  %v599_v27 = vpack.c.bf16 %v251_v20, %v249_v19  ;;  %v705_v20 = vpack.c.bf16 %v463_v10, %v461_v9 }
  0xc8   : > { %v697_v28 = vpack.c.bf16 %v447_v22, %v445_v21 }
  0xce   : > { %1042 = vmatmul.mubr.bf16.gmra.mxu0 %v589_v31  ;;  %1434 = vmatmul.mubr.bf16.gmra.mxu1 %v687_v32  ;;  %v253_v31 = vld [vmem:[%s3281_s18 + $0x2c0] sm:$0xff]  ;;  %v255_v32 = vld [vmem:[%s3281_s18 + $0x2d0] sm:$0xff] }
  0xcf   : > { %1049 = vmatprep.mubr.bf16.mxu0 %v592_v33  ;;  %1441 = vmatprep.mubr.bf16.mxu1 %v690_v34  ;;  %v449_v33 = vld [vmem:[%s3281_s18 + $0x8e0] sm:$0xff]  ;;  %v451_v34 = vld [vmem:[%s3281_s18 + $0x8f0] sm:$0xff]  ;;  %v601_v39 = vpack.c.bf16 %v255_v32, %v253_v31 }
  0xd0   : > { %v699_v40 = vpack.c.bf16 %v451_v34, %v449_v33  ;;  %v465_v33 = vld [vmem:[%s3281_s18 + $0x960] sm:$0xff]  ;;  %v467_v34 = vld [vmem:[%s3281_s18 + $0x970] sm:$0xff] }
  0xd6   : > { %1050 = vmatmul.mubr.bf16.gmra.mxu0 %v591_v43  ;;  %1442 = vmatmul.mubr.bf16.gmra.mxu1 %v689_v44  ;;  %v257_v43 = vld [vmem:[%s3281_s18 + $0x2e0] sm:$0xff]  ;;  %v259_v44 = vld [vmem:[%s3281_s18 + $0x2f0] sm:$0xff] }
  0xd7   : > { %1057 = vmatprep.mubr.bf16.mxu0 %v594_v45  ;;  %1449 = vmatprep.mubr.bf16.mxu1 %v692_v46  ;;  %v453_v45 = vld [vmem:[%s3281_s18 + $0x900] sm:$0xff]  ;;  %v455_v46 = vld [vmem:[%s3281_s18 + $0x910] sm:$0xff]  ;;  %v603_v51 = vpack.c.bf16 %v259_v44, %v257_v43  ;;  %v707_v44 = vpack.c.bf16 %v467_v34, %v465_v33 }
  0xd8   : > { %v701_v52 = vpack.c.bf16 %v455_v46, %v453_v45 }
  0xde   : > { %1058 = vmatmul.mubr.bf16.gmra.mxu0 %v593_v55  ;;  %1450 = vmatmul.mubr.bf16.gmra.mxu1 %v691_v56  ;;  %v261_v55 = vld [vmem:[%s3281_s18 + $0x300] sm:$0xff]  ;;  %v263_v56 = vld [vmem:[%s3281_s18 + $0x310] sm:$0xff] }
  0xdf   : > { %1065 = vmatprep.mubr.bf16.mxu0 %v596_v57  ;;  %1457 = vmatprep.mubr.bf16.mxu1 %v694_v58  ;;  %v457_v57 = vld [vmem:[%s3281_s18 + $0x920] sm:$0xff]  ;;  %v459_v58 = vld [vmem:[%s3281_s18 + $0x930] sm:$0xff]  ;;  %v605_v63 = vpack.c.bf16 %v263_v56, %v261_v55 }
  0xe0   : > { %v703_v0 = vpack.c.bf16 %v459_v58, %v457_v57  ;;  %v469_v57 = vld [vmem:[%s3281_s18 + $0x980] sm:$0xff]  ;;  %v471_v58 = vld [vmem:[%s3281_s18 + $0x990] sm:$0xff] }
  0xe6   : > { %1066 = vmatmul.mubr.bf16.gmra.mxu0 %v595_v3  ;;  %1458 = vmatmul.mubr.bf16.gmra.mxu1 %v693_v4 }
  0xe7   : > { %1073 = vmatprep.mubr.bf16.mxu0 %v598_v5  ;;  %1465 = vmatprep.mubr.bf16.mxu1 %v696_v6  ;;  %v265_v5 = vld [vmem:[%s3281_s18 + $0x320] sm:$0xff]  ;;  %v267_v6 = vld [vmem:[%s3281_s18 + $0x330] sm:$0xff] }
  0xe8   : > { %v607_v19 = vpack.c.bf16 %v267_v6, %v265_v5 }
  0xee   : > { %1074 = vmatmul.mubr.bf16.gmra.mxu0 %v597_v15  ;;  %1466 = vmatmul.mubr.bf16.gmra.mxu1 %v695_v16  ;;  %v466_v15 = vld [vmem:[%s3281_s18 + $0x968] sm:$0xff]  ;;  %v468_v16 = vld [vmem:[%s3281_s18 + $0x978] sm:$0xff] }
  0xef   : > { %1081 = vmatprep.mubr.bf16.mxu0 %v600_v17  ;;  %1473 = vmatprep.mubr.bf16.mxu1 %v698_v18  ;;  %v708_v24 = vpack.c.bf16 %v468_v16, %v466_v15 }
  0xf6   : > { %1082 = vmatmul.mubr.bf16.gmra.mxu0 %v599_v27  ;;  %1474 = vmatmul.mubr.bf16.gmra.mxu1 %v697_v28 }
  0xf7   : > { %1089 = vmatprep.mubr.bf16.mxu0 %v602_v29  ;;  %1481 = vmatprep.mubr.bf16.mxu1 %v700_v30  ;;  %v269_v29 = vld [vmem:[%s3281_s18 + $0x340] sm:$0xff]  ;;  %v271_v30 = vld [vmem:[%s3281_s18 + $0x350] sm:$0xff] }
  0xf8   : > { %v609_v43 = vpack.c.bf16 %v271_v30, %v269_v29 }
  0xfe   : > { %1090 = vmatmul.mubr.bf16.gmra.mxu0 %v601_v39  ;;  %1482 = vmatmul.mubr.bf16.gmra.mxu1 %v699_v40  ;;  %v470_v39 = vld [vmem:[%s3281_s18 + $0x988] sm:$0xff]  ;;  %v472_v40 = vld [vmem:[%s3281_s18 + $0x998] sm:$0xff] }
  0xff   : > { %1097 = vmatprep.mubr.bf16.mxu0 %v604_v41  ;;  %1489 = vmatprep.mubr.bf16.mxu1 %v702_v42  ;;  %v710_v48 = vpack.c.bf16 %v472_v40, %v470_v39 }
 0x106   : > { %1098 = vmatmul.mubr.bf16.gmra.mxu0 %v603_v51  ;;  %1490 = vmatmul.mubr.bf16.gmra.mxu1 %v701_v52 }
 0x107   : > { %1105 = vmatprep.mubr.bf16.mxu0 %v606_v53  ;;  %1497 = vmatprep.mubr.bf16.mxu1 %v704_v54  ;;  %v273_v53 = vld [vmem:[%s3281_s18 + $0x360] sm:$0xff]  ;;  %v275_v54 = vld [vmem:[%s3281_s18 + $0x370] sm:$0xff] }
 0x10e   : > { %v915_v3 = vpop.f32.mrf.mxu0  ;;  %1106 = vmatmul.mubr.bf16.gmra.mxu0 %v605_v63  ;;  %v1307_v4 = vpop.f32.mrf.mxu1  ;;  %1498 = vmatmul.mubr.bf16.gmra.mxu1 %v703_v0  ;;  %v474_v63 = vld [vmem:[%s3281_s18 + $0x9a8] sm:$0xff]  ;;  %v476_v0 = vld [vmem:[%s3281_s18 + $0x9b8] sm:$0xff] }
 0x10f   : > { %v2970_v7 = vpack.c.bf16 %v915_v3, %v915_v3  ;;  %v3068_v8 = vpack.c.bf16 %v1307_v4, %v1307_v4  ;;  %1113 = vmatprep.mubr.bf16.mxu0 %v608_v1  ;;  %1505 = vmatprep.mubr.bf16.mxu1 %v706_v2  ;;  %v611_v3 = vpack.c.bf16 %v275_v54, %v273_v53 }
 0x110   : > { %v917_v12 = vpop.f32.mrf.mxu0  ;;  %v1309_v13 = vpop.f32.mrf.mxu1  ;;  %v709_v4 = vpack.c.bf16 %v471_v58, %v469_v57 }
 0x111   : > { %2483 = vst.msk [vmem:[%s3527_s22] sm:$0xf] %vm2482_vm0, %v2970_v7  ;;  %2581 = vst.msk [vmem:[%s3527_s22 + $0x188] sm:$0xf] %vm2482_vm0, %v3068_v8  ;;  %v614_v7 = vpack.c.bf16 %v280_v62, %v278_v59  ;;  %v712_v8 = vpack.c.bf16 %v476_v0, %v474_v63  ;;  %v277_v13 = vld [vmem:[%s3281_s18 + $0x380] sm:$0xff]  ;;  %v287_v62 = vld [vmem:[%s3281_s18 + $0x3d0] sm:$0xff] }
 0x112   : > { %v918_v17 = vpop.f32.mrf.mxu0  ;;  %v1310_v18 = vpop.f32.mrf.mxu1 }
 0x113   : > { %v2971_v21 = vpack.c.bf16 %v918_v17, %v918_v17  ;;  %v3069_v22 = vpack.c.bf16 %v1310_v18, %v1310_v18  ;;  %v473_v17 = vld [vmem:[%s3281_s18 + $0x9a0] sm:$0xff]  ;;  %v475_v18 = vld [vmem:[%s3281_s18 + $0x9b0] sm:$0xff] }
 0x114   : > { %v920_v25 = vpop.f32.mrf.mxu0  ;;  %v1312_v26 = vpop.f32.mrf.mxu1 }
 0x115   : > { %2484 = vst.msk [vmem:[%s3527_s22 + $0x4] sm:$0xf] %vm2482_vm0, %v2971_v21  ;;  %2582 = vst.msk [vmem:[%s3527_s22 + $0x18c] sm:$0xf] %vm2482_vm0, %v3069_v22  ;;  %v284_v22 = vld [vmem:[%s3281_s18 + $0x3b8] sm:$0xff] }
 0x116   : > { %v923_v27 = vpop.f32.mrf.mxu0  ;;  %1114 = vmatmul.mubr.bf16.gmra.mxu0 %v607_v19  ;;  %v1315_v28 = vpop.f32.mrf.mxu1  ;;  %1506 = vmatmul.mubr.bf16.gmra.mxu1 %v705_v20  ;;  %v282_v19 = vld [vmem:[%s3281_s18 + $0x3a8] sm:$0xff] }
 0x117   : > { %v2972_v31 = vpack.c.bf16 %v923_v27, %v923_v27  ;;  %v3070_v32 = vpack.c.bf16 %v1315_v28, %v1315_v28  ;;  %1121 = vmatprep.mubr.bf16.mxu0 %v610_v23  ;;  %1513 = vmatprep.mubr.bf16.mxu1 %v708_v24  ;;  %v478_v23 = vld [vmem:[%s3281_s18 + $0x9c8] sm:$0xff]  ;;  %v480_v24 = vld [vmem:[%s3281_s18 + $0x9d8] sm:$0xff]  ;;  %v613_v27 = vpack.c.bf16 %v279_v14, %v277_v13 }
 0x118   : > { %v925_v36 = vpop.f32.mrf.mxu0  ;;  %v1317_v37 = vpop.f32.mrf.mxu1  ;;  %v711_v28 = vpack.c.bf16 %v475_v18, %v473_v17 }
 0x119   : > { %2485 = vst.msk [vmem:[%s3527_s22 + $0x8] sm:$0xf] %vm2482_vm0, %v2972_v31  ;;  %2583 = vst.msk [vmem:[%s3527_s22 + $0x190] sm:$0xf] %vm2482_vm0, %v3070_v32  ;;  %v616_v31 = vpack.c.bf16 %v284_v22, %v282_v19  ;;  %v714_v32 = vpack.c.bf16 %v480_v24, %v478_v23  ;;  %v281_v37 = vld [vmem:[%s3281_s18 + $0x3a0] sm:$0xff]  ;;  %v291_v22 = vld [vmem:[%s3281_s18 + $0x3f0] sm:$0xff] }
 0x11a   : > { %v926_v41 = vpop.f32.mrf.mxu0  ;;  %v1318_v42 = vpop.f32.mrf.mxu1 }
 0x11b   : > { %v2973_v45 = vpack.c.bf16 %v926_v41, %v926_v41  ;;  %v3071_v46 = vpack.c.bf16 %v1318_v42, %v1318_v42  ;;  %v477_v41 = vld [vmem:[%s3281_s18 + $0x9c0] sm:$0xff]  ;;  %v479_v42 = vld [vmem:[%s3281_s18 + $0x9d0] sm:$0xff] }
 0x11c   : > { %v928_v49 = vpop.f32.mrf.mxu0  ;;  %v1320_v50 = vpop.f32.mrf.mxu1 }
 0x11d   : > { %2486 = vst.msk [vmem:[%s3527_s22 + $0xc] sm:$0xf] %vm2482_vm0, %v2973_v45  ;;  %2584 = vst.msk [vmem:[%s3527_s22 + $0x194] sm:$0xf] %vm2482_vm0, %v3071_v46  ;;  %v288_v46 = vld [vmem:[%s3281_s18 + $0x3d8] sm:$0xff] }
 0x11e   : > { %v931_v51 = vpop.f32.mrf.mxu0  ;;  %1122 = vmatmul.mubr.bf16.gmra.mxu0 %v609_v43  ;;  %v1323_v52 = vpop.f32.mrf.mxu1  ;;  %1514 = vmatmul.mubr.bf16.gmra.mxu1 %v707_v44  ;;  %v286_v43 = vld [vmem:[%s3281_s18 + $0x3c8] sm:$0xff] }
 0x11f   : > { %v2974_v55 = vpack.c.bf16 %v931_v51, %v931_v51  ;;  %v3072_v56 = vpack.c.bf16 %v1323_v52, %v1323_v52  ;;  %1129 = vmatprep.mubr.bf16.mxu0 %v612_v47  ;;  %1521 = vmatprep.mubr.bf16.mxu1 %v710_v48  ;;  %v482_v47 = vld [vmem:[%s3281_s18 + $0x9e8] sm:$0xff]  ;;  %v484_v48 = vld [vmem:[%s3281_s18 + $0x9f8] sm:$0xff]  ;;  %v615_v51 = vpack.c.bf16 %v283_v38, %v281_v37 }
 0x120   : > { %v933_v60 = vpop.f32.mrf.mxu0  ;;  %v1325_v61 = vpop.f32.mrf.mxu1  ;;  %v713_v52 = vpack.c.bf16 %v479_v42, %v477_v41 }
 0x121   : > { %2487 = vst.msk [vmem:[%s3527_s22 + $0x10] sm:$0xf] %vm2482_vm0, %v2974_v55  ;;  %2585 = vst.msk [vmem:[%s3527_s22 + $0x198] sm:$0xf] %vm2482_vm0, %v3072_v56  ;;  %v618_v55 = vpack.c.bf16 %v288_v46, %v286_v43  ;;  %v716_v56 = vpack.c.bf16 %v484_v48, %v482_v47  ;;  %v285_v61 = vld [vmem:[%s3281_s18 + $0x3c0] sm:$0xff]  ;;  %v295_v46 = vld [vmem:[%s3281_s18 + $0x410] sm:$0xff] }
 0x122   : > { %v934_v1 = vpop.f32.mrf.mxu0  ;;  %v1326_v2 = vpop.f32.mrf.mxu1 }
 0x123   : > { %v2975_v5 = vpack.c.bf16 %v934_v1, %v934_v1  ;;  %v3073_v6 = vpack.c.bf16 %v1326_v2, %v1326_v2  ;;  %v481_v1 = vld [vmem:[%s3281_s18 + $0x9e0] sm:$0xff]  ;;  %v483_v2 = vld [vmem:[%s3281_s18 + $0x9f0] sm:$0xff] }
 0x124   : > { %v936_v9 = vpop.f32.mrf.mxu0  ;;  %v1328_v10 = vpop.f32.mrf.mxu1 }
 0x125   : > { %2488 = vst.msk [vmem:[%s3527_s22 + $0x14] sm:$0xf] %vm2482_vm0, %v2975_v5  ;;  %2586 = vst.msk [vmem:[%s3527_s22 + $0x19c] sm:$0xf] %vm2482_vm0, %v3073_v6  ;;  %v292_v6 = vld [vmem:[%s3281_s18 + $0x3f8] sm:$0xff] }
 0x126   : > { %v939_v11 = vpop.f32.mrf.mxu0  ;;  %1130 = vmatmul.mubr.bf16.gmra.mxu0 %v611_v3  ;;  %v1331_v12 = vpop.f32.mrf.mxu1  ;;  %1522 = vmatmul.mubr.bf16.gmra.mxu1 %v709_v4  ;;  %v290_v3 = vld [vmem:[%s3281_s18 + $0x3e8] sm:$0xff] }
 0x127   : > { %v2976_v15 = vpack.c.bf16 %v939_v11, %v939_v11  ;;  %v3074_v16 = vpack.c.bf16 %v1331_v12, %v1331_v12  ;;  %1137 = vmatprep.mubr.bf16.mxu0 %v614_v7  ;;  %1529 = vmatprep.mubr.bf16.mxu1 %v712_v8  ;;  %v486_v7 = vld [vmem:[%s3281_s18 + $0xa08] sm:$0xff]  ;;  %v488_v8 = vld [vmem:[%s3281_s18 + $0xa18] sm:$0xff]  ;;  %v617_v11 = vpack.c.bf16 %v287_v62, %v285_v61 }
 0x128   : > { %v941_v20 = vpop.f32.mrf.mxu0  ;;  %v1333_v21 = vpop.f32.mrf.mxu1  ;;  %v715_v12 = vpack.c.bf16 %v483_v2, %v481_v1 }
 0x129   : > { %2489 = vst.msk [vmem:[%s3527_s22 + $0x18] sm:$0xf] %vm2482_vm0, %v2976_v15  ;;  %2587 = vst.msk [vmem:[%s3527_s22 + $0x1a0] sm:$0xf] %vm2482_vm0, %v3074_v16  ;;  %v620_v15 = vpack.c.bf16 %v292_v6, %v290_v3  ;;  %v718_v16 = vpack.c.bf16 %v488_v8, %v486_v7  ;;  %v289_v21 = vld [vmem:[%s3281_s18 + $0x3e0] sm:$0xff]  ;;  %v299_v6 = vld [vmem:[%s3281_s18 + $0x430] sm:$0xff] }
 0x12a   : > { %v942_v25 = vpop.f32.mrf.mxu0  ;;  %v1334_v26 = vpop.f32.mrf.mxu1 }
 0x12b   : > { %v2977_v29 = vpack.c.bf16 %v942_v25, %v942_v25  ;;  %v3075_v30 = vpack.c.bf16 %v1334_v26, %v1334_v26  ;;  %v485_v25 = vld [vmem:[%s3281_s18 + $0xa00] sm:$0xff]  ;;  %v487_v26 = vld [vmem:[%s3281_s18 + $0xa10] sm:$0xff] }
 0x12c   : > { %v944_v33 = vpop.f32.mrf.mxu0  ;;  %v1336_v34 = vpop.f32.mrf.mxu1 }
 0x12d   : > { %2490 = vst.msk [vmem:[%s3527_s22 + $0x1c] sm:$0xf] %vm2482_vm0, %v2977_v29  ;;  %2588 = vst.msk [vmem:[%s3527_s22 + $0x1a4] sm:$0xf] %vm2482_vm0, %v3075_v30  ;;  %v296_v30 = vld [vmem:[%s3281_s18 + $0x418] sm:$0xff] }
 0x12e   : > { %v947_v35 = vpop.f32.mrf.mxu0  ;;  %1138 = vmatmul.mubr.bf16.gmra.mxu0 %v613_v27  ;;  %v1339_v36 = vpop.f32.mrf.mxu1  ;;  %1530 = vmatmul.mubr.bf16.gmra.mxu1 %v711_v28  ;;  %v294_v27 = vld [vmem:[%s3281_s18 + $0x408] sm:$0xff] }
 0x12f   : > { %v2978_v39 = vpack.c.bf16 %v947_v35, %v947_v35  ;;  %v3076_v40 = vpack.c.bf16 %v1339_v36, %v1339_v36  ;;  %1145 = vmatprep.mubr.bf16.mxu0 %v616_v31  ;;  %1537 = vmatprep.mubr.bf16.mxu1 %v714_v32  ;;  %v490_v31 = vld [vmem:[%s3281_s18 + $0xa28] sm:$0xff]  ;;  %v492_v32 = vld [vmem:[%s3281_s18 + $0xa38] sm:$0xff]  ;;  %v619_v35 = vpack.c.bf16 %v291_v22, %v289_v21 }
 0x130   : > { %v949_v44 = vpop.f32.mrf.mxu0  ;;  %v1341_v45 = vpop.f32.mrf.mxu1  ;;  %v717_v36 = vpack.c.bf16 %v487_v26, %v485_v25 }
 0x131   : > { %2491 = vst.msk [vmem:[%s3527_s22 + $0x20] sm:$0xf] %vm2482_vm0, %v2978_v39  ;;  %2589 = vst.msk [vmem:[%s3527_s22 + $0x1a8] sm:$0xf] %vm2482_vm0, %v3076_v40  ;;  %v622_v39 = vpack.c.bf16 %v296_v30, %v294_v27  ;;  %v720_v40 = vpack.c.bf16 %v492_v32, %v490_v31  ;;  %v293_v45 = vld [vmem:[%s3281_s18 + $0x400] sm:$0xff]  ;;  %v303_v30 = vld [vmem:[%s3281_s18 + $0x450] sm:$0xff] }
 0x132   : > { %v950_v49 = vpop.f32.mrf.mxu0  ;;  %v1342_v50 = vpop.f32.mrf.mxu1 }
 0x133   : > { %v2979_v53 = vpack.c.bf16 %v950_v49, %v950_v49  ;;  %v3077_v54 = vpack.c.bf16 %v1342_v50, %v1342_v50  ;;  %v489_v49 = vld [vmem:[%s3281_s18 + $0xa20] sm:$0xff]  ;;  %v491_v50 = vld [vmem:[%s3281_s18 + $0xa30] sm:$0xff] }
 0x134   : > { %v952_v57 = vpop.f32.mrf.mxu0  ;;  %v1344_v58 = vpop.f32.mrf.mxu1 }
 0x135   : > { %2492 = vst.msk [vmem:[%s3527_s22 + $0x24] sm:$0xf] %vm2482_vm0, %v2979_v53  ;;  %2590 = vst.msk [vmem:[%s3527_s22 + $0x1ac] sm:$0xf] %vm2482_vm0, %v3077_v54  ;;  %v300_v54 = vld [vmem:[%s3281_s18 + $0x438] sm:$0xff] }
 0x136   : > { %v955_v59 = vpop.f32.mrf.mxu0  ;;  %1146 = vmatmul.mubr.bf16.gmra.mxu0 %v615_v51  ;;  %v1347_v60 = vpop.f32.mrf.mxu1  ;;  %1538 = vmatmul.mubr.bf16.gmra.mxu1 %v713_v52  ;;  %v298_v51 = vld [vmem:[%s3281_s18 + $0x428] sm:$0xff] }
 0x137   : > { %v2980_v63 = vpack.c.bf16 %v955_v59, %v955_v59  ;;  %v3078_v0 = vpack.c.bf16 %v1347_v60, %v1347_v60  ;;  %1153 = vmatprep.mubr.bf16.mxu0 %v618_v55  ;;  %1545 = vmatprep.mubr.bf16.mxu1 %v716_v56  ;;  %v494_v55 = vld [vmem:[%s3281_s18 + $0xa48] sm:$0xff]  ;;  %v496_v56 = vld [vmem:[%s3281_s18 + $0xa58] sm:$0xff]  ;;  %v621_v59 = vpack.c.bf16 %v295_v46, %v293_v45 }
 0x138   : > { %v957_v4 = vpop.f32.mrf.mxu0  ;;  %v1349_v5 = vpop.f32.mrf.mxu1  ;;  %v719_v60 = vpack.c.bf16 %v491_v50, %v489_v49 }
 0x139   : > { %2493 = vst.msk [vmem:[%s3527_s22 + $0x28] sm:$0xf] %vm2482_vm0, %v2980_v63  ;;  %2591 = vst.msk [vmem:[%s3527_s22 + $0x1b0] sm:$0xf] %vm2482_vm0, %v3078_v0  ;;  %v624_v63 = vpack.c.bf16 %v300_v54, %v298_v51  ;;  %v722_v0 = vpack.c.bf16 %v496_v56, %v494_v55  ;;  %v297_v5 = vld [vmem:[%s3281_s18 + $0x420] sm:$0xff]  ;;  %v307_v54 = vld [vmem:[%s3281_s18 + $0x470] sm:$0xff] }
 0x13a   : > { %v958_v9 = vpop.f32.mrf.mxu0  ;;  %v1350_v10 = vpop.f32.mrf.mxu1 }
 0x13b   : > { %v2981_v13 = vpack.c.bf16 %v958_v9, %v958_v9  ;;  %v3079_v14 = vpack.c.bf16 %v1350_v10, %v1350_v10  ;;  %v493_v9 = vld [vmem:[%s3281_s18 + $0xa40] sm:$0xff]  ;;  %v495_v10 = vld [vmem:[%s3281_s18 + $0xa50] sm:$0xff] }
 0x13c   : > { %v960_v17 = vpop.f32.mrf.mxu0  ;;  %v1352_v18 = vpop.f32.mrf.mxu1 }
 0x13d   : > { %2494 = vst.msk [vmem:[%s3527_s22 + $0x2c] sm:$0xf] %vm2482_vm0, %v2981_v13  ;;  %2592 = vst.msk [vmem:[%s3527_s22 + $0x1b4] sm:$0xf] %vm2482_vm0, %v3079_v14  ;;  %v304_v14 = vld [vmem:[%s3281_s18 + $0x458] sm:$0xff] }
 0x13e   : > { %v963_v19 = vpop.f32.mrf.mxu0  ;;  %1154 = vmatmul.mubr.bf16.gmra.mxu0 %v617_v11  ;;  %v1355_v20 = vpop.f32.mrf.mxu1  ;;  %1546 = vmatmul.mubr.bf16.gmra.mxu1 %v715_v12  ;;  %v302_v11 = vld [vmem:[%s3281_s18 + $0x448] sm:$0xff] }
 0x13f   : > { %v2982_v23 = vpack.c.bf16 %v963_v19, %v963_v19  ;;  %v3080_v24 = vpack.c.bf16 %v1355_v20, %v1355_v20  ;;  %1161 = vmatprep.mubr.bf16.mxu0 %v620_v15  ;;  %1553 = vmatprep.mubr.bf16.mxu1 %v718_v16  ;;  %v498_v15 = vld [vmem:[%s3281_s18 + $0xa68] sm:$0xff]  ;;  %v500_v16 = vld [vmem:[%s3281_s18 + $0xa78] sm:$0xff]  ;;  %v623_v19 = vpack.c.bf16 %v299_v6, %v297_v5 }
 0x140   : > { %v965_v28 = vpop.f32.mrf.mxu0  ;;  %v1357_v29 = vpop.f32.mrf.mxu1  ;;  %v721_v20 = vpack.c.bf16 %v495_v10, %v493_v9 }
 0x141   : > { %2495 = vst.msk [vmem:[%s3527_s22 + $0x30] sm:$0xf] %vm2482_vm0, %v2982_v23  ;;  %2593 = vst.msk [vmem:[%s3527_s22 + $0x1b8] sm:$0xf] %vm2482_vm0, %v3080_v24  ;;  %v626_v23 = vpack.c.bf16 %v304_v14, %v302_v11  ;;  %v724_v24 = vpack.c.bf16 %v500_v16, %v498_v15  ;;  %v301_v29 = vld [vmem:[%s3281_s18 + $0x440] sm:$0xff]  ;;  %v311_v14 = vld [vmem:[%s3281_s18 + $0x490] sm:$0xff] }
 0x142   : > { %v966_v33 = vpop.f32.mrf.mxu0  ;;  %v1358_v34 = vpop.f32.mrf.mxu1 }
 0x143   : > { %v2983_v37 = vpack.c.bf16 %v966_v33, %v966_v33  ;;  %v3081_v38 = vpack.c.bf16 %v1358_v34, %v1358_v34  ;;  %v497_v33 = vld [vmem:[%s3281_s18 + $0xa60] sm:$0xff]  ;;  %v499_v34 = vld [vmem:[%s3281_s18 + $0xa70] sm:$0xff] }
 0x144   : > { %v968_v41 = vpop.f32.mrf.mxu0  ;;  %v1360_v42 = vpop.f32.mrf.mxu1 }
 0x145   : > { %2496 = vst.msk [vmem:[%s3527_s22 + $0x34] sm:$0xf] %vm2482_vm0, %v2983_v37  ;;  %2594 = vst.msk [vmem:[%s3527_s22 + $0x1bc] sm:$0xf] %vm2482_vm0, %v3081_v38  ;;  %v308_v38 = vld [vmem:[%s3281_s18 + $0x478] sm:$0xff] }
 0x146   : > { %v971_v43 = vpop.f32.mrf.mxu0  ;;  %1162 = vmatmul.mubr.bf16.gmra.mxu0 %v619_v35  ;;  %v1363_v44 = vpop.f32.mrf.mxu1  ;;  %1554 = vmatmul.mubr.bf16.gmra.mxu1 %v717_v36  ;;  %v306_v35 = vld [vmem:[%s3281_s18 + $0x468] sm:$0xff] }
 0x147   : > { %v2984_v47 = vpack.c.bf16 %v971_v43, %v971_v43  ;;  %v3082_v48 = vpack.c.bf16 %v1363_v44, %v1363_v44  ;;  %1169 = vmatprep.mubr.bf16.mxu0 %v622_v39  ;;  %1561 = vmatprep.mubr.bf16.mxu1 %v720_v40  ;;  %v502_v39 = vld [vmem:[%s3281_s18 + $0xa88] sm:$0xff]  ;;  %v504_v40 = vld [vmem:[%s3281_s18 + $0xa98] sm:$0xff]  ;;  %v625_v43 = vpack.c.bf16 %v303_v30, %v301_v29 }
 0x148   : > { %v973_v52 = vpop.f32.mrf.mxu0  ;;  %v1365_v53 = vpop.f32.mrf.mxu1  ;;  %v723_v44 = vpack.c.bf16 %v499_v34, %v497_v33 }
 0x149   : > { %2497 = vst.msk [vmem:[%s3527_s22 + $0x38] sm:$0xf] %vm2482_vm0, %v2984_v47  ;;  %2595 = vst.msk [vmem:[%s3527_s22 + $0x1c0] sm:$0xf] %vm2482_vm0, %v3082_v48  ;;  %v628_v47 = vpack.c.bf16 %v308_v38, %v306_v35  ;;  %v726_v48 = vpack.c.bf16 %v504_v40, %v502_v39  ;;  %v305_v53 = vld [vmem:[%s3281_s18 + $0x460] sm:$0xff]  ;;  %v315_v38 = vld [vmem:[%s3281_s18 + $0x4b0] sm:$0xff] }
 0x14a   : > { %v974_v57 = vpop.f32.mrf.mxu0  ;;  %v1366_v58 = vpop.f32.mrf.mxu1 }
 0x14b   : > { %v2985_v61 = vpack.c.bf16 %v974_v57, %v974_v57  ;;  %v3083_v62 = vpack.c.bf16 %v1366_v58, %v1366_v58  ;;  %v501_v57 = vld [vmem:[%s3281_s18 + $0xa80] sm:$0xff]  ;;  %v503_v58 = vld [vmem:[%s3281_s18 + $0xa90] sm:$0xff] }
 0x14c   : > { %v976_v1 = vpop.f32.mrf.mxu0  ;;  %v1368_v2 = vpop.f32.mrf.mxu1 }
 0x14d   : > { %2498 = vst.msk [vmem:[%s3527_s22 + $0x3c] sm:$0xf] %vm2482_vm0, %v2985_v61  ;;  %2596 = vst.msk [vmem:[%s3527_s22 + $0x1c4] sm:$0xf] %vm2482_vm0, %v3083_v62  ;;  %v312_v62 = vld [vmem:[%s3281_s18 + $0x498] sm:$0xff] }
 0x14e   : > { %v979_v3 = vpop.f32.mrf.mxu0  ;;  %1170 = vmatmul.mubr.bf16.gmra.mxu0 %v621_v59  ;;  %v1371_v4 = vpop.f32.mrf.mxu1  ;;  %1562 = vmatmul.mubr.bf16.gmra.mxu1 %v719_v60  ;;  %v310_v59 = vld [vmem:[%s3281_s18 + $0x488] sm:$0xff] }
 0x14f   : > { %v2986_v7 = vpack.c.bf16 %v979_v3, %v979_v3  ;;  %v3084_v8 = vpack.c.bf16 %v1371_v4, %v1371_v4  ;;  %1177 = vmatprep.mubr.bf16.mxu0 %v624_v63  ;;  %1569 = vmatprep.mubr.bf16.mxu1 %v722_v0  ;;  %v506_v63 = vld [vmem:[%s3281_s18 + $0xaa8] sm:$0xff]  ;;  %v508_v0 = vld [vmem:[%s3281_s18 + $0xab8] sm:$0xff]  ;;  %v627_v3 = vpack.c.bf16 %v307_v54, %v305_v53 }
 0x150   : > { %v981_v12 = vpop.f32.mrf.mxu0  ;;  %v1373_v13 = vpop.f32.mrf.mxu1  ;;  %v725_v4 = vpack.c.bf16 %v503_v58, %v501_v57 }
 0x151   : > { %2499 = vst.msk [vmem:[%s3527_s22 + $0x40] sm:$0xf] %vm2482_vm0, %v2986_v7  ;;  %2597 = vst.msk [vmem:[%s3527_s22 + $0x1c8] sm:$0xf] %vm2482_vm0, %v3084_v8  ;;  %v630_v7 = vpack.c.bf16 %v312_v62, %v310_v59  ;;  %v728_v8 = vpack.c.bf16 %v508_v0, %v506_v63  ;;  %v309_v13 = vld [vmem:[%s3281_s18 + $0x480] sm:$0xff]  ;;  %v319_v62 = vld [vmem:[%s3281_s18 + $0x4d0] sm:$0xff] }
 0x152   : > { %v982_v17 = vpop.f32.mrf.mxu0  ;;  %v1374_v18 = vpop.f32.mrf.mxu1 }
 0x153   : > { %v2987_v21 = vpack.c.bf16 %v982_v17, %v982_v17  ;;  %v3085_v22 = vpack.c.bf16 %v1374_v18, %v1374_v18  ;;  %v505_v17 = vld [vmem:[%s3281_s18 + $0xaa0] sm:$0xff]  ;;  %v507_v18 = vld [vmem:[%s3281_s18 + $0xab0] sm:$0xff] }
 0x154   : > { %v984_v25 = vpop.f32.mrf.mxu0  ;;  %v1376_v26 = vpop.f32.mrf.mxu1 }
 0x155   : > { %2500 = vst.msk [vmem:[%s3527_s22 + $0x44] sm:$0xf] %vm2482_vm0, %v2987_v21  ;;  %2598 = vst.msk [vmem:[%s3527_s22 + $0x1cc] sm:$0xf] %vm2482_vm0, %v3085_v22  ;;  %v316_v22 = vld [vmem:[%s3281_s18 + $0x4b8] sm:$0xff] }
 0x156   : > { %v987_v27 = vpop.f32.mrf.mxu0  ;;  %1178 = vmatmul.mubr.bf16.gmra.mxu0 %v623_v19  ;;  %v1379_v28 = vpop.f32.mrf.mxu1  ;;  %1570 = vmatmul.mubr.bf16.gmra.mxu1 %v721_v20  ;;  %v314_v19 = vld [vmem:[%s3281_s18 + $0x4a8] sm:$0xff] }
 0x157   : > { %v2988_v31 = vpack.c.bf16 %v987_v27, %v987_v27  ;;  %v3086_v32 = vpack.c.bf16 %v1379_v28, %v1379_v28  ;;  %1185 = vmatprep.mubr.bf16.mxu0 %v626_v23  ;;  %1577 = vmatprep.mubr.bf16.mxu1 %v724_v24  ;;  %v510_v23 = vld [vmem:[%s3281_s18 + $0xac8] sm:$0xff]  ;;  %v512_v24 = vld [vmem:[%s3281_s18 + $0xad8] sm:$0xff]  ;;  %v629_v27 = vpack.c.bf16 %v311_v14, %v309_v13 }
 0x158   : > { %v989_v36 = vpop.f32.mrf.mxu0  ;;  %v1381_v37 = vpop.f32.mrf.mxu1  ;;  %v727_v28 = vpack.c.bf16 %v507_v18, %v505_v17 }
 0x159   : > { %2501 = vst.msk [vmem:[%s3527_s22 + $0x48] sm:$0xf] %vm2482_vm0, %v2988_v31  ;;  %2599 = vst.msk [vmem:[%s3527_s22 + $0x1d0] sm:$0xf] %vm2482_vm0, %v3086_v32  ;;  %v632_v31 = vpack.c.bf16 %v316_v22, %v314_v19  ;;  %v730_v32 = vpack.c.bf16 %v512_v24, %v510_v23  ;;  %v313_v37 = vld [vmem:[%s3281_s18 + $0x4a0] sm:$0xff]  ;;  %v323_v22 = vld [vmem:[%s3281_s18 + $0x4f0] sm:$0xff] }
 0x15a   : > { %v990_v41 = vpop.f32.mrf.mxu0  ;;  %v1382_v42 = vpop.f32.mrf.mxu1 }
 0x15b   : > { %v2989_v45 = vpack.c.bf16 %v990_v41, %v990_v41  ;;  %v3087_v46 = vpack.c.bf16 %v1382_v42, %v1382_v42  ;;  %v509_v41 = vld [vmem:[%s3281_s18 + $0xac0] sm:$0xff]  ;;  %v511_v42 = vld [vmem:[%s3281_s18 + $0xad0] sm:$0xff] }
 0x15c   : > { %v992_v49 = vpop.f32.mrf.mxu0  ;;  %v1384_v50 = vpop.f32.mrf.mxu1 }
 0x15d   : > { %2502 = vst.msk [vmem:[%s3527_s22 + $0x4c] sm:$0xf] %vm2482_vm0, %v2989_v45  ;;  %2600 = vst.msk [vmem:[%s3527_s22 + $0x1d4] sm:$0xf] %vm2482_vm0, %v3087_v46  ;;  %v320_v46 = vld [vmem:[%s3281_s18 + $0x4d8] sm:$0xff] }
 0x15e   : > { %v995_v51 = vpop.f32.mrf.mxu0  ;;  %1186 = vmatmul.mubr.bf16.gmra.mxu0 %v625_v43  ;;  %v1387_v52 = vpop.f32.mrf.mxu1  ;;  %1578 = vmatmul.mubr.bf16.gmra.mxu1 %v723_v44  ;;  %v318_v43 = vld [vmem:[%s3281_s18 + $0x4c8] sm:$0xff] }
 0x15f   : > { %v2990_v55 = vpack.c.bf16 %v995_v51, %v995_v51  ;;  %v3088_v56 = vpack.c.bf16 %v1387_v52, %v1387_v52  ;;  %1193 = vmatprep.mubr.bf16.mxu0 %v628_v47  ;;  %1585 = vmatprep.mubr.bf16.mxu1 %v726_v48  ;;  %v514_v47 = vld [vmem:[%s3281_s18 + $0xae8] sm:$0xff]  ;;  %v516_v48 = vld [vmem:[%s3281_s18 + $0xaf8] sm:$0xff]  ;;  %v631_v51 = vpack.c.bf16 %v315_v38, %v313_v37 }
 0x160   : > { %v997_v60 = vpop.f32.mrf.mxu0  ;;  %v1389_v61 = vpop.f32.mrf.mxu1  ;;  %v729_v52 = vpack.c.bf16 %v511_v42, %v509_v41 }
 0x161   : > { %2503 = vst.msk [vmem:[%s3527_s22 + $0x50] sm:$0xf] %vm2482_vm0, %v2990_v55  ;;  %2601 = vst.msk [vmem:[%s3527_s22 + $0x1d8] sm:$0xf] %vm2482_vm0, %v3088_v56  ;;  %v634_v55 = vpack.c.bf16 %v320_v46, %v318_v43  ;;  %v732_v56 = vpack.c.bf16 %v516_v48, %v514_v47  ;;  %v317_v61 = vld [vmem:[%s3281_s18 + $0x4c0] sm:$0xff]  ;;  %v327_v46 = vld [vmem:[%s3281_s18 + $0x510] sm:$0xff] }
 0x162   : > { %v998_v1 = vpop.f32.mrf.mxu0  ;;  %v1390_v2 = vpop.f32.mrf.mxu1 }
 0x163   : > { %v2991_v5 = vpack.c.bf16 %v998_v1, %v998_v1  ;;  %v3089_v6 = vpack.c.bf16 %v1390_v2, %v1390_v2  ;;  %v513_v1 = vld [vmem:[%s3281_s18 + $0xae0] sm:$0xff]  ;;  %v515_v2 = vld [vmem:[%s3281_s18 + $0xaf0] sm:$0xff] }
 0x164   : > { %v1000_v9 = vpop.f32.mrf.mxu0  ;;  %v1392_v10 = vpop.f32.mrf.mxu1 }
 0x165   : > { %2504 = vst.msk [vmem:[%s3527_s22 + $0x54] sm:$0xf] %vm2482_vm0, %v2991_v5  ;;  %2602 = vst.msk [vmem:[%s3527_s22 + $0x1dc] sm:$0xf] %vm2482_vm0, %v3089_v6  ;;  %v324_v6 = vld [vmem:[%s3281_s18 + $0x4f8] sm:$0xff] }
 0x166   : > { %v1003_v11 = vpop.f32.mrf.mxu0  ;;  %1194 = vmatmul.mubr.bf16.gmra.mxu0 %v627_v3  ;;  %v1395_v12 = vpop.f32.mrf.mxu1  ;;  %1586 = vmatmul.mubr.bf16.gmra.mxu1 %v725_v4  ;;  %v322_v3 = vld [vmem:[%s3281_s18 + $0x4e8] sm:$0xff] }
 0x167   : > { %v2992_v15 = vpack.c.bf16 %v1003_v11, %v1003_v11  ;;  %v3090_v16 = vpack.c.bf16 %v1395_v12, %v1395_v12  ;;  %1201 = vmatprep.mubr.bf16.mxu0 %v630_v7  ;;  %1593 = vmatprep.mubr.bf16.mxu1 %v728_v8  ;;  %v518_v7 = vld [vmem:[%s3281_s18 + $0xb08] sm:$0xff]  ;;  %v520_v8 = vld [vmem:[%s3281_s18 + $0xb18] sm:$0xff]  ;;  %v633_v11 = vpack.c.bf16 %v319_v62, %v317_v61 }
 0x168   : > { %v1005_v20 = vpop.f32.mrf.mxu0  ;;  %v1397_v21 = vpop.f32.mrf.mxu1  ;;  %v731_v12 = vpack.c.bf16 %v515_v2, %v513_v1 }
 0x169   : > { %2505 = vst.msk [vmem:[%s3527_s22 + $0x58] sm:$0xf] %vm2482_vm0, %v2992_v15  ;;  %2603 = vst.msk [vmem:[%s3527_s22 + $0x1e0] sm:$0xf] %vm2482_vm0, %v3090_v16  ;;  %v636_v15 = vpack.c.bf16 %v324_v6, %v322_v3  ;;  %v734_v16 = vpack.c.bf16 %v520_v8, %v518_v7  ;;  %v321_v21 = vld [vmem:[%s3281_s18 + $0x4e0] sm:$0xff]  ;;  %v331_v6 = vld [vmem:[%s3281_s18 + $0x530] sm:$0xff] }
 0x16a   : > { %v1006_v25 = vpop.f32.mrf.mxu0  ;;  %v1398_v26 = vpop.f32.mrf.mxu1 }
 0x16b   : > { %v2993_v29 = vpack.c.bf16 %v1006_v25, %v1006_v25  ;;  %v3091_v30 = vpack.c.bf16 %v1398_v26, %v1398_v26  ;;  %v517_v25 = vld [vmem:[%s3281_s18 + $0xb00] sm:$0xff]  ;;  %v519_v26 = vld [vmem:[%s3281_s18 + $0xb10] sm:$0xff] }
 0x16c   : > { %v1008_v33 = vpop.f32.mrf.mxu0  ;;  %v1400_v34 = vpop.f32.mrf.mxu1 }
 0x16d   : > { %2506 = vst.msk [vmem:[%s3527_s22 + $0x5c] sm:$0xf] %vm2482_vm0, %v2993_v29  ;;  %2604 = vst.msk [vmem:[%s3527_s22 + $0x1e4] sm:$0xf] %vm2482_vm0, %v3091_v30  ;;  %v328_v30 = vld [vmem:[%s3281_s18 + $0x518] sm:$0xff] }
 0x16e   : > { %v1011_v35 = vpop.f32.mrf.mxu0  ;;  %1202 = vmatmul.mubr.bf16.gmra.mxu0 %v629_v27  ;;  %v1403_v36 = vpop.f32.mrf.mxu1  ;;  %1594 = vmatmul.mubr.bf16.gmra.mxu1 %v727_v28  ;;  %v326_v27 = vld [vmem:[%s3281_s18 + $0x508] sm:$0xff] }
 0x16f   : > { %v2994_v39 = vpack.c.bf16 %v1011_v35, %v1011_v35  ;;  %v3092_v40 = vpack.c.bf16 %v1403_v36, %v1403_v36  ;;  %1209 = vmatprep.mubr.bf16.mxu0 %v632_v31  ;;  %1601 = vmatprep.mubr.bf16.mxu1 %v730_v32  ;;  %v522_v31 = vld [vmem:[%s3281_s18 + $0xb28] sm:$0xff]  ;;  %v524_v32 = vld [vmem:[%s3281_s18 + $0xb38] sm:$0xff]  ;;  %v635_v35 = vpack.c.bf16 %v323_v22, %v321_v21 }
 0x170   : > { %v1013_v44 = vpop.f32.mrf.mxu0  ;;  %v1405_v45 = vpop.f32.mrf.mxu1  ;;  %v733_v36 = vpack.c.bf16 %v519_v26, %v517_v25 }
 0x171   : > { %2507 = vst.msk [vmem:[%s3527_s22 + $0x60] sm:$0xf] %vm2482_vm0, %v2994_v39  ;;  %2605 = vst.msk [vmem:[%s3527_s22 + $0x1e8] sm:$0xf] %vm2482_vm0, %v3092_v40  ;;  %v638_v39 = vpack.c.bf16 %v328_v30, %v326_v27  ;;  %v736_v40 = vpack.c.bf16 %v524_v32, %v522_v31  ;;  %v325_v45 = vld [vmem:[%s3281_s18 + $0x500] sm:$0xff]  ;;  %v335_v30 = vld [vmem:[%s3281_s18 + $0x550] sm:$0xff] }
 0x172   : > { %v1014_v49 = vpop.f32.mrf.mxu0  ;;  %v1406_v50 = vpop.f32.mrf.mxu1 }
 0x173   : > { %v2995_v53 = vpack.c.bf16 %v1014_v49, %v1014_v49  ;;  %v3093_v54 = vpack.c.bf16 %v1406_v50, %v1406_v50  ;;  %v521_v49 = vld [vmem:[%s3281_s18 + $0xb20] sm:$0xff]  ;;  %v523_v50 = vld [vmem:[%s3281_s18 + $0xb30] sm:$0xff] }
 0x174   : > { %v1016_v57 = vpop.f32.mrf.mxu0  ;;  %v1408_v58 = vpop.f32.mrf.mxu1 }
 0x175   : > { %2508 = vst.msk [vmem:[%s3527_s22 + $0x64] sm:$0xf] %vm2482_vm0, %v2995_v53  ;;  %2606 = vst.msk [vmem:[%s3527_s22 + $0x1ec] sm:$0xf] %vm2482_vm0, %v3093_v54  ;;  %v332_v54 = vld [vmem:[%s3281_s18 + $0x538] sm:$0xff] }
 0x176   : > { %v1019_v59 = vpop.f32.mrf.mxu0  ;;  %1210 = vmatmul.mubr.bf16.gmra.mxu0 %v631_v51  ;;  %v1411_v60 = vpop.f32.mrf.mxu1  ;;  %1602 = vmatmul.mubr.bf16.gmra.mxu1 %v729_v52  ;;  %v330_v51 = vld [vmem:[%s3281_s18 + $0x528] sm:$0xff] }
 0x177   : > { %v2996_v63 = vpack.c.bf16 %v1019_v59, %v1019_v59  ;;  %v3094_v0 = vpack.c.bf16 %v1411_v60, %v1411_v60  ;;  %1217 = vmatprep.mubr.bf16.mxu0 %v634_v55  ;;  %1609 = vmatprep.mubr.bf16.mxu1 %v732_v56  ;;  %v526_v55 = vld [vmem:[%s3281_s18 + $0xb48] sm:$0xff]  ;;  %v528_v56 = vld [vmem:[%s3281_s18 + $0xb58] sm:$0xff]  ;;  %v637_v59 = vpack.c.bf16 %v327_v46, %v325_v45 }
 0x178   : > { %v1021_v4 = vpop.f32.mrf.mxu0  ;;  %v1413_v5 = vpop.f32.mrf.mxu1  ;;  %v735_v60 = vpack.c.bf16 %v523_v50, %v521_v49 }
 0x179   : > { %2509 = vst.msk [vmem:[%s3527_s22 + $0x68] sm:$0xf] %vm2482_vm0, %v2996_v63  ;;  %2607 = vst.msk [vmem:[%s3527_s22 + $0x1f0] sm:$0xf] %vm2482_vm0, %v3094_v0  ;;  %v640_v63 = vpack.c.bf16 %v332_v54, %v330_v51  ;;  %v738_v0 = vpack.c.bf16 %v528_v56, %v526_v55  ;;  %v329_v5 = vld [vmem:[%s3281_s18 + $0x520] sm:$0xff]  ;;  %v339_v54 = vld [vmem:[%s3281_s18 + $0x570] sm:$0xff] }
 0x17a   : > { %v1022_v9 = vpop.f32.mrf.mxu0  ;;  %v1414_v10 = vpop.f32.mrf.mxu1 }
 0x17b   : > { %v2997_v13 = vpack.c.bf16 %v1022_v9, %v1022_v9  ;;  %v3095_v14 = vpack.c.bf16 %v1414_v10, %v1414_v10  ;;  %v525_v9 = vld [vmem:[%s3281_s18 + $0xb40] sm:$0xff]  ;;  %v527_v10 = vld [vmem:[%s3281_s18 + $0xb50] sm:$0xff] }
 0x17c   : > { %v1024_v17 = vpop.f32.mrf.mxu0  ;;  %v1416_v18 = vpop.f32.mrf.mxu1 }
 0x17d   : > { %2510 = vst.msk [vmem:[%s3527_s22 + $0x6c] sm:$0xf] %vm2482_vm0, %v2997_v13  ;;  %2608 = vst.msk [vmem:[%s3527_s22 + $0x1f4] sm:$0xf] %vm2482_vm0, %v3095_v14  ;;  %v336_v14 = vld [vmem:[%s3281_s18 + $0x558] sm:$0xff] }
 0x17e   : > { %v1027_v19 = vpop.f32.mrf.mxu0  ;;  %1218 = vmatmul.mubr.bf16.gmra.mxu0 %v633_v11  ;;  %v1419_v20 = vpop.f32.mrf.mxu1  ;;  %1610 = vmatmul.mubr.bf16.gmra.mxu1 %v731_v12  ;;  %v334_v11 = vld [vmem:[%s3281_s18 + $0x548] sm:$0xff] }
 0x17f   : > { %v2998_v23 = vpack.c.bf16 %v1027_v19, %v1027_v19  ;;  %v3096_v24 = vpack.c.bf16 %v1419_v20, %v1419_v20  ;;  %1225 = vmatprep.mubr.bf16.mxu0 %v636_v15  ;;  %1617 = vmatprep.mubr.bf16.mxu1 %v734_v16  ;;  %v530_v15 = vld [vmem:[%s3281_s18 + $0xb68] sm:$0xff]  ;;  %v532_v16 = vld [vmem:[%s3281_s18 + $0xb78] sm:$0xff]  ;;  %v639_v19 = vpack.c.bf16 %v331_v6, %v329_v5 }
 0x180   : > { %v1029_v28 = vpop.f32.mrf.mxu0  ;;  %v1421_v29 = vpop.f32.mrf.mxu1  ;;  %v737_v20 = vpack.c.bf16 %v527_v10, %v525_v9 }
 0x181   : > { %2511 = vst.msk [vmem:[%s3527_s22 + $0x70] sm:$0xf] %vm2482_vm0, %v2998_v23  ;;  %2609 = vst.msk [vmem:[%s3527_s22 + $0x1f8] sm:$0xf] %vm2482_vm0, %v3096_v24  ;;  %v642_v23 = vpack.c.bf16 %v336_v14, %v334_v11  ;;  %v740_v24 = vpack.c.bf16 %v532_v16, %v530_v15  ;;  %v333_v29 = vld [vmem:[%s3281_s18 + $0x540] sm:$0xff]  ;;  %v343_v14 = vld [vmem:[%s3281_s18 + $0x590] sm:$0xff] }
 0x182   : > { %v1030_v33 = vpop.f32.mrf.mxu0  ;;  %v1422_v34 = vpop.f32.mrf.mxu1 }
 0x183   : > { %v2999_v37 = vpack.c.bf16 %v1030_v33, %v1030_v33  ;;  %v3097_v38 = vpack.c.bf16 %v1422_v34, %v1422_v34  ;;  %v529_v33 = vld [vmem:[%s3281_s18 + $0xb60] sm:$0xff]  ;;  %v531_v34 = vld [vmem:[%s3281_s18 + $0xb70] sm:$0xff] }
 0x184   : > { %v1032_v41 = vpop.f32.mrf.mxu0  ;;  %v1424_v42 = vpop.f32.mrf.mxu1 }
 0x185   : > { %2512 = vst.msk [vmem:[%s3527_s22 + $0x74] sm:$0xf] %vm2482_vm0, %v2999_v37  ;;  %2610 = vst.msk [vmem:[%s3527_s22 + $0x1fc] sm:$0xf] %vm2482_vm0, %v3097_v38  ;;  %v340_v38 = vld [vmem:[%s3281_s18 + $0x578] sm:$0xff] }
 0x186   : > { %v1035_v43 = vpop.f32.mrf.mxu0  ;;  %1226 = vmatmul.mubr.bf16.gmra.mxu0 %v635_v35  ;;  %v1427_v44 = vpop.f32.mrf.mxu1  ;;  %1618 = vmatmul.mubr.bf16.gmra.mxu1 %v733_v36  ;;  %v338_v35 = vld [vmem:[%s3281_s18 + $0x568] sm:$0xff] }
 0x187   : > { %v3000_v47 = vpack.c.bf16 %v1035_v43, %v1035_v43  ;;  %v3098_v48 = vpack.c.bf16 %v1427_v44, %v1427_v44  ;;  %1233 = vmatprep.mubr.bf16.mxu0 %v638_v39  ;;  %1625 = vmatprep.mubr.bf16.mxu1 %v736_v40  ;;  %v534_v39 = vld [vmem:[%s3281_s18 + $0xb88] sm:$0xff]  ;;  %v536_v40 = vld [vmem:[%s3281_s18 + $0xb98] sm:$0xff]  ;;  %v641_v43 = vpack.c.bf16 %v335_v30, %v333_v29 }
 0x188   : > { %v1037_v52 = vpop.f32.mrf.mxu0  ;;  %v1429_v53 = vpop.f32.mrf.mxu1  ;;  %v739_v44 = vpack.c.bf16 %v531_v34, %v529_v33 }
 0x189   : > { %2513 = vst.msk [vmem:[%s3527_s22 + $0x78] sm:$0xf] %vm2482_vm0, %v3000_v47  ;;  %2611 = vst.msk [vmem:[%s3527_s22 + $0x200] sm:$0xf] %vm2482_vm0, %v3098_v48  ;;  %v644_v47 = vpack.c.bf16 %v340_v38, %v338_v35  ;;  %v742_v48 = vpack.c.bf16 %v536_v40, %v534_v39  ;;  %v337_v53 = vld [vmem:[%s3281_s18 + $0x560] sm:$0xff]  ;;  %v347_v38 = vld [vmem:[%s3281_s18 + $0x5b0] sm:$0xff] }
 0x18a   : > { %v1038_v57 = vpop.f32.mrf.mxu0  ;;  %v1430_v58 = vpop.f32.mrf.mxu1 }
 0x18b   : > { %v3001_v61 = vpack.c.bf16 %v1038_v57, %v1038_v57  ;;  %v3099_v62 = vpack.c.bf16 %v1430_v58, %v1430_v58  ;;  %v533_v57 = vld [vmem:[%s3281_s18 + $0xb80] sm:$0xff]  ;;  %v535_v58 = vld [vmem:[%s3281_s18 + $0xb90] sm:$0xff] }
 0x18c   : > { %v1040_v1 = vpop.f32.mrf.mxu0  ;;  %v1432_v2 = vpop.f32.mrf.mxu1 }
 0x18d   : > { %2514 = vst.msk [vmem:[%s3527_s22 + $0x7c] sm:$0xf] %vm2482_vm0, %v3001_v61  ;;  %2612 = vst.msk [vmem:[%s3527_s22 + $0x204] sm:$0xf] %vm2482_vm0, %v3099_v62  ;;  %v344_v62 = vld [vmem:[%s3281_s18 + $0x598] sm:$0xff] }
 0x18e   : > { %v1043_v3 = vpop.f32.mrf.mxu0  ;;  %1234 = vmatmul.mubr.bf16.gmra.mxu0 %v637_v59  ;;  %v1435_v4 = vpop.f32.mrf.mxu1  ;;  %1626 = vmatmul.mubr.bf16.gmra.mxu1 %v735_v60  ;;  %v342_v59 = vld [vmem:[%s3281_s18 + $0x588] sm:$0xff] }
 0x18f   : > { %v3002_v7 = vpack.c.bf16 %v1043_v3, %v1043_v3  ;;  %v3100_v8 = vpack.c.bf16 %v1435_v4, %v1435_v4  ;;  %1241 = vmatprep.mubr.bf16.mxu0 %v640_v63  ;;  %1633 = vmatprep.mubr.bf16.mxu1 %v738_v0  ;;  %v538_v63 = vld [vmem:[%s3281_s18 + $0xba8] sm:$0xff]  ;;  %v540_v0 = vld [vmem:[%s3281_s18 + $0xbb8] sm:$0xff]  ;;  %v643_v3 = vpack.c.bf16 %v339_v54, %v337_v53 }
 0x190   : > { %v1045_v12 = vpop.f32.mrf.mxu0  ;;  %v1437_v13 = vpop.f32.mrf.mxu1  ;;  %v741_v4 = vpack.c.bf16 %v535_v58, %v533_v57 }
 0x191   : > { %2515 = vst.msk [vmem:[%s3527_s22 + $0x80] sm:$0xf] %vm2482_vm0, %v3002_v7  ;;  %2613 = vst.msk [vmem:[%s3527_s22 + $0x208] sm:$0xf] %vm2482_vm0, %v3100_v8  ;;  %v646_v7 = vpack.c.bf16 %v344_v62, %v342_v59  ;;  %v744_v8 = vpack.c.bf16 %v540_v0, %v538_v63  ;;  %v341_v13 = vld [vmem:[%s3281_s18 + $0x580] sm:$0xff]  ;;  %v351_v62 = vld [vmem:[%s3281_s18 + $0x5d0] sm:$0xff] }
 0x192   : > { %v1046_v17 = vpop.f32.mrf.mxu0  ;;  %v1438_v18 = vpop.f32.mrf.mxu1 }
 0x193   : > { %v3003_v21 = vpack.c.bf16 %v1046_v17, %v1046_v17  ;;  %v3101_v22 = vpack.c.bf16 %v1438_v18, %v1438_v18  ;;  %v537_v17 = vld [vmem:[%s3281_s18 + $0xba0] sm:$0xff]  ;;  %v539_v18 = vld [vmem:[%s3281_s18 + $0xbb0] sm:$0xff] }
 0x194   : > { %v1048_v25 = vpop.f32.mrf.mxu0  ;;  %v1440_v26 = vpop.f32.mrf.mxu1 }
 0x195   : > { %2516 = vst.msk [vmem:[%s3527_s22 + $0x84] sm:$0xf] %vm2482_vm0, %v3003_v21  ;;  %2614 = vst.msk [vmem:[%s3527_s22 + $0x20c] sm:$0xf] %vm2482_vm0, %v3101_v22  ;;  %v348_v22 = vld [vmem:[%s3281_s18 + $0x5b8] sm:$0xff] }
 0x196   : > { %v1051_v27 = vpop.f32.mrf.mxu0  ;;  %1242 = vmatmul.mubr.bf16.gmra.mxu0 %v639_v19  ;;  %v1443_v28 = vpop.f32.mrf.mxu1  ;;  %1634 = vmatmul.mubr.bf16.gmra.mxu1 %v737_v20  ;;  %v346_v19 = vld [vmem:[%s3281_s18 + $0x5a8] sm:$0xff] }
 0x197   : > { %v3004_v31 = vpack.c.bf16 %v1051_v27, %v1051_v27  ;;  %v3102_v32 = vpack.c.bf16 %v1443_v28, %v1443_v28  ;;  %1249 = vmatprep.mubr.bf16.mxu0 %v642_v23  ;;  %1641 = vmatprep.mubr.bf16.mxu1 %v740_v24  ;;  %v542_v23 = vld [vmem:[%s3281_s18 + $0xbc8] sm:$0xff]  ;;  %v544_v24 = vld [vmem:[%s3281_s18 + $0xbd8] sm:$0xff]  ;;  %v645_v27 = vpack.c.bf16 %v343_v14, %v341_v13 }
 0x198   : > { %v1053_v36 = vpop.f32.mrf.mxu0  ;;  %v1445_v37 = vpop.f32.mrf.mxu1  ;;  %v743_v28 = vpack.c.bf16 %v539_v18, %v537_v17 }
 0x199   : > { %2517 = vst.msk [vmem:[%s3527_s22 + $0x88] sm:$0xf] %vm2482_vm0, %v3004_v31  ;;  %2615 = vst.msk [vmem:[%s3527_s22 + $0x210] sm:$0xf] %vm2482_vm0, %v3102_v32  ;;  %v648_v31 = vpack.c.bf16 %v348_v22, %v346_v19  ;;  %v746_v32 = vpack.c.bf16 %v544_v24, %v542_v23  ;;  %v345_v37 = vld [vmem:[%s3281_s18 + $0x5a0] sm:$0xff]  ;;  %v355_v22 = vld [vmem:[%s3281_s18 + $0x5f0] sm:$0xff] }
 0x19a   : > { %v1054_v41 = vpop.f32.mrf.mxu0  ;;  %v1446_v42 = vpop.f32.mrf.mxu1 }
 0x19b   : > { %v3005_v45 = vpack.c.bf16 %v1054_v41, %v1054_v41  ;;  %v3103_v46 = vpack.c.bf16 %v1446_v42, %v1446_v42  ;;  %v541_v41 = vld [vmem:[%s3281_s18 + $0xbc0] sm:$0xff]  ;;  %v543_v42 = vld [vmem:[%s3281_s18 + $0xbd0] sm:$0xff] }
 0x19c   : > { %v1056_v49 = vpop.f32.mrf.mxu0  ;;  %v1448_v50 = vpop.f32.mrf.mxu1 }
 0x19d   : > { %2518 = vst.msk [vmem:[%s3527_s22 + $0x8c] sm:$0xf] %vm2482_vm0, %v3005_v45  ;;  %2616 = vst.msk [vmem:[%s3527_s22 + $0x214] sm:$0xf] %vm2482_vm0, %v3103_v46  ;;  %v352_v46 = vld [vmem:[%s3281_s18 + $0x5d8] sm:$0xff] }
 0x19e   : > { %v1059_v51 = vpop.f32.mrf.mxu0  ;;  %1250 = vmatmul.mubr.bf16.gmra.mxu0 %v641_v43  ;;  %v1451_v52 = vpop.f32.mrf.mxu1  ;;  %1642 = vmatmul.mubr.bf16.gmra.mxu1 %v739_v44  ;;  %v350_v43 = vld [vmem:[%s3281_s18 + $0x5c8] sm:$0xff] }
 0x19f   : > { %v3006_v55 = vpack.c.bf16 %v1059_v51, %v1059_v51  ;;  %v3104_v56 = vpack.c.bf16 %v1451_v52, %v1451_v52  ;;  %1257 = vmatprep.mubr.bf16.mxu0 %v644_v47  ;;  %1649 = vmatprep.mubr.bf16.mxu1 %v742_v48  ;;  %v546_v47 = vld [vmem:[%s3281_s18 + $0xbe8] sm:$0xff]  ;;  %v548_v48 = vld [vmem:[%s3281_s18 + $0xbf8] sm:$0xff]  ;;  %v647_v51 = vpack.c.bf16 %v347_v38, %v345_v37 }
 0x1a0   : > { %v1061_v60 = vpop.f32.mrf.mxu0  ;;  %v1453_v61 = vpop.f32.mrf.mxu1  ;;  %v745_v52 = vpack.c.bf16 %v543_v42, %v541_v41 }
 0x1a1   : > { %2519 = vst.msk [vmem:[%s3527_s22 + $0x90] sm:$0xf] %vm2482_vm0, %v3006_v55  ;;  %2617 = vst.msk [vmem:[%s3527_s22 + $0x218] sm:$0xf] %vm2482_vm0, %v3104_v56  ;;  %v650_v55 = vpack.c.bf16 %v352_v46, %v350_v43  ;;  %v748_v56 = vpack.c.bf16 %v548_v48, %v546_v47  ;;  %v349_v61 = vld [vmem:[%s3281_s18 + $0x5c0] sm:$0xff]  ;;  %v359_v48 = vld [vmem:[%s3281_s18 + $0x610] sm:$0xff] }
 0x1a2   : > { %v1062_v1 = vpop.f32.mrf.mxu0  ;;  %v1454_v2 = vpop.f32.mrf.mxu1 }
 0x1a3   : > { %v3007_v5 = vpack.c.bf16 %v1062_v1, %v1062_v1  ;;  %v3105_v6 = vpack.c.bf16 %v1454_v2, %v1454_v2  ;;  %v545_v1 = vld [vmem:[%s3281_s18 + $0xbe0] sm:$0xff]  ;;  %v547_v2 = vld [vmem:[%s3281_s18 + $0xbf0] sm:$0xff] }
 0x1a4   : > { %v1064_v9 = vpop.f32.mrf.mxu0  ;;  %v1456_v10 = vpop.f32.mrf.mxu1 }
 0x1a5   : > { %2520 = vst.msk [vmem:[%s3527_s22 + $0x94] sm:$0xf] %vm2482_vm0, %v3007_v5  ;;  %2618 = vst.msk [vmem:[%s3527_s22 + $0x21c] sm:$0xf] %vm2482_vm0, %v3105_v6  ;;  %v356_v6 = vld [vmem:[%s3281_s18 + $0x5f8] sm:$0xff] }
 0x1a6   : > { %v1067_v11 = vpop.f32.mrf.mxu0  ;;  %1258 = vmatmul.mubr.bf16.gmra.mxu0 %v643_v3  ;;  %v1459_v12 = vpop.f32.mrf.mxu1  ;;  %1650 = vmatmul.mubr.bf16.gmra.mxu1 %v741_v4  ;;  %v354_v3 = vld [vmem:[%s3281_s18 + $0x5e8] sm:$0xff] }
 0x1a7   : > { %v3008_v15 = vpack.c.bf16 %v1067_v11, %v1067_v11  ;;  %v3106_v16 = vpack.c.bf16 %v1459_v12, %v1459_v12  ;;  %1265 = vmatprep.mubr.bf16.mxu0 %v646_v7  ;;  %1657 = vmatprep.mubr.bf16.mxu1 %v744_v8  ;;  %v550_v7 = vld [vmem:[%s3281_s18 + $0xc08] sm:$0xff]  ;;  %v552_v8 = vld [vmem:[%s3281_s18 + $0xc18] sm:$0xff]  ;;  %v649_v11 = vpack.c.bf16 %v351_v62, %v349_v61 }
 0x1a8   : > { %v1069_v20 = vpop.f32.mrf.mxu0  ;;  %v1461_v21 = vpop.f32.mrf.mxu1  ;;  %v747_v12 = vpack.c.bf16 %v547_v2, %v545_v1 }
 0x1a9   : > { %2521 = vst.msk [vmem:[%s3527_s22 + $0x98] sm:$0xf] %vm2482_vm0, %v3008_v15  ;;  %2619 = vst.msk [vmem:[%s3527_s22 + $0x220] sm:$0xf] %vm2482_vm0, %v3106_v16  ;;  %v652_v15 = vpack.c.bf16 %v356_v6, %v354_v3  ;;  %v750_v16 = vpack.c.bf16 %v552_v8, %v550_v7  ;;  %v353_v21 = vld [vmem:[%s3281_s18 + $0x5e0] sm:$0xff] }
 0x1aa   : > { %v1070_v25 = vpop.f32.mrf.mxu0  ;;  %v1462_v26 = vpop.f32.mrf.mxu1 }
 0x1ab   : > { %v3009_v29 = vpack.c.bf16 %v1070_v25, %v1070_v25  ;;  %v3107_v30 = vpack.c.bf16 %v1462_v26, %v1462_v26  ;;  %v549_v25 = vld [vmem:[%s3281_s18 + $0xc00] sm:$0xff]  ;;  %v551_v26 = vld [vmem:[%s3281_s18 + $0xc10] sm:$0xff] }
 0x1ac   : > { %v1072_v33 = vpop.f32.mrf.mxu0  ;;  %v1464_v34 = vpop.f32.mrf.mxu1 }
 0x1ad   : > { %2522 = vst.msk [vmem:[%s3527_s22 + $0x9c] sm:$0xf] %vm2482_vm0, %v3009_v29  ;;  %2620 = vst.msk [vmem:[%s3527_s22 + $0x224] sm:$0xf] %vm2482_vm0, %v3107_v30  ;;  %v360_v30 = vld [vmem:[%s3281_s18 + $0x618] sm:$0xff] }
 0x1ae   : > { %v1075_v35 = vpop.f32.mrf.mxu0  ;;  %1266 = vmatmul.mubr.bf16.gmra.mxu0 %v645_v27  ;;  %v1467_v36 = vpop.f32.mrf.mxu1  ;;  %1658 = vmatmul.mubr.bf16.gmra.mxu1 %v743_v28  ;;  %v358_v27 = vld [vmem:[%s3281_s18 + $0x608] sm:$0xff] }
 0x1af   : > { %v3010_v39 = vpack.c.bf16 %v1075_v35, %v1075_v35  ;;  %v3108_v40 = vpack.c.bf16 %v1467_v36, %v1467_v36  ;;  %1273 = vmatprep.mubr.bf16.mxu0 %v648_v31  ;;  %1665 = vmatprep.mubr.bf16.mxu1 %v746_v32  ;;  %v554_v31 = vld [vmem:[%s3281_s18 + $0xc28] sm:$0xff]  ;;  %v556_v32 = vld [vmem:[%s3281_s18 + $0xc38] sm:$0xff]  ;;  %v651_v35 = vpack.c.bf16 %v355_v22, %v353_v21 }
 0x1b0   : > { %v1077_v44 = vpop.f32.mrf.mxu0  ;;  %v1469_v45 = vpop.f32.mrf.mxu1  ;;  %v749_v36 = vpack.c.bf16 %v551_v26, %v549_v25 }
 0x1b1   : > { %2523 = vst.msk [vmem:[%s3527_s22 + $0xa0] sm:$0xf] %vm2482_vm0, %v3010_v39  ;;  %2621 = vst.msk [vmem:[%s3527_s22 + $0x228] sm:$0xf] %vm2482_vm0, %v3108_v40  ;;  %v654_v39 = vpack.c.bf16 %v360_v30, %v358_v27  ;;  %v752_v40 = vpack.c.bf16 %v556_v32, %v554_v31  ;;  %v357_v45 = vld [vmem:[%s3281_s18 + $0x600] sm:$0xff] }
 0x1b2   : > { %v1078_v49 = vpop.f32.mrf.mxu0  ;;  %v1470_v50 = vpop.f32.mrf.mxu1 }
 0x1b3   : > { %v3011_v53 = vpack.c.bf16 %v1078_v49, %v1078_v49  ;;  %v3109_v54 = vpack.c.bf16 %v1470_v50, %v1470_v50  ;;  %v553_v49 = vld [vmem:[%s3281_s18 + $0xc20] sm:$0xff]  ;;  %v555_v50 = vld [vmem:[%s3281_s18 + $0xc30] sm:$0xff] }
 0x1b4   : > { %v1080_v57 = vpop.f32.mrf.mxu0  ;;  %v1472_v58 = vpop.f32.mrf.mxu1 }
 0x1b5   : > { %2524 = vst.msk [vmem:[%s3527_s22 + $0xa4] sm:$0xf] %vm2482_vm0, %v3011_v53  ;;  %2622 = vst.msk [vmem:[%s3527_s22 + $0x22c] sm:$0xf] %vm2482_vm0, %v3109_v54 }
 0x1b6   : > { %v1083_v59 = vpop.f32.mrf.mxu0  ;;  %1274 = vmatmul.mubr.bf16.gmra.mxu0 %v647_v51  ;;  %v1475_v60 = vpop.f32.mrf.mxu1  ;;  %1666 = vmatmul.mubr.bf16.gmra.mxu1 %v745_v52 }
 0x1b7   : > { %v3012_v63 = vpack.c.bf16 %v1083_v59, %v1083_v59  ;;  %v3110_v0 = vpack.c.bf16 %v1475_v60, %v1475_v60  ;;  %1281 = vmatprep.mubr.bf16.mxu0 %v650_v55  ;;  %1673 = vmatprep.mubr.bf16.mxu1 %v748_v56  ;;  %v653_v55 = vpack.c.bf16 %v359_v48, %v357_v45 }
 0x1b8   : > { %v1085_v4 = vpop.f32.mrf.mxu0  ;;  %v1477_v5 = vpop.f32.mrf.mxu1  ;;  %v751_v56 = vpack.c.bf16 %v555_v50, %v553_v49 }
 0x1b9   : > { %2525 = vst.msk [vmem:[%s3527_s22 + $0xa8] sm:$0xf] %vm2482_vm0, %v3012_v63  ;;  %2623 = vst.msk [vmem:[%s3527_s22 + $0x230] sm:$0xf] %vm2482_vm0, %v3110_v0 }
 0x1ba   : > { %v1086_v9 = vpop.f32.mrf.mxu0  ;;  %v1478_v10 = vpop.f32.mrf.mxu1 }
 0x1bb   : > { %v3013_v13 = vpack.c.bf16 %v1086_v9, %v1086_v9  ;;  %v3111_v14 = vpack.c.bf16 %v1478_v10, %v1478_v10 }
 0x1bc   : > { %v1088_v17 = vpop.f32.mrf.mxu0  ;;  %v1480_v18 = vpop.f32.mrf.mxu1 }
 0x1bd   : > { %2526 = vst.msk [vmem:[%s3527_s22 + $0xac] sm:$0xf] %vm2482_vm0, %v3013_v13  ;;  %2624 = vst.msk [vmem:[%s3527_s22 + $0x234] sm:$0xf] %vm2482_vm0, %v3111_v14 }
 0x1be   : > { %v1091_v19 = vpop.f32.mrf.mxu0  ;;  %1282 = vmatmul.mubr.bf16.gmra.mxu0 %v649_v11  ;;  %v1483_v20 = vpop.f32.mrf.mxu1  ;;  %1674 = vmatmul.mubr.bf16.gmra.mxu1 %v747_v12 }
 0x1bf   : > { %v3014_v23 = vpack.c.bf16 %v1091_v19, %v1091_v19  ;;  %v3112_v24 = vpack.c.bf16 %v1483_v20, %v1483_v20  ;;  %1289 = vmatprep.mubr.bf16.mxu0 %v652_v15  ;;  %1681 = vmatprep.mubr.bf16.mxu1 %v750_v16 }
 0x1c0   : > { %v1093_v28 = vpop.f32.mrf.mxu0  ;;  %v1485_v29 = vpop.f32.mrf.mxu1 }
 0x1c1   : > { %2527 = vst.msk [vmem:[%s3527_s22 + $0xb0] sm:$0xf] %vm2482_vm0, %v3014_v23  ;;  %2625 = vst.msk [vmem:[%s3527_s22 + $0x238] sm:$0xf] %vm2482_vm0, %v3112_v24 }
 0x1c2   : > { %v1094_v33 = vpop.f32.mrf.mxu0  ;;  %v1486_v34 = vpop.f32.mrf.mxu1 }
 0x1c3   : > { %v3015_v37 = vpack.c.bf16 %v1094_v33, %v1094_v33  ;;  %v3113_v38 = vpack.c.bf16 %v1486_v34, %v1486_v34 }
 0x1c4   : > { %v1096_v41 = vpop.f32.mrf.mxu0  ;;  %v1488_v42 = vpop.f32.mrf.mxu1 }
 0x1c5   : > { %2528 = vst.msk [vmem:[%s3527_s22 + $0xb4] sm:$0xf] %vm2482_vm0, %v3015_v37  ;;  %2626 = vst.msk [vmem:[%s3527_s22 + $0x23c] sm:$0xf] %vm2482_vm0, %v3113_v38 }
 0x1c6   : > { %v1099_v43 = vpop.f32.mrf.mxu0  ;;  %1290 = vmatmul.mubr.bf16.gmra.mxu0 %v651_v35  ;;  %v1491_v44 = vpop.f32.mrf.mxu1  ;;  %1682 = vmatmul.mubr.bf16.gmra.mxu1 %v749_v36 }
 0x1c7   : > { %v3016_v46 = vpack.c.bf16 %v1099_v43, %v1099_v43  ;;  %v3114_v47 = vpack.c.bf16 %v1491_v44, %v1491_v44  ;;  %1297 = vmatprep.mubr.bf16.mxu0 %v654_v39  ;;  %1689 = vmatprep.mubr.bf16.mxu1 %v752_v40 }
 0x1c8   : > { %v1101_v51 = vpop.f32.mrf.mxu0  ;;  %v1493_v52 = vpop.f32.mrf.mxu1 }
 0x1c9   : > { %2529 = vst.msk [vmem:[%s3527_s22 + $0xb8] sm:$0xf] %vm2482_vm0, %v3016_v46  ;;  %2627 = vst.msk [vmem:[%s3527_s22 + $0x240] sm:$0xf] %vm2482_vm0, %v3114_v47 }
 0x1ca   : > { %v1102_v53 = vpop.f32.mrf.mxu0  ;;  %v1494_v54 = vpop.f32.mrf.mxu1 }
 0x1cb   : > { %v3017_v57 = vpack.c.bf16 %v1102_v53, %v1102_v53  ;;  %v3115_v58 = vpack.c.bf16 %v1494_v54, %v1494_v54 }
 0x1cc   : > { %v1104_v59 = vpop.f32.mrf.mxu0  ;;  %v1496_v60 = vpop.f32.mrf.mxu1 }
 0x1cd   : > { %2530 = vst.msk [vmem:[%s3527_s22 + $0xbc] sm:$0xf] %vm2482_vm0, %v3017_v57  ;;  %2628 = vst.msk [vmem:[%s3527_s22 + $0x244] sm:$0xf] %vm2482_vm0, %v3115_v58 }
 0x1ce   : > { %v1107_v61 = vpop.f32.mrf.mxu0  ;;  %1298 = vmatmul.mubr.bf16.gmra.mxu0 %v653_v55  ;;  %v1499_v62 = vpop.f32.mrf.mxu1  ;;  %1690 = vmatmul.mubr.bf16.gmra.mxu1 %v751_v56 }
 0x1cf   : > { %v3018_v63 = vpack.c.bf16 %v1107_v61, %v1107_v61  ;;  %v3116_v0 = vpack.c.bf16 %v1499_v62, %v1499_v62 }
 0x1d0   : > { %v1109_v1 = vpop.f32.mrf.mxu0  ;;  %v1501_v2 = vpop.f32.mrf.mxu1 }
 0x1d1   : > { %2531 = vst.msk [vmem:[%s3527_s22 + $0xc0] sm:$0xf] %vm2482_vm0, %v3018_v63  ;;  %2629 = vst.msk [vmem:[%s3527_s22 + $0x248] sm:$0xf] %vm2482_vm0, %v3116_v0 }
 0x1d2   : > { %v1110_v3 = vpop.f32.mrf.mxu0  ;;  %v1502_v4 = vpop.f32.mrf.mxu1 }
 0x1d3   : > { %v3019_v5 = vpack.c.bf16 %v1110_v3, %v1110_v3  ;;  %v3117_v6 = vpack.c.bf16 %v1502_v4, %v1502_v4 }
 0x1d4   : > { %v1112_v7 = vpop.f32.mrf.mxu0  ;;  %v1504_v8 = vpop.f32.mrf.mxu1 }
 0x1d5   : > { %2532 = vst.msk [vmem:[%s3527_s22 + $0xc4] sm:$0xf] %vm2482_vm0, %v3019_v5  ;;  %2630 = vst.msk [vmem:[%s3527_s22 + $0x24c] sm:$0xf] %vm2482_vm0, %v3117_v6 }
 0x1d6   : > { %v1115_v9 = vpop.f32.mrf.mxu0  ;;  %v1507_v10 = vpop.f32.mrf.mxu1 }
 0x1d7   : > { %v3020_v11 = vpack.c.bf16 %v1115_v9, %v1115_v9  ;;  %v3118_v12 = vpack.c.bf16 %v1507_v10, %v1507_v10 }
 0x1d8   : > { %v1117_v13 = vpop.f32.mrf.mxu0  ;;  %v1509_v14 = vpop.f32.mrf.mxu1 }
 0x1d9   : > { %2533 = vst.msk [vmem:[%s3527_s22 + $0xc8] sm:$0xf] %vm2482_vm0, %v3020_v11  ;;  %2631 = vst.msk [vmem:[%s3527_s22 + $0x250] sm:$0xf] %vm2482_vm0, %v3118_v12 }
 0x1da   : > { %v1118_v15 = vpop.f32.mrf.mxu0  ;;  %v1510_v16 = vpop.f32.mrf.mxu1 }
 0x1db   : > { %v3021_v17 = vpack.c.bf16 %v1118_v15, %v1118_v15  ;;  %v3119_v18 = vpack.c.bf16 %v1510_v16, %v1510_v16 }
 0x1dc   : > { %v1120_v19 = vpop.f32.mrf.mxu0  ;;  %v1512_v20 = vpop.f32.mrf.mxu1 }
 0x1dd   : > { %2534 = vst.msk [vmem:[%s3527_s22 + $0xcc] sm:$0xf] %vm2482_vm0, %v3021_v17  ;;  %2632 = vst.msk [vmem:[%s3527_s22 + $0x254] sm:$0xf] %vm2482_vm0, %v3119_v18 }
 0x1de   : > { %v1123_v21 = vpop.f32.mrf.mxu0  ;;  %v1515_v22 = vpop.f32.mrf.mxu1 }
 0x1df   : > { %v3022_v23 = vpack.c.bf16 %v1123_v21, %v1123_v21  ;;  %v3120_v24 = vpack.c.bf16 %v1515_v22, %v1515_v22 }
 0x1e0   : > { %v1125_v25 = vpop.f32.mrf.mxu0  ;;  %v1517_v26 = vpop.f32.mrf.mxu1 }
 0x1e1   : > { %2535 = vst.msk [vmem:[%s3527_s22 + $0xd0] sm:$0xf] %vm2482_vm0, %v3022_v23  ;;  %2633 = vst.msk [vmem:[%s3527_s22 + $0x258] sm:$0xf] %vm2482_vm0, %v3120_v24 }
 0x1e2   : > { %v1126_v27 = vpop.f32.mrf.mxu0  ;;  %v1518_v28 = vpop.f32.mrf.mxu1 }
 0x1e3   : > { %v3023_v29 = vpack.c.bf16 %v1126_v27, %v1126_v27  ;;  %v3121_v30 = vpack.c.bf16 %v1518_v28, %v1518_v28 }
 0x1e4   : > { %v1128_v31 = vpop.f32.mrf.mxu0  ;;  %v1520_v32 = vpop.f32.mrf.mxu1 }
 0x1e5   : > { %2536 = vst.msk [vmem:[%s3527_s22 + $0xd4] sm:$0xf] %vm2482_vm0, %v3023_v29  ;;  %2634 = vst.msk [vmem:[%s3527_s22 + $0x25c] sm:$0xf] %vm2482_vm0, %v3121_v30 }
 0x1e6   : > { %v1131_v33 = vpop.f32.mrf.mxu0  ;;  %v1523_v34 = vpop.f32.mrf.mxu1 }
 0x1e7   : > { %v3024_v35 = vpack.c.bf16 %v1131_v33, %v1131_v33  ;;  %v3122_v36 = vpack.c.bf16 %v1523_v34, %v1523_v34 }
 0x1e8   : > { %v1133_v37 = vpop.f32.mrf.mxu0  ;;  %v1525_v38 = vpop.f32.mrf.mxu1 }
 0x1e9   : > { %2537 = vst.msk [vmem:[%s3527_s22 + $0xd8] sm:$0xf] %vm2482_vm0, %v3024_v35  ;;  %2635 = vst.msk [vmem:[%s3527_s22 + $0x260] sm:$0xf] %vm2482_vm0, %v3122_v36 }
 0x1ea   : > { %v1134_v39 = vpop.f32.mrf.mxu0  ;;  %v1526_v40 = vpop.f32.mrf.mxu1 }
 0x1eb   : > { %v3025_v41 = vpack.c.bf16 %v1134_v39, %v1134_v39  ;;  %v3123_v42 = vpack.c.bf16 %v1526_v40, %v1526_v40 }
 0x1ec   : > { %v1136_v43 = vpop.f32.mrf.mxu0  ;;  %v1528_v44 = vpop.f32.mrf.mxu1 }
 0x1ed   : > { %2538 = vst.msk [vmem:[%s3527_s22 + $0xdc] sm:$0xf] %vm2482_vm0, %v3025_v41  ;;  %2636 = vst.msk [vmem:[%s3527_s22 + $0x264] sm:$0xf] %vm2482_vm0, %v3123_v42 }
 0x1ee   : > { %v1139_v45 = vpop.f32.mrf.mxu0  ;;  %v1531_v46 = vpop.f32.mrf.mxu1 }
 0x1ef   : > { %v3026_v47 = vpack.c.bf16 %v1139_v45, %v1139_v45  ;;  %v3124_v48 = vpack.c.bf16 %v1531_v46, %v1531_v46 }
 0x1f0   : > { %v1141_v49 = vpop.f32.mrf.mxu0  ;;  %v1533_v50 = vpop.f32.mrf.mxu1 }
 0x1f1   : > { %2539 = vst.msk [vmem:[%s3527_s22 + $0xe0] sm:$0xf] %vm2482_vm0, %v3026_v47  ;;  %2637 = vst.msk [vmem:[%s3527_s22 + $0x268] sm:$0xf] %vm2482_vm0, %v3124_v48 }
 0x1f2   : > { %v1142_v51 = vpop.f32.mrf.mxu0  ;;  %v1534_v52 = vpop.f32.mrf.mxu1 }
 0x1f3   : > { %v3027_v53 = vpack.c.bf16 %v1142_v51, %v1142_v51  ;;  %v3125_v54 = vpack.c.bf16 %v1534_v52, %v1534_v52 }
 0x1f4   : > { %v1144_v55 = vpop.f32.mrf.mxu0  ;;  %v1536_v56 = vpop.f32.mrf.mxu1 }
 0x1f5   : > { %2540 = vst.msk [vmem:[%s3527_s22 + $0xe4] sm:$0xf] %vm2482_vm0, %v3027_v53  ;;  %2638 = vst.msk [vmem:[%s3527_s22 + $0x26c] sm:$0xf] %vm2482_vm0, %v3125_v54 }
 0x1f6   : > { %v1147_v57 = vpop.f32.mrf.mxu0  ;;  %v1539_v58 = vpop.f32.mrf.mxu1 }
 0x1f7   : > { %v3028_v59 = vpack.c.bf16 %v1147_v57, %v1147_v57  ;;  %v3126_v60 = vpack.c.bf16 %v1539_v58, %v1539_v58 }
 0x1f8   : > { %v1149_v61 = vpop.f32.mrf.mxu0  ;;  %v1541_v62 = vpop.f32.mrf.mxu1 }
 0x1f9   : > { %2541 = vst.msk [vmem:[%s3527_s22 + $0xe8] sm:$0xf] %vm2482_vm0, %v3028_v59  ;;  %2639 = vst.msk [vmem:[%s3527_s22 + $0x270] sm:$0xf] %vm2482_vm0, %v3126_v60 }
 0x1fa   : > { %v1150_v63 = vpop.f32.mrf.mxu0  ;;  %v1542_v0 = vpop.f32.mrf.mxu1 }
 0x1fb   : > { %v3029_v1 = vpack.c.bf16 %v1150_v63, %v1150_v63  ;;  %v3127_v2 = vpack.c.bf16 %v1542_v0, %v1542_v0 }
 0x1fc   : > { %v1152_v3 = vpop.f32.mrf.mxu0  ;;  %v1544_v4 = vpop.f32.mrf.mxu1 }
 0x1fd   : > { %2542 = vst.msk [vmem:[%s3527_s22 + $0xec] sm:$0xf] %vm2482_vm0, %v3029_v1  ;;  %2640 = vst.msk [vmem:[%s3527_s22 + $0x274] sm:$0xf] %vm2482_vm0, %v3127_v2 }
 0x1fe   : > { %v1155_v5 = vpop.f32.mrf.mxu0  ;;  %v1547_v6 = vpop.f32.mrf.mxu1 }
 0x1ff   : > { %v3030_v7 = vpack.c.bf16 %v1155_v5, %v1155_v5  ;;  %v3128_v8 = vpack.c.bf16 %v1547_v6, %v1547_v6 }
 0x200   : > { %v1157_v9 = vpop.f32.mrf.mxu0  ;;  %v1549_v10 = vpop.f32.mrf.mxu1 }
 0x201   : > { %2543 = vst.msk [vmem:[%s3527_s22 + $0xf0] sm:$0xf] %vm2482_vm0, %v3030_v7  ;;  %2641 = vst.msk [vmem:[%s3527_s22 + $0x278] sm:$0xf] %vm2482_vm0, %v3128_v8 }
 0x202   : > { %v1158_v11 = vpop.f32.mrf.mxu0  ;;  %v1550_v12 = vpop.f32.mrf.mxu1 }
 0x203   : > { %v3031_v13 = vpack.c.bf16 %v1158_v11, %v1158_v11  ;;  %v3129_v14 = vpack.c.bf16 %v1550_v12, %v1550_v12 }
 0x204   : > { %v1160_v15 = vpop.f32.mrf.mxu0  ;;  %v1552_v16 = vpop.f32.mrf.mxu1 }
 0x205   : > { %2544 = vst.msk [vmem:[%s3527_s22 + $0xf4] sm:$0xf] %vm2482_vm0, %v3031_v13  ;;  %2642 = vst.msk [vmem:[%s3527_s22 + $0x27c] sm:$0xf] %vm2482_vm0, %v3129_v14 }
 0x206   : > { %v1163_v17 = vpop.f32.mrf.mxu0  ;;  %v1555_v18 = vpop.f32.mrf.mxu1 }
 0x207   : > { %v3032_v19 = vpack.c.bf16 %v1163_v17, %v1163_v17  ;;  %v3130_v20 = vpack.c.bf16 %v1555_v18, %v1555_v18 }
 0x208   : > { %v1165_v21 = vpop.f32.mrf.mxu0  ;;  %v1557_v22 = vpop.f32.mrf.mxu1 }
 0x209   : > { %2545 = vst.msk [vmem:[%s3527_s22 + $0xf8] sm:$0xf] %vm2482_vm0, %v3032_v19  ;;  %2643 = vst.msk [vmem:[%s3527_s22 + $0x280] sm:$0xf] %vm2482_vm0, %v3130_v20 }
 0x20a   : > { %v1166_v23 = vpop.f32.mrf.mxu0  ;;  %v1558_v24 = vpop.f32.mrf.mxu1 }
 0x20b   : > { %v3033_v25 = vpack.c.bf16 %v1166_v23, %v1166_v23  ;;  %v3131_v26 = vpack.c.bf16 %v1558_v24, %v1558_v24 }
 0x20c   : > { %v1168_v27 = vpop.f32.mrf.mxu0  ;;  %v1560_v28 = vpop.f32.mrf.mxu1 }
 0x20d   : > { %2546 = vst.msk [vmem:[%s3527_s22 + $0xfc] sm:$0xf] %vm2482_vm0, %v3033_v25  ;;  %2644 = vst.msk [vmem:[%s3527_s22 + $0x284] sm:$0xf] %vm2482_vm0, %v3131_v26 }
 0x20e   : > { %v1171_v29 = vpop.f32.mrf.mxu0  ;;  %v1563_v30 = vpop.f32.mrf.mxu1 }
 0x20f   : > { %v3034_v31 = vpack.c.bf16 %v1171_v29, %v1171_v29  ;;  %v3132_v32 = vpack.c.bf16 %v1563_v30, %v1563_v30 }
 0x210   : > { %v1173_v33 = vpop.f32.mrf.mxu0  ;;  %v1565_v34 = vpop.f32.mrf.mxu1 }
 0x211   : > { %2547 = vst.msk [vmem:[%s3527_s22 + $0x100] sm:$0xf] %vm2482_vm0, %v3034_v31  ;;  %2645 = vst.msk [vmem:[%s3527_s22 + $0x288] sm:$0xf] %vm2482_vm0, %v3132_v32 }
 0x212   : > { %v1174_v35 = vpop.f32.mrf.mxu0  ;;  %v1566_v36 = vpop.f32.mrf.mxu1 }
 0x213   : > { %v3035_v37 = vpack.c.bf16 %v1174_v35, %v1174_v35  ;;  %v3133_v38 = vpack.c.bf16 %v1566_v36, %v1566_v36 }
 0x214   : > { %v1176_v39 = vpop.f32.mrf.mxu0  ;;  %v1568_v40 = vpop.f32.mrf.mxu1 }
 0x215   : > { %2548 = vst.msk [vmem:[%s3527_s22 + $0x104] sm:$0xf] %vm2482_vm0, %v3035_v37  ;;  %2646 = vst.msk [vmem:[%s3527_s22 + $0x28c] sm:$0xf] %vm2482_vm0, %v3133_v38 }
 0x216   : > { %v1179_v41 = vpop.f32.mrf.mxu0  ;;  %v1571_v42 = vpop.f32.mrf.mxu1 }
 0x217   : > { %v3036_v43 = vpack.c.bf16 %v1179_v41, %v1179_v41  ;;  %v3134_v44 = vpack.c.bf16 %v1571_v42, %v1571_v42 }
 0x218   : > { %v1181_v45 = vpop.f32.mrf.mxu0  ;;  %v1573_v46 = vpop.f32.mrf.mxu1 }
 0x219   : > { %2549 = vst.msk [vmem:[%s3527_s22 + $0x108] sm:$0xf] %vm2482_vm0, %v3036_v43  ;;  %2647 = vst.msk [vmem:[%s3527_s22 + $0x290] sm:$0xf] %vm2482_vm0, %v3134_v44 }
 0x21a   : > { %v1182_v47 = vpop.f32.mrf.mxu0  ;;  %v1574_v48 = vpop.f32.mrf.mxu1 }
 0x21b   : > { %v3037_v49 = vpack.c.bf16 %v1182_v47, %v1182_v47  ;;  %v3135_v50 = vpack.c.bf16 %v1574_v48, %v1574_v48 }
 0x21c   : > { %v1184_v51 = vpop.f32.mrf.mxu0  ;;  %v1576_v52 = vpop.f32.mrf.mxu1 }
 0x21d   : > { %2550 = vst.msk [vmem:[%s3527_s22 + $0x10c] sm:$0xf] %vm2482_vm0, %v3037_v49  ;;  %2648 = vst.msk [vmem:[%s3527_s22 + $0x294] sm:$0xf] %vm2482_vm0, %v3135_v50 }
 0x21e   : > { %v1187_v53 = vpop.f32.mrf.mxu0  ;;  %v1579_v54 = vpop.f32.mrf.mxu1 }
 0x21f   : > { %v3038_v55 = vpack.c.bf16 %v1187_v53, %v1187_v53  ;;  %v3136_v56 = vpack.c.bf16 %v1579_v54, %v1579_v54 }
 0x220   : > { %v1189_v57 = vpop.f32.mrf.mxu0  ;;  %v1581_v58 = vpop.f32.mrf.mxu1 }
 0x221   : > { %2551 = vst.msk [vmem:[%s3527_s22 + $0x110] sm:$0xf] %vm2482_vm0, %v3038_v55  ;;  %2649 = vst.msk [vmem:[%s3527_s22 + $0x298] sm:$0xf] %vm2482_vm0, %v3136_v56 }
 0x222   : > { %v1190_v59 = vpop.f32.mrf.mxu0  ;;  %v1582_v60 = vpop.f32.mrf.mxu1 }
 0x223   : > { %v3039_v61 = vpack.c.bf16 %v1190_v59, %v1190_v59  ;;  %v3137_v62 = vpack.c.bf16 %v1582_v60, %v1582_v60 }
 0x224   : > { %v1192_v63 = vpop.f32.mrf.mxu0  ;;  %v1584_v0 = vpop.f32.mrf.mxu1 }
 0x225   : > { %2552 = vst.msk [vmem:[%s3527_s22 + $0x114] sm:$0xf] %vm2482_vm0, %v3039_v61  ;;  %2650 = vst.msk [vmem:[%s3527_s22 + $0x29c] sm:$0xf] %vm2482_vm0, %v3137_v62 }
 0x226   : > { %v1195_v1 = vpop.f32.mrf.mxu0  ;;  %v1587_v2 = vpop.f32.mrf.mxu1 }
 0x227   : > { %v3040_v3 = vpack.c.bf16 %v1195_v1, %v1195_v1  ;;  %v3138_v4 = vpack.c.bf16 %v1587_v2, %v1587_v2 }
 0x228   : > { %v1197_v5 = vpop.f32.mrf.mxu0  ;;  %v1589_v6 = vpop.f32.mrf.mxu1 }
 0x229   : > { %2553 = vst.msk [vmem:[%s3527_s22 + $0x118] sm:$0xf] %vm2482_vm0, %v3040_v3  ;;  %2651 = vst.msk [vmem:[%s3527_s22 + $0x2a0] sm:$0xf] %vm2482_vm0, %v3138_v4 }
 0x22a   : > { %v1198_v7 = vpop.f32.mrf.mxu0  ;;  %v1590_v8 = vpop.f32.mrf.mxu1 }
 0x22b   : > { %v3041_v9 = vpack.c.bf16 %v1198_v7, %v1198_v7  ;;  %v3139_v10 = vpack.c.bf16 %v1590_v8, %v1590_v8 }
 0x22c   : > { %v1200_v11 = vpop.f32.mrf.mxu0  ;;  %v1592_v12 = vpop.f32.mrf.mxu1 }
 0x22d   : > { %2554 = vst.msk [vmem:[%s3527_s22 + $0x11c] sm:$0xf] %vm2482_vm0, %v3041_v9  ;;  %2652 = vst.msk [vmem:[%s3527_s22 + $0x2a4] sm:$0xf] %vm2482_vm0, %v3139_v10 }
 0x22e   : > { %v1203_v13 = vpop.f32.mrf.mxu0  ;;  %v1595_v14 = vpop.f32.mrf.mxu1 }
 0x22f   : > { %v3042_v15 = vpack.c.bf16 %v1203_v13, %v1203_v13  ;;  %v3140_v16 = vpack.c.bf16 %v1595_v14, %v1595_v14 }
 0x230   : > { %v1205_v17 = vpop.f32.mrf.mxu0  ;;  %v1597_v18 = vpop.f32.mrf.mxu1 }
 0x231   : > { %2555 = vst.msk [vmem:[%s3527_s22 + $0x120] sm:$0xf] %vm2482_vm0, %v3042_v15  ;;  %2653 = vst.msk [vmem:[%s3527_s22 + $0x2a8] sm:$0xf] %vm2482_vm0, %v3140_v16 }
 0x232   : > { %v1206_v19 = vpop.f32.mrf.mxu0  ;;  %v1598_v20 = vpop.f32.mrf.mxu1 }
 0x233   : > { %v3043_v21 = vpack.c.bf16 %v1206_v19, %v1206_v19  ;;  %v3141_v22 = vpack.c.bf16 %v1598_v20, %v1598_v20 }
 0x234   : > { %v1208_v23 = vpop.f32.mrf.mxu0  ;;  %v1600_v24 = vpop.f32.mrf.mxu1 }
 0x235   : > { %2556 = vst.msk [vmem:[%s3527_s22 + $0x124] sm:$0xf] %vm2482_vm0, %v3043_v21  ;;  %2654 = vst.msk [vmem:[%s3527_s22 + $0x2ac] sm:$0xf] %vm2482_vm0, %v3141_v22 }
 0x236   : > { %v1211_v25 = vpop.f32.mrf.mxu0  ;;  %v1603_v26 = vpop.f32.mrf.mxu1 }
 0x237   : > { %v3044_v27 = vpack.c.bf16 %v1211_v25, %v1211_v25  ;;  %v3142_v28 = vpack.c.bf16 %v1603_v26, %v1603_v26 }
 0x238   : > { %v1213_v29 = vpop.f32.mrf.mxu0  ;;  %v1605_v30 = vpop.f32.mrf.mxu1 }
 0x239   : > { %2557 = vst.msk [vmem:[%s3527_s22 + $0x128] sm:$0xf] %vm2482_vm0, %v3044_v27  ;;  %2655 = vst.msk [vmem:[%s3527_s22 + $0x2b0] sm:$0xf] %vm2482_vm0, %v3142_v28 }
 0x23a   : > { %v1214_v31 = vpop.f32.mrf.mxu0  ;;  %v1606_v32 = vpop.f32.mrf.mxu1 }
 0x23b   : > { %v3045_v33 = vpack.c.bf16 %v1214_v31, %v1214_v31  ;;  %v3143_v34 = vpack.c.bf16 %v1606_v32, %v1606_v32 }
 0x23c   : > { %v1216_v35 = vpop.f32.mrf.mxu0  ;;  %v1608_v36 = vpop.f32.mrf.mxu1 }
 0x23d   : > { %2558 = vst.msk [vmem:[%s3527_s22 + $0x12c] sm:$0xf] %vm2482_vm0, %v3045_v33  ;;  %2656 = vst.msk [vmem:[%s3527_s22 + $0x2b4] sm:$0xf] %vm2482_vm0, %v3143_v34 }
 0x23e   : > { %v1219_v37 = vpop.f32.mrf.mxu0  ;;  %v1611_v38 = vpop.f32.mrf.mxu1 }
 0x23f   : > { %v3046_v39 = vpack.c.bf16 %v1219_v37, %v1219_v37  ;;  %v3144_v40 = vpack.c.bf16 %v1611_v38, %v1611_v38 }
 0x240   : > { %v1221_v41 = vpop.f32.mrf.mxu0  ;;  %v1613_v42 = vpop.f32.mrf.mxu1 }
 0x241   : > { %2559 = vst.msk [vmem:[%s3527_s22 + $0x130] sm:$0xf] %vm2482_vm0, %v3046_v39  ;;  %2657 = vst.msk [vmem:[%s3527_s22 + $0x2b8] sm:$0xf] %vm2482_vm0, %v3144_v40 }
 0x242   : > { %v1222_v43 = vpop.f32.mrf.mxu0  ;;  %v1614_v44 = vpop.f32.mrf.mxu1 }
 0x243   : > { %v3047_v45 = vpack.c.bf16 %v1222_v43, %v1222_v43  ;;  %v3145_v46 = vpack.c.bf16 %v1614_v44, %v1614_v44 }
 0x244   : > { %v1224_v47 = vpop.f32.mrf.mxu0  ;;  %v1616_v48 = vpop.f32.mrf.mxu1 }
 0x245   : > { %2560 = vst.msk [vmem:[%s3527_s22 + $0x134] sm:$0xf] %vm2482_vm0, %v3047_v45  ;;  %2658 = vst.msk [vmem:[%s3527_s22 + $0x2bc] sm:$0xf] %vm2482_vm0, %v3145_v46 }
 0x246   : > { %v1227_v49 = vpop.f32.mrf.mxu0  ;;  %v1619_v50 = vpop.f32.mrf.mxu1 }
 0x247   : > { %v3048_v51 = vpack.c.bf16 %v1227_v49, %v1227_v49  ;;  %v3146_v52 = vpack.c.bf16 %v1619_v50, %v1619_v50 }
 0x248   : > { %v1229_v53 = vpop.f32.mrf.mxu0  ;;  %v1621_v54 = vpop.f32.mrf.mxu1 }
 0x249   : > { %2561 = vst.msk [vmem:[%s3527_s22 + $0x138] sm:$0xf] %vm2482_vm0, %v3048_v51  ;;  %2659 = vst.msk [vmem:[%s3527_s22 + $0x2c0] sm:$0xf] %vm2482_vm0, %v3146_v52 }
 0x24a   : > { %v1230_v55 = vpop.f32.mrf.mxu0  ;;  %v1622_v56 = vpop.f32.mrf.mxu1 }
 0x24b   : > { %v3049_v57 = vpack.c.bf16 %v1230_v55, %v1230_v55  ;;  %v3147_v58 = vpack.c.bf16 %v1622_v56, %v1622_v56 }
 0x24c   : > { %v1232_v59 = vpop.f32.mrf.mxu0  ;;  %v1624_v60 = vpop.f32.mrf.mxu1 }
 0x24d   : > { %2562 = vst.msk [vmem:[%s3527_s22 + $0x13c] sm:$0xf] %vm2482_vm0, %v3049_v57  ;;  %2660 = vst.msk [vmem:[%s3527_s22 + $0x2c4] sm:$0xf] %vm2482_vm0, %v3147_v58 }
 0x24e   : > { %v1235_v61 = vpop.f32.mrf.mxu0  ;;  %v1627_v62 = vpop.f32.mrf.mxu1 }
 0x24f   : > { %v3050_v63 = vpack.c.bf16 %v1235_v61, %v1235_v61  ;;  %v3148_v0 = vpack.c.bf16 %v1627_v62, %v1627_v62 }
 0x250   : > { %v1237_v1 = vpop.f32.mrf.mxu0  ;;  %v1629_v2 = vpop.f32.mrf.mxu1 }
 0x251   : > { %2563 = vst.msk [vmem:[%s3527_s22 + $0x140] sm:$0xf] %vm2482_vm0, %v3050_v63  ;;  %2661 = vst.msk [vmem:[%s3527_s22 + $0x2c8] sm:$0xf] %vm2482_vm0, %v3148_v0 }
 0x252   : > { %v1238_v3 = vpop.f32.mrf.mxu0  ;;  %v1630_v4 = vpop.f32.mrf.mxu1 }
 0x253   : > { %v3051_v5 = vpack.c.bf16 %v1238_v3, %v1238_v3  ;;  %v3149_v6 = vpack.c.bf16 %v1630_v4, %v1630_v4 }
 0x254   : > { %v1240_v7 = vpop.f32.mrf.mxu0  ;;  %v1632_v8 = vpop.f32.mrf.mxu1 }
 0x255   : > { %2564 = vst.msk [vmem:[%s3527_s22 + $0x144] sm:$0xf] %vm2482_vm0, %v3051_v5  ;;  %2662 = vst.msk [vmem:[%s3527_s22 + $0x2cc] sm:$0xf] %vm2482_vm0, %v3149_v6 }
 0x256   : > { %v1243_v9 = vpop.f32.mrf.mxu0  ;;  %v1635_v10 = vpop.f32.mrf.mxu1 }
 0x257   : > { %v3052_v11 = vpack.c.bf16 %v1243_v9, %v1243_v9  ;;  %v3150_v12 = vpack.c.bf16 %v1635_v10, %v1635_v10 }
 0x258   : > { %v1245_v13 = vpop.f32.mrf.mxu0  ;;  %v1637_v14 = vpop.f32.mrf.mxu1 }
 0x259   : > { %2565 = vst.msk [vmem:[%s3527_s22 + $0x148] sm:$0xf] %vm2482_vm0, %v3052_v11  ;;  %2663 = vst.msk [vmem:[%s3527_s22 + $0x2d0] sm:$0xf] %vm2482_vm0, %v3150_v12 }
 0x25a   : > { %v1246_v15 = vpop.f32.mrf.mxu0  ;;  %v1638_v16 = vpop.f32.mrf.mxu1 }
 0x25b   : > { %v3053_v17 = vpack.c.bf16 %v1246_v15, %v1246_v15  ;;  %v3151_v18 = vpack.c.bf16 %v1638_v16, %v1638_v16 }
 0x25c   : > { %v1248_v19 = vpop.f32.mrf.mxu0  ;;  %v1640_v20 = vpop.f32.mrf.mxu1 }
 0x25d   : > { %2566 = vst.msk [vmem:[%s3527_s22 + $0x14c] sm:$0xf] %vm2482_vm0, %v3053_v17  ;;  %2664 = vst.msk [vmem:[%s3527_s22 + $0x2d4] sm:$0xf] %vm2482_vm0, %v3151_v18 }
 0x25e   : > { %v1251_v21 = vpop.f32.mrf.mxu0  ;;  %v1643_v22 = vpop.f32.mrf.mxu1 }
 0x25f   : > { %v3054_v23 = vpack.c.bf16 %v1251_v21, %v1251_v21  ;;  %v3152_v24 = vpack.c.bf16 %v1643_v22, %v1643_v22 }
 0x260   : > { %v1253_v25 = vpop.f32.mrf.mxu0  ;;  %v1645_v26 = vpop.f32.mrf.mxu1 }
 0x261   : > { %2567 = vst.msk [vmem:[%s3527_s22 + $0x150] sm:$0xf] %vm2482_vm0, %v3054_v23  ;;  %2665 = vst.msk [vmem:[%s3527_s22 + $0x2d8] sm:$0xf] %vm2482_vm0, %v3152_v24 }
 0x262   : > { %v1254_v27 = vpop.f32.mrf.mxu0  ;;  %v1646_v28 = vpop.f32.mrf.mxu1 }
 0x263   : > { %v3055_v29 = vpack.c.bf16 %v1254_v27, %v1254_v27  ;;  %v3153_v30 = vpack.c.bf16 %v1646_v28, %v1646_v28 }
 0x264   : > { %v1256_v31 = vpop.f32.mrf.mxu0  ;;  %v1648_v32 = vpop.f32.mrf.mxu1 }
 0x265   : > { %2568 = vst.msk [vmem:[%s3527_s22 + $0x154] sm:$0xf] %vm2482_vm0, %v3055_v29  ;;  %2666 = vst.msk [vmem:[%s3527_s22 + $0x2dc] sm:$0xf] %vm2482_vm0, %v3153_v30 }
 0x266   : > { %v1259_v33 = vpop.f32.mrf.mxu0  ;;  %v1651_v34 = vpop.f32.mrf.mxu1 }
 0x267   : > { %v3056_v35 = vpack.c.bf16 %v1259_v33, %v1259_v33  ;;  %v3154_v36 = vpack.c.bf16 %v1651_v34, %v1651_v34 }
 0x268   : > { %v1261_v37 = vpop.f32.mrf.mxu0  ;;  %v1653_v38 = vpop.f32.mrf.mxu1 }
 0x269   : > { %2569 = vst.msk [vmem:[%s3527_s22 + $0x158] sm:$0xf] %vm2482_vm0, %v3056_v35  ;;  %2667 = vst.msk [vmem:[%s3527_s22 + $0x2e0] sm:$0xf] %vm2482_vm0, %v3154_v36 }
 0x26a   : > { %v1262_v39 = vpop.f32.mrf.mxu0  ;;  %v1654_v40 = vpop.f32.mrf.mxu1 }
 0x26b   : > { %v3057_v41 = vpack.c.bf16 %v1262_v39, %v1262_v39  ;;  %v3155_v42 = vpack.c.bf16 %v1654_v40, %v1654_v40 }
 0x26c   : > { %v1264_v43 = vpop.f32.mrf.mxu0  ;;  %v1656_v44 = vpop.f32.mrf.mxu1 }
 0x26d   : > { %2570 = vst.msk [vmem:[%s3527_s22 + $0x15c] sm:$0xf] %vm2482_vm0, %v3057_v41  ;;  %2668 = vst.msk [vmem:[%s3527_s22 + $0x2e4] sm:$0xf] %vm2482_vm0, %v3155_v42 }
 0x26e   : > { %v1267_v45 = vpop.f32.mrf.mxu0  ;;  %v1659_v46 = vpop.f32.mrf.mxu1 }
 0x26f   : > { %v3058_v47 = vpack.c.bf16 %v1267_v45, %v1267_v45  ;;  %v3156_v48 = vpack.c.bf16 %v1659_v46, %v1659_v46 }
 0x270   : > { %v1269_v49 = vpop.f32.mrf.mxu0  ;;  %v1661_v50 = vpop.f32.mrf.mxu1 }
 0x271   : > { %2571 = vst.msk [vmem:[%s3527_s22 + $0x160] sm:$0xf] %vm2482_vm0, %v3058_v47  ;;  %2669 = vst.msk [vmem:[%s3527_s22 + $0x2e8] sm:$0xf] %vm2482_vm0, %v3156_v48 }
 0x272   : > { %v1270_v51 = vpop.f32.mrf.mxu0  ;;  %v1662_v52 = vpop.f32.mrf.mxu1 }
 0x273   : > { %v3059_v53 = vpack.c.bf16 %v1270_v51, %v1270_v51  ;;  %v3157_v54 = vpack.c.bf16 %v1662_v52, %v1662_v52 }
 0x274   : > { %v1272_v55 = vpop.f32.mrf.mxu0  ;;  %v1664_v56 = vpop.f32.mrf.mxu1 }
 0x275   : > { %2572 = vst.msk [vmem:[%s3527_s22 + $0x164] sm:$0xf] %vm2482_vm0, %v3059_v53  ;;  %2670 = vst.msk [vmem:[%s3527_s22 + $0x2ec] sm:$0xf] %vm2482_vm0, %v3157_v54 }
 0x276   : > { %v1275_v57 = vpop.f32.mrf.mxu0  ;;  %v1667_v58 = vpop.f32.mrf.mxu1 }
 0x277   : > { %v3060_v59 = vpack.c.bf16 %v1275_v57, %v1275_v57  ;;  %v3158_v60 = vpack.c.bf16 %v1667_v58, %v1667_v58 }
 0x278   : > { %v1277_v61 = vpop.f32.mrf.mxu0  ;;  %v1669_v62 = vpop.f32.mrf.mxu1 }
 0x279   : > { %2573 = vst.msk [vmem:[%s3527_s22 + $0x168] sm:$0xf] %vm2482_vm0, %v3060_v59  ;;  %2671 = vst.msk [vmem:[%s3527_s22 + $0x2f0] sm:$0xf] %vm2482_vm0, %v3158_v60 }
 0x27a   : > { %v1278_v63 = vpop.f32.mrf.mxu0  ;;  %v1670_v0 = vpop.f32.mrf.mxu1 }
 0x27b   : > { %v3061_v1 = vpack.c.bf16 %v1278_v63, %v1278_v63  ;;  %v3159_v2 = vpack.c.bf16 %v1670_v0, %v1670_v0 }
 0x27c   : > { %v1280_v3 = vpop.f32.mrf.mxu0  ;;  %v1672_v4 = vpop.f32.mrf.mxu1 }
 0x27d   : > { %2574 = vst.msk [vmem:[%s3527_s22 + $0x16c] sm:$0xf] %vm2482_vm0, %v3061_v1  ;;  %2672 = vst.msk [vmem:[%s3527_s22 + $0x2f4] sm:$0xf] %vm2482_vm0, %v3159_v2 }
 0x27e   : > { %v1283_v5 = vpop.f32.mrf.mxu0  ;;  %v1675_v6 = vpop.f32.mrf.mxu1 }
 0x27f   : > { %v3062_v7 = vpack.c.bf16 %v1283_v5, %v1283_v5  ;;  %v3160_v8 = vpack.c.bf16 %v1675_v6, %v1675_v6 }
 0x280   : > { %v1285_v9 = vpop.f32.mrf.mxu0  ;;  %v1677_v10 = vpop.f32.mrf.mxu1 }
 0x281   : > { %2575 = vst.msk [vmem:[%s3527_s22 + $0x170] sm:$0xf] %vm2482_vm0, %v3062_v7  ;;  %2673 = vst.msk [vmem:[%s3527_s22 + $0x2f8] sm:$0xf] %vm2482_vm0, %v3160_v8 }
 0x282   : > { %v1286_v11 = vpop.f32.mrf.mxu0  ;;  %v1678_v12 = vpop.f32.mrf.mxu1 }
 0x283   : > { %v3063_v13 = vpack.c.bf16 %v1286_v11, %v1286_v11  ;;  %v3161_v14 = vpack.c.bf16 %v1678_v12, %v1678_v12 }
 0x284   : > { %v1288_v15 = vpop.f32.mrf.mxu0  ;;  %v1680_v16 = vpop.f32.mrf.mxu1 }
 0x285   : > { %2576 = vst.msk [vmem:[%s3527_s22 + $0x174] sm:$0xf] %vm2482_vm0, %v3063_v13  ;;  %2674 = vst.msk [vmem:[%s3527_s22 + $0x2fc] sm:$0xf] %vm2482_vm0, %v3161_v14 }
 0x286   : > { %v1291_v17 = vpop.f32.mrf.mxu0  ;;  %v1683_v18 = vpop.f32.mrf.mxu1 }
 0x287   : > { %v3064_v19 = vpack.c.bf16 %v1291_v17, %v1291_v17  ;;  %v3162_v20 = vpack.c.bf16 %v1683_v18, %v1683_v18 }
 0x288   : > { %v1293_v21 = vpop.f32.mrf.mxu0  ;;  %v1685_v22 = vpop.f32.mrf.mxu1 }
 0x289   : > { %2577 = vst.msk [vmem:[%s3527_s22 + $0x178] sm:$0xf] %vm2482_vm0, %v3064_v19  ;;  %2675 = vst.msk [vmem:[%s3527_s22 + $0x300] sm:$0xf] %vm2482_vm0, %v3162_v20 }
 0x28a   : > { %v1294_v23 = vpop.f32.mrf.mxu0  ;;  %v1686_v24 = vpop.f32.mrf.mxu1 }
 0x28b   : > { %v3065_v25 = vpack.c.bf16 %v1294_v23, %v1294_v23  ;;  %v3163_v26 = vpack.c.bf16 %v1686_v24, %v1686_v24 }
 0x28c   : > { %v1296_v27 = vpop.f32.mrf.mxu0  ;;  %v1688_v28 = vpop.f32.mrf.mxu1 }
 0x28d   : > { %2578 = vst.msk [vmem:[%s3527_s22 + $0x17c] sm:$0xf] %vm2482_vm0, %v3065_v25  ;;  %2676 = vst.msk [vmem:[%s3527_s22 + $0x304] sm:$0xf] %vm2482_vm0, %v3163_v26 }
 0x28e   : > { %v1299_v29 = vpop.f32.mrf.mxu0  ;;  %v1691_v30 = vpop.f32.mrf.mxu1 }
 0x28f   : > { %v3066_v31 = vpack.c.bf16 %v1299_v29, %v1299_v29  ;;  %v3164_v32 = vpack.c.bf16 %v1691_v30, %v1691_v30 }
 0x290   : > { %v1301_v33 = vpop.f32.mrf.mxu0  ;;  %v1693_v34 = vpop.f32.mrf.mxu1 }
 0x291   : > { %2579 = vst.msk [vmem:[%s3527_s22 + $0x180] sm:$0xf] %vm2482_vm0, %v3066_v31  ;;  %2677 = vst.msk [vmem:[%s3527_s22 + $0x308] sm:$0xf] %vm2482_vm0, %v3164_v32 }
 0x292   : > { %v1302_v35 = vpop.f32.mrf.mxu0  ;;  %v1694_v36 = vpop.f32.mrf.mxu1 }
 0x293   : > { %v3067_v37 = vpack.c.bf16 %v1302_v35, %v1302_v35  ;;  %v3165_v38 = vpack.c.bf16 %v1694_v36, %v1694_v36 }
 0x294   : > { %v1304_v39 = vpop.f32.mrf.mxu0  ;;  %v1696_v40 = vpop.f32.mrf.mxu1 }
 0x295   : > { %2580 = vst.msk [vmem:[%s3527_s22 + $0x184] sm:$0xf] %vm2482_vm0, %v3067_v37  ;;  %2678 = vst.msk [vmem:[%s3527_s22 + $0x30c] sm:$0xf] %vm2482_vm0, %v3165_v38 }
 0x296 PF: > { %s12_s9 = sadd.s32 1, %s3231_s9  }
 0x297   : > { %p9_p4 = scmp.ge.s32.totalorder %s12_s9, 4  }
 0x299   :  { %11 = sbr.rel (!%p9_p4) target bundleno = 1 (0x1), region = 61 }

// kernel: forward.19
= control target key start
LH: loop header
LB: loop body
LE: loop exit
PB: predicated region body
PF: predicated region fallthrough
CT: control target
= control target key end

     0   :  { %s390_s1 = inlined_call_operand.vmem [shape: f32[128,128], index: 1, kind: input, shape index: {}]   ;;  %s391_s0 = inlined_call_operand.vmem [shape: bf16[64,128], index: 0, kind: input, shape index: {}]   ;;  %s392_s2 = inlined_call_operand.vmem [shape: f32[1,128], index: 2, kind: input, shape index: {}]   ;;  %s393_s3 = inlined_call_operand.vmem [shape: bf16[64,128], index: 3, kind: output, shape index: {}]  }
   0x1   :  { %v37_v0 = vld [vmem:[%s390_s1 + $0x70] sm:$0xff]  ;;  %v38_v1 = vld [vmem:[%s390_s1 + $0x78] sm:$0xff]  ;;  %v35_v2 = vld [vmem:[%s390_s1 + $0x60] sm:$0xff] }
   0x2   :  { %v46_v3 = vpack.c.bf16 %v38_v1, %v37_v0  ;;  %v36_v4 = vld [vmem:[%s390_s1 + $0x68] sm:$0xff]  ;;  %v33_v6 = vld [vmem:[%s390_s1 + $0x50] sm:$0xff]  ;;  %v34_v7 = vld [vmem:[%s390_s1 + $0x58] sm:$0xff] }
   0x3   :  { %v45_v5 = vpack.c.bf16 %v36_v4, %v35_v2  ;;  %v31_v8 = vld [vmem:[%s390_s1 + $0x40] sm:$0xff]  ;;  %v44_v9 = vpack.c.bf16 %v34_v7, %v33_v6  ;;  %v32_v10 = vld [vmem:[%s390_s1 + $0x48] sm:$0xff]  ;;  %v292_v12 = vld [vmem:[%s391_s0 + $0x10] sm:$0xff]  }
   0x4   :  { %251 = vmatprep.subr.bf16.mxu0 %v46_v3  ;;  %275 = vmatprep.subr.bf16.mxu1 %v46_v3  ;;  %v291_v11 = vld [vmem:[%s391_s0] sm:$0xff]   ;;  %v43_v13 = vpack.c.bf16 %v32_v10, %v31_v8  ;;  %v29_v14 = vld [vmem:[%s390_s1 + $0x30] sm:$0xff]  ;;  %v30_v15 = vld [vmem:[%s390_s1 + $0x38] sm:$0xff] }
   0x5   :  { %252 = vmatpush3.bf16.msra.mxu0 %v46_v3  ;;  %283 = vmatpush3.bf16.msra.mxu1 %v46_v3  ;;  %v42_v16 = vpack.c.bf16 %v30_v15, %v29_v14  ;;  %v27_v17 = vld [vmem:[%s390_s1 + $0x20] sm:$0xff]  ;;  %v28_v18 = vld [vmem:[%s390_s1 + $0x28] sm:$0xff]  ;;  %v25_v20 = vld [vmem:[%s390_s1 + $0x10] sm:$0xff] }
   0x6   :  { %253 = vmatprep.subr.bf16.mxu0 %v45_v5  ;;  %276 = vmatprep.subr.bf16.mxu1 %v45_v5  ;;  %v41_v19 = vpack.c.bf16 %v28_v18, %v27_v17  ;;  %v26_v21 = vld [vmem:[%s390_s1 + $0x18] sm:$0xff]  ;;  %v23_v23 = vld [vmem:[%s390_s1] sm:$0xff]  ;;  %v24_v24 = vld [vmem:[%s390_s1 + $0x8] sm:$0xff] }
   0x7   :  { %267 = vmatprep.mubr.bf16.mxu0 %v291_v11  ;;  %271 = vmatprep.mubr.bf16.mxu1 %v292_v12  ;;  %v40_v22 = vpack.c.bf16 %v26_v21, %v25_v20  ;;  %v39_v25 = vpack.c.bf16 %v24_v24, %v23_v23  ;;  %v293_v26 = vld [vmem:[%s391_s0 + $0x8] sm:$0xff]   ;;  %v294_v27 = vld [vmem:[%s391_s0 + $0x18] sm:$0xff]   ;;  %v195_v28 = vld [vmem:[%s392_s2] ss:$0 sm:$0xff] }
   0x9   :  { %254 = vmatpush3.bf16.msra.mxu0 %v45_v5  ;;  %284 = vmatpush3.bf16.msra.mxu1 %v45_v5 }
   0xa   :  { %255 = vmatprep.subr.bf16.mxu0 %v44_v9  ;;  %277 = vmatprep.subr.bf16.mxu1 %v44_v9 }
   0xd   :  { %256 = vmatpush3.bf16.msra.mxu0 %v44_v9  ;;  %285 = vmatpush3.bf16.msra.mxu1 %v44_v9 }
   0xe   :  { %257 = vmatprep.subr.bf16.mxu0 %v43_v13  ;;  %278 = vmatprep.subr.bf16.mxu1 %v43_v13 }
  0x11   :  { %258 = vmatpush3.bf16.msra.mxu0 %v43_v13  ;;  %286 = vmatpush3.bf16.msra.mxu1 %v43_v13 }
  0x12   :  { %259 = vmatprep.subr.bf16.mxu0 %v42_v16  ;;  %279 = vmatprep.subr.bf16.mxu1 %v42_v16 }
  0x15   :  { %260 = vmatpush3.bf16.msra.mxu0 %v42_v16  ;;  %287 = vmatpush3.bf16.msra.mxu1 %v42_v16 }
  0x16   :  { %261 = vmatprep.subr.bf16.mxu0 %v41_v19  ;;  %280 = vmatprep.subr.bf16.mxu1 %v41_v19 }
  0x19   :  { %262 = vmatpush3.bf16.msra.mxu0 %v41_v19  ;;  %288 = vmatpush3.bf16.msra.mxu1 %v41_v19 }
  0x1a   :  { %263 = vmatprep.subr.bf16.mxu0 %v40_v22  ;;  %281 = vmatprep.subr.bf16.mxu1 %v40_v22 }
  0x1d   :  { %264 = vmatpush3.bf16.msra.mxu0 %v40_v22  ;;  %289 = vmatpush3.bf16.msra.mxu1 %v40_v22 }
  0x1e   :  { %265 = vmatprep.subr.bf16.mxu0 %v39_v25  ;;  %282 = vmatprep.subr.bf16.mxu1 %v39_v25 }
  0x21   :  { %266 = vmatpush3.bf16.msra.mxu0 %v39_v25  ;;  %290 = vmatpush3.bf16.msra.mxu1 %v39_v25 }
  0x24   :  { %268 = vmatmul.mubr.bf16.vlgmr.msra.gmra.mxu0 %v293_v26  ;;  %272 = vmatmul.mubr.bf16.vlgmr.msra.gmra.mxu1 %v294_v27 }
  0xe4   :  { %v269_v29 = vpop.f32.mrf.mxu0  ;;  %v273_v30 = vpop.f32.mrf.mxu1 }
  0xe5   :  { %v121_v31 = vadd.f32 %v269_v29, %v195_v28  ;;  %v137_v32 = vadd.f32 %v273_v30, %v195_v28 }
  0xe6   :  { %v112_v33 = vpop.f32.mrf.mxu0  ;;  %v128_v34 = vpop.f32.mrf.mxu1 }
  0xe7   :  { %v113_v35 = vadd.f32 %v195_v28, %v112_v33  ;;  %v129_v36 = vadd.f32 %v195_v28, %v128_v34  ;;  %v145_v41 = vmax.f32 %v121_v31, 0.0  ;;  %v149_v42 = vmax.f32 %v137_v32, 0.0 }
  0xe8   :  { %v270_v37 = vpop.f32.mrf.mxu0  ;;  %v274_v38 = vpop.f32.mrf.mxu1 }
  0xe9   :  { %v124_v39 = vadd.f32 %v270_v37, %v195_v28  ;;  %v140_v40 = vadd.f32 %v274_v38, %v195_v28  ;;  %v143_v49 = vmax.f32 %v113_v35, 0.0  ;;  %v147_v50 = vmax.f32 %v129_v36, 0.0 }
  0xea   :  { %v115_v43 = vpop.f32.mrf.mxu0  ;;  %v131_v44 = vpop.f32.mrf.mxu1 }
  0xeb   :  { %v146_v45 = vmax.f32 %v124_v39, 0.0  ;;  %v150_v46 = vmax.f32 %v140_v40, 0.0  ;;  %v116_v47 = vadd.f32 %v195_v28, %v115_v43  ;;  %v132_v48 = vadd.f32 %v195_v28, %v131_v44 }
  0xed   :  { %v224_v51 = vpack.c.bf16 %v146_v45, %v145_v41  ;;  %v234_v52 = vpack.c.bf16 %v150_v46, %v149_v42  ;;  %v144_v53 = vmax.f32 %v116_v47, 0.0  ;;  %v148_v54 = vmax.f32 %v132_v48, 0.0 }
  0xef   :  { %236 = vst [vmem:[%s393_s3 + $0x8] sm:$0xff] %v224_v51   ;;  %238 = vst [vmem:[%s393_s3 + $0x18] sm:$0xff] %v234_v52   ;;  %v219_v55 = vpack.c.bf16 %v144_v53, %v143_v49  ;;  %v229_v56 = vpack.c.bf16 %v148_v54, %v147_v50 }
  0xf1   :  { %220 = vst [vmem:[%s393_s3] sm:$0xff] %v219_v55   ;;  %237 = vst [vmem:[%s393_s3 + $0x10] sm:$0xff] %v229_v56  }

// kernel: forward.18
= control target key start
LH: loop header
LB: loop body
LE: loop exit
PB: predicated region body
PF: predicated region fallthrough
CT: control target
= control target key end

     0   :  { %vm632_vm0 = vcmask 261120   ;;  %s2480_s1 = inlined_call_operand.vmem [shape: f32[1568,128], index: 1, kind: input, shape index: {}]   ;;  %s2481_s0 = inlined_call_operand.vmem [shape: bf16[64,1568], index: 0, kind: input, shape index: {}]   ;;  %s2482_s2 = inlined_call_operand.vmem [shape: f32[1,128], index: 2, kind: input, shape index: {}]   ;;  %s2483_s3 = inlined_call_operand.vmem [shape: bf16[64,128], index: 3, kind: output, shape index: {}]  }
   0x1   :  { %v101_v0 = vld [vmem:[%s2480_s1 + $0xf0] sm:$0xff]  ;;  %v102_v1 = vld [vmem:[%s2480_s1 + $0xf8] sm:$0xff]  ;;  %v99_v11 = vld [vmem:[%s2480_s1 + $0xe0] sm:$0xff] }
   0x2   :  { %v133_v2 = vld [vmem:[%s2480_s1 + $0x1f0] sm:$0xff]  ;;  %v282_v3 = vpack.c.bf16 %v102_v1, %v101_v0  ;;  %v134_v4 = vld [vmem:[%s2480_s1 + $0x1f8] sm:$0xff]  ;;  %v100_v13 = vld [vmem:[%s2480_s1 + $0xe8] sm:$0xff] }
   0x3   :  { %v85_v5 = vld [vmem:[%s2480_s1 + $0x70] sm:$0xff]  ;;  %v86_v6 = vld [vmem:[%s2480_s1 + $0x78] sm:$0xff]  ;;  %v298_v7 = vpack.c.bf16 %v134_v4, %v133_v2  ;;  %v131_v14 = vld [vmem:[%s2480_s1 + $0x1e0] sm:$0xff]  ;;  %v281_v16 = vpack.c.bf16 %v100_v13, %v99_v11 }
   0x4   :  { %v274_v8 = vpack.c.bf16 %v86_v6, %v85_v5  ;;  %v117_v9 = vld [vmem:[%s2480_s1 + $0x170] sm:$0xff]  ;;  %v118_v10 = vld [vmem:[%s2480_s1 + $0x178] sm:$0xff]  ;;  %1248 = vmatprep.subr.bf16.mxu0 %v282_v3  ;;  %v132_v15 = vld [vmem:[%s2480_s1 + $0x1e8] sm:$0xff] }
   0x5   :  { %v290_v12 = vpack.c.bf16 %v118_v10, %v117_v9  ;;  %1288 = vmatprep.subr.bf16.mxu1 %v298_v7  ;;  %v297_v17 = vpack.c.bf16 %v132_v15, %v131_v14  ;;  %v83_v18 = vld [vmem:[%s2480_s1 + $0x60] sm:$0xff]  ;;  %v84_v19 = vld [vmem:[%s2480_s1 + $0x68] sm:$0xff]  ;;  %v97_v23 = vld [vmem:[%s2480_s1 + $0xd0] sm:$0xff] }
   0x6   :  { %1249 = vmatpush3.bf16.msra.mxu0 %v274_v8  ;;  %v115_v20 = vld [vmem:[%s2480_s1 + $0x160] sm:$0xff]  ;;  %v273_v21 = vpack.c.bf16 %v84_v19, %v83_v18  ;;  %v116_v22 = vld [vmem:[%s2480_s1 + $0x168] sm:$0xff]  ;;  %v98_v24 = vld [vmem:[%s2480_s1 + $0xd8] sm:$0xff] }
   0x7   :  { %1289 = vmatpush3.bf16.msra.mxu1 %v290_v12  ;;  %1250 = vmatprep.subr.bf16.mxu0 %v281_v16  ;;  %v289_v25 = vpack.c.bf16 %v116_v22, %v115_v20  ;;  %v280_v26 = vpack.c.bf16 %v98_v24, %v97_v23  ;;  %v129_v27 = vld [vmem:[%s2480_s1 + $0x1d0] sm:$0xff]  ;;  %v130_v28 = vld [vmem:[%s2480_s1 + $0x1d8] sm:$0xff]  ;;  %v95_v35 = vld [vmem:[%s2480_s1 + $0xc0] sm:$0xff] }
   0x8   :  { %1290 = vmatprep.subr.bf16.mxu1 %v297_v17  ;;  %v81_v29 = vld [vmem:[%s2480_s1 + $0x50] sm:$0xff]  ;;  %v296_v30 = vpack.c.bf16 %v130_v28, %v129_v27  ;;  %v82_v31 = vld [vmem:[%s2480_s1 + $0x58] sm:$0xff]  ;;  %v96_v36 = vld [vmem:[%s2480_s1 + $0xc8] sm:$0xff] }
   0x9   :  { %v113_v32 = vld [vmem:[%s2480_s1 + $0x150] sm:$0xff]  ;;  %v114_v33 = vld [vmem:[%s2480_s1 + $0x158] sm:$0xff]  ;;  %v272_v34 = vpack.c.bf16 %v82_v31, %v81_v29  ;;  %v127_v37 = vld [vmem:[%s2480_s1 + $0x1c0] sm:$0xff]  ;;  %v279_v39 = vpack.c.bf16 %v96_v36, %v95_v35 }
   0xa   :  { %1251 = vmatpush3.bf16.msra.mxu0 %v273_v21  ;;  %v288_v38 = vpack.c.bf16 %v114_v33, %v113_v32  ;;  %v128_v40 = vld [vmem:[%s2480_s1 + $0x1c8] sm:$0xff]  ;;  %v79_v41 = vld [vmem:[%s2480_s1 + $0x40] sm:$0xff]  ;;  %v93_v46 = vld [vmem:[%s2480_s1 + $0xb0] sm:$0xff] }
   0xb   :  { %1291 = vmatpush3.bf16.msra.mxu1 %v289_v25  ;;  %1252 = vmatprep.subr.bf16.mxu0 %v280_v26  ;;  %v80_v42 = vld [vmem:[%s2480_s1 + $0x48] sm:$0xff]  ;;  %v295_v43 = vpack.c.bf16 %v128_v40, %v127_v37  ;;  %v111_v44 = vld [vmem:[%s2480_s1 + $0x140] sm:$0xff]  ;;  %v94_v47 = vld [vmem:[%s2480_s1 + $0xb8] sm:$0xff] }
   0xc   :  { %1292 = vmatprep.subr.bf16.mxu1 %v296_v30  ;;  %v112_v45 = vld [vmem:[%s2480_s1 + $0x148] sm:$0xff]  ;;  %v125_v48 = vld [vmem:[%s2480_s1 + $0x1b0] sm:$0xff]  ;;  %v126_v49 = vld [vmem:[%s2480_s1 + $0x1b8] sm:$0xff]  ;;  %v271_v50 = vpack.c.bf16 %v80_v42, %v79_v41  ;;  %v278_v52 = vpack.c.bf16 %v94_v47, %v93_v46 }
   0xd   :  { %v287_v51 = vpack.c.bf16 %v112_v45, %v111_v44  ;;  %v77_v53 = vld [vmem:[%s2480_s1 + $0x30] sm:$0xff]  ;;  %v78_v54 = vld [vmem:[%s2480_s1 + $0x38] sm:$0xff]  ;;  %v294_v56 = vpack.c.bf16 %v126_v49, %v125_v48  ;;  %v91_v58 = vld [vmem:[%s2480_s1 + $0xa0] sm:$0xff] }
   0xe   :  { %1253 = vmatpush3.bf16.msra.mxu0 %v272_v34  ;;  %v109_v55 = vld [vmem:[%s2480_s1 + $0x130] sm:$0xff]  ;;  %v110_v57 = vld [vmem:[%s2480_s1 + $0x138] sm:$0xff]  ;;  %v92_v59 = vld [vmem:[%s2480_s1 + $0xa8] sm:$0xff]  ;;  %v270_v62 = vpack.c.bf16 %v78_v54, %v77_v53 }
   0xf   :  { %1293 = vmatpush3.bf16.msra.mxu1 %v288_v38  ;;  %1254 = vmatprep.subr.bf16.mxu0 %v279_v39  ;;  %v123_v60 = vld [vmem:[%s2480_s1 + $0x1a0] sm:$0xff]  ;;  %v124_v61 = vld [vmem:[%s2480_s1 + $0x1a8] sm:$0xff]  ;;  %v286_v0 = vpack.c.bf16 %v110_v57, %v109_v55  ;;  %v277_v1 = vpack.c.bf16 %v92_v59, %v91_v58  ;;  %v89_v6 = vld [vmem:[%s2480_s1 + $0x90] sm:$0xff] }
  0x10   :  { %1294 = vmatprep.subr.bf16.mxu1 %v295_v43  ;;  %v75_v63 = vld [vmem:[%s2480_s1 + $0x20] sm:$0xff]  ;;  %v76_v2 = vld [vmem:[%s2480_s1 + $0x28] sm:$0xff]  ;;  %v293_v5 = vpack.c.bf16 %v124_v61, %v123_v60  ;;  %v90_v7 = vld [vmem:[%s2480_s1 + $0x98] sm:$0xff] }
  0x11   :  { %v107_v3 = vld [vmem:[%s2480_s1 + $0x120] sm:$0xff]  ;;  %v108_v4 = vld [vmem:[%s2480_s1 + $0x128] sm:$0xff]  ;;  %v121_v8 = vld [vmem:[%s2480_s1 + $0x190] sm:$0xff]  ;;  %v269_v12 = vpack.c.bf16 %v76_v2, %v75_v63  ;;  %v276_v17 = vpack.c.bf16 %v90_v7, %v89_v6 }
  0x12   :  { %1255 = vmatpush3.bf16.msra.mxu0 %v271_v50  ;;  %v122_v9 = vld [vmem:[%s2480_s1 + $0x198] sm:$0xff]  ;;  %v73_v10 = vld [vmem:[%s2480_s1 + $0x10] sm:$0xff]  ;;  %v87_v15 = vld [vmem:[%s2480_s1 + $0x80] sm:$0xff]  ;;  %v285_v16 = vpack.c.bf16 %v108_v4, %v107_v3 }
  0x13   :  { %1295 = vmatpush3.bf16.msra.mxu1 %v287_v51  ;;  %1256 = vmatprep.subr.bf16.mxu0 %v278_v52  ;;  %v74_v11 = vld [vmem:[%s2480_s1 + $0x18] sm:$0xff]  ;;  %v105_v13 = vld [vmem:[%s2480_s1 + $0x110] sm:$0xff]  ;;  %v88_v18 = vld [vmem:[%s2480_s1 + $0x88] sm:$0xff]  ;;  %v292_v19 = vpack.c.bf16 %v122_v9, %v121_v8 }
  0x14   :  { %1296 = vmatprep.subr.bf16.mxu1 %v294_v56  ;;  %v106_v14 = vld [vmem:[%s2480_s1 + $0x118] sm:$0xff]  ;;  %v119_v20 = vld [vmem:[%s2480_s1 + $0x180] sm:$0xff]  ;;  %v120_v22 = vld [vmem:[%s2480_s1 + $0x188] sm:$0xff]  ;;  %v268_v24 = vpack.c.bf16 %v74_v11, %v73_v10  ;;  %v275_v26 = vpack.c.bf16 %v88_v18, %v87_v15 }
  0x15   :  { %v1512_v21 = vld [vmem:[%s2481_s0 + $0x4] ss:$52 sps:$4 sm:$0xff]   ;;  %v1515_v23 = vld [vmem:[%s2481_s0 + $0xc] ss:$52 sps:$4 sm:$0xff]   ;;  %v284_v25 = vpack.c.bf16 %v106_v14, %v105_v13  ;;  %v291_v30 = vpack.c.bf16 %v120_v22, %v119_v20  ;;  %v165_v32 = vld [vmem:[%s2480_s1 + $0x2f0] sm:$0xff] }
  0x16   :  { %1257 = vmatpush3.bf16.msra.mxu0 %v270_v62  ;;  %677 = vmatprep.mubr.bf16.mxu0 %v1512_v21  ;;  %v71_v27 = vld [vmem:[%s2480_s1] sm:$0xff]  ;;  %v72_v28 = vld [vmem:[%s2480_s1 + $0x8] sm:$0xff]  ;;  %v166_v33 = vld [vmem:[%s2480_s1 + $0x2f8] sm:$0xff] }
  0x17   :  { %1297 = vmatpush3.bf16.msra.mxu1 %v286_v0  ;;  %1258 = vmatprep.subr.bf16.mxu0 %v277_v1  ;;  %v103_v29 = vld [vmem:[%s2480_s1 + $0x100] sm:$0xff]  ;;  %v104_v31 = vld [vmem:[%s2480_s1 + $0x108] sm:$0xff]  ;;  %v197_v34 = vld [vmem:[%s2480_s1 + $0x3f0] sm:$0xff]  ;;  %v267_v37 = vpack.c.bf16 %v72_v28, %v71_v27  ;;  %v314_v42 = vpack.c.bf16 %v166_v33, %v165_v32 }
  0x18   :  { %1298 = vmatprep.subr.bf16.mxu1 %v293_v5  ;;  %742 = vmatprep.mubr.bf16.mxu1 %v1515_v23  ;;  %v198_v35 = vld [vmem:[%s2480_s1 + $0x3f8] sm:$0xff]  ;;  %v149_v36 = vld [vmem:[%s2480_s1 + $0x270] sm:$0xff]  ;;  %v283_v41 = vpack.c.bf16 %v104_v31, %v103_v29  ;;  %v163_v43 = vld [vmem:[%s2480_s1 + $0x2e0] sm:$0xff] }
  0x19   :  { %v150_v38 = vld [vmem:[%s2480_s1 + $0x278] sm:$0xff]  ;;  %v181_v39 = vld [vmem:[%s2480_s1 + $0x370] sm:$0xff]  ;;  %v330_v44 = vpack.c.bf16 %v198_v35, %v197_v34  ;;  %v164_v45 = vld [vmem:[%s2480_s1 + $0x2e8] sm:$0xff] }
  0x1a   :  { %1259 = vmatpush3.bf16.msra.mxu0 %v269_v12  ;;  %v182_v40 = vld [vmem:[%s2480_s1 + $0x378] sm:$0xff]  ;;  %v1510_v46 = vld [vmem:[%s2481_s0] ss:$52 sps:$4 sm:$0xff]   ;;  %v196_v48 = vld [vmem:[%s2480_s1 + $0x3e8] sm:$0xff]  ;;  %v306_v50 = vpack.c.bf16 %v150_v38, %v149_v36  ;;  %v313_v54 = vpack.c.bf16 %v164_v45, %v163_v43 }
  0x1b   :  { %1299 = vmatpush3.bf16.msra.mxu1 %v285_v16  ;;  %1260 = vmatprep.subr.bf16.mxu0 %v276_v17  ;;  %v195_v47 = vld [vmem:[%s2480_s1 + $0x3e0] sm:$0xff]  ;;  %v1513_v49 = vld [vmem:[%s2481_s0 + $0x8] ss:$52 sps:$4 sm:$0xff]   ;;  %v322_v53 = vpack.c.bf16 %v182_v40, %v181_v39  ;;  %v161_v60 = vld [vmem:[%s2480_s1 + $0x2d0] sm:$0xff] }
  0x1c   :  { %1300 = vmatprep.subr.bf16.mxu1 %v292_v19  ;;  %v147_v51 = vld [vmem:[%s2480_s1 + $0x260] sm:$0xff]  ;;  %v148_v52 = vld [vmem:[%s2480_s1 + $0x268] sm:$0xff]  ;;  %v329_v58 = vpack.c.bf16 %v196_v48, %v195_v47  ;;  %v162_v61 = vld [vmem:[%s2480_s1 + $0x2d8] sm:$0xff] }
  0x1d   :  { %v179_v55 = vld [vmem:[%s2480_s1 + $0x360] sm:$0xff]  ;;  %v180_v56 = vld [vmem:[%s2480_s1 + $0x368] sm:$0xff]  ;;  %v193_v62 = vld [vmem:[%s2480_s1 + $0x3d0] sm:$0xff]  ;;  %v305_v1 = vpack.c.bf16 %v148_v52, %v147_v51  ;;  %v312_v6 = vpack.c.bf16 %v162_v61, %v161_v60 }
  0x1e   :  { %1261 = vmatpush3.bf16.msra.mxu0 %v268_v24  ;;  %v1516_v57 = vld [vmem:[%s2481_s0 + $0x6c] ss:$52 sps:$4 sm:$0xff]   ;;  %v1518_v59 = vld [vmem:[%s2481_s0 + $0x74] ss:$52 sps:$4 sm:$0xff]   ;;  %v194_v63 = vld [vmem:[%s2480_s1 + $0x3d8] sm:$0xff]  ;;  %v321_v5 = vpack.c.bf16 %v180_v56, %v179_v55 }
  0x1f   :  { %1301 = vmatpush3.bf16.msra.mxu1 %v284_v25  ;;  %1262 = vmatprep.subr.bf16.mxu0 %v275_v26  ;;  %v145_v0 = vld [vmem:[%s2480_s1 + $0x250] sm:$0xff]  ;;  %v146_v2 = vld [vmem:[%s2480_s1 + $0x258] sm:$0xff]  ;;  %v159_v7 = vld [vmem:[%s2480_s1 + $0x2c0] sm:$0xff]  ;;  %v328_v8 = vpack.c.bf16 %v194_v63, %v193_v62 }
  0x20   :  { %1302 = vmatprep.subr.bf16.mxu1 %v291_v30  ;;  %v177_v3 = vld [vmem:[%s2480_s1 + $0x350] sm:$0xff]  ;;  %v178_v4 = vld [vmem:[%s2480_s1 + $0x358] sm:$0xff]  ;;  %v160_v9 = vld [vmem:[%s2480_s1 + $0x2c8] sm:$0xff]  ;;  %v304_v14 = vpack.c.bf16 %v146_v2, %v145_v0 }
  0x21   :  { %v1520_v10 = vld [vmem:[%s2481_s0 + $0x68] ss:$52 sps:$4 sm:$0xff]   ;;  %v191_v11 = vld [vmem:[%s2480_s1 + $0x3c0] sm:$0xff]  ;;  %v320_v17 = vpack.c.bf16 %v178_v4, %v177_v3  ;;  %v311_v18 = vpack.c.bf16 %v160_v9, %v159_v7  ;;  %v157_v24 = vld [vmem:[%s2480_s1 + $0x2b0] sm:$0xff] }
  0x22   :  { %1263 = vmatpush3.bf16.msra.mxu0 %v267_v37  ;;  %v192_v12 = vld [vmem:[%s2480_s1 + $0x3c8] sm:$0xff]  ;;  %v1521_v13 = vld [vmem:[%s2481_s0 + $0x70] ss:$52 sps:$4 sm:$0xff]   ;;  %v158_v25 = vld [vmem:[%s2480_s1 + $0x2b8] sm:$0xff] }
  0x23   :  { %1303 = vmatpush3.bf16.msra.mxu1 %v283_v41  ;;  %1328 = vmatprep.subr.bf16.mxu0 %v314_v42  ;;  %v143_v15 = vld [vmem:[%s2480_s1 + $0x240] sm:$0xff]  ;;  %v144_v16 = vld [vmem:[%s2480_s1 + $0x248] sm:$0xff]  ;;  %v327_v22 = vpack.c.bf16 %v192_v12, %v191_v11  ;;  %v1524_v23 = vld [vmem:[%s2481_s0 + $0xdc] ss:$52 sps:$4 sm:$0xff]   ;;  %v310_v34 = vpack.c.bf16 %v158_v25, %v157_v24 }
  0x24   :  { %1368 = vmatprep.subr.bf16.mxu1 %v330_v44  ;;  %v175_v19 = vld [vmem:[%s2480_s1 + $0x340] sm:$0xff]  ;;  %v176_v20 = vld [vmem:[%s2480_s1 + $0x348] sm:$0xff]  ;;  %v189_v26 = vld [vmem:[%s2480_s1 + $0x3b0] sm:$0xff]  ;;  %v303_v29 = vpack.c.bf16 %v144_v16, %v143_v15 }
  0x25   :  { %678 = vmatmul.mubr.bf16.vlgmr.msra.gmra.mxu0 %v1510_v46  ;;  %v1522_v21 = vld [vmem:[%s2481_s0 + $0xd4] ss:$52 sps:$4 sm:$0xff]   ;;  %v190_v27 = vld [vmem:[%s2480_s1 + $0x3b8] sm:$0xff]  ;;  %v319_v33 = vpack.c.bf16 %v176_v20, %v175_v19  ;;  %v155_v35 = vld [vmem:[%s2480_s1 + $0x2a0] sm:$0xff] }
  0x26   :  { %743 = vmatmul.mubr.bf16.vlgmr.msra.gmra.mxu1 %v1513_v49  ;;  %1329 = vmatpush3.bf16.msra.mxu0 %v306_v50  ;;  %v141_v28 = vld [vmem:[%s2480_s1 + $0x230] sm:$0xff]  ;;  %v142_v30 = vld [vmem:[%s2480_s1 + $0x238] sm:$0xff]  ;;  %v326_v36 = vpack.c.bf16 %v190_v27, %v189_v26  ;;  %v156_v37 = vld [vmem:[%s2480_s1 + $0x2a8] sm:$0xff] }
  0x27   :  { %1369 = vmatpush3.bf16.msra.mxu1 %v322_v53  ;;  %1330 = vmatprep.subr.bf16.mxu0 %v313_v54  ;;  %v173_v31 = vld [vmem:[%s2480_s1 + $0x330] sm:$0xff]  ;;  %v174_v32 = vld [vmem:[%s2480_s1 + $0x338] sm:$0xff]  ;;  %v187_v39 = vld [vmem:[%s2480_s1 + $0x3a0] sm:$0xff]  ;;  %v302_v42 = vpack.c.bf16 %v142_v30, %v141_v28  ;;  %v309_v45 = vpack.c.bf16 %v156_v37, %v155_v35 }
  0x28   :  { %1370 = vmatprep.subr.bf16.mxu1 %v329_v58  ;;  %685 = vmatprep.mubr.bf16.mxu0 %v1516_v57  ;;  %v1526_v38 = vld [vmem:[%s2481_s0 + $0xd0] ss:$52 sps:$4 sm:$0xff]   ;;  %v188_v40 = vld [vmem:[%s2480_s1 + $0x3a8] sm:$0xff]  ;;  %v318_v44 = vpack.c.bf16 %v174_v32, %v173_v31  ;;  %v154_v52 = vld [vmem:[%s2480_s1 + $0x298] sm:$0xff] }
  0x29   :  { %750 = vmatprep.mubr.bf16.mxu1 %v1518_v59  ;;  %v1527_v41 = vld [vmem:[%s2481_s0 + $0xd8] ss:$52 sps:$4 sm:$0xff]   ;;  %v139_v43 = vld [vmem:[%s2480_s1 + $0x220] sm:$0xff]  ;;  %v325_v49 = vpack.c.bf16 %v188_v40, %v187_v39  ;;  %v1528_v50 = vld [vmem:[%s2481_s0 + $0x13c] ss:$52 sps:$4 sm:$0xff]  }
  0x2a   :  { %1331 = vmatpush3.bf16.msra.mxu0 %v305_v1  ;;  %v140_v46 = vld [vmem:[%s2480_s1 + $0x228] sm:$0xff]  ;;  %v171_v47 = vld [vmem:[%s2480_s1 + $0x320] sm:$0xff]  ;;  %v153_v51 = vld [vmem:[%s2480_s1 + $0x290] sm:$0xff] }
  0x2b   :  { %1371 = vmatpush3.bf16.msra.mxu1 %v321_v5  ;;  %1332 = vmatprep.subr.bf16.mxu0 %v312_v6  ;;  %v172_v48 = vld [vmem:[%s2480_s1 + $0x328] sm:$0xff]  ;;  %v1530_v53 = vld [vmem:[%s2481_s0 + $0x144] ss:$52 sps:$4 sm:$0xff]   ;;  %v185_v54 = vld [vmem:[%s2480_s1 + $0x390] sm:$0xff]  ;;  %v301_v56 = vpack.c.bf16 %v140_v46, %v139_v43  ;;  %v308_v62 = vpack.c.bf16 %v154_v52, %v153_v51 }
  0x2c   :  { %1372 = vmatprep.subr.bf16.mxu1 %v328_v8  ;;  %v186_v55 = vld [vmem:[%s2480_s1 + $0x398] sm:$0xff]  ;;  %v137_v57 = vld [vmem:[%s2480_s1 + $0x210] sm:$0xff]  ;;  %v317_v60 = vpack.c.bf16 %v172_v48, %v171_v47  ;;  %v151_v1 = vld [vmem:[%s2480_s1 + $0x280] sm:$0xff] }
  0x2d   :  { %686 = vmatmul.mubr.bf16.gmra.mxu0 %v1520_v10  ;;  %v138_v58 = vld [vmem:[%s2480_s1 + $0x218] sm:$0xff]  ;;  %v169_v59 = vld [vmem:[%s2480_s1 + $0x310] sm:$0xff]  ;;  %v324_v0 = vpack.c.bf16 %v186_v55, %v185_v54  ;;  %v152_v2 = vld [vmem:[%s2480_s1 + $0x288] sm:$0xff] }
  0x2e   :  { %751 = vmatmul.mubr.bf16.gmra.mxu1 %v1521_v13  ;;  %1333 = vmatpush3.bf16.msra.mxu0 %v304_v14  ;;  %v1532_v61 = vld [vmem:[%s2481_s0 + $0x138] ss:$52 sps:$4 sm:$0xff]   ;;  %v183_v3 = vld [vmem:[%s2480_s1 + $0x380] sm:$0xff]  ;;  %v300_v6 = vpack.c.bf16 %v138_v58, %v137_v57  ;;  %v307_v10 = vpack.c.bf16 %v152_v2, %v151_v1  ;;  %v1536_v13 = vld [vmem:[%s2481_s0 + $0x14] ss:$52 sps:$4 sm:$0xff]  }
  0x2f   :  { %1373 = vmatpush3.bf16.msra.mxu1 %v320_v17  ;;  %1334 = vmatprep.subr.bf16.mxu0 %v311_v18  ;;  %v170_v63 = vld [vmem:[%s2480_s1 + $0x318] sm:$0xff]  ;;  %v184_v4 = vld [vmem:[%s2480_s1 + $0x388] sm:$0xff]  ;;  %v1533_v5 = vld [vmem:[%s2481_s0 + $0x140] ss:$52 sps:$4 sm:$0xff]  }
  0x30   :  { %1374 = vmatprep.subr.bf16.mxu1 %v327_v22  ;;  %693 = vmatprep.mubr.bf16.mxu0 %v1522_v21  ;;  %v135_v7 = vld [vmem:[%s2480_s1 + $0x200] sm:$0xff]  ;;  %v136_v8 = vld [vmem:[%s2480_s1 + $0x208] sm:$0xff]  ;;  %v316_v9 = vpack.c.bf16 %v170_v63, %v169_v59  ;;  %v323_v14 = vpack.c.bf16 %v184_v4, %v183_v3  ;;  %v1539_v15 = vld [vmem:[%s2481_s0 + $0x1c] ss:$52 sps:$4 sm:$0xff]  }
  0x31   :  { %758 = vmatprep.mubr.bf16.mxu1 %v1524_v23  ;;  %v167_v11 = vld [vmem:[%s2480_s1 + $0x300] sm:$0xff]  ;;  %v168_v12 = vld [vmem:[%s2480_s1 + $0x308] sm:$0xff]  ;;  %v229_v16 = vld [vmem:[%s2480_s1 + $0x4f0] sm:$0xff]  ;;  %v299_v21 = vpack.c.bf16 %v136_v8, %v135_v7 }
  0x32   :  { %1335 = vmatpush3.bf16.msra.mxu0 %v303_v29  ;;  %v230_v17 = vld [vmem:[%s2480_s1 + $0x4f8] sm:$0xff]  ;;  %v261_v18 = vld [vmem:[%s2480_s1 + $0x5f0] sm:$0xff]  ;;  %v315_v25 = vpack.c.bf16 %v168_v12, %v167_v11  ;;  %v227_v27 = vld [vmem:[%s2480_s1 + $0x4e0] sm:$0xff] }
  0x33   :  { %1375 = vmatpush3.bf16.msra.mxu1 %v319_v33  ;;  %1336 = vmatprep.subr.bf16.mxu0 %v310_v34  ;;  %v262_v19 = vld [vmem:[%s2480_s1 + $0x5f8] sm:$0xff]  ;;  %v213_v20 = vld [vmem:[%s2480_s1 + $0x470] sm:$0xff]  ;;  %v346_v26 = vpack.c.bf16 %v230_v17, %v229_v16  ;;  %v228_v29 = vld [vmem:[%s2480_s1 + $0x4e8] sm:$0xff] }
  0x34   :  { %1376 = vmatprep.subr.bf16.mxu1 %v326_v36  ;;  %v214_v22 = vld [vmem:[%s2480_s1 + $0x478] sm:$0xff]  ;;  %v245_v23 = vld [vmem:[%s2480_s1 + $0x570] sm:$0xff]  ;;  %v362_v28 = vpack.c.bf16 %v262_v19, %v261_v18  ;;  %v259_v31 = vld [vmem:[%s2480_s1 + $0x5e0] sm:$0xff] }
  0x35   :  { %694 = vmatmul.mubr.bf16.gmra.mxu0 %v1526_v38  ;;  %v246_v24 = vld [vmem:[%s2480_s1 + $0x578] sm:$0xff]  ;;  %v1534_v30 = vld [vmem:[%s2481_s0 + $0x10] ss:$52 sps:$4 sm:$0xff]   ;;  %v260_v32 = vld [vmem:[%s2480_s1 + $0x5e8] sm:$0xff]  ;;  %v338_v34 = vpack.c.bf16 %v214_v22, %v213_v20  ;;  %v345_v38 = vpack.c.bf16 %v228_v29, %v227_v27 }
  0x36   :  { %759 = vmatmul.mubr.bf16.gmra.mxu1 %v1527_v41  ;;  %1337 = vmatpush3.bf16.msra.mxu0 %v302_v42  ;;  %v1537_v33 = vld [vmem:[%s2481_s0 + $0x18] ss:$52 sps:$4 sm:$0xff]   ;;  %v211_v35 = vld [vmem:[%s2480_s1 + $0x460] sm:$0xff]  ;;  %v354_v37 = vpack.c.bf16 %v246_v24, %v245_v23  ;;  %v1540_v41 = vld [vmem:[%s2481_s0 + $0x7c] ss:$52 sps:$4 sm:$0xff]   ;;  %v361_v42 = vpack.c.bf16 %v260_v32, %v259_v31 }
  0x37   :  { %1377 = vmatpush3.bf16.msra.mxu1 %v318_v44  ;;  %1338 = vmatprep.subr.bf16.mxu0 %v309_v45  ;;  %v212_v36 = vld [vmem:[%s2480_s1 + $0x468] sm:$0xff]  ;;  %v243_v39 = vld [vmem:[%s2480_s1 + $0x560] sm:$0xff]  ;;  %v225_v44 = vld [vmem:[%s2480_s1 + $0x4d0] sm:$0xff] }
  0x38   :  { %1378 = vmatprep.subr.bf16.mxu1 %v325_v49  ;;  %701 = vmatprep.mubr.bf16.mxu0 %v1528_v50  ;;  %v244_v40 = vld [vmem:[%s2480_s1 + $0x568] sm:$0xff]  ;;  %v1542_v43 = vld [vmem:[%s2481_s0 + $0x84] ss:$52 sps:$4 sm:$0xff]   ;;  %v257_v46 = vld [vmem:[%s2480_s1 + $0x5d0] sm:$0xff]  ;;  %v337_v49 = vpack.c.bf16 %v212_v36, %v211_v35 }
  0x39   :  { %766 = vmatprep.mubr.bf16.mxu1 %v1530_v53  ;;  %v226_v45 = vld [vmem:[%s2480_s1 + $0x4d8] sm:$0xff]  ;;  %v209_v48 = vld [vmem:[%s2480_s1 + $0x450] sm:$0xff]  ;;  %v353_v53 = vpack.c.bf16 %v244_v40, %v243_v39  ;;  %v223_v55 = vld [vmem:[%s2480_s1 + $0x4c0] sm:$0xff] }
  0x3a   :  { %1339 = vmatpush3.bf16.msra.mxu0 %v301_v56  ;;  %v258_v47 = vld [vmem:[%s2480_s1 + $0x5d8] sm:$0xff]  ;;  %v241_v51 = vld [vmem:[%s2480_s1 + $0x550] sm:$0xff]  ;;  %v344_v54 = vpack.c.bf16 %v226_v45, %v225_v44  ;;  %v224_v57 = vld [vmem:[%s2480_s1 + $0x4c8] sm:$0xff] }
  0x3b   :  { %1379 = vmatpush3.bf16.msra.mxu1 %v317_v60  ;;  %1340 = vmatprep.subr.bf16.mxu0 %v308_v62  ;;  %v210_v50 = vld [vmem:[%s2480_s1 + $0x458] sm:$0xff]  ;;  %v360_v56 = vpack.c.bf16 %v258_v47, %v257_v46  ;;  %v255_v59 = vld [vmem:[%s2480_s1 + $0x5c0] sm:$0xff]  ;;  %v256_v60 = vld [vmem:[%s2480_s1 + $0x5c8] sm:$0xff]  ;;  %v343_v2 = vpack.c.bf16 %v224_v57, %v223_v55 }
  0x3c   :  { %1380 = vmatprep.subr.bf16.mxu1 %v324_v0  ;;  %v242_v52 = vld [vmem:[%s2480_s1 + $0x558] sm:$0xff]  ;;  %v336_v62 = vpack.c.bf16 %v210_v50, %v209_v48  ;;  %v207_v63 = vld [vmem:[%s2480_s1 + $0x440] sm:$0xff]  ;;  %v208_v0 = vld [vmem:[%s2480_s1 + $0x448] sm:$0xff] }
  0x3d   :  { %702 = vmatmul.mubr.bf16.gmra.mxu0 %v1532_v61  ;;  %v1544_v58 = vld [vmem:[%s2481_s0 + $0x78] ss:$52 sps:$4 sm:$0xff]   ;;  %v1545_v61 = vld [vmem:[%s2481_s0 + $0x80] ss:$52 sps:$4 sm:$0xff]   ;;  %v352_v1 = vpack.c.bf16 %v242_v52, %v241_v51  ;;  %v1551_v23 = vld [vmem:[%s2481_s0 + $0xe8] ss:$52 sps:$4 sm:$0xff]  }
  0x3e   :  { %767 = vmatmul.mubr.bf16.gmra.mxu1 %v1533_v5  ;;  %1341 = vmatpush3.bf16.msra.mxu0 %v300_v6  ;;  %v239_v3 = vld [vmem:[%s2480_s1 + $0x540] sm:$0xff]  ;;  %v240_v4 = vld [vmem:[%s2480_s1 + $0x548] sm:$0xff]  ;;  %v359_v6 = vpack.c.bf16 %v256_v60, %v255_v59  ;;  %v221_v8 = vld [vmem:[%s2480_s1 + $0x4b0] sm:$0xff] }
  0x3f   :  { %1381 = vmatpush3.bf16.msra.mxu1 %v316_v9  ;;  %1342 = vmatprep.subr.bf16.mxu0 %v307_v10  ;;  %v1546_v5 = vld [vmem:[%s2481_s0 + $0xe4] ss:$52 sps:$4 sm:$0xff]   ;;  %v1548_v7 = vld [vmem:[%s2481_s0 + $0xec] ss:$52 sps:$4 sm:$0xff]   ;;  %v253_v10 = vld [vmem:[%s2480_s1 + $0x5b0] sm:$0xff]  ;;  %v351_v17 = vpack.c.bf16 %v240_v4, %v239_v3 }
  0x40   :  { %1382 = vmatprep.subr.bf16.mxu1 %v323_v14  ;;  %807 = vmatprep.mubr.bf16.mxu0 %v1536_v13  ;;  %v222_v9 = vld [vmem:[%s2480_s1 + $0x4b8] sm:$0xff]  ;;  %v205_v12 = vld [vmem:[%s2480_s1 + $0x430] sm:$0xff]  ;;  %v335_v13 = vpack.c.bf16 %v208_v0, %v207_v63  ;;  %v219_v20 = vld [vmem:[%s2480_s1 + $0x4a0] sm:$0xff] }
  0x41   :  { %872 = vmatprep.mubr.bf16.mxu1 %v1539_v15  ;;  %v254_v11 = vld [vmem:[%s2480_s1 + $0x5b8] sm:$0xff]  ;;  %v237_v15 = vld [vmem:[%s2480_s1 + $0x530] sm:$0xff]  ;;  %v342_v19 = vpack.c.bf16 %v222_v9, %v221_v8  ;;  %v220_v22 = vld [vmem:[%s2480_s1 + $0x4a8] sm:$0xff] }
  0x42   :  { %1343 = vmatpush3.bf16.msra.mxu0 %v299_v21  ;;  %v206_v14 = vld [vmem:[%s2480_s1 + $0x438] sm:$0xff]  ;;  %v1550_v18 = vld [vmem:[%s2481_s0 + $0xe0] ss:$52 sps:$4 sm:$0xff]   ;;  %v358_v21 = vpack.c.bf16 %v254_v11, %v253_v10  ;;  %v341_v31 = vpack.c.bf16 %v220_v22, %v219_v20  ;;  %v236_v32 = vld [vmem:[%s2480_s1 + $0x528] sm:$0xff] }
  0x43   :  { %1383 = vmatpush3.bf16.msra.mxu1 %v315_v25  ;;  %1408 = vmatprep.subr.bf16.mxu0 %v346_v26  ;;  %v238_v16 = vld [vmem:[%s2480_s1 + $0x538] sm:$0xff]  ;;  %v251_v24 = vld [vmem:[%s2480_s1 + $0x5a0] sm:$0xff]  ;;  %v252_v25 = vld [vmem:[%s2480_s1 + $0x5a8] sm:$0xff]  ;;  %v334_v26 = vpack.c.bf16 %v206_v14, %v205_v12 }
  0x44   :  { %1448 = vmatprep.subr.bf16.mxu1 %v362_v28  ;;  %v203_v27 = vld [vmem:[%s2480_s1 + $0x420] sm:$0xff]  ;;  %v204_v28 = vld [vmem:[%s2480_s1 + $0x428] sm:$0xff]  ;;  %v357_v35 = vpack.c.bf16 %v252_v25, %v251_v24  ;;  %v217_v36 = vld [vmem:[%s2480_s1 + $0x490] sm:$0xff] }
  0x45   :  { %808 = vmatmul.mubr.bf16.vlgmr.msra.gmra.mxu0 %v1534_v30  ;;  %v235_v29 = vld [vmem:[%s2480_s1 + $0x520] sm:$0xff]  ;;  %v350_v30 = vpack.c.bf16 %v238_v16, %v237_v15  ;;  %v250_v39 = vld [vmem:[%s2480_s1 + $0x598] sm:$0xff]  ;;  %v201_v40 = vld [vmem:[%s2480_s1 + $0x410] sm:$0xff] }
  0x46   :  { %873 = vmatmul.mubr.bf16.vlgmr.msra.gmra.mxu1 %v1537_v33  ;;  %1409 = vmatpush3.bf16.msra.mxu0 %v338_v34  ;;  %v1552_v33 = vld [vmem:[%s2481_s0 + $0x14c] ss:$52 sps:$4 sm:$0xff]   ;;  %v1554_v34 = vld [vmem:[%s2481_s0 + $0x154] ss:$52 sps:$4 sm:$0xff]   ;;  %v234_v44 = vld [vmem:[%s2480_s1 + $0x518] sm:$0xff]  ;;  %v349_v46 = vpack.c.bf16 %v236_v32, %v235_v29 }
  0x47   :  { %1449 = vmatpush3.bf16.msra.mxu1 %v354_v37  ;;  %1410 = vmatprep.subr.bf16.mxu0 %v345_v38  ;;  %v218_v37 = vld [vmem:[%s2480_s1 + $0x498] sm:$0xff]  ;;  %v249_v38 = vld [vmem:[%s2480_s1 + $0x590] sm:$0xff]  ;;  %v215_v45 = vld [vmem:[%s2480_s1 + $0x480] sm:$0xff] }
  0x48   :  { %1450 = vmatprep.subr.bf16.mxu1 %v361_v42  ;;  %815 = vmatprep.mubr.bf16.mxu0 %v1540_v41  ;;  %v202_v41 = vld [vmem:[%s2480_s1 + $0x418] sm:$0xff]  ;;  %v333_v42 = vpack.c.bf16 %v204_v28, %v203_v27  ;;  %v340_v48 = vpack.c.bf16 %v218_v37, %v217_v36  ;;  %v1557_v50 = vld [vmem:[%s2481_s0 + $0x150] ss:$52 sps:$4 sm:$0xff]   ;;  %v356_v51 = vpack.c.bf16 %v250_v39, %v249_v38  ;;  %v200_v55 = vld [vmem:[%s2480_s1 + $0x408] sm:$0xff] }
  0x49   :  { %880 = vmatprep.mubr.bf16.mxu1 %v1542_v43  ;;  %v233_v43 = vld [vmem:[%s2480_s1 + $0x510] sm:$0xff]  ;;  %v1556_v47 = vld [vmem:[%s2481_s0 + $0x148] ss:$52 sps:$4 sm:$0xff]   ;;  %v247_v52 = vld [vmem:[%s2480_s1 + $0x580] sm:$0xff] }
  0x4a   :  { %1411 = vmatpush3.bf16.msra.mxu0 %v337_v49  ;;  %v216_v49 = vld [vmem:[%s2480_s1 + $0x488] sm:$0xff]  ;;  %v231_v57 = vld [vmem:[%s2480_s1 + $0x500] sm:$0xff]  ;;  %v348_v59 = vpack.c.bf16 %v234_v44, %v233_v43  ;;  %v265_v63 = vld [vmem:[%s2480_s1 + $0x610] sm:$0xff] }
  0x4b   :  { %1451 = vmatpush3.bf16.msra.mxu1 %v353_v53  ;;  %1412 = vmatprep.subr.bf16.mxu0 %v344_v54  ;;  %v248_v53 = vld [vmem:[%s2480_s1 + $0x588] sm:$0xff]  ;;  %v199_v54 = vld [vmem:[%s2480_s1 + $0x400] sm:$0xff]  ;;  %v339_v60 = vpack.c.bf16 %v216_v49, %v215_v45  ;;  %v266_v0 = vld [vmem:[%s2480_s1 + $0x618] sm:$0xff] }
  0x4c   :  { %1452 = vmatprep.subr.bf16.mxu1 %v360_v56  ;;  %v332_v56 = vpack.c.bf16 %v202_v41, %v201_v40  ;;  %v364_v4 = vpack.c.bf16 %v266_v0, %v265_v63  ;;  %v1561_v8 = vld [vmem:[%s2481_s0 + $0x28] ss:$52 sps:$4 sm:$0xff]   ;;  %v1564_v9 = vld [vmem:[%s2481_s0 + $0x8c] ss:$52 sps:$4 sm:$0xff]   ;;  %v1574_v16 = vld [vmem:[%s2481_s0 + $0xf0] ss:$52 sps:$4 sm:$0xff]  }
  0x4d   :  { %816 = vmatmul.mubr.bf16.gmra.mxu0 %v1544_v58  ;;  %v232_v58 = vld [vmem:[%s2480_s1 + $0x508] sm:$0xff]  ;;  %v1572_v15 = vld [vmem:[%s2481_s0 + $0xfc] ss:$52 sps:$4 sm:$0xff]   ;;  %v2353_v28 = vld [vmem:[%s2482_s2] ss:$0 sm:$0xff] }
  0x4e   :  { %881 = vmatmul.mubr.bf16.gmra.mxu1 %v1545_v61  ;;  %1413 = vmatpush3.bf16.msra.mxu0 %v336_v62  ;;  %v1560_v61 = vld [vmem:[%s2481_s0 + $0x24] ss:$52 sps:$4 sm:$0xff]   ;;  %v355_v62 = vpack.c.bf16 %v248_v53, %v247_v52  ;;  %v347_v3 = vpack.c.bf16 %v232_v58, %v231_v57  ;;  %v1566_v10 = vld [vmem:[%s2481_s0 + $0x94] ss:$52 sps:$4 sm:$0xff]  }
  0x4f   :  { %1453 = vmatpush3.bf16.msra.mxu1 %v352_v1  ;;  %1414 = vmatprep.subr.bf16.mxu0 %v343_v2  ;;  %v1563_v1 = vld [vmem:[%s2481_s0 + $0x2c] ss:$52 sps:$4 sm:$0xff]   ;;  %v331_v2 = vpack.c.bf16 %v200_v55, %v199_v54  ;;  %v1568_v12 = vld [vmem:[%s2481_s0 + $0x88] ss:$52 sps:$4 sm:$0xff]   ;;  %v1582_v22 = vld [vmem:[%s2481_s0 + $0x30] ss:$52 sps:$4 sm:$0xff]  }
  0x50   :  { %1454 = vmatprep.subr.bf16.mxu1 %v359_v6  ;;  %823 = vmatprep.mubr.bf16.mxu0 %v1546_v5  ;;  %v1558_v5 = vld [vmem:[%s2481_s0 + $0x20] ss:$52 sps:$4 sm:$0xff]   ;;  %v1580_v20 = vld [vmem:[%s2481_s0 + $0x158] ss:$52 sps:$4 sm:$0xff]   ;;  %v1585_v25 = vld [vmem:[%s2481_s0 + $0x168] ss:$52 sps:$4 sm:$0xff]  }
  0x51   :  { %888 = vmatprep.mubr.bf16.mxu1 %v1548_v7  ;;  %v263_v6 = vld [vmem:[%s2480_s1 + $0x600] sm:$0xff]  ;;  %v264_v7 = vld [vmem:[%s2480_s1 + $0x608] sm:$0xff] }
  0x52   :  { %1415 = vmatpush3.bf16.msra.mxu0 %v335_v13  ;;  %v363_v11 = vpack.c.bf16 %v264_v7, %v263_v6  ;;  %v1569_v13 = vld [vmem:[%s2481_s0 + $0x90] ss:$52 sps:$4 sm:$0xff]   ;;  %v1570_v14 = vld [vmem:[%s2481_s0 + $0xf4] ss:$52 sps:$4 sm:$0xff]   ;;  %v1584_v24 = vld [vmem:[%s2481_s0 + $0x98] ss:$52 sps:$4 sm:$0xff]  }
  0x53   :  { %1455 = vmatpush3.bf16.msra.mxu1 %v351_v17  ;;  %1416 = vmatprep.subr.bf16.mxu0 %v342_v19  ;;  %v1575_v17 = vld [vmem:[%s2481_s0 + $0xf8] ss:$52 sps:$4 sm:$0xff]  }
  0x54   :  { %1456 = vmatprep.subr.bf16.mxu1 %v358_v21  ;;  %v1578_v19 = vld [vmem:[%s2481_s0 + $0x164] ss:$52 sps:$4 sm:$0xff]   ;;  %v1581_v21 = vld [vmem:[%s2481_s0 + $0x160] ss:$52 sps:$4 sm:$0xff]  }
  0x55   :  { %824 = vmatmul.mubr.bf16.gmra.mxu0 %v1550_v18  ;;  %v1576_v18 = vld [vmem:[%s2481_s0 + $0x15c] ss:$52 sps:$4 sm:$0xff]  }
  0x56   :  { %889 = vmatmul.mubr.bf16.gmra.mxu1 %v1551_v23  ;;  %1417 = vmatpush3.bf16.msra.mxu0 %v334_v26  ;;  %v1583_v23 = vld [vmem:[%s2481_s0 + $0x100] ss:$52 sps:$4 sm:$0xff]  }
  0x57   :  { %1457 = vmatpush3.bf16.msra.mxu1 %v350_v30  ;;  %1418 = vmatprep.subr.bf16.mxu0 %v341_v31 }
  0x58   :  { %1458 = vmatprep.subr.bf16.mxu1 %v357_v35  ;;  %831 = vmatprep.mubr.bf16.mxu0 %v1552_v33 }
  0x59   :  { %896 = vmatprep.mubr.bf16.mxu1 %v1554_v34 }
  0x5a   :  { %1419 = vmatpush3.bf16.msra.mxu0 %v333_v42 }
  0x5b   :  { %1459 = vmatpush3.bf16.msra.mxu1 %v349_v46  ;;  %1420 = vmatprep.subr.bf16.mxu0 %v340_v48 }
  0x5c   :  { %1460 = vmatprep.subr.bf16.mxu1 %v356_v51 }
  0x5d   :  { %832 = vmatmul.mubr.bf16.gmra.mxu0 %v1556_v47 }
  0x5e   :  { %897 = vmatmul.mubr.bf16.gmra.mxu1 %v1557_v50  ;;  %1421 = vmatpush3.bf16.msra.mxu0 %v332_v56 }
  0x5f   :  { %1461 = vmatpush3.bf16.msra.mxu1 %v348_v59  ;;  %1422 = vmatprep.subr.bf16.mxu0 %v339_v60 }
  0x60   :  { %1462 = vmatprep.subr.bf16.mxu1 %v355_v62  ;;  %937 = vmatprep.mubr.bf16.mxu0 %v1560_v61 }
  0x61   :  { %1002 = vmatprep.mubr.bf16.mxu1 %v1563_v1 }
  0x62   :  { %1423 = vmatpush3.bf16.msra.mxu0 %v331_v2 }
  0x63   :  { %1463 = vmatpush3.bf16.msra.mxu1 %v347_v3  ;;  %1494 = vmatprep.subr.bf16.mxu0 %v364_v4 }
  0x64   :  { %1506 = vmatprep.subr.bf16.mxu1 %v364_v4 }
  0x65   :  { %938 = vmatmul.mubr.bf16.vlgmr.msra.gmra.mxu0 %v1558_v5 }
  0x66   :  { %1003 = vmatmul.mubr.bf16.vlgmr.msra.gmra.mxu1 %v1561_v8  ;;  %1495 = vmatpush3.bf16.msra.mxu0 %v364_v4 }
  0x67   :  { %1508 = vmatpush3.bf16.msra.mxu1 %v364_v4  ;;  %945 = vmatprep.mubr.bf16.mxu0 %v1564_v9 }
  0x68   :  { %1010 = vmatprep.mubr.bf16.mxu1 %v1566_v10  ;;  %1496 = vmatprep.subr.bf16.mxu0 %v363_v11 }
  0x69   :  { %1507 = vmatprep.subr.bf16.mxu1 %v363_v11 }
  0x6a   :  { %1497 = vmatpush3.bf16.msra.mxu0 %v363_v11 }
  0x6b   :  { %1509 = vmatpush3.bf16.msra.mxu1 %v363_v11 }
  0x6d   :  { %946 = vmatmul.mubr.bf16.gmra.mxu0 %v1568_v12 }
  0x6e   :  { %1011 = vmatmul.mubr.bf16.gmra.mxu1 %v1569_v13  ;;  %953 = vmatprep.mubr.bf16.mxu0 %v1570_v14 }
  0x6f   :  { %1018 = vmatprep.mubr.bf16.mxu1 %v1572_v15 }
  0x75   :  { %954 = vmatmul.mubr.bf16.gmra.mxu0 %v1574_v16 }
  0x76   :  { %1019 = vmatmul.mubr.bf16.gmra.mxu1 %v1575_v17  ;;  %961 = vmatprep.mubr.bf16.mxu0 %v1576_v18 }
  0x77   :  { %1026 = vmatprep.mubr.bf16.mxu1 %v1578_v19 }
  0x7d   :  { %962 = vmatmul.mubr.bf16.gmra.mxu0 %v1580_v20 }
  0x7e   :  { %1027 = vmatmul.mubr.bf16.gmra.mxu1 %v1581_v21  ;;  %1498 = vmatprep.mubr.msk.bf16.mxu0 %vm632_vm0, %v1582_v22 }
  0x7f   :  { %1502 = vmatprep.mubr.msk.bf16.mxu1 %vm632_vm0, %v1583_v23 }
  0x85   :  { %1499 = vmatmul.mubr.msk.bf16.vlgmr.msra.gmra.mxu0 %vm632_vm0, %v1584_v24 }
  0x86   :  { %1503 = vmatmul.mubr.msk.bf16.vlgmr.msra.gmra.mxu1 %vm632_vm0, %v1585_v25 }
  0xe5   :  { %v1264_v26 = vpop.f32.mrf.mxu0 }
  0xe6   :  { %v1304_v27 = vpop.f32.mrf.mxu1 }
  0xe7   :  { %v1265_v29 = vpop.f32.mrf.mxu0 }
  0xe8   :  { %v1266_v30 = vadd.f32 %v1265_v29, %v1264_v26  ;;  %v1305_v31 = vpop.f32.mrf.mxu1 }
  0xe9   :  { %v1306_v32 = vadd.f32 %v1305_v31, %v1304_v27  ;;  %v1267_v33 = vpop.f32.mrf.mxu0 }
  0xea   :  { %v680_v34 = vadd.f32 %v1266_v30, %v2353_v28  ;;  %v1307_v35 = vpop.f32.mrf.mxu1 }
  0xeb   :  { %v1268_v36 = vpop.f32.mrf.mxu0 }
  0xec   :  { %v2356_v37 = vadd.f32 %v1306_v32, %v680_v34  ;;  %v1269_v38 = vadd.f32 %v1268_v36, %v1267_v33  ;;  %v1308_v39 = vpop.f32.mrf.mxu1 }
  0xed   :  { %v1309_v40 = vadd.f32 %v1308_v39, %v1307_v35  ;;  %v1270_v41 = vpop.f32.mrf.mxu0 }
  0xee   :  { %v683_v42 = vadd.f32 %v1269_v38, %v2353_v28  ;;  %v1310_v43 = vpop.f32.mrf.mxu1 }
  0xef   :  { %v1271_v44 = vpop.f32.mrf.mxu0 }
  0xf0   :  { %v2359_v45 = vadd.f32 %v1309_v40, %v683_v42  ;;  %v1272_v46 = vadd.f32 %v1271_v44, %v1270_v41  ;;  %v1311_v47 = vpop.f32.mrf.mxu1 }
  0xf1   :  { %v1312_v48 = vadd.f32 %v1311_v47, %v1310_v43  ;;  %v1273_v49 = vpop.f32.mrf.mxu0 }
  0xf2   :  { %v688_v50 = vadd.f32 %v1272_v46, %v2353_v28  ;;  %v1313_v51 = vpop.f32.mrf.mxu1 }
  0xf3   :  { %v1274_v52 = vpop.f32.mrf.mxu0 }
  0xf4   :  { %v2362_v53 = vadd.f32 %v1312_v48, %v688_v50  ;;  %v1275_v54 = vadd.f32 %v1274_v52, %v1273_v49  ;;  %v1314_v55 = vpop.f32.mrf.mxu1 }
  0xf5   :  { %v1315_v56 = vadd.f32 %v1314_v55, %v1313_v51  ;;  %v1276_v57 = vpop.f32.mrf.mxu0 }
  0xf6   :  { %v691_v58 = vadd.f32 %v1275_v54, %v2353_v28  ;;  %v1316_v59 = vpop.f32.mrf.mxu1 }
  0xf7   :  { %v1277_v60 = vpop.f32.mrf.mxu0 }
  0xf8   :  { %v2365_v61 = vadd.f32 %v1315_v56, %v691_v58  ;;  %v1278_v62 = vadd.f32 %v1277_v60, %v1276_v57  ;;  %v1317_v63 = vpop.f32.mrf.mxu1 }
  0xf9   :  { %v1318_v0 = vadd.f32 %v1317_v63, %v1316_v59  ;;  %v1279_v1 = vpop.f32.mrf.mxu0 }
  0xfa   :  { %v696_v2 = vadd.f32 %v1278_v62, %v2353_v28  ;;  %v1319_v3 = vpop.f32.mrf.mxu1 }
  0xfb   :  { %v1280_v4 = vpop.f32.mrf.mxu0 }
  0xfc   :  { %v2368_v5 = vadd.f32 %v1318_v0, %v696_v2  ;;  %v1281_v6 = vadd.f32 %v1280_v4, %v1279_v1  ;;  %v1320_v7 = vpop.f32.mrf.mxu1 }
  0xfd   :  { %v1321_v8 = vadd.f32 %v1320_v7, %v1319_v3  ;;  %v1282_v9 = vpop.f32.mrf.mxu0 }
  0xfe   :  { %v699_v10 = vadd.f32 %v1281_v6, %v2353_v28  ;;  %v2371_v11 = vpop.f32.mrf.mxu1 }
  0xff   :  { %v1283_v12 = vpop.f32.mrf.mxu0 }
 0x100   :  { %v2373_v13 = vadd.f32 %v1321_v8, %v699_v10  ;;  %v1323_v14 = vpop.f32.mrf.mxu1  ;;  %v1284_v6 = vadd.f32 %v1283_v12, %v1282_v9 }
 0x101   :  { %v1285_v15 = vpop.f32.mrf.mxu0 }
 0x102   :  { %v2375_v16 = vpop.f32.mrf.mxu1 }
 0x103   :  { %v1286_v17 = vpop.f32.mrf.mxu0 }
 0x104   :  { %v2377_v18 = vpop.f32.mrf.mxu1 }
 0x105   :  { %v1344_v19 = vpop.f32.mrf.mxu0 }
 0x106   :  { %v2379_v20 = vpop.f32.mrf.mxu1 }
 0x107   :  { %v1345_v21 = vpop.f32.mrf.mxu0 }
 0x108   :  { %v2381_v22 = vpop.f32.mrf.mxu1 }
 0x109   :  { %v1347_v23 = vpop.f32.mrf.mxu0 }
 0x10a   :  { %v2383_v24 = vpop.f32.mrf.mxu1 }
 0x10b   :  { %v1348_v25 = vpop.f32.mrf.mxu0 }
 0x10c   :  { %v2385_v26 = vpop.f32.mrf.mxu1 }
 0x10d   :  { %v1350_v27 = vpop.f32.mrf.mxu0 }
 0x10e   :  { %v2387_v29 = vpop.f32.mrf.mxu1 }
 0x10f   :  { %v1351_v30 = vpop.f32.mrf.mxu0 }
 0x110   :  { %v2389_v31 = vpop.f32.mrf.mxu1 }
 0x111   :  { %v1353_v32 = vpop.f32.mrf.mxu0 }
 0x112   :  { %v2391_v33 = vpop.f32.mrf.mxu1 }
 0x113   :  { %v1354_v34 = vpop.f32.mrf.mxu0 }
 0x114   :  { %v2393_v35 = vpop.f32.mrf.mxu1 }
 0x115   :  { %v1356_v36 = vpop.f32.mrf.mxu0 }
 0x116   :  { %v2395_v38 = vpop.f32.mrf.mxu1 }
 0x117   :  { %v1357_v39 = vpop.f32.mrf.mxu0 }
 0x118   :  { %v2397_v40 = vpop.f32.mrf.mxu1 }
 0x119   :  { %v1359_v41 = vpop.f32.mrf.mxu0 }
 0x11a   :  { %v2399_v42 = vpop.f32.mrf.mxu1 }
 0x11b   :  { %2484 = vst [vmem:[#allocation2_spill] sm:$0xff] %v2399_v42  ;;  %v1360_v43 = vpop.f32.mrf.mxu0 }
 0x11c   :  { %v2401_v44 = vpop.f32.mrf.mxu1 }
 0x11d   :  { %2485 = vst [vmem:[#allocation3_spill] sm:$0xff] %v2401_v44  ;;  %v1362_v46 = vpop.f32.mrf.mxu0  ;;  %v1324_v44 = vadd.f32 %v1323_v14, %v2371_v11  ;;  %v1327_v11 = vadd.f32 %v2377_v18, %v2375_v16  ;;  %v1386_v14 = vadd.f32 %v2381_v22, %v2379_v20 }
 0x11e   :  { %v1402_v47 = vpop.f32.mrf.mxu1 }
 0x11f   :  { %v1363_v48 = vpop.f32.mrf.mxu0 }
 0x120   :  { %v1403_v49 = vpop.f32.mrf.mxu1 }
 0x121   :  { %v1365_v50 = vpop.f32.mrf.mxu0  ;;  %v1404_v22 = vadd.f32 %v1403_v49, %v1402_v47 }
 0x122   :  { %v2403_v51 = vpop.f32.mrf.mxu1 }
 0x123   :  { %2486 = vst [vmem:[#allocation4_spill] sm:$0xff] %v2403_v51  ;;  %v1366_v52 = vpop.f32.mrf.mxu0  ;;  %v704_v51 = vadd.f32 %v1284_v6, %v2353_v28 }
 0x124   :  { %v2405_v54 = vpop.f32.mrf.mxu1  ;;  %v2496_v47 = vld [vmem:[#allocation3_spill] sm:$0xff] }
 0x125   :  { %2487 = vst [vmem:[#allocation5_spill] sm:$0xff] %v2405_v54  ;;  %v1424_v55 = vpop.f32.mrf.mxu0  ;;  %v1349_v54 = vadd.f32 %v1348_v25, %v1347_v23  ;;  %v1358_v25 = vadd.f32 %v1357_v39, %v1356_v36 }
 0x126   :  { %v2407_v56 = vpop.f32.mrf.mxu1 }
 0x127   :  { %2488 = vst [vmem:[#allocation6_spill] sm:$0xff] %v2407_v56  ;;  %v1425_v57 = vpop.f32.mrf.mxu0  ;;  %v1346_v56 = vadd.f32 %v1345_v21, %v1344_v19  ;;  %v769_v21 = vadd.f32 %v1324_v44, %v704_v51  ;;  %v826_v20 = vadd.f32 %v1358_v25, %v2368_v5  ;;  %v2495_v5 = vld [vmem:[#allocation2_spill] sm:$0xff] }
 0x128   :  { %v2409_v58 = vpop.f32.mrf.mxu1  ;;  %v1401_v49 = vadd.f32 %v2496_v47, %v2495_v5 }
 0x129   :  { %2489 = vst [vmem:[#allocation7_spill] sm:$0xff] %v2409_v58  ;;  %v2411_v59 = vpop.f32.mrf.mxu0  ;;  %v1287_v58 = vadd.f32 %v1286_v17, %v1285_v15  ;;  %v810_v12 = vadd.f32 %v1346_v56, %v2356_v37  ;;  %v813_v15 = vadd.f32 %v1349_v54, %v2359_v45  ;;  %v1355_v17 = vadd.f32 %v1354_v34, %v1353_v32 }
 0x12a   :  { %2490 = vst [vmem:[#allocation8_spill] sm:$0xff] %v2411_v59  ;;  %v2413_v60 = vpop.f32.mrf.mxu1  ;;  %v1361_v37 = vadd.f32 %v1360_v43, %v1359_v41  ;;  %v1392_v45 = vadd.f32 %v2389_v31, %v2387_v29  ;;  %v1367_v34 = vadd.f32 %v1366_v52, %v1365_v50  ;;  %v1398_v29 = vadd.f32 %v2397_v40, %v2395_v38 }
 0x12b   :  { %2491 = vst [vmem:[#allocation9_spill] sm:$0xff] %v2413_v60  ;;  %v1428_v62 = vpop.f32.mrf.mxu0  ;;  %v707_v9 = vadd.f32 %v1287_v58, %v2353_v28  ;;  %v1389_v28 = vadd.f32 %v2385_v26, %v2383_v24  ;;  %v875_v39 = vadd.f32 %v1386_v14, %v810_v12  ;;  %v1395_v26 = vadd.f32 %v2393_v35, %v2391_v33 }
 0x12c   :  { %v2415_v63 = vpop.f32.mrf.mxu1  ;;  %v829_v31 = vadd.f32 %v1361_v37, %v2373_v13  ;;  %v1426_v41 = vadd.f32 %v1425_v57, %v1424_v55  ;;  %v891_v35 = vadd.f32 %v1398_v29, %v826_v20  ;;  %v2499_v38 = vld [vmem:[#allocation5_spill] sm:$0xff] }
 0x12d   :  { %2492 = vst [vmem:[#allocation10_spill] sm:$0xff] %v2415_v63  ;;  %v1430_v0 = vpop.f32.mrf.mxu0  ;;  %v1352_v63 = vadd.f32 %v1351_v30, %v1350_v27  ;;  %v772_v36 = vadd.f32 %v1327_v11, %v707_v9  ;;  %v878_v44 = vadd.f32 %v1389_v28, %v813_v15 }
 0x12e   :  { %v2417_v1 = vpop.f32.mrf.mxu1  ;;  %v940_v6 = vadd.f32 %v1426_v41, %v875_v39 }
 0x12f   :  { %2493 = vst [vmem:[#allocation11_spill] sm:$0xff] %v2417_v1  ;;  %v1431_v2 = vpop.f32.mrf.mxu0  ;;  %v818_v23 = vadd.f32 %v1352_v63, %v2362_v53  ;;  %v837_v51 = vadd.f32 %v1367_v34, %v772_v36 }
 0x130   :  { %v2419_v3 = vpop.f32.mrf.mxu1  ;;  %v2503_v25 = vld [vmem:[#allocation7_spill] sm:$0xff] }
 0x131   :  { %2494 = vst [vmem:[#allocation12_spill] sm:$0xff] %v2419_v3  ;;  %v1433_v4 = vpop.f32.mrf.mxu0  ;;  %v1364_v3 = vadd.f32 %v1363_v48, %v1362_v46  ;;  %v821_v46 = vadd.f32 %v1355_v17, %v2365_v61  ;;  %v883_v18 = vadd.f32 %v1392_v45, %v818_v23  ;;  %v1432_v48 = vadd.f32 %v1431_v2, %v1430_v0  ;;  %v2497_v58 = vld [vmem:[#allocation8_spill] sm:$0xff] }
 0x132   :  { %v2421_v7 = vpop.f32.mrf.mxu1  ;;  %v1429_v63 = vadd.f32 %v1428_v62, %v2497_v58  ;;  %v2498_v2 = vld [vmem:[#allocation4_spill] sm:$0xff]  ;;  %v2504_v20 = vld [vmem:[#allocation9_spill] sm:$0xff] }
 0x133   :  { %v1434_v8 = vpop.f32.mrf.mxu0  ;;  %v834_v32 = vadd.f32 %v1364_v3, %v769_v21  ;;  %v886_v56 = vadd.f32 %v1395_v26, %v821_v46  ;;  %v1407_v40 = vadd.f32 %v2499_v38, %v2498_v2  ;;  %v948_v13 = vadd.f32 %v1432_v48, %v883_v18 }
 0x134   :  { %v2423_v10 = vpop.f32.mrf.mxu1  ;;  %v1435_v61 = vadd.f32 %v1434_v8, %v1433_v4  ;;  %v894_v3 = vadd.f32 %v1401_v49, %v829_v31  ;;  %v943_v14 = vadd.f32 %v1429_v63, %v878_v44 }
 0x135   :  { %v1436_v60 = vpop.f32.mrf.mxu0  ;;  %v899_v50 = vadd.f32 %v1404_v22, %v834_v32  ;;  %v902_v12 = vadd.f32 %v1407_v40, %v837_v51  ;;  %v1475_v32 = vadd.f32 %v2423_v10, %v2421_v7  ;;  %v2505_v22 = vld [vmem:[#allocation10_spill] sm:$0xff] }
 0x136   :  { %v2426_v59 = vpop.f32.mrf.mxu1  ;;  %v2500_v15 = vld [vmem:[#allocation11_spill] sm:$0xff]  ;;  %v951_v23 = vadd.f32 %v1435_v61, %v886_v56  ;;  %v1469_v48 = vadd.f32 %v2505_v22, %v2504_v20 }
 0x137   :  { %v1437_v1 = vpop.f32.mrf.mxu0 }
 0x138   :  { %v2429_v42 = vpop.f32.mrf.mxu1  ;;  %v1438_v0 = vadd.f32 %v1437_v1, %v1436_v60  ;;  %v2501_v17 = vld [vmem:[#allocation12_spill] sm:$0xff]  ;;  %v2502_v1 = vld [vmem:[#allocation6_spill] sm:$0xff]  ;;  %v1016_v26 = vadd.f32 %v1475_v32, %v951_v23  ;;  %v1008_v61 = vadd.f32 %v1469_v48, %v943_v14 }
 0x139   :  { %v1439_v19 = vpop.f32.mrf.mxu0  ;;  %v1472_v21 = vadd.f32 %v2501_v17, %v2500_v15  ;;  %v1466_v11 = vadd.f32 %v2503_v25, %v2502_v1  ;;  %v1478_v39 = vadd.f32 %v2429_v42, %v2426_v59 }
 0x13a   :  { %v2435_v27 = vpop.f32.mrf.mxu1  ;;  %v956_v28 = vadd.f32 %v1438_v0, %v891_v35 }
 0x13b   :  { %v1440_v30 = vpop.f32.mrf.mxu0  ;;  %v1013_v34 = vadd.f32 %v1472_v21, %v948_v13 }
 0x13c   :  { %v1480_v53 = vpop.f32.mrf.mxu1  ;;  %v1441_v4 = vadd.f32 %v1440_v30, %v1439_v19  ;;  %v1021_v10 = vadd.f32 %v1478_v39, %v956_v28 }
 0x13d   :  { %v1442_v16 = vpop.f32.mrf.mxu0  ;;  %v1481_v31 = vadd.f32 %v1480_v53, %v2435_v27 }
 0x13e   :  { %v1482_v24 = vpop.f32.mrf.mxu1  ;;  %v959_v46 = vadd.f32 %v1441_v4, %v894_v3 }
 0x13f   :  { %v1443_v43 = vpop.f32.mrf.mxu0 }
 0x140   :  { %v1444_v52 = vadd.f32 %v1443_v43, %v1442_v16  ;;  %v1483_v54 = vpop.f32.mrf.mxu1  ;;  %v1005_v16 = vadd.f32 %v1466_v11, %v940_v6 }
 0x141   :  { %v1445_v33 = vpop.f32.mrf.mxu0  ;;  %v1484_v8 = vadd.f32 %v1483_v54, %v1482_v24  ;;  %v1024_v54 = vadd.f32 %v1481_v31, %v959_v46 }
 0x142   :  { %v964_v55 = vadd.f32 %v1444_v52, %v899_v50  ;;  %v1485_v57 = vpop.f32.mrf.mxu1 }
 0x143   :  { %v1446_v9 = vpop.f32.mrf.mxu0 }
 0x144   :  { %v1447_v62 = vadd.f32 %v1446_v9, %v1445_v33  ;;  %v1486_v60 = vpop.f32.mrf.mxu1  ;;  %v1029_v45 = vadd.f32 %v1484_v8, %v964_v55 }
 0x145   :  { %v1500_v37 = vpop.f32.mrf.mxu0  ;;  %v1487_v30 = vadd.f32 %v1486_v60, %v1485_v57 }
 0x146   :  { %v967_v19 = vadd.f32 %v1447_v62, %v902_v12  ;;  %v1504_v36 = vpop.f32.mrf.mxu1  ;;  %v1078_v44 = vadd.f32 %v1500_v37, %v1013_v34 }
 0x147   :  { %v1069_v18 = vpop.f32.mrf.mxu0  ;;  %v1094_v7 = vadd.f32 %v1504_v36, %v1029_v45 }
 0x148   :  { %v1085_v24 = vpop.f32.mrf.mxu1  ;;  %v1032_v29 = vadd.f32 %v1487_v30, %v967_v19  ;;  %v1070_v43 = vadd.f32 %v1069_v18, %v1005_v16  ;;  %v1102_v56 = vmax.f32 %v1078_v44, 0.0 }
 0x149   :  { %v1501_v41 = vpop.f32.mrf.mxu0  ;;  %v1086_v42 = vadd.f32 %v1085_v24, %v1021_v10  ;;  %v1106_v58 = vmax.f32 %v1094_v7, 0.0 }
 0x14a   :  { %v1081_v50 = vadd.f32 %v1501_v41, %v1016_v26  ;;  %v1505_v51 = vpop.f32.mrf.mxu1  ;;  %v1100_v33 = vmax.f32 %v1070_v43, 0.0 }
 0x14b   :  { %v1097_v59 = vadd.f32 %v1505_v51, %v1032_v29  ;;  %v1072_v52 = vpop.f32.mrf.mxu0  ;;  %v1104_v35 = vmax.f32 %v1086_v42, 0.0 }
 0x14c   :  { %v1103_v5 = vmax.f32 %v1081_v50, 0.0  ;;  %v1073_v47 = vadd.f32 %v1072_v52, %v1008_v61  ;;  %v1088_v49 = vpop.f32.mrf.mxu1 }
 0x14d   :  { %v1107_v63 = vmax.f32 %v1097_v59, 0.0  ;;  %v1089_v0 = vadd.f32 %v1088_v49, %v1024_v54 }
 0x14e   :  { %v1233_v27 = vpack.c.bf16 %v1103_v5, %v1102_v56  ;;  %v1101_v53 = vmax.f32 %v1073_v47, 0.0 }
 0x14f   :  { %v1243_v2 = vpack.c.bf16 %v1107_v63, %v1106_v58  ;;  %v1105_v38 = vmax.f32 %v1089_v0, 0.0 }
 0x150   :  { %1245 = vst [vmem:[%s2483_s3 + $0x8] sm:$0xff] %v1233_v27   ;;  %v1228_v40 = vpack.c.bf16 %v1101_v53, %v1100_v33 }
 0x151   :  { %1247 = vst [vmem:[%s2483_s3 + $0x18] sm:$0xff] %v1243_v2   ;;  %v1238_v13 = vpack.c.bf16 %v1105_v38, %v1104_v35 }
 0x152   :  { %1229 = vst [vmem:[%s2483_s3] sm:$0xff] %v1228_v40  }
 0x153   :  { %1246 = vst [vmem:[%s2483_s3 + $0x10] sm:$0xff] %v1238_v13  }

// kernel: forward.20
= control target key start
LH: loop header
LB: loop body
LE: loop exit
PB: predicated region body
PF: predicated region fallthrough
CT: control target
= control target key end

     0   :  { %vm143_vm0 = vcmask 121856   ;;  %s332_s1 = inlined_call_operand.vmem [shape: f32[128,15], index: 1, kind: input, shape index: {}]   ;;  %s333_s0 = inlined_call_operand.vmem [shape: bf16[64,128], index: 0, kind: input, shape index: {}]   ;;  %s334_s2 = inlined_call_operand.vmem [shape: f32[1,15], index: 2, kind: input, shape index: {}]   ;;  %s335_s3 = inlined_call_operand.vmem [shape: f32[64,15], index: 3, kind: output, shape index: {}]  }
   0x1   :  { %v37_v0 = vld [vmem:[%s332_s1 + $0x70] sm:$0xff]  ;;  %v38_v1 = vld [vmem:[%s332_s1 + $0x78] sm:$0xff]  ;;  %v35_v2 = vld [vmem:[%s332_s1 + $0x60] sm:$0xff] }
   0x2   :  { %v46_v3 = vpack.c.bf16 %v38_v1, %v37_v0  ;;  %v36_v4 = vld [vmem:[%s332_s1 + $0x68] sm:$0xff]  ;;  %v33_v6 = vld [vmem:[%s332_s1 + $0x50] sm:$0xff]  ;;  %v34_v7 = vld [vmem:[%s332_s1 + $0x58] sm:$0xff] }
   0x3   :  { %v45_v5 = vpack.c.bf16 %v36_v4, %v35_v2  ;;  %v31_v8 = vld [vmem:[%s332_s1 + $0x40] sm:$0xff]  ;;  %v44_v9 = vpack.c.bf16 %v34_v7, %v33_v6  ;;  %v32_v10 = vld [vmem:[%s332_s1 + $0x48] sm:$0xff]  ;;  %v214_v12 = vld [vmem:[%s333_s0 + $0x10] sm:$0xff]  }
   0x4   :  { %173 = vmatprep.subr.bf16.mxu0 %v46_v3  ;;  %197 = vmatprep.subr.bf16.mxu1 %v46_v3  ;;  %v213_v11 = vld [vmem:[%s333_s0] sm:$0xff]   ;;  %v43_v13 = vpack.c.bf16 %v32_v10, %v31_v8  ;;  %v29_v14 = vld [vmem:[%s332_s1 + $0x30] sm:$0xff]  ;;  %v30_v15 = vld [vmem:[%s332_s1 + $0x38] sm:$0xff] }
   0x5   :  { %174 = vmatpush3.bf16.msra.mxu0 %v46_v3  ;;  %205 = vmatpush3.bf16.msra.mxu1 %v46_v3  ;;  %v42_v16 = vpack.c.bf16 %v30_v15, %v29_v14  ;;  %v27_v17 = vld [vmem:[%s332_s1 + $0x20] sm:$0xff]  ;;  %v28_v18 = vld [vmem:[%s332_s1 + $0x28] sm:$0xff]  ;;  %v25_v20 = vld [vmem:[%s332_s1 + $0x10] sm:$0xff] }
   0x6   :  { %175 = vmatprep.subr.bf16.mxu0 %v45_v5  ;;  %198 = vmatprep.subr.bf16.mxu1 %v45_v5  ;;  %v41_v19 = vpack.c.bf16 %v28_v18, %v27_v17  ;;  %v26_v21 = vld [vmem:[%s332_s1 + $0x18] sm:$0xff]  ;;  %v23_v23 = vld [vmem:[%s332_s1] sm:$0xff]  ;;  %v24_v24 = vld [vmem:[%s332_s1 + $0x8] sm:$0xff] }
   0x7   :  { %189 = vmatprep.mubr.bf16.mxu0 %v213_v11  ;;  %193 = vmatprep.mubr.bf16.mxu1 %v214_v12  ;;  %v40_v22 = vpack.c.bf16 %v26_v21, %v25_v20  ;;  %v39_v25 = vpack.c.bf16 %v24_v24, %v23_v23  ;;  %v215_v26 = vld [vmem:[%s333_s0 + $0x8] sm:$0xff]   ;;  %v216_v27 = vld [vmem:[%s333_s0 + $0x18] sm:$0xff]   ;;  %v156_v28 = vld [vmem:[%s334_s2] ss:$0 sm:$0xff] }
   0x9   :  { %176 = vmatpush3.bf16.msra.mxu0 %v45_v5  ;;  %206 = vmatpush3.bf16.msra.mxu1 %v45_v5 }
   0xa   :  { %177 = vmatprep.subr.bf16.mxu0 %v44_v9  ;;  %199 = vmatprep.subr.bf16.mxu1 %v44_v9 }
   0xd   :  { %178 = vmatpush3.bf16.msra.mxu0 %v44_v9  ;;  %207 = vmatpush3.bf16.msra.mxu1 %v44_v9 }
   0xe   :  { %179 = vmatprep.subr.bf16.mxu0 %v43_v13  ;;  %200 = vmatprep.subr.bf16.mxu1 %v43_v13 }
  0x11   :  { %180 = vmatpush3.bf16.msra.mxu0 %v43_v13  ;;  %208 = vmatpush3.bf16.msra.mxu1 %v43_v13 }
  0x12   :  { %181 = vmatprep.subr.bf16.mxu0 %v42_v16  ;;  %201 = vmatprep.subr.bf16.mxu1 %v42_v16 }
  0x15   :  { %182 = vmatpush3.bf16.msra.mxu0 %v42_v16  ;;  %209 = vmatpush3.bf16.msra.mxu1 %v42_v16 }
  0x16   :  { %183 = vmatprep.subr.bf16.mxu0 %v41_v19  ;;  %202 = vmatprep.subr.bf16.mxu1 %v41_v19 }
  0x19   :  { %184 = vmatpush3.bf16.msra.mxu0 %v41_v19  ;;  %210 = vmatpush3.bf16.msra.mxu1 %v41_v19 }
  0x1a   :  { %185 = vmatprep.subr.bf16.mxu0 %v40_v22  ;;  %203 = vmatprep.subr.bf16.mxu1 %v40_v22 }
  0x1d   :  { %186 = vmatpush3.bf16.msra.mxu0 %v40_v22  ;;  %211 = vmatpush3.bf16.msra.mxu1 %v40_v22 }
  0x1e   :  { %187 = vmatprep.subr.bf16.mxu0 %v39_v25  ;;  %204 = vmatprep.subr.bf16.mxu1 %v39_v25 }
  0x21   :  { %188 = vmatpush3.bf16.msra.mxu0 %v39_v25  ;;  %212 = vmatpush3.bf16.msra.mxu1 %v39_v25 }
  0x24   :  { %190 = vmatmul.mubr.bf16.vlgmr.msra.gmra.mxu0 %v215_v26  ;;  %194 = vmatmul.mubr.bf16.vlgmr.msra.gmra.mxu1 %v216_v27 }
  0xe4   :  { %v191_v29 = vpop.f32.mrf.mxu0  ;;  %v195_v30 = vpop.f32.mrf.mxu1 }
  0xe5   :  { %v121_v31 = vadd.f32 %v191_v29, %v156_v28  ;;  %v137_v32 = vadd.f32 %v195_v30, %v156_v28 }
  0xe6   :  { %v112_v33 = vpop.f32.mrf.mxu0  ;;  %v128_v34 = vpop.f32.mrf.mxu1 }
  0xe7   :  { %146 = vst.msk [vmem:[%s335_s3 + $0x10] sm:$0xff] %vm143_vm0, %v121_v31  ;;  %150 = vst.msk [vmem:[%s335_s3 + $0x30] sm:$0xff] %vm143_vm0, %v137_v32  ;;  %v113_v35 = vadd.f32 %v156_v28, %v112_v33  ;;  %v129_v36 = vadd.f32 %v156_v28, %v128_v34 }
  0xe8   :  { %v192_v37 = vpop.f32.mrf.mxu0  ;;  %v196_v38 = vpop.f32.mrf.mxu1 }
  0xe9   :  { %144 = vst.msk [vmem:[%s335_s3] sm:$0xff] %vm143_vm0, %v113_v35  ;;  %148 = vst.msk [vmem:[%s335_s3 + $0x20] sm:$0xff] %vm143_vm0, %v129_v36  ;;  %v124_v39 = vadd.f32 %v192_v37, %v156_v28  ;;  %v140_v40 = vadd.f32 %v196_v38, %v156_v28 }
  0xea   :  { %v115_v41 = vpop.f32.mrf.mxu0  ;;  %v131_v42 = vpop.f32.mrf.mxu1 }
  0xeb   :  { %147 = vst.msk [vmem:[%s335_s3 + $0x18] sm:$0xff] %vm143_vm0, %v124_v39  ;;  %151 = vst.msk [vmem:[%s335_s3 + $0x38] sm:$0xff] %vm143_vm0, %v140_v40  ;;  %v116_v43 = vadd.f32 %v156_v28, %v115_v41  ;;  %v132_v44 = vadd.f32 %v156_v28, %v131_v42 }
  0xed   :  { %145 = vst.msk [vmem:[%s335_s3 + $0x8] sm:$0xff] %vm143_vm0, %v116_v43  ;;  %149 = vst.msk [vmem:[%s335_s3 + $0x28] sm:$0xff] %vm143_vm0, %v132_v44 }

// kernel: forward.21
= control target key start
LH: loop header
LB: loop body
LE: loop exit
PB: predicated region body
PF: predicated region fallthrough
CT: control target
= control target key end

     0   :  { %v29_v0 = vlaneseq  ;;  %v180_v34 = vmov 1.0   ;;  %vm131_vm1 = vcmask 1040384   ;;  %vm133_vm2 = vcmask 1041408   ;;  %s258_s0 = inlined_call_operand.vmem [shape: f32[3,128], index: 0, kind: input, shape index: {}]   ;;  %s259_s1 = inlined_call_operand.vmem [shape: f32[12,128], index: 1, kind: input, shape index: {}]   ;;  %s260_s2 = inlined_call_operand.vmem [shape: f32[4,128], index: 2, kind: input, shape index: {}]   ;;  %s261_s6 = inlined_call_operand.vmem [shape: f32[1,128], index: 6, kind: output, shape index: {3}]   ;;  %s262_s5 = inlined_call_operand.vmem [shape: s32[1,128], index: 5, kind: output, shape index: {2}]   ;;  %s263_s3 = inlined_call_operand.vmem [shape: f32[4,128], index: 3, kind: output, shape index: {0}]   ;;  %s264_s4 = inlined_call_operand.vmem [shape: f32[2,128], index: 4, kind: output, shape index: {1}]  }
   0x1   :  { %v18_v1 = vld [vmem:[%s258_s0] sm:$0x7]  ;;  %v20_v18 = vld [vmem:[%s259_s1 + $0x8] sm:$0xf]  ;;  %vm135_vm3 = vcmask 1042432  }
   0x2   :  { %v23_v2 = vrot.slane %v18_v1, 1  ;;  %v26_v3 = vrot.slane %v18_v1, 2  ;;  %v30_v4 = vshrl.u32 %v29_v0, 7  ;;  %v19_v17 = vld [vmem:[%s259_s1] sm:$0xff]  ;;  %v70_v23 = vrot.slane %v20_v18, 1 }
   0x3   :  { %v21_v20 = vld [vmem:[%s260_s2] sm:$0xf]  ;;  %v67_v22 = vrot.slane %v19_v17, 4  ;;  %v72_v24 = vrot.slane %v19_v17, 5  ;;  %v56_v42 = vrot.slane %v20_v18, 6  ;;  %v59_v43 = vrot.slane %v19_v17, 2 }
   0x4   :  { %v25_v5 = vmax.f32 %v18_v1, %v23_v2  ;;  %v31_v6 = vsub.s32 0, %v30_v4  ;;  %v76_v26 = vrot.slane %v21_v20, 6  ;;  %v62_v45 = vrot.slane %v20_v18, 7 }
   0x5   :  { %v64_v46 = vrot.slane %v19_v17, 3 }
   0x6   :  { %v28_v7 = vmax.f32 %v25_v5, %v26_v3  ;;  %v78_v30 = vsub.f32 %v21_v20, %v76_v26 }
   0x8   :  { %v32_v8 = vrot.slane %v28_v7, %v31_v6  ;;  %v79_v39 = vmul.f32 0.5, %v78_v30  ;;  %v92_v53 = vrot.slane %v78_v30, 1 }
   0xa   :  { %v33_v9 = vsub.f32 %v18_v1, %v32_v8  ;;  %v81_v47 = vrot.slane %v79_v39, 2 }
   0xc   :  { %v34_v10 = vmul.f32 1.442695, %v33_v9  ;;  %v83_v50 = vadd.f32 %v81_v47, %v21_v20 }
   0xe   :  { %172 = vpow2.f32 %v34_v10  ;;  %v87_v55 = vrot.slane %v83_v50, 6  ;;  %v95_v57 = vrot.slane %v83_v50, 7 }
  0x1b   :  { %v173_v11 = vpop.eup %172 }
  0x1c   :  { %v37_v12 = vrot.slane %v173_v11, 1  ;;  %v40_v13 = vrot.slane %v173_v11, 2 }
  0x1e   :  { %v39_v14 = vadd.f32 %v173_v11, %v37_v12 }
  0x20   :  { %v42_v15 = vadd.f32 %v40_v13, %v39_v14 }
  0x22   :  { %v46_v16 = vrot.slane %v42_v15, %v31_v6 }
  0x24   :  { %174 = vrcp.f32 %v46_v16 }
  0x31   :  { %v175_v19 = vpop.eup %174 }
  0x32   :  { %v48_v21 = vmul.f32 %v175_v19, %v173_v11 }
  0x34   :  { %v50_v25 = vrot.slane %v48_v21, 7 }
  0x36   :  { %vm228_vm0 = vcmp.gt.f32.partialorder %v48_v21, %v50_v25 }
  0x37   :  { %v69_v28 = vsel %vm228_vm0, %v20_v18, %v67_v22  ;;  %v74_v29 = vsel %vm228_vm0, %v70_v23, %v72_v24  ;;  %v53_v32 = vsel %vm228_vm0, %v48_v21, %v50_v25  ;;  %v54_v35 = vsel %vm228_vm0, 2.0, %v180_v34 }
  0x38   :  { %v98_v31 = vmul.f32 0.2, %v69_v28  ;;  %v103_v33 = vmul.f32 0.2, %v74_v29  ;;  %152 = vst [vmem:[%s261_s6 - $0x2] sm:$0x4] %v53_v32  ;;  %v169_v37 = vtrunc.f32 %v54_v35  ;;  %v61_v48 = vsel %vm228_vm0, %v56_v42, %v59_v43 }
  0x39   :  { %v66_v49 = vsel %vm228_vm0, %v62_v45, %v64_v46  ;;  %v84_v51 = vmul.f32 0.1, %v61_v48 }
  0x3a   :  { %v99_v36 = vmin.f32 %v98_v31, 4.1351666  ;;  %v104_v38 = vmin.f32 %v103_v33, 4.1351666  ;;  %v170_v41 = vcvt.f32.s32 %v169_v37  ;;  %v90_v52 = vmul.f32 0.1, %v66_v49 }
  0x3b   :  { %v85_v54 = vmul.f32 %v84_v51, %v78_v30 }
  0x3c   :  { %v100_v40 = vmul.f32 1.442695, %v99_v36  ;;  %v105_v44 = vmul.f32 1.442695, %v104_v38  ;;  %151 = vst [vmem:[%s262_s5 - $0x2] sm:$0x4] %v170_v41  ;;  %v94_v56 = vmul.f32 %v92_v53, %v90_v52 }
  0x3d   :  { %v89_v60 = vadd.f32 %v87_v55, %v85_v54 }
  0x3e   :  { %176 = vpow2.f32 %v100_v40  ;;  %v97_v62 = vadd.f32 %v95_v57, %v94_v56 }
  0x3f   :  { %178 = vpow2.f32 %v105_v44 }
  0x4b   :  { %v177_v58 = vpop.eup %176 }
  0x4c   :  { %v179_v59 = vpop.eup %178  ;;  %v102_v61 = vmul.f32 %v177_v58, %v78_v30 }
  0x4d   :  { %v107_v63 = vmul.f32 %v179_v59, %v92_v53 }
  0x4e   :  { %v108_v0 = vmul.f32 0.5, %v102_v61 }
  0x4f   :  { %v112_v1 = vmul.f32 0.5, %v107_v63 }
  0x50   :  { %v109_v2 = vsub.f32 %v89_v60, %v108_v0  ;;  %v116_v3 = vadd.f32 %v108_v0, %v89_v60 }
  0x51   :  { %v113_v4 = vsub.f32 %v97_v62, %v112_v1  ;;  %v119_v5 = vadd.f32 %v112_v1, %v97_v62 }
  0x52   :  { %v110_v6 = vmax.f32 %v109_v2, 0.0  ;;  %v117_v7 = vmax.f32 %v116_v3, 0.0 }
  0x53   :  { %v114_v8 = vmax.f32 %v113_v4, 0.0  ;;  %v120_v9 = vmax.f32 %v119_v5, 0.0 }
  0x54   :  { %v111_v10 = vmin.f32 %v110_v6, 64.0  ;;  %v118_v11 = vmin.f32 %v117_v7, 64.0 }
  0x55   :  { %v115_v12 = vmin.f32 %v114_v8, 64.0  ;;  %v121_v13 = vmin.f32 %v120_v9, 64.0 }
  0x56   :  { %v123_v14 = vrot.slane %v111_v10, 2  ;;  %v138_v15 = vadd.f32 %v118_v11, %v111_v10 }
  0x57   :  { %v126_v16 = vrot.slane %v115_v12, 1  ;;  %v129_v17 = vrot.slane %v121_v13, 7  ;;  %v140_v18 = vadd.f32 %v121_v13, %v115_v12 }
  0x58   :  { %v139_v19 = vmul.f32 0.5, %v138_v15 }
  0x59   :  { %v132_v20 = vsel %vm131_vm1, %v123_v14, %v126_v16  ;;  %v141_v21 = vmul.f32 0.5, %v140_v18 }
  0x5a   :  { %v134_v22 = vsel %vm133_vm2, %v132_v20, %v118_v11  ;;  %v143_v23 = vrot.slane %v139_v19, 2 }
  0x5b   :  { %v136_v24 = vsel %vm135_vm3, %v134_v22, %v129_v17  ;;  %v146_v25 = vrot.slane %v141_v21, 1 }
  0x5c   :  { %137 = vst [vmem:[%s263_s3] sm:$0xf] %v136_v24 }
  0x5d   :  { %v148_v26 = vsel %vm131_vm1, %v143_v23, %v146_v25 }
  0x5e   :  { %149 = vst [vmem:[%s264_s4] sm:$0x3] %v148_v26 }

</bundles_post_ra>
